<compile_context>
chip_gen: v5e
topology: v5e:2x2
jax: 0.10.0
libtpu: 0.0.40
codegen_flags: <defaults>
</compile_context>

<pallas_src>
import math
import jax
import jax.numpy as jnp
from jax.experimental import pallas as pl
from jax.experimental.pallas import tpu as pltpu

# ---------------- small synthetic config (real model: vocab~1024, 24L/16H/1024D) ------
SOS_TOKEN = 0
PKEEP = 0.5
VOCAB = 64            # args.num_codebook_vectors
VOCAB_PAD = 128       # head output padded to a full 128-lane slab
LATENT = 32           # codebook vector dim (256 in the real VQGAN)
PATCH = 4             # synthetic encoder downsample -> 4x4 = 16 tokens per image
N_LAYER = 2           # 24 in the real GPT
N_HEAD = 2            # 16 in the real GPT
N_EMBD = 256          # 1024 in the real GPT; Dh = 128 -> lane-aligned head slices
BLOCK_SIZE = 64       # 1024 in the real GPT

VMEM = pltpu.MemorySpace.VMEM
GELU_C = 0.7978845608028654   # sqrt(2/pi)


# ------------------------------ encoder kernel (fused conv + VQ) ------------------------------
def _encode_vq_kernel(p_ref, w_ref, b_ref, cbT_ref, cbsq_ref, idx_ref):
    # patch-conv as matmul, z stays in VMEM/vregs, straight into VQ distances.
    z = jnp.dot(p_ref[...], w_ref[...], preferred_element_type=jnp.float32) + b_ref[...]
    d = (jnp.sum(z * z, axis=-1, keepdims=True)
         - 2.0 * jnp.dot(z, cbT_ref[...], preferred_element_type=jnp.float32)
         + cbsq_ref[...])                                   # (N, K) squared distances
    K = d.shape[-1]
    lane = jax.lax.broadcasted_iota(jnp.int32, d.shape, 1)
    dmin = jnp.min(d, axis=-1, keepdims=True)
    idx = jnp.min(jnp.where(d <= dmin, lane, K), axis=-1, keepdims=True)   # first argmin
    # (N, 1) int32 output: tiny masked store, negligible at this size.
    idx_ref[...] = idx.astype(jnp.int32)


# ------------------------------ fused GPT kernel (grid over layers) ------------------------------
def _gpt_kernel(x0_ref, mask_ref,
                ln1g_ref, ln1b_ref, wqkv_ref, bqkv_ref, wo_ref, bo_ref,
                ln2g_ref, ln2b_ref, w1_ref, b1_ref, w2_ref, b2_ref,
                lnfg_ref, lnfb_ref, head_ref,
                logits_ref,
                x_ref, attn_ref):
    l = pl.program_id(0)
    D = N_EMBD
    H = N_HEAD
    Dh = D // H
    T = mask_ref.shape[0]
    BT = x0_ref.shape[0]
    B = BT // T
    scale = 1.0 / math.sqrt(Dh)

    @pl.when(l == 0)
    def _():
        x_ref[...] = x0_ref[...]          # activation becomes VMEM-resident

    def layernorm(v, g, b):
        mu = jnp.mean(v, axis=-1, keepdims=True)
        var = jnp.mean((v - mu) * (v - mu), axis=-1, keepdims=True)
        return (v - mu) * jax.lax.rsqrt(var + 1e-5) * g + b

    x = x_ref[...]

    # ---- attention: LN -> fused QKV matmul -> per (batch, head) softmax ----
    h = layernorm(x, ln1g_ref[...], ln1b_ref[...])
    qkv = jnp.dot(h, wqkv_ref[...], preferred_element_type=jnp.float32) + bqkv_ref[...]
    mask = mask_ref[...]                   # additive causal bias (0 / -1e30), layer-invariant
    for b in range(B):                     # static loops: B=2, H=2 -> 4 tiny attention blocks
        r0, r1 = b * T, (b + 1) * T
        for hh in range(H):
            c0 = hh * Dh                   # 128-lane aligned slices of the QKV slab
            q = qkv[r0:r1, c0:c0 + Dh]
            k = qkv[r0:r1, D + c0:D + c0 + Dh]
            v = qkv[r0:r1, 2 * D + c0:2 * D + c0 + Dh]
            s = jnp.einsum('qd,kd->qk', q, k,
                           preferred_element_type=jnp.float32) * scale + mask
            m = jnp.max(s, axis=-1, keepdims=True)
            p = jnp.exp(s - m)
            p = p * pl.reciprocal(jnp.sum(p, axis=-1, keepdims=True), approx=True)
            attn_ref[r0:r1, c0:c0 + Dh] = jnp.dot(p, v,
                                                  preferred_element_type=jnp.float32)
    # output projection + residual, fused (no HBM round trip of x)
    x = x + jnp.dot(attn_ref[...], wo_ref[...],
                    preferred_element_type=jnp.float32) + bo_ref[...]

    # ---- MLP: LN -> fc1 -> GELU(tanh) -> fc2 + residual ----
    h2 = layernorm(x, ln2g_ref[...], ln2b_ref[...])
    hm = jnp.dot(h2, w1_ref[...], preferred_element_type=jnp.float32) + b1_ref[...]
    g = 0.5 * hm * (1.0 + jnp.tanh(GELU_C * (hm + 0.044715 * hm * hm * hm)))
    x = x + jnp.dot(g, w2_ref[...], preferred_element_type=jnp.float32) + b2_ref[...]
    x_ref[...] = x

    # ---- final LN + (padded, lane-dense) head on the last layer step ----
    @pl.when(l == pl.num_programs(0) - 1)
    def _():
        xf = layernorm(x, lnfg_ref[...], lnfb_ref[...])
        logits_ref[...] = jnp.dot(xf, head_ref[...],
                                  preferred_element_type=jnp.float32)


# ------------------------------ parameters ------------------------------
def init_params(key):
    keys = jax.random.split(key, 8 + N_LAYER)

    def nrm(k, shape, std=0.02):
        return jax.random.normal(k, shape, jnp.float32) * std

    patch_dim = 3 * PATCH * PATCH
    D = N_EMBD
    params = {
        'enc_w': nrm(keys[0], (patch_dim, LATENT)),
        'enc_b': jnp.zeros((1, LATENT), jnp.float32),
        'codebook': nrm(keys[1], (VOCAB, LATENT), std=1.0 / VOCAB),
        'wte': nrm(keys[2], (VOCAB, D)),
        'wpe': nrm(keys[3], (BLOCK_SIZE, D)),
        'ln_f_g': jnp.ones((1, D), jnp.float32),
        'ln_f_b': jnp.zeros((1, D), jnp.float32),
    }
    head_w = nrm(keys[4], (D, VOCAB))
    params['head_w_pad'] = jnp.pad(head_w, ((0, 0), (0, VOCAB_PAD - VOCAB)))

    names = ['ln1_g', 'ln1_b', 'w_qkv', 'b_qkv', 'wo', 'bo',
             'ln2_g', 'ln2_b', 'w1', 'b1', 'w2', 'b2']
    layers = {n: [] for n in names}
    for i in range(N_LAYER):
        bk = jax.random.split(keys[5 + i], 6)
        wq, wk, wv = nrm(bk[0], (D, D)), nrm(bk[1], (D, D)), nrm(bk[2], (D, D))
        layers['ln1_g'].append(jnp.ones((1, D), jnp.float32))
        layers['ln1_b'].append(jnp.zeros((1, D), jnp.float32))
        layers['w_qkv'].append(jnp.concatenate([wq, wk, wv], axis=1))   # (D, 3D) fused
        layers['b_qkv'].append(jnp.zeros((1, 3 * D), jnp.float32))
        layers['wo'].append(nrm(bk[3], (D, D)))
        layers['bo'].append(jnp.zeros((1, D), jnp.float32))
        layers['ln2_g'].append(jnp.ones((1, D), jnp.float32))
        layers['ln2_b'].append(jnp.zeros((1, D), jnp.float32))
        layers['w1'].append(nrm(bk[4], (D, 4 * D)))
        layers['b1'].append(jnp.zeros((1, 4 * D), jnp.float32))
        layers['w2'].append(nrm(bk[5], (4 * D, D)))
        layers['b2'].append(jnp.zeros((1, D), jnp.float32))
    params['layers'] = {k: jnp.stack(v) for k, v in layers.items()}     # (L, ...)
    return params


# ------------------------------ model pieces ------------------------------
def encode_to_z(params, x):
    """Synthetic VQGAN encode: strided patch-conv (as matmul) + codebook VQ, one kernel."""
    B, C, Hh, W = x.shape                                    # NCHW in
    p = PATCH
    patches = x.reshape(B, C, Hh // p, p, W // p, p)
    patches = jnp.transpose(patches, (0, 2, 4, 1, 3, 5))
    patches = patches.reshape(B * (Hh // p) * (W // p), C * p * p)
    cbT = params['codebook'].T
    cbsq = jnp.sum(params['codebook'] ** 2, axis=-1).reshape(1, -1)
    n = patches.shape[0]
    idx = pl.pallas_call(
        _encode_vq_kernel,
        out_shape=jax.ShapeDtypeStruct((n, 1), jnp.int32),
        in_specs=[pl.BlockSpec(memory_space=VMEM)] * 5,
        out_specs=pl.BlockSpec(memory_space=VMEM),
    )(patches, params['enc_w'], params['enc_b'], cbT, cbsq)
    return idx[:, 0].reshape(B, -1)                          # (B, T) int32


def gpt_forward(params, tokens):
    B, T = tokens.shape
    D = N_EMBD
    L = N_LAYER
    lyr = params['layers']

    # embedding gathers stay as JAX glue
    x0 = (jnp.take(params['wte'], tokens, axis=0)
          + params['wpe'][None, :T, :]).reshape(B * T, D).astype(jnp.float32)
    # precomputed additive causal bias (finite negative, safe with max-subtract softmax)
    causal = jnp.tril(jnp.ones((T, T), dtype=jnp.bool_))
    mask_bias = jnp.where(causal, 0.0, -1e30).astype(jnp.float32)

    def layer_spec(trailing):
        nd = len(trailing)
        return pl.BlockSpec((None,) + tuple(trailing),
                            lambda l, _nd=nd: (l,) + (0,) * _nd)

    def const_spec(shape):
        nd = len(shape)
        return pl.BlockSpec(tuple(shape), lambda l, _nd=nd: (0,) * _nd)

    logits_pad = pl.pallas_call(
        _gpt_kernel,
        out_shape=jax.ShapeDtypeStruct((B * T, VOCAB_PAD), jnp.float32),
        grid=(L,),
        in_specs=[
            const_spec((B * T, D)),                             # token+pos embeddings
            const_spec((T, T)),                                 # causal bias
            layer_spec((1, D)), layer_spec((1, D)),             # ln1 g, b
            layer_spec((D, 3 * D)), layer_spec((1, 3 * D)),     # fused qkv w, b
            layer_spec((D, D)), layer_spec((1, D)),             # wo, bo
            layer_spec((1, D)), layer_spec((1, D)),             # ln2 g, b
            layer_spec((D, 4 * D)), layer_spec((1, 4 * D)),     # w1, b1
            layer_spec((4 * D, D)), layer_spec((1, D)),         # w2, b2
            const_spec((1, D)), const_spec((1, D)),             # ln_f g, b
            const_spec((D, VOCAB_PAD)),                         # padded head
        ],
        out_specs=pl.BlockSpec((B * T, VOCAB_PAD), lambda l: (0, 0)),  # resident output
        scratch_shapes=[pltpu.VMEM((B * T, D), jnp.float32),           # activation x
                        pltpu.VMEM((B * T, D), jnp.float32)],          # attention slab
        compiler_params=pltpu.CompilerParams(
            dimension_semantics=("arbitrary",),
            vmem_limit_bytes=32 * 1024 * 1024),
    )(x0, mask_bias,
      lyr['ln1_g'], lyr['ln1_b'], lyr['w_qkv'], lyr['b_qkv'],
      lyr['wo'], lyr['bo'], lyr['ln2_g'], lyr['ln2_b'],
      lyr['w1'], lyr['b1'], lyr['w2'], lyr['b2'],
      params['ln_f_g'], params['ln_f_b'], params['head_w_pad'])

    return logits_pad[:, :VOCAB].reshape(B, T, VOCAB)


def vqgan_transformer_forward(params, x, key):
    indices = encode_to_z(params, x)                           # (B, T) int32
    B = x.shape[0]
    sos_tokens = jnp.full((B, 1), SOS_TOKEN, dtype=jnp.int32)
    k_mask, k_rand = jax.random.split(key)
    mask = jax.random.bernoulli(k_mask, PKEEP, indices.shape).astype(jnp.int32)
    random_indices = jax.random.randint(k_rand, indices.shape, 0, VOCAB, dtype=jnp.int32)
    new_indices = mask * indices + (1 - mask) * random_indices
    new_indices = jnp.concatenate([sos_tokens, new_indices], axis=1)
    target = indices
    logits = gpt_forward(params, new_indices[:, :-1])
    return logits, target


if __name__ == "__main__":
    key = jax.random.PRNGKey(0)
    kp, kx, kf = jax.random.split(key, 3)
    params = init_params(kp)
    x = jax.random.normal(kx, (2, 3, 16, 16), jnp.float32)     # NCHW, like PyTorch
    logits, target = jax.jit(vqgan_transformer_forward)(params, x, kf)
    jax.block_until_ready((logits, target))
    assert logits.shape == (2, 16, VOCAB)
    assert target.shape == (2, 16)
    print("KERNEL_OK")
</pallas_src>

<mosaic_0001>
module attributes {stable_mosaic.version = 11 : i64} {
  func.func @_encode_vq_kernel(%arg0: memref<32x48xf32, #tpu.memory_space<vmem>>, %arg1: memref<48x32xf32, #tpu.memory_space<vmem>>, %arg2: memref<1x32xf32, #tpu.memory_space<vmem>>, %arg3: memref<32x64xf32, #tpu.memory_space<vmem>>, %arg4: memref<1x64xf32, #tpu.memory_space<vmem>>, %arg5: memref<32x1xi32, #tpu.memory_space<vmem>>) attributes {dimension_semantics = [], scalar_prefetch = 0 : i64, scratch_operands = 0 : i64, tpu.core_type = #tpu.core_type<tc>} {
    %c0 = arith.constant 0 : index
    %c0_0 = arith.constant 0 : index
    %0 = vector.load %arg0[%c0, %c0_0] : memref<32x48xf32, #tpu.memory_space<vmem>>, vector<32x48xf32>
    %c0_1 = arith.constant 0 : index
    %c0_2 = arith.constant 0 : index
    %1 = vector.load %arg1[%c0_1, %c0_2] : memref<48x32xf32, #tpu.memory_space<vmem>>, vector<48x32xf32>
    %cst = arith.constant dense<0.000000e+00> : vector<32x32xf32>
    %2 = tpu.matmul %0, %1, %cst {dimension_numbers = #tpu.dot_dimension_numbers<[1], [0], [0], [1], [0, 0, 1, 1], [], []>} : vector<32x48xf32>, vector<48x32xf32>, vector<32x32xf32> -> vector<32x32xf32>
    %c0_3 = arith.constant 0 : index
    %c0_4 = arith.constant 0 : index
    %3 = vector.load %arg2[%c0_3, %c0_4] : memref<1x32xf32, #tpu.memory_space<vmem>>, vector<1x32xf32>
    %4 = vector.broadcast %3 : vector<1x32xf32> to vector<32x32xf32>
    %5 = arith.addf %2, %4 : vector<32x32xf32>
    %6 = arith.mulf %5, %5 : vector<32x32xf32>
    %cst_5 = arith.constant dense<0.000000e+00> : vector<32xf32>
    %7 = vector.multi_reduction <add>, %6, %cst_5 [1] : vector<32x32xf32> to vector<32xf32>
    %8 = vector.shape_cast %7 : vector<32xf32> to vector<32x1xf32>
    %c0_6 = arith.constant 0 : index
    %c0_7 = arith.constant 0 : index
    %9 = vector.load %arg3[%c0_6, %c0_7] : memref<32x64xf32, #tpu.memory_space<vmem>>, vector<32x64xf32>
    %cst_8 = arith.constant dense<0.000000e+00> : vector<32x64xf32>
    %10 = tpu.matmul %5, %9, %cst_8 {dimension_numbers = #tpu.dot_dimension_numbers<[1], [0], [0], [1], [0, 0, 1, 1], [], []>} : vector<32x32xf32>, vector<32x64xf32>, vector<32x64xf32> -> vector<32x64xf32>
    %cst_9 = arith.constant 2.000000e+00 : f32
    %11 = vector.broadcast %cst_9 : f32 to vector<32x64xf32>
    %12 = arith.mulf %11, %10 : vector<32x64xf32>
    %13 = vector.broadcast %8 : vector<32x1xf32> to vector<32x64xf32>
    %14 = arith.subf %13, %12 : vector<32x64xf32>
    %c0_10 = arith.constant 0 : index
    %c0_11 = arith.constant 0 : index
    %15 = vector.load %arg4[%c0_10, %c0_11] : memref<1x64xf32, #tpu.memory_space<vmem>>, vector<1x64xf32>
    %16 = vector.broadcast %15 : vector<1x64xf32> to vector<32x64xf32>
    %17 = arith.addf %14, %16 : vector<32x64xf32>
    %18 = tpu.iota {dimensions = array<i32: 1>} : vector<32x64xi32>
    %cst_12 = arith.constant dense<0x7F800000> : vector<32xf32>
    %19 = vector.multi_reduction <minimumf>, %17, %cst_12 [1] : vector<32x64xf32> to vector<32xf32>
    %20 = vector.shape_cast %19 : vector<32xf32> to vector<32x1xf32>
    %21 = vector.broadcast %20 : vector<32x1xf32> to vector<32x64xf32>
    %22 = arith.cmpf ole, %17, %21 : vector<32x64xf32>
    %c64_i32 = arith.constant 64 : i32
    %23 = vector.broadcast %c64_i32 : i32 to vector<32x64xi32>
    %24 = arith.select %22, %18, %23 : vector<32x64xi1>, vector<32x64xi32>
    %cst_13 = arith.constant dense<2147483647> : vector<32xi32>
    %25 = vector.multi_reduction <minsi>, %24, %cst_13 [1] : vector<32x64xi32> to vector<32xi32>
    %26 = vector.shape_cast %25 : vector<32xi32> to vector<32x1xi32>
    %c0_14 = arith.constant 0 : index
    %c0_15 = arith.constant 0 : index
    %27 = vector.load %arg5[%c0_14, %c0_15] : memref<32x1xi32, #tpu.memory_space<vmem>>, vector<32x1xi32>
    tpu.vector_store %arg5[%c0_14, %c0_15], %26 {strides = array<i32>} : memref<32x1xi32, #tpu.memory_space<vmem>>, vector<32x1xi32>,
    return
  }
}

module attributes {stable_mosaic.version = 11 : i64} {
  func.func @_gpt_kernel(%arg0: i32, %arg1: memref<32x256xf32, #tpu.memory_space<vmem>>, %arg2: memref<16x16xf32, #tpu.memory_space<vmem>>, %arg3: memref<1x1x256xf32, #tpu.memory_space<vmem>>, %arg4: memref<1x1x256xf32, #tpu.memory_space<vmem>>, %arg5: memref<1x256x768xf32, #tpu.memory_space<vmem>>, %arg6: memref<1x1x768xf32, #tpu.memory_space<vmem>>, %arg7: memref<1x256x256xf32, #tpu.memory_space<vmem>>, %arg8: memref<1x1x256xf32, #tpu.memory_space<vmem>>, %arg9: memref<1x1x256xf32, #tpu.memory_space<vmem>>, %arg10: memref<1x1x256xf32, #tpu.memory_space<vmem>>, %arg11: memref<1x256x1024xf32, #tpu.memory_space<vmem>>, %arg12: memref<1x1x1024xf32, #tpu.memory_space<vmem>>, %arg13: memref<1x1024x256xf32, #tpu.memory_space<vmem>>, %arg14: memref<1x1x256xf32, #tpu.memory_space<vmem>>, %arg15: memref<1x256xf32, #tpu.memory_space<vmem>>, %arg16: memref<1x256xf32, #tpu.memory_space<vmem>>, %arg17: memref<256x128xf32, #tpu.memory_space<vmem>>, %arg18: memref<32x128xf32, #tpu.memory_space<vmem>>, %arg19: memref<32x256xf32, #tpu.memory_space<vmem>>, %arg20: memref<32x256xf32, #tpu.memory_space<vmem>>) attributes {dimension_semantics = [#tpu.dimension_semantics<arbitrary>], iteration_bounds = array<i64: 2>, scalar_prefetch = 0 : i64, scratch_operands = 2 : i64, tpu.core_type = #tpu.core_type<tc>, window_params = [{pipeline_mode = #tpu.pipeline_mode<synchronous>, transform_indices = @transform_0, window_bounds = array<i64: 32, 256>}, {pipeline_mode = #tpu.pipeline_mode<synchronous>, transform_indices = @transform_1, window_bounds = array<i64: 16, 16>}, {transform_indices = @transform_2, window_bounds = array<i64: 1, 1, 256>}, {transform_indices = @transform_3, window_bounds = array<i64: 1, 1, 256>}, {transform_indices = @transform_4, window_bounds = array<i64: 1, 256, 768>}, {transform_indices = @transform_5, window_bounds = array<i64: 1, 1, 768>}, {transform_indices = @transform_6, window_bounds = array<i64: 1, 256, 256>}, {transform_indices = @transform_7, window_bounds = array<i64: 1, 1, 256>}, {transform_indices = @transform_8, window_bounds = array<i64: 1, 1, 256>}, {transform_indices = @transform_9, window_bounds = array<i64: 1, 1, 256>}, {transform_indices = @transform_10, window_bounds = array<i64: 1, 256, 1024>}, {transform_indices = @transform_11, window_bounds = array<i64: 1, 1, 1024>}, {transform_indices = @transform_12, window_bounds = array<i64: 1, 1024, 256>}, {transform_indices = @transform_13, window_bounds = array<i64: 1, 1, 256>}, {pipeline_mode = #tpu.pipeline_mode<synchronous>, transform_indices = @transform_14, window_bounds = array<i64: 1, 256>}, {pipeline_mode = #tpu.pipeline_mode<synchronous>, transform_indices = @transform_15, window_bounds = array<i64: 1, 256>}, {pipeline_mode = #tpu.pipeline_mode<synchronous>, transform_indices = @transform_16, window_bounds = array<i64: 256, 128>}, {pipeline_mode = #tpu.pipeline_mode<synchronous>, transform_indices = @transform_17, window_bounds = array<i64: 32, 128>}]} {
    %c0_i32 = arith.constant 0 : i32
    %0 = arith.cmpi eq, %arg0, %c0_i32 : i32
    %1 = arith.extui %0 : i1 to i32
    %c0_i32_0 = arith.constant 0 : i32
    %2 = arith.cmpi ne, %1, %c0_i32_0 : i32
    scf.if %2 {
      %c0_88 = arith.constant 0 : index
      %c0_89 = arith.constant 0 : index
      %185 = vector.load %arg1[%c0_88, %c0_89] : memref<32x256xf32, #tpu.memory_space<vmem>>, vector<32x256xf32>
      %c0_90 = arith.constant 0 : index
      %c0_91 = arith.constant 0 : index
      %186 = vector.load %arg19[%c0_90, %c0_91] : memref<32x256xf32, #tpu.memory_space<vmem>>, vector<32x256xf32>
      tpu.vector_store %arg19[%c0_90, %c0_91], %185 {strides = array<i32>} : memref<32x256xf32, #tpu.memory_space<vmem>>, vector<32x256xf32>,
    } else {
    }
    %c0 = arith.constant 0 : index
    %c0_1 = arith.constant 0 : index
    %3 = vector.load %arg19[%c0, %c0_1] : memref<32x256xf32, #tpu.memory_space<vmem>>, vector<32x256xf32>
    %c0_2 = arith.constant 0 : index
    %c0_3 = arith.constant 0 : index
    %c0_4 = arith.constant 0 : index
    %4 = vector.load %arg3[%c0_2, %c0_3, %c0_4] : memref<1x1x256xf32, #tpu.memory_space<vmem>>, vector<1x1x256xf32>
    %5 = vector.shape_cast %4 : vector<1x1x256xf32> to vector<1x256xf32>
    %c0_5 = arith.constant 0 : index
    %c0_6 = arith.constant 0 : index
    %c0_7 = arith.constant 0 : index
    %6 = vector.load %arg4[%c0_5, %c0_6, %c0_7] : memref<1x1x256xf32, #tpu.memory_space<vmem>>, vector<1x1x256xf32>
    %7 = vector.shape_cast %6 : vector<1x1x256xf32> to vector<1x256xf32>
    %cst = arith.constant dense<0.000000e+00> : vector<32xf32>
    %8 = vector.multi_reduction <add>, %3, %cst [1] : vector<32x256xf32> to vector<32xf32>
    %9 = vector.shape_cast %8 : vector<32xf32> to vector<32x1xf32>
    %cst_8 = arith.constant 2.560000e+02 : f32
    %10 = vector.broadcast %cst_8 : f32 to vector<32x1xf32>
    %11 = arith.divf %9, %10 : vector<32x1xf32>
    %12 = vector.broadcast %11 : vector<32x1xf32> to vector<32x256xf32>
    %13 = arith.subf %3, %12 : vector<32x256xf32>
    %14 = vector.broadcast %11 : vector<32x1xf32> to vector<32x256xf32>
    %15 = arith.subf %3, %14 : vector<32x256xf32>
    %16 = arith.mulf %13, %15 : vector<32x256xf32>
    %cst_9 = arith.constant dense<0.000000e+00> : vector<32xf32>
    %17 = vector.multi_reduction <add>, %16, %cst_9 [1] : vector<32x256xf32> to vector<32xf32>
    %18 = vector.shape_cast %17 : vector<32xf32> to vector<32x1xf32>
    %cst_10 = arith.constant 2.560000e+02 : f32
    %19 = vector.broadcast %cst_10 : f32 to vector<32x1xf32>
    %20 = arith.divf %18, %19 : vector<32x1xf32>
    %21 = vector.broadcast %11 : vector<32x1xf32> to vector<32x256xf32>
    %22 = arith.subf %3, %21 : vector<32x256xf32>
    %cst_11 = arith.constant 9.99999974E-6 : f32
    %23 = vector.broadcast %cst_11 : f32 to vector<32x1xf32>
    %24 = arith.addf %20, %23 : vector<32x1xf32>
    %25 = math.rsqrt %24 : vector<32x1xf32>
    %26 = vector.broadcast %25 : vector<32x1xf32> to vector<32x256xf32>
    %27 = arith.mulf %22, %26 : vector<32x256xf32>
    %28 = vector.broadcast %5 : vector<1x256xf32> to vector<32x256xf32>
    %29 = arith.mulf %27, %28 : vector<32x256xf32>
    %30 = vector.broadcast %7 : vector<1x256xf32> to vector<32x256xf32>
    %31 = arith.addf %29, %30 : vector<32x256xf32>
    %c0_12 = arith.constant 0 : index
    %c0_13 = arith.constant 0 : index
    %c0_14 = arith.constant 0 : index
    %32 = vector.load %arg5[%c0_12, %c0_13, %c0_14] : memref<1x256x768xf32, #tpu.memory_space<vmem>>, vector<1x256x768xf32>
    %33 = vector.shape_cast %32 : vector<1x256x768xf32> to vector<256x768xf32>
    %cst_15 = arith.constant dense<0.000000e+00> : vector<32x768xf32>
    %34 = tpu.matmul %31, %33, %cst_15 {dimension_numbers = #tpu.dot_dimension_numbers<[1], [0], [0], [1], [0, 0, 1, 1], [], []>} : vector<32x256xf32>, vector<256x768xf32>, vector<32x768xf32> -> vector<32x768xf32>
    %c0_16 = arith.constant 0 : index
    %c0_17 = arith.constant 0 : index
    %c0_18 = arith.constant 0 : index
    %35 = vector.load %arg6[%c0_16, %c0_17, %c0_18] : memref<1x1x768xf32, #tpu.memory_space<vmem>>, vector<1x1x768xf32>
    %36 = vector.shape_cast %35 : vector<1x1x768xf32> to vector<1x768xf32>
    %37 = vector.broadcast %36 : vector<1x768xf32> to vector<32x768xf32>
    %38 = arith.addf %34, %37 : vector<32x768xf32>
    %c0_19 = arith.constant 0 : index
    %c0_20 = arith.constant 0 : index
    %39 = vector.load %arg2[%c0_19, %c0_20] : memref<16x16xf32, #tpu.memory_space<vmem>>, vector<16x16xf32>
    %40 = vector.extract_strided_slice %38 {offsets = [0, 0], sizes = [16, 128], strides = [1, 1]} : vector<32x768xf32> to vector<16x128xf32>
    %41 = vector.extract_strided_slice %38 {offsets = [0, 256], sizes = [16, 128], strides = [1, 1]} : vector<32x768xf32> to vector<16x128xf32>
    %42 = vector.extract_strided_slice %38 {offsets = [0, 512], sizes = [16, 128], strides = [1, 1]} : vector<32x768xf32> to vector<16x128xf32>
    "tpu.trace_start"() <{level = 10 : i32, message = "qd,kd->qk"}> : () -> ()
    %cst_21 = arith.constant dense<0.000000e+00> : vector<16x16xf32>
    %43 = tpu.matmul %40, %41, %cst_21 {dimension_numbers = #tpu.dot_dimension_numbers<[1], [1], [0], [0], [0, 0, 1, 0], [], []>} : vector<16x128xf32>, vector<16x128xf32>, vector<16x16xf32> -> vector<16x16xf32>
    "tpu.trace_stop"() : () -> ()
    %cst_22 = arith.constant 0.0883883461 : f32
    %44 = vector.broadcast %cst_22 : f32 to vector<16x16xf32>
    %45 = arith.mulf %43, %44 : vector<16x16xf32>
    %46 = arith.addf %45, %39 : vector<16x16xf32>
    %cst_23 = arith.constant dense<0xFF800000> : vector<16xf32>
    %47 = vector.multi_reduction <maximumf>, %46, %cst_23 [1] : vector<16x16xf32> to vector<16xf32>
    %48 = vector.shape_cast %47 : vector<16xf32> to vector<16x1xf32>
    %49 = vector.broadcast %48 : vector<16x1xf32> to vector<16x16xf32>
    %50 = arith.subf %46, %49 : vector<16x16xf32>
    %51 = math.exp %50 : vector<16x16xf32>
    %cst_24 = arith.constant dense<0.000000e+00> : vector<16xf32>
    %52 = vector.multi_reduction <add>, %51, %cst_24 [1] : vector<16x16xf32> to vector<16xf32>
    %53 = vector.shape_cast %52 : vector<16xf32> to vector<16x1xf32>
    %54 = tpu.reciprocal %53 {approx = true} : vector<16x1xf32> -> vector<16x1xf32>
    %55 = vector.broadcast %54 : vector<16x1xf32> to vector<16x16xf32>
    %56 = arith.mulf %51, %55 : vector<16x16xf32>
    %cst_25 = arith.constant dense<0.000000e+00> : vector<16x128xf32>
    %57 = tpu.matmul %56, %42, %cst_25 {dimension_numbers = #tpu.dot_dimension_numbers<[1], [0], [0], [1], [0, 0, 1, 1], [], []>} : vector<16x16xf32>, vector<16x128xf32>, vector<16x128xf32> -> vector<16x128xf32>
    %c0_26 = arith.constant 0 : index
    %c0_27 = arith.constant 0 : index
    %58 = vector.load %arg20[%c0_26, %c0_27] : memref<32x256xf32, #tpu.memory_space<vmem>>, vector<16x128xf32>
    tpu.vector_store %arg20[%c0_26, %c0_27], %57 {strides = array<i32>} : memref<32x256xf32, #tpu.memory_space<vmem>>, vector<16x128xf32>,
    %59 = vector.extract_strided_slice %38 {offsets = [0, 128], sizes = [16, 128], strides = [1, 1]} : vector<32x768xf32> to vector<16x128xf32>
    %60 = vector.extract_strided_slice %38 {offsets = [0, 384], sizes = [16, 128], strides = [1, 1]} : vector<32x768xf32> to vector<16x128xf32>
    %61 = vector.extract_strided_slice %38 {offsets = [0, 640], sizes = [16, 128], strides = [1, 1]} : vector<32x768xf32> to vector<16x128xf32>
    "tpu.trace_start"() <{level = 10 : i32, message = "qd,kd->qk"}> : () -> ()
    %cst_28 = arith.constant dense<0.000000e+00> : vector<16x16xf32>
    %62 = tpu.matmul %59, %60, %cst_28 {dimension_numbers = #tpu.dot_dimension_numbers<[1], [1], [0], [0], [0, 0, 1, 0], [], []>} : vector<16x128xf32>, vector<16x128xf32>, vector<16x16xf32> -> vector<16x16xf32>
    "tpu.trace_stop"() : () -> ()
    %cst_29 = arith.constant 0.0883883461 : f32
    %63 = vector.broadcast %cst_29 : f32 to vector<16x16xf32>
    %64 = arith.mulf %62, %63 : vector<16x16xf32>
    %65 = arith.addf %64, %39 : vector<16x16xf32>
    %cst_30 = arith.constant dense<0xFF800000> : vector<16xf32>
    %66 = vector.multi_reduction <maximumf>, %65, %cst_30 [1] : vector<16x16xf32> to vector<16xf32>
    %67 = vector.shape_cast %66 : vector<16xf32> to vector<16x1xf32>
    %68 = vector.broadcast %67 : vector<16x1xf32> to vector<16x16xf32>
    %69 = arith.subf %65, %68 : vector<16x16xf32>
    %70 = math.exp %69 : vector<16x16xf32>
    %cst_31 = arith.constant dense<0.000000e+00> : vector<16xf32>
    %71 = vector.multi_reduction <add>, %70, %cst_31 [1] : vector<16x16xf32> to vector<16xf32>
    %72 = vector.shape_cast %71 : vector<16xf32> to vector<16x1xf32>
    %73 = tpu.reciprocal %72 {approx = true} : vector<16x1xf32> -> vector<16x1xf32>
    %74 = vector.broadcast %73 : vector<16x1xf32> to vector<16x16xf32>
    %75 = arith.mulf %70, %74 : vector<16x16xf32>
    %cst_32 = arith.constant dense<0.000000e+00> : vector<16x128xf32>
    %76 = tpu.matmul %75, %61, %cst_32 {dimension_numbers = #tpu.dot_dimension_numbers<[1], [0], [0], [1], [0, 0, 1, 1], [], []>} : vector<16x16xf32>, vector<16x128xf32>, vector<16x128xf32> -> vector<16x128xf32>
    %c0_33 = arith.constant 0 : index
    %c128 = arith.constant 128 : index
    %77 = vector.load %arg20[%c0_33, %c128] : memref<32x256xf32, #tpu.memory_space<vmem>>, vector<16x128xf32>
    tpu.vector_store %arg20[%c0_33, %c128], %76 {strides = array<i32>} : memref<32x256xf32, #tpu.memory_space<vmem>>, vector<16x128xf32>,
    %78 = vector.extract_strided_slice %38 {offsets = [16, 0], sizes = [16, 128], strides = [1, 1]} : vector<32x768xf32> to vector<16x128xf32>
    %79 = vector.extract_strided_slice %38 {offsets = [16, 256], sizes = [16, 128], strides = [1, 1]} : vector<32x768xf32> to vector<16x128xf32>
    %80 = vector.extract_strided_slice %38 {offsets = [16, 512], sizes = [16, 128], strides = [1, 1]} : vector<32x768xf32> to vector<16x128xf32>
    "tpu.trace_start"() <{level = 10 : i32, message = "qd,kd->qk"}> : () -> ()
    %cst_34 = arith.constant dense<0.000000e+00> : vector<16x16xf32>
    %81 = tpu.matmul %78, %79, %cst_34 {dimension_numbers = #tpu.dot_dimension_numbers<[1], [1], [0], [0], [0, 0, 1, 0], [], []>} : vector<16x128xf32>, vector<16x128xf32>, vector<16x16xf32> -> vector<16x16xf32>
    "tpu.trace_stop"() : () -> ()
    %cst_35 = arith.constant 0.0883883461 : f32
    %82 = vector.broadcast %cst_35 : f32 to vector<16x16xf32>
    %83 = arith.mulf %81, %82 : vector<16x16xf32>
    %84 = arith.addf %83, %39 : vector<16x16xf32>
    %cst_36 = arith.constant dense<0xFF800000> : vector<16xf32>
    %85 = vector.multi_reduction <maximumf>, %84, %cst_36 [1] : vector<16x16xf32> to vector<16xf32>
    %86 = vector.shape_cast %85 : vector<16xf32> to vector<16x1xf32>
    %87 = vector.broadcast %86 : vector<16x1xf32> to vector<16x16xf32>
    %88 = arith.subf %84, %87 : vector<16x16xf32>
    %89 = math.exp %88 : vector<16x16xf32>
    %cst_37 = arith.constant dense<0.000000e+00> : vector<16xf32>
    %90 = vector.multi_reduction <add>, %89, %cst_37 [1] : vector<16x16xf32> to vector<16xf32>
    %91 = vector.shape_cast %90 : vector<16xf32> to vector<16x1xf32>
    %92 = tpu.reciprocal %91 {approx = true} : vector<16x1xf32> -> vector<16x1xf32>
    %93 = vector.broadcast %92 : vector<16x1xf32> to vector<16x16xf32>
    %94 = arith.mulf %89, %93 : vector<16x16xf32>
    %cst_38 = arith.constant dense<0.000000e+00> : vector<16x128xf32>
    %95 = tpu.matmul %94, %80, %cst_38 {dimension_numbers = #tpu.dot_dimension_numbers<[1], [0], [0], [1], [0, 0, 1, 1], [], []>} : vector<16x16xf32>, vector<16x128xf32>, vector<16x128xf32> -> vector<16x128xf32>
    %c16 = arith.constant 16 : index
    %c0_39 = arith.constant 0 : index
    %96 = vector.load %arg20[%c16, %c0_39] : memref<32x256xf32, #tpu.memory_space<vmem>>, vector<16x128xf32>
    tpu.vector_store %arg20[%c16, %c0_39], %95 {strides = array<i32>} : memref<32x256xf32, #tpu.memory_space<vmem>>, vector<16x128xf32>,
    %97 = vector.extract_strided_slice %38 {offsets = [16, 128], sizes = [16, 128], strides = [1, 1]} : vector<32x768xf32> to vector<16x128xf32>
    %98 = vector.extract_strided_slice %38 {offsets = [16, 384], sizes = [16, 128], strides = [1, 1]} : vector<32x768xf32> to vector<16x128xf32>
    %99 = vector.extract_strided_slice %38 {offsets = [16, 640], sizes = [16, 128], strides = [1, 1]} : vector<32x768xf32> to vector<16x128xf32>
    "tpu.trace_start"() <{level = 10 : i32, message = "qd,kd->qk"}> : () -> ()
    %cst_40 = arith.constant dense<0.000000e+00> : vector<16x16xf32>
    %100 = tpu.matmul %97, %98, %cst_40 {dimension_numbers = #tpu.dot_dimension_numbers<[1], [1], [0], [0], [0, 0, 1, 0], [], []>} : vector<16x128xf32>, vector<16x128xf32>, vector<16x16xf32> -> vector<16x16xf32>
    "tpu.trace_stop"() : () -> ()
    %cst_41 = arith.constant 0.0883883461 : f32
    %101 = vector.broadcast %cst_41 : f32 to vector<16x16xf32>
    %102 = arith.mulf %100, %101 : vector<16x16xf32>
    %103 = arith.addf %102, %39 : vector<16x16xf32>
    %cst_42 = arith.constant dense<0xFF800000> : vector<16xf32>
    %104 = vector.multi_reduction <maximumf>, %103, %cst_42 [1] : vector<16x16xf32> to vector<16xf32>
    %105 = vector.shape_cast %104 : vector<16xf32> to vector<16x1xf32>
    %106 = vector.broadcast %105 : vector<16x1xf32> to vector<16x16xf32>
    %107 = arith.subf %103, %106 : vector<16x16xf32>
    %108 = math.exp %107 : vector<16x16xf32>
    %cst_43 = arith.constant dense<0.000000e+00> : vector<16xf32>
    %109 = vector.multi_reduction <add>, %108, %cst_43 [1] : vector<16x16xf32> to vector<16xf32>
    %110 = vector.shape_cast %109 : vector<16xf32> to vector<16x1xf32>
    %111 = tpu.reciprocal %110 {approx = true} : vector<16x1xf32> -> vector<16x1xf32>
    %112 = vector.broadcast %111 : vector<16x1xf32> to vector<16x16xf32>
    %113 = arith.mulf %108, %112 : vector<16x16xf32>
    %cst_44 = arith.constant dense<0.000000e+00> : vector<16x128xf32>
    %114 = tpu.matmul %113, %99, %cst_44 {dimension_numbers = #tpu.dot_dimension_numbers<[1], [0], [0], [1], [0, 0, 1, 1], [], []>} : vector<16x16xf32>, vector<16x128xf32>, vector<16x128xf32> -> vector<16x128xf32>
    %c16_45 = arith.constant 16 : index
    %c128_46 = arith.constant 128 : index
    %115 = vector.load %arg20[%c16_45, %c128_46] : memref<32x256xf32, #tpu.memory_space<vmem>>, vector<16x128xf32>
    tpu.vector_store %arg20[%c16_45, %c128_46], %114 {strides = array<i32>} : memref<32x256xf32, #tpu.memory_space<vmem>>, vector<16x128xf32>,
    %c0_47 = arith.constant 0 : index
    %c0_48 = arith.constant 0 : index
    %116 = vector.load %arg20[%c0_47, %c0_48] : memref<32x256xf32, #tpu.memory_space<vmem>>, vector<32x256xf32>
    %c0_49 = arith.constant 0 : index
    %c0_50 = arith.constant 0 : index
    %c0_51 = arith.constant 0 : index
    %117 = vector.load %arg7[%c0_49, %c0_50, %c0_51] : memref<1x256x256xf32, #tpu.memory_space<vmem>>, vector<1x256x256xf32>
    %118 = vector.shape_cast %117 : vector<1x256x256xf32> to vector<256x256xf32>
    %cst_52 = arith.constant dense<0.000000e+00> : vector<32x256xf32>
    %119 = tpu.matmul %116, %118, %cst_52 {dimension_numbers = #tpu.dot_dimension_numbers<[1], [0], [0], [1], [0, 0, 1, 1], [], []>} : vector<32x256xf32>, vector<256x256xf32>, vector<32x256xf32> -> vector<32x256xf32>
    %120 = arith.addf %3, %119 : vector<32x256xf32>
    %c0_53 = arith.constant 0 : index
    %c0_54 = arith.constant 0 : index
    %c0_55 = arith.constant 0 : index
    %121 = vector.load %arg8[%c0_53, %c0_54, %c0_55] : memref<1x1x256xf32, #tpu.memory_space<vmem>>, vector<1x1x256xf32>
    %122 = vector.shape_cast %121 : vector<1x1x256xf32> to vector<1x256xf32>
    %123 = vector.broadcast %122 : vector<1x256xf32> to vector<32x256xf32>
    %124 = arith.addf %120, %123 : vector<32x256xf32>
    %c0_56 = arith.constant 0 : index
    %c0_57 = arith.constant 0 : index
    %c0_58 = arith.constant 0 : index
    %125 = vector.load %arg9[%c0_56, %c0_57, %c0_58] : memref<1x1x256xf32, #tpu.memory_space<vmem>>, vector<1x1x256xf32>
    %126 = vector.shape_cast %125 : vector<1x1x256xf32> to vector<1x256xf32>
    %c0_59 = arith.constant 0 : index
    %c0_60 = arith.constant 0 : index
    %c0_61 = arith.constant 0 : index
    %127 = vector.load %arg10[%c0_59, %c0_60, %c0_61] : memref<1x1x256xf32, #tpu.memory_space<vmem>>, vector<1x1x256xf32>
    %128 = vector.shape_cast %127 : vector<1x1x256xf32> to vector<1x256xf32>
    %cst_62 = arith.constant dense<0.000000e+00> : vector<32xf32>
    %129 = vector.multi_reduction <add>, %124, %cst_62 [1] : vector<32x256xf32> to vector<32xf32>
    %130 = vector.shape_cast %129 : vector<32xf32> to vector<32x1xf32>
    %cst_63 = arith.constant 2.560000e+02 : f32
    %131 = vector.broadcast %cst_63 : f32 to vector<32x1xf32>
    %132 = arith.divf %130, %131 : vector<32x1xf32>
    %133 = vector.broadcast %132 : vector<32x1xf32> to vector<32x256xf32>
    %134 = arith.subf %124, %133 : vector<32x256xf32>
    %135 = vector.broadcast %132 : vector<32x1xf32> to vector<32x256xf32>
    %136 = arith.subf %124, %135 : vector<32x256xf32>
    %137 = arith.mulf %134, %136 : vector<32x256xf32>
    %cst_64 = arith.constant dense<0.000000e+00> : vector<32xf32>
    %138 = vector.multi_reduction <add>, %137, %cst_64 [1] : vector<32x256xf32> to vector<32xf32>
    %139 = vector.shape_cast %138 : vector<32xf32> to vector<32x1xf32>
    %cst_65 = arith.constant 2.560000e+02 : f32
    %140 = vector.broadcast %cst_65 : f32 to vector<32x1xf32>
    %141 = arith.divf %139, %140 : vector<32x1xf32>
    %142 = vector.broadcast %132 : vector<32x1xf32> to vector<32x256xf32>
    %143 = arith.subf %124, %142 : vector<32x256xf32>
    %cst_66 = arith.constant 9.99999974E-6 : f32
    %144 = vector.broadcast %cst_66 : f32 to vector<32x1xf32>
    %145 = arith.addf %141, %144 : vector<32x1xf32>
    %146 = math.rsqrt %145 : vector<32x1xf32>
    %147 = vector.broadcast %146 : vector<32x1xf32> to vector<32x256xf32>
    %148 = arith.mulf %143, %147 : vector<32x256xf32>
    %149 = vector.broadcast %126 : vector<1x256xf32> to vector<32x256xf32>
    %150 = arith.mulf %148, %149 : vector<32x256xf32>
    %151 = vector.broadcast %128 : vector<1x256xf32> to vector<32x256xf32>
    %152 = arith.addf %150, %151 : vector<32x256xf32>
    %c0_67 = arith.constant 0 : index
    %c0_68 = arith.constant 0 : index
    %c0_69 = arith.constant 0 : index
    %153 = vector.load %arg11[%c0_67, %c0_68, %c0_69] : memref<1x256x1024xf32, #tpu.memory_space<vmem>>, vector<1x256x1024xf32>
    %154 = vector.shape_cast %153 : vector<1x256x1024xf32> to vector<256x1024xf32>
    %cst_70 = arith.constant dense<0.000000e+00> : vector<32x1024xf32>
    %155 = tpu.matmul %152, %154, %cst_70 {dimension_numbers = #tpu.dot_dimension_numbers<[1], [0], [0], [1], [0, 0, 1, 1], [], []>} : vector<32x256xf32>, vector<256x1024xf32>, vector<32x1024xf32> -> vector<32x1024xf32>
    %c0_71 = arith.constant 0 : index
    %c0_72 = arith.constant 0 : index
    %c0_73 = arith.constant 0 : index
    %156 = vector.load %arg12[%c0_71, %c0_72, %c0_73] : memref<1x1x1024xf32, #tpu.memory_space<vmem>>, vector<1x1x1024xf32>
    %157 = vector.shape_cast %156 : vector<1x1x1024xf32> to vector<1x1024xf32>
    %158 = vector.broadcast %157 : vector<1x1024xf32> to vector<32x1024xf32>
    %159 = arith.addf %155, %158 : vector<32x1024xf32>
    %cst_74 = arith.constant 5.000000e-01 : f32
    %160 = vector.broadcast %cst_74 : f32 to vector<32x1024xf32>
    %161 = arith.mulf %160, %159 : vector<32x1024xf32>
    %cst_75 = arith.constant 4.471500e-02 : f32
    %162 = vector.broadcast %cst_75 : f32 to vector<32x1024xf32>
    %163 = arith.mulf %162, %159 : vector<32x1024xf32>
    %164 = arith.mulf %163, %159 : vector<32x1024xf32>
    %165 = arith.mulf %164, %159 : vector<32x1024xf32>
    %166 = arith.addf %159, %165 : vector<32x1024xf32>
    %cst_76 = arith.constant 0.797884583 : f32
    %167 = vector.broadcast %cst_76 : f32 to vector<32x1024xf32>
    %168 = arith.mulf %167, %166 : vector<32x1024xf32>
    %169 = math.tanh %168 : vector<32x1024xf32>
    %cst_77 = arith.constant 1.000000e+00 : f32
    %170 = vector.broadcast %cst_77 : f32 to vector<32x1024xf32>
    %171 = arith.addf %170, %169 : vector<32x1024xf32>
    %172 = arith.mulf %161, %171 : vector<32x1024xf32>
    %c0_78 = arith.constant 0 : index
    %c0_79 = arith.constant 0 : index
    %c0_80 = arith.constant 0 : index
    %173 = vector.load %arg13[%c0_78, %c0_79, %c0_80] : memref<1x1024x256xf32, #tpu.memory_space<vmem>>, vector<1x1024x256xf32>
    %174 = vector.shape_cast %173 : vector<1x1024x256xf32> to vector<1024x256xf32>
    %cst_81 = arith.constant dense<0.000000e+00> : vector<32x256xf32>
    %175 = tpu.matmul %172, %174, %cst_81 {dimension_numbers = #tpu.dot_dimension_numbers<[1], [0], [0], [1], [0, 0, 1, 1], [], []>} : vector<32x1024xf32>, vector<1024x256xf32>, vector<32x256xf32> -> vector<32x256xf32>
    %176 = arith.addf %124, %175 : vector<32x256xf32>
    %c0_82 = arith.constant 0 : index
    %c0_83 = arith.constant 0 : index
    %c0_84 = arith.constant 0 : index
    %177 = vector.load %arg14[%c0_82, %c0_83, %c0_84] : memref<1x1x256xf32, #tpu.memory_space<vmem>>, vector<1x1x256xf32>
    %178 = vector.shape_cast %177 : vector<1x1x256xf32> to vector<1x256xf32>
    %179 = vector.broadcast %178 : vector<1x256xf32> to vector<32x256xf32>
    %180 = arith.addf %176, %179 : vector<32x256xf32>
    %c0_85 = arith.constant 0 : index
    %c0_86 = arith.constant 0 : index
    %181 = vector.load %arg19[%c0_85, %c0_86] : memref<32x256xf32, #tpu.memory_space<vmem>>, vector<32x256xf32>
    tpu.vector_store %arg19[%c0_85, %c0_86], %180 {strides = array<i32>} : memref<32x256xf32, #tpu.memory_space<vmem>>, vector<32x256xf32>,
    %c1_i32 = arith.constant 1 : i32
    %182 = arith.cmpi eq, %arg0, %c1_i32 : i32
    %183 = arith.extui %182 : i1 to i32
    %c0_i32_87 = arith.constant 0 : i32
    %184 = arith.cmpi ne, %183, %c0_i32_87 : i32
    scf.if %184 {
      %c0_88 = arith.constant 0 : index
      %c0_89 = arith.constant 0 : index
      %185 = vector.load %arg15[%c0_88, %c0_89] : memref<1x256xf32, #tpu.memory_space<vmem>>, vector<1x256xf32>
      %c0_90 = arith.constant 0 : index
      %c0_91 = arith.constant 0 : index
      %186 = vector.load %arg16[%c0_90, %c0_91] : memref<1x256xf32, #tpu.memory_space<vmem>>, vector<1x256xf32>
      %cst_92 = arith.constant dense<0.000000e+00> : vector<32xf32>
      %187 = vector.multi_reduction <add>, %180, %cst_92 [1] : vector<32x256xf32> to vector<32xf32>
      %188 = vector.shape_cast %187 : vector<32xf32> to vector<32x1xf32>
      %cst_93 = arith.constant 2.560000e+02 : f32
      %189 = vector.broadcast %cst_93 : f32 to vector<32x1xf32>
      %190 = arith.divf %188, %189 : vector<32x1xf32>
      %191 = vector.broadcast %190 : vector<32x1xf32> to vector<32x256xf32>
      %192 = arith.subf %180, %191 : vector<32x256xf32>
      %193 = vector.broadcast %190 : vector<32x1xf32> to vector<32x256xf32>
      %194 = arith.subf %180, %193 : vector<32x256xf32>
      %195 = arith.mulf %192, %194 : vector<32x256xf32>
      %cst_94 = arith.constant dense<0.000000e+00> : vector<32xf32>
      %196 = vector.multi_reduction <add>, %195, %cst_94 [1] : vector<32x256xf32> to vector<32xf32>
      %197 = vector.shape_cast %196 : vector<32xf32> to vector<32x1xf32>
      %cst_95 = arith.constant 2.560000e+02 : f32
      %198 = vector.broadcast %cst_95 : f32 to vector<32x1xf32>
      %199 = arith.divf %197, %198 : vector<32x1xf32>
      %200 = vector.broadcast %190 : vector<32x1xf32> to vector<32x256xf32>
      %201 = arith.subf %180, %200 : vector<32x256xf32>
      %cst_96 = arith.constant 9.99999974E-6 : f32
      %202 = vector.broadcast %cst_96 : f32 to vector<32x1xf32>
      %203 = arith.addf %199, %202 : vector<32x1xf32>
      %204 = math.rsqrt %203 : vector<32x1xf32>
      %205 = vector.broadcast %204 : vector<32x1xf32> to vector<32x256xf32>
      %206 = arith.mulf %201, %205 : vector<32x256xf32>
      %207 = vector.broadcast %185 : vector<1x256xf32> to vector<32x256xf32>
      %208 = arith.mulf %206, %207 : vector<32x256xf32>
      %209 = vector.broadcast %186 : vector<1x256xf32> to vector<32x256xf32>
      %210 = arith.addf %208, %209 : vector<32x256xf32>
      %c0_97 = arith.constant 0 : index
      %c0_98 = arith.constant 0 : index
      %211 = vector.load %arg17[%c0_97, %c0_98] : memref<256x128xf32, #tpu.memory_space<vmem>>, vector<256x128xf32>
      %cst_99 = arith.constant dense<0.000000e+00> : vector<32x128xf32>
      %212 = tpu.matmul %210, %211, %cst_99 {dimension_numbers = #tpu.dot_dimension_numbers<[1], [0], [0], [1], [0, 0, 1, 1], [], []>} : vector<32x256xf32>, vector<256x128xf32>, vector<32x128xf32> -> vector<32x128xf32>
      %c0_100 = arith.constant 0 : index
      %c0_101 = arith.constant 0 : index
      %213 = vector.load %arg18[%c0_100, %c0_101] : memref<32x128xf32, #tpu.memory_space<vmem>>, vector<32x128xf32>
      tpu.vector_store %arg18[%c0_100, %c0_101], %212 {strides = array<i32>} : memref<32x128xf32, #tpu.memory_space<vmem>>, vector<32x128xf32>,
    } else {
    }
    return
  }
  func.func @transform_0(%arg0: i32) -> (i32, i32) {
    %c0_i32 = arith.constant 0 : i32
    %c0_i32_0 = arith.constant 0 : i32
    %c0_i32_1 = arith.constant 0 : i32
    return %c0_i32, %c0_i32_0 : i32, i32
  }
  func.func @transform_1(%arg0: i32) -> (i32, i32) {
    %c0_i32 = arith.constant 0 : i32
    %c0_i32_0 = arith.constant 0 : i32
    %c0_i32_1 = arith.constant 0 : i32
    return %c0_i32, %c0_i32_0 : i32, i32
  }
  func.func @transform_2(%arg0: i32) -> (i32, i32, i32) {
    %c0_i32 = arith.constant 0 : i32
    %c0_i32_0 = arith.constant 0 : i32
    %c0_i32_1 = arith.constant 0 : i32
    return %arg0, %c0_i32, %c0_i32_0 : i32, i32, i32
  }
  func.func @transform_3(%arg0: i32) -> (i32, i32, i32) {
    %c0_i32 = arith.constant 0 : i32
    %c0_i32_0 = arith.constant 0 : i32
    %c0_i32_1 = arith.constant 0 : i32
    return %arg0, %c0_i32, %c0_i32_0 : i32, i32, i32
  }
  func.func @transform_4(%arg0: i32) -> (i32, i32, i32) {
    %c0_i32 = arith.constant 0 : i32
    %c0_i32_0 = arith.constant 0 : i32
    %c0_i32_1 = arith.constant 0 : i32
    return %arg0, %c0_i32, %c0_i32_0 : i32, i32, i32
  }
  func.func @transform_5(%arg0: i32) -> (i32, i32, i32) {
    %c0_i32 = arith.constant 0 : i32
    %c0_i32_0 = arith.constant 0 : i32
    %c0_i32_1 = arith.constant 0 : i32
    return %arg0, %c0_i32, %c0_i32_0 : i32, i32, i32
  }
  func.func @transform_6(%arg0: i32) -> (i32, i32, i32) {
    %c0_i32 = arith.constant 0 : i32
    %c0_i32_0 = arith.constant 0 : i32
    %c0_i32_1 = arith.constant 0 : i32
    return %arg0, %c0_i32, %c0_i32_0 : i32, i32, i32
  }
  func.func @transform_7(%arg0: i32) -> (i32, i32, i32) {
    %c0_i32 = arith.constant 0 : i32
    %c0_i32_0 = arith.constant 0 : i32
    %c0_i32_1 = arith.constant 0 : i32
    return %arg0, %c0_i32, %c0_i32_0 : i32, i32, i32
  }
  func.func @transform_8(%arg0: i32) -> (i32, i32, i32) {
    %c0_i32 = arith.constant 0 : i32
    %c0_i32_0 = arith.constant 0 : i32
    %c0_i32_1 = arith.constant 0 : i32
    return %arg0, %c0_i32, %c0_i32_0 : i32, i32, i32
  }
  func.func @transform_9(%arg0: i32) -> (i32, i32, i32) {
    %c0_i32 = arith.constant 0 : i32
    %c0_i32_0 = arith.constant 0 : i32
    %c0_i32_1 = arith.constant 0 : i32
    return %arg0, %c0_i32, %c0_i32_0 : i32, i32, i32
  }
  func.func @transform_10(%arg0: i32) -> (i32, i32, i32) {
    %c0_i32 = arith.constant 0 : i32
    %c0_i32_0 = arith.constant 0 : i32
    %c0_i32_1 = arith.constant 0 : i32
    return %arg0, %c0_i32, %c0_i32_0 : i32, i32, i32
  }
  func.func @transform_11(%arg0: i32) -> (i32, i32, i32) {
    %c0_i32 = arith.constant 0 : i32
    %c0_i32_0 = arith.constant 0 : i32
    %c0_i32_1 = arith.constant 0 : i32
    return %arg0, %c0_i32, %c0_i32_0 : i32, i32, i32
  }
  func.func @transform_12(%arg0: i32) -> (i32, i32, i32) {
    %c0_i32 = arith.constant 0 : i32
    %c0_i32_0 = arith.constant 0 : i32
    %c0_i32_1 = arith.constant 0 : i32
    return %arg0, %c0_i32, %c0_i32_0 : i32, i32, i32
  }
  func.func @transform_13(%arg0: i32) -> (i32, i32, i32) {
    %c0_i32 = arith.constant 0 : i32
    %c0_i32_0 = arith.constant 0 : i32
    %c0_i32_1 = arith.constant 0 : i32
    return %arg0, %c0_i32, %c0_i32_0 : i32, i32, i32
  }
  func.func @transform_14(%arg0: i32) -> (i32, i32) {
    %c0_i32 = arith.constant 0 : i32
    %c0_i32_0 = arith.constant 0 : i32
    %c0_i32_1 = arith.constant 0 : i32
    return %c0_i32, %c0_i32_0 : i32, i32
  }
  func.func @transform_15(%arg0: i32) -> (i32, i32) {
    %c0_i32 = arith.constant 0 : i32
    %c0_i32_0 = arith.constant 0 : i32
    %c0_i32_1 = arith.constant 0 : i32
    return %c0_i32, %c0_i32_0 : i32, i32
  }
  func.func @transform_16(%arg0: i32) -> (i32, i32) {
    %c0_i32 = arith.constant 0 : i32
    %c0_i32_0 = arith.constant 0 : i32
    %c0_i32_1 = arith.constant 0 : i32
    return %c0_i32, %c0_i32_0 : i32, i32
  }
  func.func @transform_17(%arg0: i32) -> (i32, i32) {
    %c0_i32 = arith.constant 0 : i32
    %c0_i32_0 = arith.constant 0 : i32
    %c0_i32_1 = arith.constant 0 : i32
    return %c0_i32, %c0_i32_0 : i32, i32
  }
}

</mosaic_0001>

<bundles_post_ra>
// kernel: squeeze.23
= control target key start
LH: loop header
LB: loop body
LE: loop exit
PB: predicated region body
PF: predicated region fallthrough
CT: control target
= control target key end

     0   :  { %vm7_vm0 = vcmask 130048   ;;  %s39_s0 = inlined_call_operand.vmem [shape: s32[32], index: 0, kind: input, shape index: {}]   ;;  %s40_s1 = inlined_call_operand.vmem [shape: s32[2,16], index: 1, kind: output, shape index: {}]  }
   0x1   :  { %v4_v0 = vld [vmem:[%s39_s0] sm:$0x1]  ;;  %s22_s0 = smov 112  }
   0x2   :  { %5 = vst [vmem:[#allocation1] sm:$0x1] %v4_v0 }
   0x9   :  { %v9_v1 = vld [vmem:[#allocation1] sm:$0x1]  }
   0xa   :  { %v6_v2 = vld [vmem:[#allocation1] sm:$0x1]   ;;  %10 = vrot.lane.b32.xlu0 %v9_v1, %s22_s0 }
   0xb   :  { %8 = vst.msk [vmem:[#allocation0] sm:$0x1] %vm7_vm0, %v6_v2  }
  0x7c   :  { %v11_v3 = vpop.permute.xlu0 %10  }
  0x7d   :  { %14 = vst.msk [vmem:[#allocation0 + $0x1] sm:$0x1] %vm7_vm0, %v11_v3  }
  0x84   :  { %v17_v4 = vld [vmem:[#allocation0] sm:$0x3] }
  0x85   :  { %20 = vst [vmem:[%s40_s1] sm:$0x3] %v17_v4 }

// kernel: vqgan_transformer_forward.2
= control target key start
LH: loop header
LB: loop body
LE: loop exit
PB: predicated region body
PF: predicated region fallthrough
CT: control target
= control target key end

     0   :  { %10 = vsyncpa [#allocation3], 0  ;;  %s459_s0 = inlined_call_operand.vmem [shape: f32[32,48], index: 0, kind: input, shape index: {}]   ;;  %s460_s1 = inlined_call_operand.vmem [shape: f32[48,32], index: 1, kind: input, shape index: {}]   ;;  %s461_s2 = inlined_call_operand.hbm [shape: f32[1,32], index: 2, kind: input, shape index: {}]   ;;  %s462_s3 = inlined_call_operand.hbm [shape: f32[32,64], index: 3, kind: input, shape index: {}]   ;;  %s463_s4 = inlined_call_operand.vmem [shape: f32[1,64], index: 4, kind: input, shape index: {}]   ;;  %s464_s5 = inlined_call_operand.vmem [shape: s32[32,1], index: 5, kind: output, shape index: {}]  }
   0x1   :  { %s21_s20 = sshll.u32 %s461_s2, 4  ;;  %s22_s20 = int_to_ptr.hbm [resolvable:$true] %s21_s20 }
   0x2   :  { %11 = vsyncpa [#allocation5], 0  ;;  %s354_s21 = smov [#allocation2]   ;;  %s31_s25 = sshll.u32 %s462_s3, 4  ;;  %s32_s25 = int_to_ptr.hbm [resolvable:$true] %s31_s25 }
   0x3   :  { %s23_s22 = sshll.u32 %s354_s21, 4  ;;  %s355_s26 = smov [#allocation4]   ;;  %s24_s22 = int_to_ptr.vmem [resolvable:$true] %s23_s22 }
   0x4   :  { %26 = dma.hbm_to_vmem [thread:$0]  %s22_s20, 16, %s24_s22, [#allocation3]  }
   0x5   :  { %s33_s27 = sshll.u32 %s355_s26, 4  ;;  %s356_s28 = smov 128   ;;  %s34_s27 = int_to_ptr.vmem [resolvable:$true] %s33_s27 }
   0x6   :  { %s357_s29 = smov 8  }
   0x7   :  { %39 = dma.hbm_to_vmem [thread:$0]  %s32_s25, 512, %s34_s27, [#allocation5], %s356_s28, %s356_s28, %s357_s29  }
   0x8   :  { %350 = dma.done.wait [#allocation3], 16  }
   0x9   :  { %351 = vsyncadd [#allocation3], 4294967280 }
   0xa   :  { %352 = dma.done.wait [#allocation5], 512  }
   0xb   :  { %353 = vsyncadd [#allocation5], 4294966784  ;;  %v59_v0 = vld [vmem:[%s460_s1 + $0x28] sm:$0xff]  ;;  %v58_v1 = vld [vmem:[%s460_s1 + $0x20] sm:$0xff]  ;;  %vm64_vm0 = vcmask 392192   ;;  %vm110_vm1 = vcmask 261120   ;;  %v184_v56 = vlaneseq }
   0xc   :  { %87 = vmatpush.msra.mxu0 %v59_v0  ;;  %286 = vmatpush.msra.mxu2 %v59_v0  ;;  %v57_v2 = vld [vmem:[%s460_s1 + $0x18] sm:$0xff]  ;;  %v56_v5 = vld [vmem:[%s460_s1 + $0x10] sm:$0xff]  ;;  %v55_v6 = vld [vmem:[%s460_s1 + $0x8] sm:$0xff]  ;;  %vm186_vm2 = vcmask 523264   ;;  %vm267_vm11 = vcmask 7168  }
   0xd   :  { %v126_v3 = vld [vmem:[#allocation4 + $0x18] sm:$0xff]  ;;  %v125_v4 = vld [vmem:[#allocation4 + $0x10] sm:$0xff]  ;;  %v51_v10 = vld [vmem:[%s459_s0 + $0x8] sm:$0xff]  ;;  %v185_v57 = vand.u32 127, %v184_v56 }
   0xe   :  { %88 = vmatpush.msra.mxu0 %v58_v1  ;;  %287 = vmatpush.msra.mxu2 %v58_v1  ;;  %v54_v7 = vld [vmem:[%s460_s1] sm:$0xff]  ;;  %v52_v9 = vld [vmem:[%s459_s0 + $0x10] sm:$0xff]  ;;  %v53_v11 = vld [vmem:[%s459_s0 + $0x18] sm:$0xff] }
   0xf   :  { %151 = vmatpush.msra.mxu1 %v126_v3  ;;  %292 = vmatpush.msra.mxu3 %v126_v3  ;;  %v50_v8 = vld [vmem:[%s459_s0] sm:$0xff]  ;;  %v124_v12 = vld [vmem:[#allocation4 + $0x8] sm:$0xff] }
  0x10   :  { %89 = vmatpush.msra.mxu0 %v57_v2  ;;  %288 = vmatpush.msra.mxu2 %v57_v2  ;;  %v123_v13 = vld [vmem:[#allocation4] sm:$0xff]  ;;  %v300_v14 = vld [vmem:[#allocation2] ss:$0 sm:$0xff] }
  0x11   :  { %152 = vmatpush.msra.mxu1 %v125_v4  ;;  %293 = vmatpush.msra.mxu3 %v125_v4  ;;  %v301_v33 = vld [vmem:[%s463_s4] ss:$0 sm:$0xff] }
  0x12   :  { %90 = vmatpush.msra.mxu0 %v56_v5  ;;  %289 = vmatpush.msra.mxu2 %v56_v5 }
  0x13   :  { %153 = vmatpush.msra.mxu1 %v124_v12  ;;  %294 = vmatpush.msra.mxu3 %v124_v12 }
  0x14   :  { %91 = vmatpush.msra.mxu0 %v55_v6  ;;  %290 = vmatpush.msra.mxu2 %v55_v6 }
  0x15   :  { %154 = vmatpush.msra.mxu1 %v123_v13  ;;  %295 = vmatpush.msra.mxu3 %v123_v13 }
  0x16   :  { %92 = vmatpush.msra.mxu0 %v54_v7  ;;  %291 = vmatpush.msra.mxu2 %v54_v7 }
  0x17   :  { %278 = vmatmul.msk.f32.vlgmr.msra.gmra.mxu0 %vm64_vm0, %v50_v8  ;;  %280 = vmatmul.msk.f32.vlgmr.msra.gmra.mxu2 %vm64_vm0, %v52_v9 }
  0x1f   :  { %279 = vmatmul.msk.f32.gmra.mxu0 %vm64_vm0, %v51_v10  ;;  %281 = vmatmul.msk.f32.gmra.mxu2 %vm64_vm0, %v53_v11 }
  0x94   :  { %v94_v15 = vpop.f32.mrf.mxu0 }
  0x95   :  { %v95_v16 = vadd.f32 %v300_v14, %v94_v15 }
  0x97   :  { %282 = vmatmul.msk.f32.vlgmr.msra.gmra.mxu1 %vm110_vm1, %v95_v16  ;;  %v106_v17 = vmul.f32 %v95_v16, %v95_v16 }
  0x99   :  { %v111_v18 = vsel %vm110_vm1, %v106_v17, 0.0 }
  0x9a   :  { %112 = vadd.xlane.f32.xlu0 %v111_v18  ;;  %v100_v19 = vpop.f32.mrf.mxu2 }
  0x9b   :  { %v101_v20 = vadd.f32 %v300_v14, %v100_v19 }
  0x9c   :  { %v97_v21 = vpop.f32.mrf.mxu0 }
  0x9d   :  { %v98_v22 = vadd.f32 %v300_v14, %v97_v21  ;;  %v108_v23 = vmul.f32 %v101_v20, %v101_v20 }
  0x9f   :  { %283 = vmatmul.msk.f32.vlgmr.msra.gmra.mxu3 %vm110_vm1, %v98_v22  ;;  %v107_v24 = vmul.f32 %v98_v22, %v98_v22  ;;  %v117_v25 = vsel %vm110_vm1, %v108_v23, 0.0 }
  0xa0   :  { %118 = vadd.xlane.f32.xlu1 %v117_v25 }
  0xa1   :  { %v114_v26 = vsel %vm110_vm1, %v107_v24, 0.0 }
  0xa2   :  { %115 = vadd.xlane.f32.xlu0 %v114_v26  ;;  %v103_v27 = vpop.f32.mrf.mxu2 }
  0xa3   :  { %v104_v28 = vadd.f32 %v300_v14, %v103_v27 }
  0xa5   :  { %v109_v29 = vmul.f32 %v104_v28, %v104_v28 }
  0xa7   :  { %284 = vmatmul.msk.f32.gmra.mxu3 %vm110_vm1, %v101_v20  ;;  %v120_v30 = vsel %vm110_vm1, %v109_v29, 0.0 }
  0xa8   :  { %121 = vadd.xlane.f32.xlu1 %v120_v30 }
  0xaf   :  { %285 = vmatmul.msk.f32.gmra.mxu3 %vm110_vm1, %v104_v28 }
 0x10d   :  { %v113_v34 = vpop.xlane.xlu0 %112 }
 0x113   :  { %v119_v44 = vpop.xlane.xlu1 %118 }
 0x114   :  { %v156_v31 = vpop.f32.mrf.mxu1 }
 0x115   :  { %v168_v32 = vmul.f32 2.0, %v156_v31  ;;  %v116_v40 = vpop.xlane.xlu0 %115 }
 0x117   :  { %v172_v35 = vsub.f32 %v113_v34, %v168_v32 }
 0x119   :  { %v180_v36 = vadd.f32 %v301_v33, %v172_v35 }
 0x11b   :  { %v187_v37 = vsel %vm186_vm2, %v180_v36, inf  ;;  %v122_v52 = vpop.xlane.xlu1 %121 }
 0x11c   :  { %188 = vmin.xlane.f32.xlu2 %v187_v37 }
 0x122   :  { %v159_v38 = vpop.f32.mrf.mxu3 }
 0x123   :  { %v169_v39 = vmul.f32 2.0, %v159_v38 }
 0x125   :  { %v173_v41 = vsub.f32 %v116_v40, %v169_v39 }
 0x127   :  { %v181_v42 = vadd.f32 %v301_v33, %v173_v41 }
 0x129   :  { %v190_v43 = vsel %vm186_vm2, %v181_v42, inf }
 0x12a   :  { %v162_v45 = vpop.f32.mrf.mxu3  ;;  %191 = vmin.xlane.f32.xlu2 %v190_v43 }
 0x12b   :  { %v170_v46 = vmul.f32 2.0, %v162_v45 }
 0x12d   :  { %v174_v47 = vsub.f32 %v119_v44, %v170_v46 }
 0x12f   :  { %v182_v48 = vadd.f32 %v301_v33, %v174_v47 }
 0x131   :  { %v193_v49 = vsel %vm186_vm2, %v182_v48, inf }
 0x132   :  { %v165_v50 = vpop.f32.mrf.mxu3  ;;  %194 = vmin.xlane.f32.xlu0 %v193_v49 }
 0x133   :  { %v171_v51 = vmul.f32 2.0, %v165_v50 }
 0x135   :  { %v175_v53 = vsub.f32 %v122_v52, %v171_v51 }
 0x137   :  { %v183_v54 = vadd.f32 %v301_v33, %v175_v53 }
 0x139   :  { %v196_v55 = vsel %vm186_vm2, %v183_v54, inf }
 0x13a   :  { %197 = vmin.xlane.f32.xlu1 %v196_v55 }
 0x18f   :  { %v189_v58 = vpop.xlane.xlu2 %188 }
 0x190   :  { %vm199_vm3 = vcmp.le.f32.partialorder %v180_v36, %v189_v58 }
 0x191   :  { %v203_v59 = vsel %vm199_vm3, %v185_v57, 64 }
 0x192   :  { %v207_v60 = vsel %vm186_vm2, %v203_v59, 2147483647 }
 0x193   :  { %v209_v61 = vshra.s32 %v207_v60, 16  ;;  %v208_v14 = vand.u32 65535, %v207_v60 }
 0x195   :  { %v211_v62 = vcvt.s32.f32 %v209_v61  ;;  %v210_v16 = vcvt.s32.f32 %v208_v14 }
 0x197   :  { %212 = vmin.xlane.f32.xlu2 %v211_v62 }
 0x19d   :  { %v192_v63 = vpop.xlane.xlu2 %191 }
 0x19e   :  { %vm200_vm4 = vcmp.le.f32.partialorder %v181_v42, %v192_v63 }
 0x19f   :  { %v204_v0 = vsel %vm200_vm4, %v185_v57, 64 }
 0x1a0   :  { %v222_v1 = vsel %vm186_vm2, %v204_v0, 2147483647 }
 0x1a1   :  { %v224_v2 = vshra.s32 %v222_v1, 16  ;;  %v223_v18 = vand.u32 65535, %v222_v1 }
 0x1a3   :  { %v226_v3 = vcvt.s32.f32 %v224_v2  ;;  %v225_v20 = vcvt.s32.f32 %v223_v18 }
 0x1a5   :  { %227 = vmin.xlane.f32.xlu0 %v226_v3  ;;  %v195_v4 = vpop.xlane.xlu0 %194 }
 0x1a6   :  { %vm201_vm5 = vcmp.le.f32.partialorder %v182_v48, %v195_v4 }
 0x1a7   :  { %v205_v5 = vsel %vm201_vm5, %v185_v57, 64 }
 0x1a8   :  { %v237_v6 = vsel %vm186_vm2, %v205_v5, 2147483647 }
 0x1a9   :  { %v239_v7 = vshra.s32 %v237_v6, 16  ;;  %v238_v22 = vand.u32 65535, %v237_v6 }
 0x1ab   :  { %v241_v8 = vcvt.s32.f32 %v239_v7  ;;  %v240_v24 = vcvt.s32.f32 %v238_v22 }
 0x1ad   :  { %v198_v9 = vpop.xlane.xlu1 %197  ;;  %242 = vmin.xlane.f32.xlu1 %v241_v8 }
 0x1ae   :  { %vm202_vm6 = vcmp.le.f32.partialorder %v183_v54, %v198_v9 }
 0x1af   :  { %v206_v10 = vsel %vm202_vm6, %v185_v57, 64 }
 0x1b0   :  { %v252_v11 = vsel %vm186_vm2, %v206_v10, 2147483647 }
 0x1b1   :  { %v254_v12 = vshra.s32 %v252_v11, 16  ;;  %v253_v26 = vand.u32 65535, %v252_v11 }
 0x1b3   :  { %v256_v13 = vcvt.s32.f32 %v254_v12  ;;  %v255_v28 = vcvt.s32.f32 %v253_v26 }
 0x1b5   :  { %257 = vmin.xlane.f32.xlu2 %v256_v13 }
 0x20a   :  { %v213_v15 = vpop.xlane.xlu2 %212 }
 0x20b   :  { %vm214_vm7 = vcmp.eq.f32.partialorder %v211_v62, %v213_v15  ;;  %v219_v30 = vcvt.f32.s32 %v213_v15 }
 0x20c   :  { %v215_v17 = vsel %vm214_vm7, %v210_v16, inf }
 0x20d   :  { %216 = vmin.xlane.f32.xlu0 %v215_v17  ;;  %v220_v32 = vshll.u32 %v219_v30, 16 }
 0x218   :  { %v228_v19 = vpop.xlane.xlu0 %227 }
 0x219   :  { %vm229_vm8 = vcmp.eq.f32.partialorder %v226_v3, %v228_v19  ;;  %v234_v35 = vcvt.f32.s32 %v228_v19 }
 0x21a   :  { %v230_v21 = vsel %vm229_vm8, %v225_v20, inf }
 0x21b   :  { %231 = vmin.xlane.f32.xlu1 %v230_v21  ;;  %v235_v37 = vshll.u32 %v234_v35, 16 }
 0x220   :  { %v243_v23 = vpop.xlane.xlu1 %242 }
 0x221   :  { %vm244_vm9 = vcmp.eq.f32.partialorder %v241_v8, %v243_v23  ;;  %v249_v40 = vcvt.f32.s32 %v243_v23 }
 0x222   :  { %v245_v25 = vsel %vm244_vm9, %v240_v24, inf }
 0x223   :  { %246 = vmin.xlane.f32.xlu2 %v245_v25  ;;  %v250_v42 = vshll.u32 %v249_v40, 16 }
 0x228   :  { %v258_v27 = vpop.xlane.xlu2 %257 }
 0x229   :  { %vm259_vm10 = vcmp.eq.f32.partialorder %v256_v13, %v258_v27  ;;  %v264_v45 = vcvt.f32.s32 %v258_v27 }
 0x22a   :  { %v260_v29 = vsel %vm259_vm10, %v255_v28, inf }
 0x22b   :  { %261 = vmin.xlane.f32.xlu0 %v260_v29  ;;  %v265_v47 = vshll.u32 %v264_v45, 16 }
 0x280   :  { %v217_v31 = vpop.xlane.xlu0 %216 }
 0x281   :  { %v218_v33 = vcvt.f32.s32 %v217_v31 }
 0x283   :  { %v221_v34 = vadd.s32 %v220_v32, %v218_v33 }
 0x285   :  { %268 = vst.msk [vmem:[%s464_s5] sm:$0xff] %vm267_vm11, %v221_v34 }
 0x28e   :  { %v232_v36 = vpop.xlane.xlu1 %231 }
 0x28f   :  { %v233_v38 = vcvt.f32.s32 %v232_v36 }
 0x291   :  { %v236_v39 = vadd.s32 %v235_v37, %v233_v38 }
 0x293   :  { %269 = vst.msk [vmem:[%s464_s5 + $0x8] sm:$0xff] %vm267_vm11, %v236_v39 }
 0x296   :  { %v247_v41 = vpop.xlane.xlu2 %246 }
 0x297   :  { %v248_v43 = vcvt.f32.s32 %v247_v41 }
 0x299   :  { %v251_v44 = vadd.s32 %v250_v42, %v248_v43 }
 0x29b   :  { %270 = vst.msk [vmem:[%s464_s5 + $0x10] sm:$0xff] %vm267_vm11, %v251_v44 }
 0x29e   :  { %v262_v46 = vpop.xlane.xlu0 %261 }
 0x29f   :  { %v263_v48 = vcvt.f32.s32 %v262_v46 }
 0x2a1   :  { %v266_v49 = vadd.s32 %v265_v47, %v263_v48 }
 0x2a3   :  { %271 = vst.msk [vmem:[%s464_s5 + $0x18] sm:$0xff] %vm267_vm11, %v266_v49 }
 0x2a4   :  { %276 = vsyncpa [#allocation3], 1 }
 0x2a5   :  { %277 = vsyncpa [#allocation5], 1 }

// kernel: vqgan_transformer_forward.3
= control target key start
LH: loop header
LB: loop body
LE: loop exit
PB: predicated region body
PF: predicated region fallthrough
CT: control target
= control target key end

     0   :  { %s7911_s0 = inlined_call_operand.vmem [shape: f32[32,256], index: 0, kind: input, shape index: {}]   ;;  %s7912_s1 = inlined_call_operand.vmem [shape: f32[16,16], index: 1, kind: input, shape index: {}]   ;;  %s7913_s2 = inlined_call_operand.hbm [shape: f32[2,1,256], index: 2, kind: input, shape index: {}]   ;;  %s7914_s3 = inlined_call_operand.hbm [shape: f32[2,1,256], index: 3, kind: input, shape index: {}]   ;;  %s7915_s4 = inlined_call_operand.hbm [shape: f32[2,256,768], index: 4, kind: input, shape index: {}]   ;;  %s7916_s5 = inlined_call_operand.hbm [shape: f32[2,1,768], index: 5, kind: input, shape index: {}]   ;;  %s7917_s6 = inlined_call_operand.hbm [shape: f32[2,256,256], index: 6, kind: input, shape index: {}]   ;;  %s7918_s7 = inlined_call_operand.hbm [shape: f32[2,1,256], index: 7, kind: input, shape index: {}]   ;;  %s7919_s8 = inlined_call_operand.hbm [shape: f32[2,1,256], index: 8, kind: input, shape index: {}]   ;;  %s7920_s9 = inlined_call_operand.hbm [shape: f32[2,1,256], index: 9, kind: input, shape index: {}]   ;;  %s7921_s10 = inlined_call_operand.hbm [shape: f32[2,256,1024], index: 10, kind: input, shape index: {}]   ;;  %s7922_s11 = inlined_call_operand.hbm [shape: f32[2,1,1024], index: 11, kind: input, shape index: {}]   ;;  %s7923_s12 = inlined_call_operand.hbm [shape: f32[2,1024,256], index: 12, kind: input, shape index: {}]   ;;  %s7924_s13 = inlined_call_operand.hbm [shape: f32[2,1,256], index: 13, kind: input, shape index: {}]   ;;  %s7925_s14 = inlined_call_operand.hbm [shape: f32[1,256], index: 14, kind: input, shape index: {}]   ;;  %s7926_s15 = inlined_call_operand.hbm [shape: f32[1,256], index: 15, kind: input, shape index: {}]   ;;  %s7927_s16 = inlined_call_operand.hbm [shape: f32[256,128], index: 16, kind: input, shape index: {}]   ;;  %s7928_s17 = inlined_call_operand.hbm [shape: f32[32,128], index: 17, kind: output, shape index: {}]  }
   0x1   :  { %7948 = sst [smem:[#allocation46_spill]] %s7911_s0 }
   0x2   :  { %7949 = sst [smem:[#allocation47_spill]] %s7912_s1 }
   0x3   :  { %7950 = sst [smem:[#allocation48_spill]] %s7913_s2 }
   0x4   :  { %7951 = sst [smem:[#allocation49_spill]] %s7914_s3 }
   0x5   :  { %7952 = sst [smem:[#allocation50_spill]] %s7923_s12 }
   0x6   :  { %7953 = sst [smem:[#allocation51_spill]] %s7924_s13 }
   0x7   :  { %7954 = sst [smem:[#allocation52_spill]] %s7925_s14 }
   0x8   :  { %7955 = sst [smem:[#allocation53_spill]] %s7926_s15 }
   0x9   :  { %7956 = sst [smem:[#allocation54_spill]] %s7927_s16 }
   0xa   :  { %7957 = sst [smem:[#allocation55_spill]] %s7928_s17 }
   0xb   :  { %22 = vsyncpa [#allocation5], 0 }
   0xc   :  { %24 = vsyncpa [#allocation5 + $0x1], 0 }
   0xd   :  { %25 = vsyncpa [#allocation8], 0 }
   0xe   :  { %27 = vsyncpa [#allocation8 + $0x1], 0 }
   0xf   :  { %28 = vsyncpa [#allocation11], 0 }
  0x10   :  { %30 = vsyncpa [#allocation11 + $0x1], 0 }
  0x11   :  { %31 = vsyncpa [#allocation14], 0 }
  0x12   :  { %33 = vsyncpa [#allocation14 + $0x1], 0 }
  0x13   :  { %34 = vsyncpa [#allocation17], 0 }
  0x14   :  { %36 = vsyncpa [#allocation17 + $0x1], 0 }
  0x15   :  { %37 = vsyncpa [#allocation20], 0 }
  0x16   :  { %39 = vsyncpa [#allocation20 + $0x1], 0 }
  0x17   :  { %40 = vsyncpa [#allocation23], 0 }
  0x18   :  { %42 = vsyncpa [#allocation23 + $0x1], 0 }
  0x19   :  { %43 = vsyncpa [#allocation26], 0 }
  0x1a   :  { %44 = vsyncpa [#allocation6], 0  ;;  %s5698_s24 = smov 0   ;;  %s5700_s25 = smov 0  }
  0x1b   :  { %s5702_s26 = smov 0   ;;  %s5704_s27 = smov 0  }
  0x1c LB: > { %7958 = sst [smem:[#allocation39_spill]] %s5583_s25  ;;  %s5717_s28 = sadd.s32 4294967295, %s5591_s27   ;;  %s5591_s27 = sphi %s5704_s27, %s7996_s27   ;;  %s5587_s26 = sphi %s5702_s26, %s7999_s26   ;;  %s5583_s25 = sphi %s5700_s25, %s7998_s25   ;;  %s5579_s24 = sphi %s5698_s24, %s7997_s24  }
  0x1d   : > { %7959 = sst [smem:[#allocation40_spill]] %s5587_s26  ;;  %s5720_s29 = sadd.s32 1, %s5591_s27  }
  0x1e   : > { %7960 = sst [smem:[#allocation41_spill]] %s5717_s28  ;;  %s96_s0 = ssub.s32 %s5591_s27, %s5720_s29 }
  0x1f   : > { %7961 = sst [smem:[#allocation42_spill]] %s5720_s29  ;;  %s99_s30 = sadd.s32 1, %s5587_s26 }
  0x20   : > { %p97_p0 = scmp.eq.s32.totalorder %s96_s0, 0  ;;  %p106_p1 = scmp.ne.s32.totalorder %s5587_s26, %s5583_s25 }
  0x21   : > { %p107_p2 = scmp.eq.s32.totalorder %s5591_s27, 0  ;;  %p112_p3 = scmp.ne.s32.totalorder %s5583_s25, %s5579_s24 }
  0x22   : > { %s5730_s18 = scalar_select %p97_p0, %s5587_s26, %s99_s30  }
  0x23   : > { %p5732_p4 = por %p107_p2, %p106_p1  ;;  %p113_p5 = scmp.eq.s32.totalorder %s5717_s28, 0 }
  0x24   : > { %7962 = sst [smem:[#allocation43_spill]] %s5730_s18  ;;  %p4733_p6 = scmp.ge.s32.totalorder %s5591_s27, 1 }
  0x25   : > { %p493_p7 = scmp.lt.s32.totalorder %s5591_s27, 3  ;;  %p5741_p8 = por %p113_p5, %p112_p3 }
  0x26   : > { %p4734_p9 = scmp.ne.s32.totalorder %s5717_s28, 0  ;;  %s7968_s15 = sld [smem:[#allocation53_spill]] }
  0x27   : > { %s7964_s1 = scalar_select %p5741_p8, 1, 0 }
  0x28   : > { %p5746_p10 = pnand %p4733_p6, %p493_p7  ;;  %s5593_s24 = smov [#allocation25]  }
  0x29   : > { %7965 = sst [smem:[#allocation44_spill]] %s7964_s1  ;;  %s525_s0 = sshll.u32 %s5593_s24, 4  ;;  %s526_s0 = int_to_ptr.vmem [resolvable:$true] %s525_s0 }
  0x2a   : > { %s7966_s20 = scalar_select %p5746_p10, 1, 0 }
  0x2b   : > { %p4871_p11 = pneg %p5746_p10  ;;  %s7969_s14 = sld [smem:[#allocation52_spill]] }
  0x2c   : > { %7967 = sst [smem:[#allocation45_spill]] %s7966_s20  ;;  %s523_s23 = sshll.u32 %s7968_s15, 4  ;;  %s524_s23 = int_to_ptr.hbm [resolvable:$true] %s523_s23 }
  0x2d   : > { %p5760_p12 = pnand %p4871_p11, %p113_p5  ;;  %s7971_s16 = sld [smem:[#allocation54_spill]] }
  0x2e   : > { %s5594_s1 = smov [#allocation24]   ;;  %s5595_s18 = smov [#allocation27]  }
  0x2f   : > { %s513_s24 = sshll.u32 %s5594_s1, 4  ;;  %s536_s30 = sshll.u32 %s5595_s18, 4  ;;  %s514_s24 = int_to_ptr.vmem [resolvable:$true] %s513_s24  ;;  %s537_s30 = int_to_ptr.vmem [resolvable:$true] %s536_s30 }
  0x30   : > { %4877 = dma.hbm_to_vmem [thread:$0]  (!%p5760_p12), %s524_s23, 32, %s526_s0, [#allocation26]  }
  0x31   : > { %s511_s29 = sshll.u32 %s7969_s14, 4  ;;  %s5596_s14 = smov 128   ;;  %s512_s29 = int_to_ptr.hbm [resolvable:$true] %s511_s29 }
  0x32   : > { %4874 = dma.hbm_to_vmem [thread:$0]  (!%p5760_p12), %s512_s29, 32, %s514_s24, [#allocation23]  }
  0x33   : > { %s534_s15 = sshll.u32 %s7971_s16, 4  ;;  %s5597_s28 = smov 8   ;;  %s535_s15 = int_to_ptr.hbm [resolvable:$true] %s534_s15 }
  0x34   : > { %4880 = dma.hbm_to_vmem [thread:$0]  (!%p5760_p12), %s535_s15, 4096, %s537_s30, [#allocation26], %s5596_s14, %s5596_s14, %s5597_s28  }
  0x35   : > { %p4737_p13 = scmp.ge.s32.totalorder %s5591_s27, 2 }
  0x36   : > { %s5775_s1 = sand.u32 (!%p4737_p13), 1, %s5587_s26   ;;  %s5778_s23 = sshll.u32 (!%p4737_p13), %s5591_s27, 1 }
  0x37   : > { %546 = sbr.rel (%p4737_p13) target bundleno = 260 (0x104), region = 36  ;;  %s5781_s29 = sshll.u32 (!%p4737_p13), %s5775_s1, 1 }
  0x38   : > { %s5784_s0 = sand.u32 (!%p4737_p13), 1, %s5591_s27   ;;  %s7972_s3 = sld [smem:[#allocation49_spill]] (!%p4737_p13) }
  0x39   : > { %s573_s28 = scalar_lea.vmem (!%p4737_p13), [#allocation7], %s5781_s29  ;;  %s7946_s24 = scalar_lea.sflag (!%p4737_p13), [#allocation8], %s5784_s0 }
  0x3a   : > { %s581_s21 = sshll.u32 (!%p4737_p13), %s573_s28, 4  ;;  %s582_s21 = int_to_ptr.vmem [resolvable:$true] %s581_s21 }
  0x3e   : > { %s577_s15 = scalar_lea.hbm %s7972_s3, %s5778_s23  ;;  %s5163_s25 = scalar_lea.hbm %s7972_s3, 4 }
  0x3f   : > { %s579_s22 = sshll.u32 %s577_s15, 4  ;;  %s580_s22 = int_to_ptr.hbm [resolvable:$true] %s579_s22 }
  0x40   : > { %s5157_s18 = sshra.s32 %s580_s22, 4  ;;  %s5158_s18 = int_to_ptr.hbm [resolvable:$true] %s5157_s18 }
  0x41   : > { %s5159_s30 = scalar_lea.hbm %s5158_s18, 2  ;;  %p5164_p3 = scmp.lt.s32.totalorder %s5158_s18, %s7972_s3 }
  0x42   : > { %p5160_p0 = scmp.ne.s32.totalorder %s5158_s18, %s5159_s30  ;;  %p5165_p6 = scmp.lt.s32.totalorder %s5163_s25, %s5159_s30 }
  0x44   : > { %p5161_p1 = pnand %p5160_p0, %p5732_p4  ;;  %p5166_p7 = por %p5165_p6, %p5164_p3 }
  0x46   : > { %p5162_p2 = pneg %p5161_p1 }
  0x48   : > { %p5167_p11 = pnand %p5166_p7, %p5162_p2 }
  0x4a   : > { %5170 = shalt.err (!%p5167_p11)
}
  0x4b   : > { %4838 = dma.hbm_to_vmem [thread:$0]  (%p5732_p4), %s580_s22, 32, %s582_s21, %s7946_s24  }
  0x4c   : > { %s4827_s16 = smul.u32 6, %s5775_s1  ;;  %s659_s18 = scalar_lea.hbm %s7918_s7, %s5778_s23 }
  0x4d   : > { %s4828_s26 = smul.u32 6, %s5591_s27  ;;  %s5813_s13 = sshll.u32 %s659_s18, 4  ;;  %s662_s13 = int_to_ptr.hbm [resolvable:$true] %s5813_s13 }
  0x4e   : > { %s614_s14 = scalar_lea.vmem [#allocation10], %s4827_s16  ;;  %s7944_s12 = scalar_lea.sflag [#allocation11], %s5784_s0 }
  0x4f   : > { %s618_s17 = scalar_lea.hbm %s7916_s5, %s4828_s26  ;;  %s622_s3 = sshll.u32 %s614_s14, 4  ;;  %s623_s3 = int_to_ptr.vmem [resolvable:$true] %s622_s3 }
  0x50   : > { %s620_s20 = sshll.u32 %s618_s17, 4  ;;  %s5191_s25 = scalar_lea.hbm %s7916_s5, 12  ;;  %s621_s20 = int_to_ptr.hbm [resolvable:$true] %s620_s20 }
  0x51   : > { %s5185_s21 = sshra.s32 %s621_s20, 4  ;;  %s5186_s21 = int_to_ptr.hbm [resolvable:$true] %s5185_s21 }
  0x52   : > { %s5187_s22 = scalar_lea.hbm %s5186_s21, 6  ;;  %p5192_p1 = scmp.lt.s32.totalorder %s5186_s21, %s7916_s5 }
  0x53   : > { %p5188_p12 = scmp.ne.s32.totalorder %s5186_s21, %s5187_s22  ;;  %p5193_p2 = scmp.lt.s32.totalorder %s5191_s25, %s5187_s22 }
  0x55   : > { %p5189_p13 = pnand %p5188_p12, %p5732_p4  ;;  %p5194_p3 = por %p5193_p2, %p5192_p1 }
  0x57   : > { %p5190_p0 = pneg %p5189_p13 }
  0x59   : > { %p5195_p6 = pnand %p5194_p3, %p5190_p0 }
  0x5b   : > { %5198 = shalt.err (!%p5195_p6)
}
  0x5c   : > { %4840 = dma.hbm_to_vmem [thread:$0]  (%p5732_p4), %s621_s20, 96, %s623_s3, %s7944_s12  }
  0x5d   : > { %s655_s18 = scalar_lea.vmem [#allocation13], %s5781_s29  ;;  %s7942_s17 = scalar_lea.sflag [#allocation14], %s5784_s0 }
  0x5e   : > { %s663_s30 = sshll.u32 %s655_s18, 4  ;;  %s5213_s14 = sshra.s32 %s662_s13, 4  ;;  %s664_s30 = int_to_ptr.vmem [resolvable:$true] %s663_s30  ;;  %s5214_s14 = int_to_ptr.hbm [resolvable:$true] %s5213_s14 }
  0x5f   : > { %s5215_s21 = scalar_lea.hbm %s5214_s14, 2  ;;  %s5219_s28 = scalar_lea.hbm %s7918_s7, 4 }
  0x60   : > { %p5216_p7 = scmp.ne.s32.totalorder %s5214_s14, %s5215_s21  ;;  %p5220_p13 = scmp.lt.s32.totalorder %s5214_s14, %s7918_s7 }
  0x61   : > { %p5221_p0 = scmp.lt.s32.totalorder %s5219_s28, %s5215_s21 }
  0x62   : > { %p5217_p11 = pnand %p5216_p7, %p5732_p4 }
  0x63   : > { %p5222_p1 = por %p5221_p0, %p5220_p13 }
  0x64   : > { %p5218_p12 = pneg %p5217_p11 }
  0x66   : > { %p5223_p2 = pnand %p5222_p1, %p5218_p12 }
  0x68   : > { %5226 = shalt.err (!%p5223_p2)
}
  0x69   : > { %4842 = dma.hbm_to_vmem [thread:$0]  (%p5732_p4), %s662_s13, 32, %s664_s30, %s7942_s17  }
  0x6a   : > { %s697_s16 = scalar_lea.hbm %s7920_s9, %s5778_s23  ;;  %s693_s22 = scalar_lea.vmem [#allocation16], %s5781_s29 }
  0x6b   : > { %s699_s18 = sshll.u32 %s697_s16, 4  ;;  %s701_s14 = sshll.u32 %s693_s22, 4  ;;  %s700_s18 = int_to_ptr.hbm [resolvable:$true] %s699_s18  ;;  %s702_s14 = int_to_ptr.vmem [resolvable:$true] %s701_s14 }
  0x6c   : > { %s7943_s21 = scalar_lea.sflag [#allocation17], %s5784_s0  ;;  %s5241_s15 = sshra.s32 %s700_s18, 4  ;;  %s5242_s15 = int_to_ptr.hbm [resolvable:$true] %s5241_s15 }
  0x6d   : > { %s5243_s28 = scalar_lea.hbm %s5242_s15, 2  ;;  %s5247_s13 = scalar_lea.hbm %s7920_s9, 4 }
  0x6e   : > { %p5244_p3 = scmp.ne.s32.totalorder %s5242_s15, %s5243_s28  ;;  %p5248_p11 = scmp.lt.s32.totalorder %s5242_s15, %s7920_s9 }
  0x6f   : > { %p5249_p12 = scmp.lt.s32.totalorder %s5247_s13, %s5243_s28 }
  0x70   : > { %p5245_p6 = pnand %p5244_p3, %p5732_p4 }
  0x71   : > { %p5250_p13 = por %p5249_p12, %p5248_p11 }
  0x72   : > { %p5246_p7 = pneg %p5245_p6 }
  0x74   : > { %p5251_p0 = pnand %p5250_p13, %p5246_p7 }
  0x76   : > { %5254 = shalt.err (!%p5251_p0)
}
  0x77   : > { %4844 = dma.hbm_to_vmem [thread:$0]  (%p5732_p4), %s700_s18, 32, %s702_s14, %s7943_s21  }
  0x78   : > { %s4755_s20 = sshll.u32 %s5775_s1, 3  ;;  %s4756_s16 = sshll.u32 %s5591_s27, 3 }
  0x79   : > { %s738_s26 = scalar_lea.hbm %s7922_s11, %s4756_s16  ;;  %s734_s15 = scalar_lea.vmem [#allocation19], %s4755_s20 }
  0x7a   : > { %s742_s28 = sshll.u32 %s734_s15, 4  ;;  %s740_s13 = sshll.u32 %s738_s26, 4  ;;  %s743_s28 = int_to_ptr.vmem [resolvable:$true] %s742_s28  ;;  %s741_s13 = int_to_ptr.hbm [resolvable:$true] %s740_s13 }
  0x7b   : > { %s7945_s30 = scalar_lea.sflag [#allocation20], %s5784_s0  ;;  %s5269_s3 = sshra.s32 %s741_s13, 4  ;;  %s5270_s3 = int_to_ptr.hbm [resolvable:$true] %s5269_s3 }
  0x7c   : > { %s5271_s17 = scalar_lea.hbm %s5270_s3, 8  ;;  %s5275_s21 = scalar_lea.hbm %s7922_s11, 16 }
  0x7d   : > { %p5272_p1 = scmp.ne.s32.totalorder %s5270_s3, %s5271_s17  ;;  %p5276_p6 = scmp.lt.s32.totalorder %s5270_s3, %s7922_s11 }
  0x7e   : > { %p5277_p7 = scmp.lt.s32.totalorder %s5275_s21, %s5271_s17 }
  0x7f   : > { %p5273_p2 = pnand %p5272_p1, %p5732_p4 }
  0x80   : > { %p5278_p11 = por %p5277_p7, %p5276_p6 }
  0x81   : > { %p5274_p3 = pneg %p5273_p2 }
  0x83   : > { %p5279_p12 = pnand %p5278_p11, %p5274_p3 }
  0x85   : > { %5282 = shalt.err (!%p5279_p12)
}
  0x86   : > { %4846 = dma.hbm_to_vmem [thread:$0]  (%p5732_p4), %s741_s13, 128, %s743_s28, %s7945_s30  }
  0x87   : > { %s7973_s2 = sld [smem:[#allocation48_spill]]  ;;  %s554_s12 = scalar_lea.vmem [#allocation4], %s5781_s29 }
  0x88   : > { %s562_s15 = sshll.u32 %s554_s12, 4  ;;  %s551_s17 = scalar_lea.sflag [#allocation5], %s5775_s1  ;;  %s563_s15 = int_to_ptr.vmem [resolvable:$true] %s562_s15 }
  0x8d   : > { %s558_s25 = scalar_lea.hbm %s7973_s2, %s5778_s23  ;;  %s5303_s28 = scalar_lea.hbm %s7973_s2, 4 }
  0x8e   : > { %s560_s26 = sshll.u32 %s558_s25, 4  ;;  %s561_s26 = int_to_ptr.hbm [resolvable:$true] %s560_s26 }
  0x8f   : > { %s5297_s21 = sshra.s32 %s561_s26, 4  ;;  %s5298_s21 = int_to_ptr.hbm [resolvable:$true] %s5297_s21 }
  0x90   : > { %s5299_s3 = scalar_lea.hbm %s5298_s21, 2  ;;  %p5304_p2 = scmp.lt.s32.totalorder %s5298_s21, %s7973_s2 }
  0x91   : > { %p5300_p13 = scmp.ne.s32.totalorder %s5298_s21, %s5299_s3  ;;  %p5305_p3 = scmp.lt.s32.totalorder %s5303_s28, %s5299_s3 }
  0x93   : > { %p5301_p0 = pnand %p5300_p13, %p5732_p4  ;;  %p5306_p6 = por %p5305_p3, %p5304_p2 }
  0x95   : > { %p5302_p1 = pneg %p5301_p0 }
  0x97   : > { %p5307_p7 = pnand %p5306_p6, %p5302_p1 }
  0x99   : > { %5310 = shalt.err (!%p5307_p7)
}
  0x9a   : > { %4837 = dma.hbm_to_vmem [thread:$0]  (%p5732_p4), %s561_s26, 32, %s563_s15, %s551_s17  }
  0x9b   : > { %s4825_s20 = smul.u32 1536, %s5775_s1  ;;  %s4743_s25 = sshll.u32 %s5775_s1, 9 }
  0x9c   : > { %s4826_s16 = smul.u32 1536, %s5591_s27  ;;  %s5331_s17 = scalar_lea.hbm %s7915_s4, 3072 }
  0x9d   : > { %s592_s13 = scalar_lea.vmem [#allocation9], %s4825_s20 }
  0x9e   : > { %s597_s14 = scalar_lea.hbm %s7915_s4, %s4826_s16  ;;  %s600_s21 = sshll.u32 %s592_s13, 4  ;;  %s601_s21 = int_to_ptr.vmem [resolvable:$true] %s600_s21 }
  0x9f   : > { %s598_s3 = sshll.u32 %s597_s14, 4  ;;  %s599_s3 = int_to_ptr.hbm [resolvable:$true] %s598_s3 }
  0xa0   : > { %s5325_s28 = sshra.s32 %s599_s3, 4  ;;  %s5326_s28 = int_to_ptr.hbm [resolvable:$true] %s5325_s28 }
  0xa1   : > { %s5327_s22 = scalar_lea.hbm %s5326_s28, 1536  ;;  %p5332_p0 = scmp.lt.s32.totalorder %s5326_s28, %s7915_s4 }
  0xa2   : > { %p5328_p11 = scmp.ne.s32.totalorder %s5326_s28, %s5327_s22  ;;  %p5333_p1 = scmp.lt.s32.totalorder %s5331_s17, %s5327_s22 }
  0xa4   : > { %p5329_p12 = pnand %p5328_p11, %p5732_p4  ;;  %p5334_p2 = por %p5333_p1, %p5332_p0 }
  0xa6   : > { %p5330_p13 = pneg %p5329_p12 }
  0xa8   : > { %p5335_p3 = pnand %p5334_p2, %p5330_p13 }
  0xaa   : > { %5338 = shalt.err (!%p5335_p3)
}
  0xab   : > { %s5598_s20 = smov 768   ;;  %s5599_s16 = smov 48  }
  0xac   : > { %s7974_s12 = scalar_lea.sflag [#allocation8], %s5784_s0  ;;  %s4790_s18 = sshll.u32 %s5591_s27, 9 }
  0xad   : > { %4839 = dma.hbm_to_vmem [thread:$0]  (%p5732_p4), %s599_s3, 24576, %s601_s21, %s7974_s12, %s5598_s20, %s5598_s20, %s5599_s16  }
  0xae   : > { %s633_s14 = scalar_lea.vmem [#allocation12], %s4743_s25  ;;  %s638_s24 = scalar_lea.hbm %s7917_s6, %s4790_s18 }
  0xaf   : > { %s641_s13 = sshll.u32 %s633_s14, 4  ;;  %s639_s30 = sshll.u32 %s638_s24, 4  ;;  %s642_s13 = int_to_ptr.vmem [resolvable:$true] %s641_s13  ;;  %s640_s30 = int_to_ptr.hbm [resolvable:$true] %s639_s30 }
  0xb0   : > { %s5353_s28 = sshra.s32 %s640_s30, 4  ;;  %s5359_s21 = scalar_lea.hbm %s7917_s6, 1024  ;;  %s5354_s28 = int_to_ptr.hbm [resolvable:$true] %s5353_s28 }
  0xb1   : > { %s5355_s22 = scalar_lea.hbm %s5354_s28, 512  ;;  %p5360_p12 = scmp.lt.s32.totalorder %s5354_s28, %s7917_s6 }
  0xb2   : > { %p5356_p6 = scmp.ne.s32.totalorder %s5354_s28, %s5355_s22  ;;  %p5361_p13 = scmp.lt.s32.totalorder %s5359_s21, %s5355_s22 }
  0xb4   : > { %p5357_p7 = pnand %p5356_p6, %p5732_p4  ;;  %p5362_p0 = por %p5361_p13, %p5360_p12 }
  0xb6   : > { %p5358_p11 = pneg %p5357_p7 }
  0xb8   : > { %p5363_p1 = pnand %p5362_p0, %p5358_p11 }
  0xba   : > { %5366 = shalt.err (!%p5363_p1)
}
  0xbb   : > { %s7947_s20 = smov 256   ;;  %s5601_s16 = smov 16  }
  0xbc   : > { %s7975_s2 = scalar_lea.sflag [#allocation11], %s5784_s0  ;;  %s678_s14 = scalar_lea.hbm %s7919_s8, %s5778_s23 }
  0xbd   : > { %4841 = dma.hbm_to_vmem [thread:$0]  (%p5732_p4), %s640_s30, 8192, %s642_s13, %s7975_s2, %s7947_s20, %s7947_s20, %s5601_s16  }
  0xbe   : > { %s680_s26 = sshll.u32 %s678_s14, 4  ;;  %s674_s15 = scalar_lea.vmem [#allocation15], %s5781_s29  ;;  %s681_s26 = int_to_ptr.hbm [resolvable:$true] %s680_s26 }
  0xbf   : > { %s682_s24 = sshll.u32 %s674_s15, 4  ;;  %s5381_s28 = sshra.s32 %s681_s26, 4  ;;  %s683_s24 = int_to_ptr.vmem [resolvable:$true] %s682_s24  ;;  %s5382_s28 = int_to_ptr.hbm [resolvable:$true] %s5381_s28 }
  0xc0   : > { %s5383_s22 = scalar_lea.hbm %s5382_s28, 2  ;;  %s5387_s13 = scalar_lea.hbm %s7919_s8, 4 }
  0xc1   : > { %p5384_p2 = scmp.ne.s32.totalorder %s5382_s28, %s5383_s22  ;;  %p5388_p7 = scmp.lt.s32.totalorder %s5382_s28, %s7919_s8 }
  0xc2   : > { %p5389_p11 = scmp.lt.s32.totalorder %s5387_s13, %s5383_s22 }
  0xc3   : > { %p5385_p3 = pnand %p5384_p2, %p5732_p4 }
  0xc4   : > { %p5390_p12 = por %p5389_p11, %p5388_p7 }
  0xc5   : > { %p5386_p6 = pneg %p5385_p3 }
  0xc7   : > { %p5391_p13 = pnand %p5390_p12, %p5386_p6 }
  0xc9   : > { %5394 = shalt.err (!%p5391_p13)
}
  0xca   : > { %s7976_s3 = scalar_lea.sflag [#allocation14], %s5784_s0  ;;  %s4752_s2 = sshll.u32 %s5775_s1, 11 }
  0xcb   : > { %4843 = dma.hbm_to_vmem [thread:$0]  (%p5732_p4), %s681_s26, 32, %s683_s24, %s7976_s3  }
  0xcc   : > { %s4791_s12 = sshll.u32 %s5591_s27, 11  ;;  %s712_s28 = scalar_lea.vmem [#allocation18], %s4752_s2 }
  0xcd   : > { %s717_s15 = scalar_lea.hbm %s7921_s10, %s4791_s12  ;;  %s720_s22 = sshll.u32 %s712_s28, 4  ;;  %s721_s22 = int_to_ptr.vmem [resolvable:$true] %s720_s22 }
  0xce   : > { %s718_s17 = sshll.u32 %s717_s15, 4  ;;  %s5415_s27 = scalar_lea.hbm %s7921_s10, 4096  ;;  %s719_s17 = int_to_ptr.hbm [resolvable:$true] %s718_s17 }
  0xcf   : > { %s5409_s21 = sshra.s32 %s719_s17, 4  ;;  %s5410_s21 = int_to_ptr.hbm [resolvable:$true] %s5409_s21 }
  0xd0   : > { %s5411_s13 = scalar_lea.hbm %s5410_s21, 2048  ;;  %p5416_p3 = scmp.lt.s32.totalorder %s5410_s21, %s7921_s10 }
  0xd1   : > { %p5412_p0 = scmp.ne.s32.totalorder %s5410_s21, %s5411_s13  ;;  %p5417_p6 = scmp.lt.s32.totalorder %s5415_s27, %s5411_s13 }
  0xd3   : > { %p5413_p1 = pnand %p5412_p0, %p5732_p4  ;;  %p5418_p7 = por %p5417_p6, %p5416_p3 }
  0xd5   : > { %p5414_p2 = pneg %p5413_p1 }
  0xd7   : > { %p5419_p11 = pnand %p5418_p7, %p5414_p2 }
  0xd9   : > { %5422 = shalt.err (!%p5419_p11)
}
  0xda   : > { %s5602_s25 = smov 1024   ;;  %s5603_s3 = smov 64  }
  0xdb   : > { %s7977_s18 = scalar_lea.sflag [#allocation17], %s5784_s0  ;;  %s7978_s28 = sld [smem:[#allocation50_spill]] }
  0xdc   : > { %4845 = dma.hbm_to_vmem [thread:$0]  (%p5732_p4), %s719_s17, 32768, %s721_s22, %s7977_s18, %s5602_s25, %s5602_s25, %s5603_s3  }
  0xdd   : > { %s753_s20 = scalar_lea.vmem [#allocation21], %s4752_s2 }
  0xde   : > { %s761_s1 = sshll.u32 %s753_s20, 4  ;;  %s762_s1 = int_to_ptr.vmem [resolvable:$true] %s761_s1 }
  0xe1   : > { %s758_s30 = scalar_lea.hbm %s7978_s28, %s4791_s12  ;;  %s5443_s17 = scalar_lea.hbm %s7978_s28, 4096 }
  0xe2   : > { %s759_s26 = sshll.u32 %s758_s30, 4  ;;  %s760_s26 = int_to_ptr.hbm [resolvable:$true] %s759_s26 }
  0xe3   : > { %s5437_s21 = sshra.s32 %s760_s26, 4  ;;  %s5438_s21 = int_to_ptr.hbm [resolvable:$true] %s5437_s21 }
  0xe4   : > { %s5439_s13 = scalar_lea.hbm %s5438_s21, 2048  ;;  %p5444_p1 = scmp.lt.s32.totalorder %s5438_s21, %s7978_s28 }
  0xe5   : > { %p5440_p12 = scmp.ne.s32.totalorder %s5438_s21, %s5439_s13  ;;  %p5445_p2 = scmp.lt.s32.totalorder %s5443_s17, %s5439_s13 }
  0xe7   : > { %p5441_p13 = pnand %p5440_p12, %p5732_p4  ;;  %p5446_p3 = por %p5445_p2, %p5444_p1 }
  0xe9   : > { %p5442_p0 = pneg %p5441_p13 }
  0xeb   : > { %p5447_p6 = pnand %p5446_p3, %p5442_p0 }
  0xed   : > { %5450 = shalt.err (!%p5447_p6)
}
  0xee   : > { %s7979_s20 = smov 256   ;;  %s7980_s2 = scalar_lea.sflag [#allocation20], %s5784_s0 }
  0xef   : > { %4847 = dma.hbm_to_vmem [thread:$0]  (%p5732_p4), %s760_s26, 32768, %s762_s1, %s7980_s2, %s7979_s20, %s7979_s20, %s5601_s16  }
  0xf0   : > { %s7981_s18 = sld [smem:[#allocation51_spill]]  ;;  %s775_s15 = scalar_lea.vmem [#allocation22], %s5781_s29 }
  0xf1   : > { %s783_s30 = sshll.u32 %s775_s15, 4  ;;  %s772_s13 = scalar_lea.sflag [#allocation23], %s5784_s0  ;;  %s784_s30 = int_to_ptr.vmem [resolvable:$true] %s783_s30 }
  0xf6   : > { %s779_s14 = scalar_lea.hbm %s7981_s18, %s5778_s23  ;;  %s5471_s16 = scalar_lea.hbm %s7981_s18, 4 }
  0xf7   : > { %s781_s21 = sshll.u32 %s779_s14, 4  ;;  %s782_s21 = int_to_ptr.hbm [resolvable:$true] %s781_s21 }
  0xf8   : > { %s5465_s27 = sshra.s32 %s782_s21, 4  ;;  %s5466_s27 = int_to_ptr.hbm [resolvable:$true] %s5465_s27 }
  0xf9   : > { %s5467_s24 = scalar_lea.hbm %s5466_s27, 2  ;;  %p5472_p13 = scmp.lt.s32.totalorder %s5466_s27, %s7981_s18 }
  0xfa   : > { %p5468_p7 = scmp.ne.s32.totalorder %s5466_s27, %s5467_s24  ;;  %p5473_p0 = scmp.lt.s32.totalorder %s5471_s16, %s5467_s24 }
  0xfc   : > { %p5469_p11 = pnand %p5468_p7, %p5732_p4  ;;  %p5474_p1 = por %p5473_p0, %p5472_p13 }
  0xfe   : > { %p5470_p12 = pneg %p5469_p11 }
 0x100   : > { %p5475_p2 = pnand %p5474_p1, %p5470_p12 }
 0x102   : > { %5478 = shalt.err (!%p5475_p2)
}
 0x103   : > { %4848 = dma.hbm_to_vmem [thread:$0]  (%p5732_p4), %s782_s21, 32, %s784_s30, %s772_s13  }
 0x104 PF: > { %792 = sbr.rel (%p5746_p10) target bundleno = 2612 (0xa34), region = 88  ;;  %s7983_s29 = sld [smem:[#allocation39_spill]] (!%p5746_p10) }
 0x10a   : > { %s6003_s25 = sand.u32 1, %s7983_s29  }
 0x10b   : > { %s6006_s20 = sshll.u32 %s6003_s25, 1  ;;  %s795_s2 = scalar_lea.sflag [#allocation5], %s6003_s25 }
 0x10c   : > { %s798_s12 = scalar_lea.vmem [#allocation4], %s6006_s20 }
 0x10d   : > { %5538 = dma.done.wait (%p5741_p8), %s795_s2, 32  }
 0x10e   : > { %5540 = vsyncadd (%p5741_p8), %s795_s2, 4294967264  ;;  %s7985_s19 = sld [smem:[#allocation41_spill]]  ;;  %s808_s15 = scalar_lea.vmem [#allocation7], %s6006_s20 }
 0x114   : > { %s6015_s3 = sand.u32 1, %s7985_s19  }
 0x115   : > { %s805_s14 = scalar_lea.sflag [#allocation8], %s6015_s3 }
 0x116   : > { %5542 = dma.done.wait (%p5741_p8), %s805_s14, 24608  }
 0x117   : > { %5544 = vsyncadd (%p5741_p8), %s805_s14, 4294942688  ;;  %s4829_s30 = smul.u32 1536, %s6003_s25  ;;  %s825_s27 = scalar_lea.sflag [#allocation11], %s6015_s3 }
 0x118   : > { %s4830_s21 = smul.u32 6, %s6003_s25 }
 0x119   : > { %s6025_s13 = scalar_lea.vmem [#allocation9], %s4829_s30 }
 0x11a   : > { %s6028_s24 = scalar_lea.vmem [#allocation10], %s4830_s21 }
 0x11b   : > { %5546 = dma.done.wait (%p5741_p8), %s825_s27, 8288  }
 0x11c   : > { %5548 = vsyncadd (%p5741_p8), %s825_s27, 4294959008  ;;  %s4765_s17 = sshll.u32 %s6003_s25, 9  ;;  %s845_s16 = scalar_lea.sflag [#allocation14], %s6015_s3 }
 0x11d   : > { %s6035_s22 = scalar_lea.vmem [#allocation12], %s4765_s17  ;;  %s848_s26 = scalar_lea.vmem [#allocation13], %s6006_s20 }
 0x11e   : > { %5550 = dma.done.wait (%p5741_p8), %s845_s16, 64  }
 0x11f   : > { %5552 = vsyncadd (%p5741_p8), %s845_s16, 4294967232  ;;  %s865_s23 = scalar_lea.sflag [#allocation17], %s6015_s3 }
 0x120   : > { %5554 = dma.done.wait (%p5741_p8), %s865_s23, 32800  }
 0x121   : > { %5556 = vsyncadd (%p5741_p8), %s865_s23, 4294934496  ;;  %s4769_s2 = sshll.u32 %s6003_s25, 11  ;;  %s4770_s14 = sshll.u32 %s6003_s25, 3 }
 0x122   : > { %s6052_s30 = scalar_lea.vmem [#allocation18], %s4769_s2  ;;  %s885_s21 = scalar_lea.sflag [#allocation20], %s6015_s3 }
 0x123   : > { %s6055_s27 = scalar_lea.vmem [#allocation19], %s4770_s14 }
 0x124   : > { %5558 = dma.done.wait (%p5741_p8), %s885_s21, 32896  }
 0x125   : > { %5560 = vsyncadd (%p5741_p8), %s885_s21, 4294934400  ;;  %s6061_s17 = scalar_lea.vmem [#allocation21], %s4769_s2  ;;  %s905_s16 = scalar_lea.sflag [#allocation23], %s6015_s3 }
 0x126   : > { %5562 = dma.done.wait (%p5741_p8), %s905_s16, 32  }
 0x127   : > { %5564 = vsyncadd (%p5741_p8), %s905_s16, 4294967264 }
 0x128   : > { %5566 = dma.done.wait (%p113_p5), [#allocation23], 32  }
 0x129   : > { %5568 = vsyncadd (%p113_p5), [#allocation23], 4294967264 }
 0x12a   : > { %5570 = dma.done.wait (%p113_p5), [#allocation26], 4128  }
 0x12b   : > { %5572 = vsyncadd (%p113_p5), [#allocation26], 4294963168  ;;  %1028 = sbr.rel (%p4734_p9) target bundleno = 314 (0x13a), region = 152  ;;  %s7986_s2 = sld [smem:[#allocation46_spill]] (!%p4734_p9) }
 0x131   : > { %v1029_v0 = vld [vmem:[%s7986_s2] sm:$0xff]  ;;  %v1030_v1 = vld [vmem:[%s7986_s2 + $0x8] sm:$0xff]  ;;  %v1031_v2 = vld [vmem:[%s7986_s2 + $0x10] sm:$0xff] }
 0x132   : > { %1037 = vst [vmem:[#allocation2 + $0x30] sm:$0xff] %v1029_v0  ;;  %v1032_v3 = vld [vmem:[%s7986_s2 + $0x18] sm:$0xff]  ;;  %v1033_v4 = vld [vmem:[%s7986_s2 + $0x20] sm:$0xff]  ;;  %v1034_v5 = vld [vmem:[%s7986_s2 + $0x28] sm:$0xff] }
 0x133   : > { %1038 = vst [vmem:[#allocation2] sm:$0xff] %v1030_v1  ;;  %v1035_v6 = vld [vmem:[%s7986_s2 + $0x30] sm:$0xff]  ;;  %v1036_v7 = vld [vmem:[%s7986_s2 + $0x38] sm:$0xff] }
 0x134   : > { %1039 = vst [vmem:[#allocation2 + $0x18] sm:$0xff] %v1031_v2 }
 0x135   : > { %1040 = vst [vmem:[#allocation2 + $0x10] sm:$0xff] %v1032_v3 }
 0x136   : > { %1041 = vst [vmem:[#allocation2 + $0x8] sm:$0xff] %v1033_v4 }
 0x137   : > { %1042 = vst [vmem:[#allocation2 + $0x20] sm:$0xff] %v1034_v5 }
 0x138   : > { %1043 = vst [vmem:[#allocation2 + $0x28] sm:$0xff] %v1035_v6 }
 0x139   : > { %1044 = vst [vmem:[#allocation2 + $0x38] sm:$0xff] %v1036_v7 }
 0x13a PF: > { %v1045_v10 = vld [vmem:[#allocation2 + $0x30] sm:$0xff]  ;;  %v1046_v12 = vld [vmem:[#allocation2] sm:$0xff]  ;;  %v5604_v20 = vmov 256.0   ;;  %v1278_v24 = vld [vmem:[%s6025_s13 + $0x2d0] sm:$0xff]  ;;  %vm1771_vm13 = vcmask 130048   ;;  %s7992_s29 = scalar_lea.vmem [#allocation22], %s6006_s20 }
 0x13b   : > { %v1055_v13 = vadd.f32 %v1046_v12, %v1045_v10  ;;  %v1047_v16 = vld [vmem:[#allocation2 + $0x18] sm:$0xff]  ;;  %4936 = vrcp.f32 %v5604_v20  ;;  %v1279_v26 = vld [vmem:[%s6025_s13 + $0x2d8] sm:$0xff]  ;;  %1394 = vmatpush.msra.mxu0 %v1278_v24  ;;  %v1272_v28 = vld [vmem:[%s6025_s13 + $0x2a0] sm:$0xff] }
 0x13c   : > { %v1048_v17 = vld [vmem:[#allocation2 + $0x10] sm:$0xff]  ;;  %v1374_v25 = vld [vmem:[%s6025_s13 + $0x5d0] sm:$0xff]  ;;  %v1375_v27 = vld [vmem:[%s6025_s13 + $0x5d8] sm:$0xff]  ;;  %1452 = vmatpush.msra.mxu2 %v1279_v26 }
 0x13d   : > { %v1049_v8 = vld [vmem:[#allocation2 + $0x8] sm:$0xff]  ;;  %1056 = vadd.xlane.f32.xlu0 %v1055_v13  ;;  %v1058_v19 = vadd.f32 %v1048_v17, %v1047_v16  ;;  %1423 = vmatpush.msra.mxu1 %v1374_v25  ;;  %v1273_v30 = vld [vmem:[%s6025_s13 + $0x2a8] sm:$0xff]  ;;  %v1266_v63 = vld [vmem:[%s6025_s13 + $0x270] sm:$0xff] }
 0x13e   : > { %v1050_v9 = vld [vmem:[#allocation2 + $0x20] sm:$0xff]  ;;  %v1368_v29 = vld [vmem:[%s6025_s13 + $0x5a0] sm:$0xff]  ;;  %1481 = vmatpush.msra.mxu3 %v1375_v27  ;;  %v1369_v31 = vld [vmem:[%s6025_s13 + $0x5a8] sm:$0xff]  ;;  %1395 = vmatpush.msra.mxu0 %v1272_v28 }
 0x13f   : > { %v1061_v11 = vadd.f32 %v1050_v9, %v1049_v8  ;;  %v1051_v14 = vld [vmem:[#allocation2 + $0x28] sm:$0xff]  ;;  %1424 = vmatpush.msra.mxu1 %v1368_v29  ;;  %1453 = vmatpush.msra.mxu2 %v1273_v30  ;;  %v1362_v0 = vld [vmem:[%s6025_s13 + $0x570] sm:$0xff]  ;;  %v1267_v1 = vld [vmem:[%s6025_s13 + $0x278] sm:$0xff] }
 0x140   : > { %v1052_v15 = vld [vmem:[#allocation2 + $0x38] sm:$0xff]  ;;  %1482 = vmatpush.msra.mxu3 %v1369_v31  ;;  %1396 = vmatpush.msra.mxu0 %v1266_v63  ;;  %v1363_v2 = vld [vmem:[%s6025_s13 + $0x578] sm:$0xff]  ;;  %v1260_v3 = vld [vmem:[%s6025_s13 + $0x240] sm:$0xff] }
 0x141   : > { %1062 = vadd.xlane.f32.xlu1 %v1061_v11  ;;  %v1064_v18 = vadd.f32 %v1052_v15, %v1051_v14  ;;  %v4937_v21 = vpop.eup %4936  ;;  %1425 = vmatpush.msra.mxu1 %v1362_v0  ;;  %v1356_v4 = vld [vmem:[%s6025_s13 + $0x540] sm:$0xff]  ;;  %v1261_v5 = vld [vmem:[%s6025_s13 + $0x248] sm:$0xff]  ;;  %v1254_v7 = vld [vmem:[%s6025_s13 + $0x210] sm:$0xff] }
 0x142   : > { %v1068_v22 = vmul.f32 256.0, %v4937_v21  ;;  %vm1072_vm0 = vweird.f32 %v4937_v21  ;;  %1454 = vmatpush.msra.mxu2 %v1267_v1  ;;  %1483 = vmatpush.msra.mxu3 %v1363_v2  ;;  %v1357_v6 = vld [vmem:[%s6025_s13 + $0x548] sm:$0xff]  ;;  %v1248_v11 = vld [vmem:[%s6025_s13 + $0x1e0] sm:$0xff]  ;;  %v1326_v24 = vld [vmem:[%s6025_s13 + $0x450] sm:$0xff] }
 0x143   : > { %1397 = vmatpush.msra.mxu0 %v1260_v3  ;;  %1426 = vmatpush.msra.mxu1 %v1356_v4  ;;  %v1249_v13 = vld [vmem:[%s6025_s13 + $0x1e8] sm:$0xff]  ;;  %v1332_v20 = vld [vmem:[%s6025_s13 + $0x480] sm:$0xff]  ;;  %v1231_v25 = vld [vmem:[%s6025_s13 + $0x158] sm:$0xff] }
 0x144   : > { %v1069_v23 = vsub.f32 1.0, %v1068_v22  ;;  %1455 = vmatpush.msra.mxu2 %v1261_v5  ;;  %1484 = vmatpush.msra.mxu3 %v1357_v6  ;;  %v1333_v22 = vld [vmem:[%s6025_s13 + $0x488] sm:$0xff]  ;;  %v1327_v26 = vld [vmem:[%s6025_s13 + $0x458] sm:$0xff]  ;;  %v1224_v27 = vld [vmem:[%s6025_s13 + $0x120] sm:$0xff] }
 0x145   : > { %1059 = vadd.xlane.f32.xlu0 %v1058_v19  ;;  %1398 = vmatpush.msra.mxu0 %v1254_v7  ;;  %v1236_v19 = vld [vmem:[%s6025_s13 + $0x180] sm:$0xff]  ;;  %v1225_v29 = vld [vmem:[%s6025_s13 + $0x128] sm:$0xff]  ;;  %v1218_v31 = vld [vmem:[%s6025_s13 + $0xf0] sm:$0xff] }
 0x146   : > { %v1070_v32 = vmul.f32 %v4937_v21, %v1069_v23  ;;  %v1230_v23 = vld [vmem:[%s6025_s13 + $0x150] sm:$0xff]  ;;  %v1320_v28 = vld [vmem:[%s6025_s13 + $0x420] sm:$0xff]  ;;  %v1321_v30 = vld [vmem:[%s6025_s13 + $0x428] sm:$0xff] }
 0x147   : > { %1399 = vmatpush.msra.mxu0 %v1248_v11  ;;  %v1285_v63 = vld [vmem:[%s6025_s13 + $0x308] sm:$0xff]  ;;  %v1280_v0 = vld [vmem:[%s6025_s13 + $0x2e0] sm:$0xff]  ;;  %v1274_v7 = vld [vmem:[%s6025_s13 + $0x2b0] sm:$0xff] }
 0x148   : > { %v1071_v33 = vadd.f32 %v4937_v21, %v1070_v32  ;;  %v1314_v32 = vld [vmem:[%s6025_s13 + $0x3f0] sm:$0xff]  ;;  %v1376_v1 = vld [vmem:[%s6025_s13 + $0x5e0] sm:$0xff]  ;;  %v1281_v2 = vld [vmem:[%s6025_s13 + $0x2e8] sm:$0xff] }
 0x149   : > { %1065 = vadd.xlane.f32.xlu1 %v1064_v18  ;;  %v1339_v18 = vld [vmem:[%s6025_s13 + $0x4b8] sm:$0xff]  ;;  %v1377_v4 = vld [vmem:[%s6025_s13 + $0x5e8] sm:$0xff] }
 0x14a   : > { %v6111_v34 = vsel %vm1072_vm0, %v4937_v21, %v1071_v33  ;;  %v1237_v21 = vld [vmem:[%s6025_s13 + $0x188] sm:$0xff]  ;;  %v1219_v33 = vld [vmem:[%s6025_s13 + $0xf8] sm:$0xff] }
 0x14b   : > { %v1371_v11 = vld [vmem:[%s6025_s13 + $0x5b8] sm:$0xff] }
 0x1b0   : > { %v1057_v37 = vpop.xlane.xlu0 %1056 }
 0x1b1   : > { %v1074_v38 = vmul.f32 %v6111_v34, %v1057_v37  ;;  %v1308_v37 = vld [vmem:[%s6025_s13 + $0x3c0] sm:$0xff] }
 0x1b3   : > { %v6119_v41 = vsub.f32 %v1045_v10, %v1074_v38  ;;  %v6121_v42 = vsub.f32 %v1046_v12, %v1074_v38  ;;  %v1351_v10 = vld [vmem:[%s6025_s13 + $0x518] sm:$0xff]  ;;  %v1344_v12 = vld [vmem:[%s6025_s13 + $0x4e0] sm:$0xff]  ;;  %v1213_v38 = vld [vmem:[%s6025_s13 + $0xc8] sm:$0xff] }
 0x1b4   : > { %v1063_v35 = vpop.xlane.xlu1 %1062  ;;  %1485 = vmatpush.msra.mxu3 %v1351_v10 }
 0x1b5   : > { %v1076_v36 = vmul.f32 %v6111_v34, %v1063_v35  ;;  %v1086_v45 = vmul.f32 %v6119_v41, %v6119_v41  ;;  %v1087_v46 = vmul.f32 %v6121_v42, %v6121_v42  ;;  %v1315_v35 = vld [vmem:[%s6025_s13 + $0x3f8] sm:$0xff] }
 0x1b7   : > { %v6115_v39 = vsub.f32 %v1049_v8, %v1076_v36  ;;  %v6117_v40 = vsub.f32 %v1050_v9, %v1076_v36  ;;  %v1094_v49 = vadd.f32 %v1087_v46, %v1086_v45  ;;  %v1350_v8 = vld [vmem:[%s6025_s13 + $0x510] sm:$0xff]  ;;  %v1255_v9 = vld [vmem:[%s6025_s13 + $0x218] sm:$0xff]  ;;  %v1212_v36 = vld [vmem:[%s6025_s13 + $0xc0] sm:$0xff] }
 0x1b8   : > { %v1060_v51 = vpop.xlane.xlu0 %1059  ;;  %1427 = vmatpush.msra.mxu1 %v1350_v8  ;;  %1456 = vmatpush.msra.mxu2 %v1255_v9  ;;  %v1302_v45 = vld [vmem:[%s6025_s13 + $0x390] sm:$0xff]  ;;  %v1207_v46 = vld [vmem:[%s6025_s13 + $0x98] sm:$0xff] }
 0x1b9   : > { %v1090_v43 = vmul.f32 %v6115_v39, %v6115_v39  ;;  %v1091_v44 = vmul.f32 %v6117_v40, %v6117_v40  ;;  %v1075_v52 = vmul.f32 %v6111_v34, %v1060_v51  ;;  %1095 = vadd.xlane.f32.xlu2 %v1094_v49  ;;  %v1296_v49 = vld [vmem:[%s6025_s13 + $0x360] sm:$0xff]  ;;  %v1297_v51 = vld [vmem:[%s6025_s13 + $0x368] sm:$0xff]  ;;  %v1370_v8 = vld [vmem:[%s6025_s13 + $0x5b0] sm:$0xff] }
 0x1ba   : > { %1428 = vmatpush.msra.mxu1 %v1344_v12  ;;  %1457 = vmatpush.msra.mxu2 %v1249_v13  ;;  %v1275_v9 = vld [vmem:[%s6025_s13 + $0x2b8] sm:$0xff]  ;;  %v1268_v13 = vld [vmem:[%s6025_s13 + $0x280] sm:$0xff] }
 0x1bb   : > { %v1100_v47 = vadd.f32 %v1091_v44, %v1090_v43  ;;  %v6137_v55 = vsub.f32 %v1047_v16, %v1075_v52  ;;  %v6139_v56 = vsub.f32 %v1048_v17, %v1075_v52  ;;  %v1338_v16 = vld [vmem:[%s6025_s13 + $0x4b0] sm:$0xff]  ;;  %v1243_v17 = vld [vmem:[%s6025_s13 + $0x1b8] sm:$0xff]  ;;  %v1309_v43 = vld [vmem:[%s6025_s13 + $0x3c8] sm:$0xff] }
 0x1bc   : > { %v1066_v48 = vpop.xlane.xlu1 %1065  ;;  %1429 = vmatpush.msra.mxu1 %v1338_v16  ;;  %1458 = vmatpush.msra.mxu2 %v1243_v17  ;;  %v1206_v44 = vld [vmem:[%s6025_s13 + $0x90] sm:$0xff]  ;;  %v1365_v17 = vld [vmem:[%s6025_s13 + $0x588] sm:$0xff] }
 0x1bd   : > { %v1077_v50 = vmul.f32 %v6111_v34, %v1066_v48  ;;  %1101 = vadd.xlane.f32.xlu0 %v1100_v47  ;;  %v1088_v59 = vmul.f32 %v6137_v55, %v6137_v55  ;;  %v1089_v60 = vmul.f32 %v6139_v56, %v6139_v56  ;;  %v1303_v47 = vld [vmem:[%s6025_s13 + $0x398] sm:$0xff]  ;;  %v1200_v48 = vld [vmem:[%s6025_s13 + $0x60] sm:$0xff]  ;;  %v1194_v52 = vld [vmem:[%s6025_s13 + $0x30] sm:$0xff] }
 0x1be   : > { %1430 = vmatpush.msra.mxu1 %v1332_v20  ;;  %1459 = vmatpush.msra.mxu2 %v1237_v21  ;;  %v1263_v20 = vld [vmem:[%s6025_s13 + $0x258] sm:$0xff] }
 0x1bf   : > { %v6133_v53 = vsub.f32 %v1051_v14, %v1077_v50  ;;  %v6135_v54 = vsub.f32 %v1052_v15, %v1077_v50  ;;  %v1097_v62 = vadd.f32 %v1089_v60, %v1088_v59  ;;  %v1345_v14 = vld [vmem:[%s6025_s13 + $0x4e8] sm:$0xff]  ;;  %v1242_v15 = vld [vmem:[%s6025_s13 + $0x1b0] sm:$0xff]  ;;  %v1291_v59 = vld [vmem:[%s6025_s13 + $0x338] sm:$0xff] }
 0x1c0   : > { %1486 = vmatpush.msra.mxu3 %v1345_v14  ;;  %1400 = vmatpush.msra.mxu0 %v1242_v15  ;;  %v1201_v50 = vld [vmem:[%s6025_s13 + $0x68] sm:$0xff]  ;;  %v1188_v60 = vld [vmem:[%s6025_s13] sm:$0xff]  ;;  %v1359_v21 = vld [vmem:[%s6025_s13 + $0x558] sm:$0xff] }
 0x1c1   : > { %v1092_v57 = vmul.f32 %v6133_v53, %v6133_v53  ;;  %v1093_v58 = vmul.f32 %v6135_v54, %v6135_v54  ;;  %1098 = vadd.xlane.f32.xlu2 %v1097_v62  ;;  %1431 = vmatpush.msra.mxu1 %v1326_v24  ;;  %v1189_v62 = vld [vmem:[%s6025_s13 + $0x8] sm:$0xff]  ;;  %v1364_v14 = vld [vmem:[%s6025_s13 + $0x580] sm:$0xff] }
 0x1c2   : > { %1487 = vmatpush.msra.mxu3 %v1339_v18  ;;  %1401 = vmatpush.msra.mxu0 %v1236_v19  ;;  %v1269_v15 = vld [vmem:[%s6025_s13 + $0x288] sm:$0xff]  ;;  %v1262_v18 = vld [vmem:[%s6025_s13 + $0x250] sm:$0xff] }
 0x1c3   : > { %v1103_v61 = vadd.f32 %v1093_v58, %v1092_v57  ;;  %1460 = vmatpush.msra.mxu2 %v1231_v25  ;;  %1432 = vmatpush.msra.mxu1 %v1320_v28  ;;  %v1290_v57 = vld [vmem:[%s6025_s13 + $0x330] sm:$0xff]  ;;  %v1195_v58 = vld [vmem:[%s6025_s13 + $0x38] sm:$0xff]  ;;  %v1257_v24 = vld [vmem:[%s6025_s13 + $0x228] sm:$0xff] }
 0x1c4   : > { %1488 = vmatpush.msra.mxu3 %v1333_v22  ;;  %1402 = vmatpush.msra.mxu0 %v1230_v23  ;;  %v1358_v19 = vld [vmem:[%s6025_s13 + $0x550] sm:$0xff]  ;;  %v1256_v22 = vld [vmem:[%s6025_s13 + $0x220] sm:$0xff] }
 0x1c5   : > { %1104 = vadd.xlane.f32.xlu1 %v1103_v61  ;;  %1461 = vmatpush.msra.mxu2 %v1225_v29  ;;  %v1284_v61 = vld [vmem:[%s6025_s13 + $0x300] sm:$0xff]  ;;  %v1346_v28 = vld [vmem:[%s6025_s13 + $0x4f0] sm:$0xff] }
 0x1c6   : > { %1489 = vmatpush.msra.mxu3 %v1327_v26  ;;  %1403 = vmatpush.msra.mxu0 %v1224_v27  ;;  %v1352_v23 = vld [vmem:[%s6025_s13 + $0x520] sm:$0xff]  ;;  %v1353_v26 = vld [vmem:[%s6025_s13 + $0x528] sm:$0xff]  ;;  %v1250_v27 = vld [vmem:[%s6025_s13 + $0x1f0] sm:$0xff] }
 0x1c7   : > { %1433 = vmatpush.msra.mxu1 %v1314_v32  ;;  %1462 = vmatpush.msra.mxu2 %v1219_v33  ;;  %v1347_v32 = vld [vmem:[%s6025_s13 + $0x4f8] sm:$0xff]  ;;  %v1244_v33 = vld [vmem:[%s6025_s13 + $0x1c0] sm:$0xff] }
 0x1c8   : > { %1490 = vmatpush.msra.mxu3 %v1321_v30  ;;  %1404 = vmatpush.msra.mxu0 %v1218_v31  ;;  %v1251_v31 = vld [vmem:[%s6025_s13 + $0x1f8] sm:$0xff] }
 0x1c9   : > { %1434 = vmatpush.msra.mxu1 %v1308_v37  ;;  %1463 = vmatpush.msra.mxu2 %v1213_v38  ;;  %v1245_v37 = vld [vmem:[%s6025_s13 + $0x1c8] sm:$0xff] }
 0x1ca   : > { %1491 = vmatpush.msra.mxu3 %v1315_v35  ;;  %1405 = vmatpush.msra.mxu0 %v1212_v36  ;;  %v1340_v36 = vld [vmem:[%s6025_s13 + $0x4c0] sm:$0xff]  ;;  %v1341_v38 = vld [vmem:[%s6025_s13 + $0x4c8] sm:$0xff] }
 0x1cb   : > { %1435 = vmatpush.msra.mxu1 %v1302_v45  ;;  %1464 = vmatpush.msra.mxu2 %v1207_v46  ;;  %v1238_v45 = vld [vmem:[%s6025_s13 + $0x190] sm:$0xff] }
 0x1cc   : > { %1492 = vmatpush.msra.mxu3 %v1309_v43  ;;  %1406 = vmatpush.msra.mxu0 %v1206_v44  ;;  %v1334_v46 = vld [vmem:[%s6025_s13 + $0x490] sm:$0xff] }
 0x1cd   : > { %1436 = vmatpush.msra.mxu1 %v1296_v49  ;;  %1465 = vmatpush.msra.mxu2 %v1201_v50  ;;  %v1239_v50 = vld [vmem:[%s6025_s13 + $0x198] sm:$0xff] }
 0x1ce   : > { %1493 = vmatpush.msra.mxu3 %v1303_v47  ;;  %1407 = vmatpush.msra.mxu0 %v1200_v48 }
 0x1cf   : > { %1437 = vmatpush.msra.mxu1 %v1290_v57  ;;  %1466 = vmatpush.msra.mxu2 %v1195_v58  ;;  %v1232_v58 = vld [vmem:[%s6025_s13 + $0x160] sm:$0xff] }
 0x1d0   : > { %1494 = vmatpush.msra.mxu3 %v1297_v51  ;;  %1408 = vmatpush.msra.mxu0 %v1194_v52  ;;  %v1335_v51 = vld [vmem:[%s6025_s13 + $0x498] sm:$0xff] }
 0x1d1   : > { %1438 = vmatpush.msra.mxu1 %v1284_v61  ;;  %1467 = vmatpush.msra.mxu2 %v1189_v62  ;;  %v1329_v62 = vld [vmem:[%s6025_s13 + $0x468] sm:$0xff] }
 0x1d2   : > { %1495 = vmatpush.msra.mxu3 %v1291_v59  ;;  %1409 = vmatpush.msra.mxu0 %v1188_v60  ;;  %v1328_v59 = vld [vmem:[%s6025_s13 + $0x460] sm:$0xff]  ;;  %v1233_v60 = vld [vmem:[%s6025_s13 + $0x168] sm:$0xff] }
 0x1d3   : > { %1539 = vmatpush.msrb.mxu1 %v1376_v1  ;;  %1568 = vmatpush.msrb.mxu2 %v1281_v2  ;;  %v1227_v2 = vld [vmem:[%s6025_s13 + $0x138] sm:$0xff] }
 0x1d4   : > { %1496 = vmatpush.msra.mxu3 %v1285_v63  ;;  %1510 = vmatpush.msrb.mxu0 %v1280_v0  ;;  %v1226_v63 = vld [vmem:[%s6025_s13 + $0x130] sm:$0xff] }
 0x1d5   : > { %1540 = vmatpush.msrb.mxu1 %v1370_v8  ;;  %1569 = vmatpush.msrb.mxu2 %v1275_v9  ;;  %v1322_v0 = vld [vmem:[%s6025_s13 + $0x430] sm:$0xff]  ;;  %v1053_v9 = vld [vmem:[%s798_s12] sm:$0x3] }
 0x1d6   : > { %1597 = vmatpush.msrb.mxu3 %v1377_v4  ;;  %1511 = vmatpush.msrb.mxu0 %v1274_v7  ;;  %v1220_v4 = vld [vmem:[%s6025_s13 + $0x100] sm:$0xff]  ;;  %v1317_v7 = vld [vmem:[%s6025_s13 + $0x408] sm:$0xff] }
 0x1d7   : > { %1541 = vmatpush.msrb.mxu1 %v1364_v14  ;;  %1570 = vmatpush.msrb.mxu2 %v1269_v15  ;;  %v1054_v15 = vld [vmem:[%s808_s15] sm:$0x3] }
 0x1d8   : > { %1598 = vmatpush.msrb.mxu3 %v1371_v11  ;;  %1512 = vmatpush.msrb.mxu0 %v1268_v13  ;;  %v1214_v11 = vld [vmem:[%s6025_s13 + $0xd0] sm:$0xff] }
 0x1d9   : > { %1542 = vmatpush.msrb.mxu1 %v1358_v19  ;;  %1571 = vmatpush.msrb.mxu2 %v1263_v20  ;;  %v1310_v13 = vld [vmem:[%s6025_s13 + $0x3d0] sm:$0xff] }
 0x1da   : > { %1599 = vmatpush.msrb.mxu3 %v1365_v17  ;;  %1513 = vmatpush.msrb.mxu0 %v1262_v18  ;;  %v1215_v18 = vld [vmem:[%s6025_s13 + $0xd8] sm:$0xff] }
 0x1db   : > { %1543 = vmatpush.msrb.mxu1 %v1352_v23  ;;  %1572 = vmatpush.msrb.mxu2 %v1257_v24  ;;  %v6294_v23 = vperm.slane %v1053_v9, 0  ;;  %v6296_v24 = vperm.slane %v1053_v9, 1  ;;  %v1283_v9 = vld [vmem:[%s6025_s13 + $0x2f8] sm:$0xff] }
 0x1dc   : > { %1600 = vmatpush.msrb.mxu3 %v1359_v21  ;;  %1514 = vmatpush.msrb.mxu0 %v1256_v22  ;;  %v1311_v22 = vld [vmem:[%s6025_s13 + $0x3d8] sm:$0xff] }
 0x1dd   : > { %1544 = vmatpush.msrb.mxu1 %v1346_v28  ;;  %1573 = vmatpush.msrb.mxu2 %v1251_v31  ;;  %v1304_v28 = vld [vmem:[%s6025_s13 + $0x3a0] sm:$0xff] }
 0x1de   : > { %1601 = vmatpush.msrb.mxu3 %v1353_v26  ;;  %1515 = vmatpush.msrb.mxu0 %v1250_v27  ;;  %v1208_v27 = vld [vmem:[%s6025_s13 + $0xa0] sm:$0xff] }
 0x1df   : > { %1545 = vmatpush.msrb.mxu1 %v1340_v36  ;;  %1574 = vmatpush.msrb.mxu2 %v1245_v37  ;;  %v1202_v36 = vld [vmem:[%s6025_s13 + $0x70] sm:$0xff] }
 0x1e0   : > { %1602 = vmatpush.msrb.mxu3 %v1347_v32  ;;  %1516 = vmatpush.msrb.mxu0 %v1244_v33  ;;  %v1298_v37 = vld [vmem:[%s6025_s13 + $0x370] sm:$0xff] }
 0x1e1   : > { %1546 = vmatpush.msrb.mxu1 %v1334_v46  ;;  %1575 = vmatpush.msrb.mxu2 %v1239_v50  ;;  %v1203_v46 = vld [vmem:[%s6025_s13 + $0x78] sm:$0xff]  ;;  %v1292_v50 = vld [vmem:[%s6025_s13 + $0x340] sm:$0xff] }
 0x1e2   : > { %1603 = vmatpush.msrb.mxu3 %v1341_v38  ;;  %1517 = vmatpush.msrb.mxu0 %v1238_v45 }
 0x1e3   : > { %1547 = vmatpush.msrb.mxu1 %v1328_v59  ;;  %1576 = vmatpush.msrb.mxu2 %v1233_v60  ;;  %v1240_v60 = vld [vmem:[%s6025_s13 + $0x1a0] sm:$0xff] }
 0x1e4   : > { %1604 = vmatpush.msrb.mxu3 %v1335_v51  ;;  %1518 = vmatpush.msrb.mxu0 %v1232_v58  ;;  %v1197_v51 = vld [vmem:[%s6025_s13 + $0x48] sm:$0xff] }
 0x1e5   : > { %1548 = vmatpush.msrb.mxu1 %v1322_v0  ;;  %1577 = vmatpush.msrb.mxu2 %v1227_v2  ;;  %v1190_v0 = vld [vmem:[%s6025_s13 + $0x10] sm:$0xff] }
 0x1e6   : > { %1605 = vmatpush.msrb.mxu3 %v1329_v62  ;;  %1519 = vmatpush.msrb.mxu0 %v1226_v63  ;;  %v1293_v63 = vld [vmem:[%s6025_s13 + $0x348] sm:$0xff] }
 0x1e8   : > { %1520 = vmatpush.msrb.mxu0 %v1220_v4 }
 0x1ea   : > { %1521 = vmatpush.msrb.mxu0 %v1214_v11  ;;  %v1379_v11 = vld [vmem:[%s6025_s13 + $0x5f8] sm:$0xff] }
 0x1ec   : > { %1522 = vmatpush.msrb.mxu0 %v1208_v27 }
 0x1ee   : > { %1523 = vmatpush.msrb.mxu0 %v1202_v36  ;;  %v1259_v36 = vld [vmem:[%s6025_s13 + $0x238] sm:$0xff] }
 0x22c   : > { %v1096_v5 = vpop.xlane.xlu2 %1095 }
 0x22d   : > { %v1106_v10 = vmul.f32 %v1096_v5, %v6111_v34  ;;  %v1316_v5 = vld [vmem:[%s6025_s13 + $0x400] sm:$0xff] }
 0x22e   : > { %1549 = vmatpush.msrb.mxu1 %v1316_v5 }
 0x22f   : > { %v6220_v16 = vadd.f32 1e-05, %v1106_v10 }
 0x230   : > { %v1102_v3 = vpop.xlane.xlu0 %1101  ;;  %1550 = vmatpush.msrb.mxu1 %v1310_v13  ;;  %v1276_v13 = vld [vmem:[%s6025_s13 + $0x2c0] sm:$0xff] }
 0x231   : > { %v1108_v6 = vmul.f32 %v1102_v3, %v6111_v34  ;;  %v1323_v3 = vld [vmem:[%s6025_s13 + $0x438] sm:$0xff]  ;;  %vm1120_vm2 = vweird.f32 %v6220_v16 }
 0x232   : > { %1606 = vmatpush.msrb.mxu3 %v1323_v3  ;;  %1551 = vmatpush.msrb.mxu1 %v1304_v28  ;;  %v1282_v3 = vld [vmem:[%s6025_s13 + $0x2f0] sm:$0xff]  ;;  %v1360_v28 = vld [vmem:[%s6025_s13 + $0x560] sm:$0xff] }
 0x233   : > { %v6215_v12 = vadd.f32 1e-05, %v1108_v6  ;;  %v1221_v6 = vld [vmem:[%s6025_s13 + $0x108] sm:$0xff] }
 0x234   : > { %v1099_v30 = vpop.xlane.xlu2 %1098  ;;  %1578 = vmatpush.msrb.mxu2 %v1221_v6  ;;  %1607 = vmatpush.msrb.mxu3 %v1317_v7  ;;  %v1378_v7 = vld [vmem:[%s6025_s13 + $0x5f0] sm:$0xff] }
 0x235   : > { %4938 = vrsqrt.f32 %v6215_v12  ;;  %v1107_v35 = vmul.f32 %v1099_v30, %v6111_v34  ;;  %v6307_v30 = vperm.slane %v1054_v15, 1  ;;  %vm1140_vm4 = vweird.f32 %v6215_v12  ;;  %1552 = vmatpush.msrb.mxu1 %v1298_v37 }
 0x236   : > { %4940 = vrsqrt.f32 %v6220_v16  ;;  %1579 = vmatpush.msrb.mxu2 %v1215_v18  ;;  %1608 = vmatpush.msrb.mxu3 %v1311_v22 }
 0x237   : > { %v6253_v49 = vadd.f32 1e-05, %v1107_v35  ;;  %v1305_v35 = vld [vmem:[%s6025_s13 + $0x3a8] sm:$0xff]  ;;  %1553 = vmatpush.msrb.mxu1 %v1292_v50 }
 0x238   : > { %v1105_v25 = vpop.xlane.xlu1 %1104  ;;  %1609 = vmatpush.msrb.mxu3 %v1305_v35  ;;  %v1354_v35 = vld [vmem:[%s6025_s13 + $0x530] sm:$0xff] }
 0x239   : > { %v1109_v29 = vmul.f32 %v1105_v25, %v6111_v34  ;;  %vm1130_vm8 = vweird.f32 %v6253_v49 }
 0x23b   : > { %v6243_v43 = vpop.eup %4938  ;;  %v6245_v44 = vadd.f32 1e-05, %v1109_v29  ;;  %v1209_v29 = vld [vmem:[%s6025_s13 + $0xa8] sm:$0xff] }
 0x23c   : > { %v6249_v47 = vpop.eup %4940  ;;  %v1135_v48 = vmul.f32 %v6243_v43, %v6215_v12  ;;  %1580 = vmatpush.msrb.mxu2 %v1209_v29  ;;  %vm1141_vm5 = vweird.f32 %v6243_v43  ;;  %v1286_v12 = vld [vmem:[%s6025_s13 + $0x310] sm:$0xff]  ;;  %v1265_v29 = vld [vmem:[%s6025_s13 + $0x268] sm:$0xff] }
 0x23d   : > { %v1115_v52 = vmul.f32 %v6249_v47, %v6220_v16  ;;  %4942 = vrsqrt.f32 %v6245_v44  ;;  %vm1121_vm1 = vweird.f32 %v6249_v47  ;;  %v6300_v16 = vperm.slane %v1054_v15, 0  ;;  %vm6334_vm7 = vmor %vm1140_vm4, %vm1141_vm5  ;;  %1554 = vmatpush.msrb.mxu1 %v1286_v12  ;;  %v1330_v12 = vld [vmem:[%s6025_s13 + $0x470] sm:$0xff] }
 0x23e   : > { %4944 = vrsqrt.f32 %v6253_v49  ;;  %v1136_v61 = vmul.f32 %v6243_v43, %v1135_v48  ;;  %vm1122_vm3 = vmor %vm1120_vm2, %vm1121_vm1  ;;  %v1196_v48 = vld [vmem:[%s6025_s13 + $0x40] sm:$0xff]  ;;  %1581 = vmatpush.msrb.mxu2 %v1203_v46  ;;  %vm1150_vm10 = vweird.f32 %v6245_v44  ;;  %v1355_v46 = vld [vmem:[%s6025_s13 + $0x538] sm:$0xff] }
 0x23f   : > { %v1116_v57 = vmul.f32 %v6249_v47, %v1115_v52  ;;  %1524 = vmatpush.msrb.mxu0 %v1196_v48  ;;  %v1348_v48 = vld [vmem:[%s6025_s13 + $0x500] sm:$0xff] }
 0x240   : > { %v1137_v17 = vmul.f32 0.5, %v1136_v61  ;;  %1582 = vmatpush.msrb.mxu2 %v1197_v51  ;;  %v1342_v51 = vld [vmem:[%s6025_s13 + $0x4d0] sm:$0xff] }
 0x241   : > { %v1117_v1 = vmul.f32 0.5, %v1116_v57  ;;  %1525 = vmatpush.msrb.mxu0 %v1190_v0  ;;  %v1234_v0 = vld [vmem:[%s6025_s13 + $0x170] sm:$0xff] }
 0x242   : > { %v1138_v33 = vsub.f32 1.5, %v1137_v17 }
 0x243   : > { %v6275_v8 = vpop.eup %4942  ;;  %v1118_v10 = vsub.f32 1.5, %v1117_v1  ;;  %v1191_v1 = vld [vmem:[%s6025_s13 + $0x18] sm:$0xff] }
 0x244   : > { %v6282_v14 = vpop.eup %4944  ;;  %v1145_v20 = vmul.f32 %v6275_v8, %v6245_v44  ;;  %v1139_v59 = vmul.f32 %v6243_v43, %v1138_v33  ;;  %1583 = vmatpush.msrb.mxu2 %v1191_v1  ;;  %vm1151_vm11 = vweird.f32 %v6275_v8  ;;  %v1373_v44 = vld [vmem:[%s6025_s13 + $0x5c8] sm:$0xff]  ;;  %v1258_v33 = vld [vmem:[%s6025_s13 + $0x230] sm:$0xff]  ;;  %v1228_v1 = vld [vmem:[%s6025_s13 + $0x140] sm:$0xff] }
 0x245   : > { %v1119_v19 = vmul.f32 %v6249_v47, %v1118_v10  ;;  %v1125_v21 = vmul.f32 %v6282_v14, %v6253_v49  ;;  %vm1131_vm6 = vweird.f32 %v6282_v14  ;;  %v1287_v49 = vld [vmem:[%s6025_s13 + $0x318] sm:$0xff]  ;;  %vm1152_vm12 = vmor %vm1150_vm10, %vm1151_vm11 }
 0x246   : > { %v1146_v38 = vmul.f32 %v6275_v8, %v1145_v20  ;;  %vm1132_vm9 = vmor %vm1130_vm8, %vm1131_vm6  ;;  %v1143_v4 = vsel %vm6334_vm7, %v6243_v43, %v1139_v59  ;;  %v1277_v43 = vld [vmem:[%s6025_s13 + $0x2c8] sm:$0xff]  ;;  %v1270_v20 = vld [vmem:[%s6025_s13 + $0x290] sm:$0xff] }
 0x247   : > { %v1123_v25 = vsel %vm1122_vm3, %v6249_v47, %v1119_v19  ;;  %v1126_v26 = vmul.f32 %v6282_v14, %v1125_v21  ;;  %v1299_v47 = vld [vmem:[%s6025_s13 + $0x378] sm:$0xff]  ;;  %v1159_v17 = vmul.f32 %v1143_v4, %v6117_v40  ;;  %v1366_v40 = vld [vmem:[%s6025_s13 + $0x590] sm:$0xff] }
 0x248   : > { %v1154_v31 = vmul.f32 %v1123_v25, %v6119_v41  ;;  %v1155_v32 = vmul.f32 %v1123_v25, %v6121_v42  ;;  %1610 = vmatpush.msrb.mxu3 %v1299_v47  ;;  %v1147_v61 = vmul.f32 0.5, %v1146_v38  ;;  %v1271_v21 = vld [vmem:[%s6025_s13 + $0x298] sm:$0xff]  ;;  %v1252_v47 = vld [vmem:[%s6025_s13 + $0x200] sm:$0xff] }
 0x249   : > { %v1127_v45 = vmul.f32 0.5, %v1126_v26  ;;  %v1367_v25 = vld [vmem:[%s6025_s13 + $0x598] sm:$0xff]  ;;  %v1264_v26 = vld [vmem:[%s6025_s13 + $0x260] sm:$0xff]  ;;  %v1172_v27 = vmul.f32 %v6296_v24, %v1159_v17 }
 0x24a   : > { %v1167_v41 = vmul.f32 %v6294_v23, %v1154_v31  ;;  %v1168_v42 = vmul.f32 %v6296_v24, %v1155_v32  ;;  %1611 = vmatpush.msrb.mxu3 %v1293_v63  ;;  %v1148_v10 = vsub.f32 1.5, %v1147_v61  ;;  %v1361_v32 = vld [vmem:[%s6025_s13 + $0x568] sm:$0xff]  ;;  %v1343_v59 = vld [vmem:[%s6025_s13 + $0x4d8] sm:$0xff]  ;;  %v1336_v61 = vld [vmem:[%s6025_s13 + $0x4a0] sm:$0xff] }
 0x24b   : > { %v1128_v52 = vsub.f32 1.5, %v1127_v45  ;;  %v1337_v63 = vld [vmem:[%s6025_s13 + $0x4a8] sm:$0xff]  ;;  %v1300_v17 = vld [vmem:[%s6025_s13 + $0x380] sm:$0xff] }
 0x24c   : > { %v6326_v57 = vadd.f32 %v6300_v16, %v1167_v41  ;;  %v6329_v58 = vadd.f32 %v6307_v30, %v1168_v42  ;;  %1612 = vmatpush.msrb.mxu3 %v1287_v49  ;;  %v1253_v41 = vld [vmem:[%s6025_s13 + $0x208] sm:$0xff] }
 0x24d   : > { %v1129_v62 = vmul.f32 %v6282_v14, %v1128_v52  ;;  %v1247_v52 = vld [vmem:[%s6025_s13 + $0x1d8] sm:$0xff]  ;;  %v1229_v49 = vld [vmem:[%s6025_s13 + $0x148] sm:$0xff] }
 0x24e   : > { %1410 = vmatmul.f32.vlgmr.msra.gmra.mxu0 %v6326_v57  ;;  %1439 = vmatmul.f32.vlgmr.msra.gmra.mxu1 %v6329_v58 }
 0x24f   : > { %v1133_v2 = vsel %vm1132_vm9, %v6282_v14, %v1129_v62  ;;  %1468 = vmatmul.f32.vlgmr.msra.gmra.mxu2 %v6326_v57  ;;  %1497 = vmatmul.f32.vlgmr.msra.gmra.mxu3 %v6329_v58  ;;  %v1241_v62 = vld [vmem:[%s6025_s13 + $0x1a8] sm:$0xff] }
 0x250   : > { %v1156_v5 = vmul.f32 %v1133_v2, %v6137_v55  ;;  %v1157_v6 = vmul.f32 %v1133_v2, %v6139_v56  ;;  %1626 = vmatpush.msra.mxu0 %v1282_v3  ;;  %v1372_v55 = vld [vmem:[%s6025_s13 + $0x5c0] sm:$0xff]  ;;  %v1158_v56 = vmul.f32 %v1143_v4, %v6115_v39  ;;  %1655 = vmatpush.msra.mxu1 %v1378_v7  ;;  %v1325_v3 = vld [vmem:[%s6025_s13 + $0x448] sm:$0xff]  ;;  %v1222_v4 = vld [vmem:[%s6025_s13 + $0x110] sm:$0xff] }
 0x251   : > { %1684 = vmatpush.msra.mxu2 %v1283_v9  ;;  %1713 = vmatpush.msra.mxu3 %v1379_v11  ;;  %v1149_v39 = vmul.f32 %v6275_v8, %v1148_v10  ;;  %v1324_v2 = vld [vmem:[%s6025_s13 + $0x440] sm:$0xff]  ;;  %v1319_v7 = vld [vmem:[%s6025_s13 + $0x418] sm:$0xff]  ;;  %v1217_v11 = vld [vmem:[%s6025_s13 + $0xe8] sm:$0xff] }
 0x252   : > { %v1169_v14 = vmul.f32 %v6294_v23, %v1156_v5  ;;  %v1170_v15 = vmul.f32 %v6296_v24, %v1157_v6  ;;  %1627 = vmatpush.msra.mxu0 %v1276_v13  ;;  %1656 = vmatpush.msra.mxu1 %v1372_v55  ;;  %v1171_v22 = vmul.f32 %v6294_v23, %v1158_v56  ;;  %v1318_v5 = vld [vmem:[%s6025_s13 + $0x410] sm:$0xff]  ;;  %v1223_v6 = vld [vmem:[%s6025_s13 + $0x118] sm:$0xff]  ;;  %v1216_v9 = vld [vmem:[%s6025_s13 + $0xe0] sm:$0xff] }
 0x253   : > { %1685 = vmatpush.msra.mxu2 %v1277_v43  ;;  %1714 = vmatpush.msra.mxu3 %v1373_v44  ;;  %v1153_v31 = vsel %vm1152_vm12, %v6275_v8, %v1149_v39  ;;  %v6400_v8 = vadd.f32 %v6307_v30, %v1172_v27  ;;  %v1312_v10 = vld [vmem:[%s6025_s13 + $0x3e0] sm:$0xff]  ;;  %v1313_v13 = vld [vmem:[%s6025_s13 + $0x3e8] sm:$0xff]  ;;  %v1211_v55 = vld [vmem:[%s6025_s13 + $0xb8] sm:$0xff] }
 0x254   : > { %v6371_v18 = vadd.f32 %v6300_v16, %v1169_v14  ;;  %v6374_v19 = vadd.f32 %v6307_v30, %v1170_v15  ;;  %1628 = vmatpush.msra.mxu0 %v1270_v20  ;;  %1657 = vmatpush.msra.mxu1 %v1366_v40  ;;  %v6397_v37 = vadd.f32 %v6300_v16, %v1171_v22  ;;  %v1210_v14 = vld [vmem:[%s6025_s13 + $0xb0] sm:$0xff]  ;;  %v1307_v43 = vld [vmem:[%s6025_s13 + $0x3b8] sm:$0xff]  ;;  %v1204_v56 = vld [vmem:[%s6025_s13 + $0x80] sm:$0xff] }
 0x255   : > { %1686 = vmatpush.msra.mxu2 %v1271_v21  ;;  %1715 = vmatpush.msra.mxu3 %v1367_v25  ;;  %v1160_v38 = vmul.f32 %v1153_v31, %v6133_v53  ;;  %v1161_v45 = vmul.f32 %v1153_v31, %v6135_v54  ;;  %v1349_v53 = vld [vmem:[%s6025_s13 + $0x508] sm:$0xff]  ;;  %v1246_v54 = vld [vmem:[%s6025_s13 + $0x1d0] sm:$0xff]  ;;  %v1199_v21 = vld [vmem:[%s6025_s13 + $0x58] sm:$0xff] }
 0x256   : > { %1413 = vmatmul.f32.gmra.mxu0 %v6371_v18  ;;  %1442 = vmatmul.f32.gmra.mxu1 %v6374_v19  ;;  %v1306_v15 = vld [vmem:[%s6025_s13 + $0x3b0] sm:$0xff]  ;;  %v1205_v39 = vld [vmem:[%s6025_s13 + $0x88] sm:$0xff]  ;;  %v1295_v22 = vld [vmem:[%s6025_s13 + $0x358] sm:$0xff] }
 0x257   : > { %1471 = vmatmul.f32.gmra.mxu2 %v6371_v18  ;;  %1500 = vmatmul.f32.gmra.mxu3 %v6374_v19  ;;  %v1173_v42 = vmul.f32 %v6294_v23, %v1160_v38  ;;  %v1174_v50 = vmul.f32 %v6296_v24, %v1161_v45  ;;  %v1301_v44 = vld [vmem:[%s6025_s13 + $0x388] sm:$0xff]  ;;  %v1198_v20 = vld [vmem:[%s6025_s13 + $0x50] sm:$0xff]  ;;  %v1192_v25 = vld [vmem:[%s6025_s13 + $0x20] sm:$0xff] }
 0x258   : > { %1629 = vmatpush.msra.mxu0 %v1264_v26  ;;  %1658 = vmatpush.msra.mxu1 %v1360_v28  ;;  %v1294_v40 = vld [vmem:[%s6025_s13 + $0x350] sm:$0xff]  ;;  %v1288_v26 = vld [vmem:[%s6025_s13 + $0x320] sm:$0xff]  ;;  %v1193_v27 = vld [vmem:[%s6025_s13 + $0x28] sm:$0xff] }
 0x259   : > { %1687 = vmatpush.msra.mxu2 %v1265_v29  ;;  %1716 = vmatpush.msra.mxu3 %v1361_v32  ;;  %v6423_v23 = vadd.f32 %v6300_v16, %v1173_v42  ;;  %v6426_v24 = vadd.f32 %v6307_v30, %v1174_v50  ;;  %v1235_v16 = vld [vmem:[%s6025_s13 + $0x178] sm:$0xff]  ;;  %v1289_v28 = vld [vmem:[%s6025_s13 + $0x328] sm:$0xff] }
 0x25a   : > { %1630 = vmatpush.msra.mxu0 %v1258_v33  ;;  %1659 = vmatpush.msra.mxu1 %v1354_v35  ;;  %v1331_v30 = vld [vmem:[%s6025_s13 + $0x478] sm:$0xff]  ;;  %s7989_s13 = sld [smem:[#allocation47_spill]] }
 0x25b   : > { %1688 = vmatpush.msra.mxu2 %v1259_v36  ;;  %1717 = vmatpush.msra.mxu3 %v1355_v46 }
 0x25c   : > { %1631 = vmatpush.msra.mxu0 %v1252_v47  ;;  %1660 = vmatpush.msra.mxu1 %v1348_v48 }
 0x25d   : > { %1689 = vmatpush.msra.mxu2 %v1253_v41  ;;  %1718 = vmatpush.msra.mxu3 %v1349_v53  ;;  %v6510_v53 = vld [vmem:[%s6028_s24] sm:$0x3f] }
 0x25e   : > { %1416 = vmatmul.f32.gmra.mxu0 %v6397_v37  ;;  %1445 = vmatmul.f32.gmra.mxu1 %v6400_v8 }
 0x25f   : > { %1474 = vmatmul.f32.gmra.mxu2 %v6397_v37  ;;  %1503 = vmatmul.f32.gmra.mxu3 %v6400_v8 }
 0x260   : > { %1632 = vmatpush.msra.mxu0 %v1246_v54  ;;  %1661 = vmatpush.msra.mxu1 %v1342_v51  ;;  %v1384_v54 = vperm.slane %v6510_v53, 2 }
 0x261   : > { %1690 = vmatpush.msra.mxu2 %v1247_v52  ;;  %1719 = vmatpush.msra.mxu3 %v1343_v59 }
 0x262   : > { %1633 = vmatpush.msra.mxu0 %v1240_v60  ;;  %1662 = vmatpush.msra.mxu1 %v1336_v61  ;;  %v1382_v60 = vperm.slane %v6510_v53, 0 }
 0x263   : > { %1691 = vmatpush.msra.mxu2 %v1241_v62  ;;  %1720 = vmatpush.msra.mxu3 %v1337_v63 }
 0x264   : > { %1634 = vmatpush.msra.mxu0 %v1234_v0  ;;  %1663 = vmatpush.msra.mxu1 %v1330_v12 }
 0x265   : > { %1692 = vmatpush.msra.mxu2 %v1235_v16  ;;  %1721 = vmatpush.msra.mxu3 %v1331_v30 }
 0x266   : > { %1419 = vmatmul.f32.gmra.mxu0 %v6423_v23  ;;  %1448 = vmatmul.f32.gmra.mxu1 %v6426_v24 }
 0x267   : > { %1477 = vmatmul.f32.gmra.mxu2 %v6423_v23  ;;  %1506 = vmatmul.f32.gmra.mxu3 %v6426_v24 }
 0x268   : > { %1635 = vmatpush.msra.mxu0 %v1228_v1  ;;  %1664 = vmatpush.msra.mxu1 %v1324_v2  ;;  %v1383_v2 = vperm.slane %v6510_v53, 1 }
 0x269   : > { %1693 = vmatpush.msra.mxu2 %v1229_v49  ;;  %1722 = vmatpush.msra.mxu3 %v1325_v3 }
 0x26a   : > { %1636 = vmatpush.msra.mxu0 %v1222_v4  ;;  %1665 = vmatpush.msra.mxu1 %v1318_v5 }
 0x26b   : > { %1694 = vmatpush.msra.mxu2 %v1223_v6  ;;  %1723 = vmatpush.msra.mxu3 %v1319_v7 }
 0x26c   : > { %1637 = vmatpush.msra.mxu0 %v1216_v9  ;;  %1666 = vmatpush.msra.mxu1 %v1312_v10 }
 0x26d   : > { %1695 = vmatpush.msra.mxu2 %v1217_v11  ;;  %1724 = vmatpush.msra.mxu3 %v1313_v13 }
 0x26e   : > { %1526 = vmatmul.f32.vlgmr.msrb.gmra.mxu0 %v6326_v57  ;;  %1555 = vmatmul.f32.vlgmr.msrb.gmra.mxu1 %v6329_v58 }
 0x26f   : > { %1584 = vmatmul.f32.vlgmr.msrb.gmra.mxu2 %v6326_v57  ;;  %1613 = vmatmul.f32.vlgmr.msrb.gmra.mxu3 %v6329_v58 }
 0x270   : > { %1638 = vmatpush.msra.mxu0 %v1210_v14  ;;  %1667 = vmatpush.msra.mxu1 %v1306_v15 }
 0x271   : > { %1696 = vmatpush.msra.mxu2 %v1211_v55  ;;  %1725 = vmatpush.msra.mxu3 %v1307_v43 }
 0x272   : > { %1639 = vmatpush.msra.mxu0 %v1204_v56  ;;  %1668 = vmatpush.msra.mxu1 %v1300_v17 }
 0x273   : > { %1697 = vmatpush.msra.mxu2 %v1205_v39  ;;  %1726 = vmatpush.msra.mxu3 %v1301_v44 }
 0x274   : > { %1640 = vmatpush.msra.mxu0 %v1198_v20  ;;  %1669 = vmatpush.msra.mxu1 %v1294_v40 }
 0x275   : > { %1698 = vmatpush.msra.mxu2 %v1199_v21  ;;  %1727 = vmatpush.msra.mxu3 %v1295_v22 }
 0x276   : > { %1529 = vmatmul.f32.gmra.mxu0 %v6371_v18  ;;  %1558 = vmatmul.f32.gmra.mxu1 %v6374_v19 }
 0x277   : > { %1587 = vmatmul.f32.gmra.mxu2 %v6371_v18  ;;  %1616 = vmatmul.f32.gmra.mxu3 %v6374_v19 }
 0x278   : > { %1641 = vmatpush.msra.mxu0 %v1192_v25  ;;  %1670 = vmatpush.msra.mxu1 %v1288_v26 }
 0x279   : > { %1699 = vmatpush.msra.mxu2 %v1193_v27  ;;  %1728 = vmatpush.msra.mxu3 %v1289_v28 }
 0x27e   : > { %1532 = vmatmul.f32.gmra.mxu0 %v6397_v37  ;;  %1561 = vmatmul.f32.gmra.mxu1 %v6400_v8 }
 0x27f   : > { %1590 = vmatmul.f32.gmra.mxu2 %v6397_v37  ;;  %1619 = vmatmul.f32.gmra.mxu3 %v6400_v8 }
 0x286   : > { %1535 = vmatmul.f32.gmra.mxu0 %v6423_v23  ;;  %1564 = vmatmul.f32.gmra.mxu1 %v6426_v24 }
 0x287   : > { %1593 = vmatmul.f32.gmra.mxu2 %v6423_v23  ;;  %1622 = vmatmul.f32.gmra.mxu3 %v6426_v24 }
 0x28e   : > { %1642 = vmatmul.f32.vlgmr.msra.gmra.mxu0 %v6326_v57  ;;  %1671 = vmatmul.f32.vlgmr.msra.gmra.mxu1 %v6329_v58 }
 0x28f   : > { %1700 = vmatmul.f32.vlgmr.msra.gmra.mxu2 %v6326_v57  ;;  %1729 = vmatmul.f32.vlgmr.msra.gmra.mxu3 %v6329_v58 }
 0x296   : > { %1645 = vmatmul.f32.gmra.mxu0 %v6371_v18  ;;  %1674 = vmatmul.f32.gmra.mxu1 %v6374_v19 }
 0x297   : > { %1703 = vmatmul.f32.gmra.mxu2 %v6371_v18  ;;  %1732 = vmatmul.f32.gmra.mxu3 %v6374_v19 }
 0x29e   : > { %1648 = vmatmul.f32.gmra.mxu0 %v6397_v37  ;;  %1677 = vmatmul.f32.gmra.mxu1 %v6400_v8 }
 0x29f   : > { %1706 = vmatmul.f32.gmra.mxu2 %v6397_v37  ;;  %1735 = vmatmul.f32.gmra.mxu3 %v6400_v8 }
 0x2a6   : > { %1651 = vmatmul.f32.gmra.mxu0 %v6423_v23  ;;  %1680 = vmatmul.f32.gmra.mxu1 %v6426_v24 }
 0x2a7   : > { %1709 = vmatmul.f32.gmra.mxu2 %v6423_v23  ;;  %1738 = vmatmul.f32.gmra.mxu3 %v6426_v24  ;;  %v1385_v24 = vperm.slane %v6510_v53, 3 }
 0x2cb   : > { %v1411_v57 = vpop.f32.mrf.mxu0  ;;  %v1440_v58 = vpop.f32.mrf.mxu1 }
 0x2cc   : > { %v1412_v23 = vadd.f32 %v1411_v57, %v1382_v60 }
 0x2ce   : > { %v1441_v49 = vadd.f32 %v1440_v58, %v1412_v23 }
 0x2d2   : > { %v1469_v18 = vpop.f32.mrf.mxu2  ;;  %v1498_v19 = vpop.f32.mrf.mxu3 }
 0x2d3   : > { %v1414_v29 = vpop.f32.mrf.mxu0  ;;  %v1443_v31 = vpop.f32.mrf.mxu1  ;;  %v1470_v5 = vadd.f32 %v1469_v18, %v1383_v2  ;;  %v1386_v18 = vperm.slane %v6510_v53, 4 }
 0x2d4   : > { %v1415_v6 = vadd.f32 %v1414_v29, %v1382_v60 }
 0x2d5   : > { %v1499_v14 = vadd.f32 %v1498_v19, %v1470_v5 }
 0x2d6   : > { %v1444_v55 = vadd.f32 %v1443_v31, %v1415_v6  ;;  %v1742_v6 = vld [vmem:[%s7989_s13] sm:$0xff] }
 0x2da   : > { %v1472_v32 = vpop.f32.mrf.mxu2  ;;  %v1501_v33 = vpop.f32.mrf.mxu3 }
 0x2db   : > { %v1417_v35 = vpop.f32.mrf.mxu0  ;;  %v1446_v36 = vpop.f32.mrf.mxu1  ;;  %v1473_v17 = vadd.f32 %v1472_v32, %v1383_v2 }
 0x2dc   : > { %v1418_v39 = vadd.f32 %v1417_v35, %v1382_v60 }
 0x2dd   : > { %v1502_v26 = vadd.f32 %v1501_v33, %v1473_v17 }
 0x2de   : > { %v1447_v27 = vadd.f32 %v1446_v36, %v1418_v39 }
 0x2e2   : > { %v6497_v37 = vpop.f32.mrf.mxu2  ;;  %v6499_v8 = vpop.f32.mrf.mxu3 }
 0x2e3   : > { %v6501_v38 = vpop.f32.mrf.mxu0  ;;  %v6503_v45 = vpop.f32.mrf.mxu1  ;;  %v1476_v58 = vadd.f32 %v6497_v37, %v1383_v2  ;;  %v1387_v37 = vperm.slane %v6510_v53, 5 }
 0x2e4   : > { %v1421_v19 = vadd.f32 %v6501_v38, %v1382_v60 }
 0x2e5   : > { %v1505_v33 = vadd.f32 %v6499_v8, %v1476_v58 }
 0x2ea   : > { %v6505_v46 = vpop.f32.mrf.mxu2  ;;  %v6507_v47 = vpop.f32.mrf.mxu3 }
 0x2eb   : > { %v1527_v48 = vpop.f32.mrf.mxu0  ;;  %v1556_v41 = vpop.f32.mrf.mxu1 }
 0x2ec   : > { %v1528_v61 = vadd.f32 %v1527_v48, %v1384_v54 }
 0x2ee   : > { %v1557_v63 = vadd.f32 %v1556_v41, %v1528_v61 }
 0x2f2   : > { %v1585_v42 = vpop.f32.mrf.mxu2  ;;  %v1614_v50 = vpop.f32.mrf.mxu3 }
 0x2f3   : > { %v1530_v51 = vpop.f32.mrf.mxu0  ;;  %v1559_v52 = vpop.f32.mrf.mxu1  ;;  %v1586_v3 = vadd.f32 %v1585_v42, %v1385_v24 }
 0x2f4   : > { %v1531_v59 = vadd.f32 %v1530_v51, %v1384_v54 }
 0x2f5   : > { %v1615_v7 = vadd.f32 %v1614_v50, %v1586_v3  ;;  %v1479_v50 = vadd.f32 %v6505_v46, %v1383_v2 }
 0x2f6   : > { %v1560_v62 = vadd.f32 %v1559_v52, %v1531_v59 }
 0x2f8   : > { %1758 = vmatpush.xpose.msrb.mxu0 %v1560_v62  ;;  %v1508_v62 = vadd.f32 %v6507_v47, %v1479_v50 }
 0x2fa   : > { %v1588_v0 = vpop.f32.mrf.mxu2  ;;  %v1617_v12 = vpop.f32.mrf.mxu3 }
 0x2fb   : > { %v1589_v16 = vadd.f32 %v1588_v0, %v1385_v24  ;;  %v1533_v30 = vpop.f32.mrf.mxu0  ;;  %v1562_v1 = vpop.f32.mrf.mxu1 }
 0x2fc   : > { %1759 = vmatpush.xpose.msrb.mxu0 %v1557_v63  ;;  %v1534_v43 = vadd.f32 %v1533_v30, %v1384_v54 }
 0x2fd   : > { %v1618_v4 = vadd.f32 %v1617_v12, %v1589_v16 }
 0x2fe   : > { %v1563_v44 = vadd.f32 %v1562_v1, %v1534_v43 }
 0x2ff   : > { %1839 = vmatpush.xpose.msrb.mxu2 %v1618_v4  ;;  %1760 = vmatmul.f32.vlgmr.msrb.gmra.mxu0 %v1441_v49 }
 0x302   : > { %v1591_v9 = vpop.f32.mrf.mxu2  ;;  %v1620_v10 = vpop.f32.mrf.mxu3 }
 0x303   : > { %1840 = vmatpush.xpose.msrb.mxu2 %v1615_v7  ;;  %v1536_v11 = vpop.f32.mrf.mxu0  ;;  %v1565_v13 = vpop.f32.mrf.mxu1  ;;  %v1592_v28 = vadd.f32 %v1591_v9, %v1385_v24 }
 0x304   : > { %v1537_v15 = vadd.f32 %v1536_v11, %v1384_v54  ;;  %v1450_v54 = vadd.f32 %v6503_v45, %v1421_v19 }
 0x305   : > { %v1621_v29 = vadd.f32 %v1620_v10, %v1592_v28 }
 0x306   : > { %v1566_v56 = vadd.f32 %v1565_v13, %v1537_v15  ;;  %1841 = vmatmul.f32.vlgmr.msrb.gmra.mxu2 %v1499_v14 }
 0x307   : > { %1763 = vmatmul.f32.gmra.mxu0 %v1444_v55 }
 0x308   : > { %1919 = vmatpush.xpose.msra.mxu0 %v1566_v56  ;;  %v1743_v56 = vld [vmem:[%s7989_s13 + $0x8] sm:$0xff] }
 0x30a   : > { %v1594_v20 = vpop.f32.mrf.mxu2  ;;  %v1623_v40 = vpop.f32.mrf.mxu3 }
 0x30b   : > { %v1595_v21 = vadd.f32 %v1594_v20, %v1385_v24  ;;  %v1643_v22 = vpop.f32.mrf.mxu0  ;;  %v1672_v25 = vpop.f32.mrf.mxu1 }
 0x30c   : > { %1920 = vmatpush.xpose.msra.mxu0 %v1563_v44  ;;  %v1644_v36 = vadd.f32 %v1643_v22, %v1386_v18 }
 0x30d   : > { %v1624_v57 = vadd.f32 %v1623_v40, %v1595_v21 }
 0x30e   : > { %1844 = vmatmul.f32.gmra.mxu2 %v1502_v26  ;;  %v1673_v38 = vadd.f32 %v1672_v25, %v1644_v36 }
 0x30f   : > { %1999 = vmatpush.xpose.msra.mxu2 %v1624_v57  ;;  %1921 = vmatmul.f32.vlgmr.msra.gmra.mxu0 %v1447_v27 }
 0x312   : > { %v1701_v31 = vpop.f32.mrf.mxu2  ;;  %v1730_v32 = vpop.f32.mrf.mxu3 }
 0x313   : > { %2000 = vmatpush.xpose.msra.mxu2 %v1621_v29  ;;  %v1646_v35 = vpop.f32.mrf.mxu0  ;;  %v1675_v48 = vpop.f32.mrf.mxu1  ;;  %v1702_v59 = vadd.f32 %v1701_v31, %v1387_v37 }
 0x314   : > { %v1647_v41 = vadd.f32 %v1646_v35, %v1386_v18 }
 0x315   : > { %v1731_v45 = vadd.f32 %v1730_v32, %v1702_v59 }
 0x316   : > { %v1676_v42 = vadd.f32 %v1675_v48, %v1647_v41  ;;  %2001 = vmatmul.f32.vlgmr.msra.gmra.mxu2 %v1505_v33 }
 0x317   : > { %1924 = vmatmul.f32.gmra.mxu0 %v1450_v54 }
 0x318   : > { %1814 = vmatpush.msrb.mxu1 %v1676_v42 }
 0x31a   : > { %v1704_v51 = vpop.f32.mrf.mxu2  ;;  %v1733_v52 = vpop.f32.mrf.mxu3  ;;  %1815 = vmatpush.msrb.mxu1 %v1673_v38 }
 0x31b   : > { %v1705_v60 = vadd.f32 %v1704_v51, %v1387_v37  ;;  %v1649_v61 = vpop.f32.mrf.mxu0  ;;  %v1678_v8 = vpop.f32.mrf.mxu1 }
 0x31c   : > { %v1650_v46 = vadd.f32 %v1649_v61, %v1386_v18 }
 0x31d   : > { %v1734_v23 = vadd.f32 %v1733_v52, %v1705_v60 }
 0x31e   : > { %2004 = vmatmul.f32.gmra.mxu2 %v1508_v62  ;;  %v1679_v30 = vadd.f32 %v1678_v8, %v1650_v46 }
 0x31f   : > { %1894 = vmatpush.msrb.mxu3 %v1734_v23 }
 0x321   : > { %1895 = vmatpush.msrb.mxu3 %v1731_v45 }
 0x322   : > { %v1707_v53 = vpop.f32.mrf.mxu2  ;;  %v1736_v24 = vpop.f32.mrf.mxu3 }
 0x323   : > { %v1652_v63 = vpop.f32.mrf.mxu0  ;;  %v1681_v12 = vpop.f32.mrf.mxu1  ;;  %v1708_v2 = vadd.f32 %v1707_v53, %v1387_v37 }
 0x324   : > { %v1653_v0 = vadd.f32 %v1652_v63, %v1386_v18 }
 0x325   : > { %v1737_v4 = vadd.f32 %v1736_v24, %v1708_v2 }
 0x326   : > { %v1682_v16 = vadd.f32 %v1681_v12, %v1653_v0 }
 0x328   : > { %1974 = vmatpush.msra.mxu1 %v1682_v16 }
 0x32a   : > { %v1710_v1 = vpop.f32.mrf.mxu2  ;;  %1975 = vmatpush.msra.mxu1 %v1679_v30  ;;  %v1739_v3 = vpop.f32.mrf.mxu3 }
 0x32b   : > { %v1711_v49 = vadd.f32 %v1710_v1, %v1387_v37 }
 0x32d   : > { %v1740_v47 = vadd.f32 %v1739_v3, %v1711_v49 }
 0x32f   : > { %2054 = vmatpush.msra.mxu3 %v1740_v47 }
 0x331   : > { %2055 = vmatpush.msra.mxu3 %v1737_v4 }
 0x37c   : > { %v1761_v5 = vpop.f32.mrf.mxu0 }
 0x37d   : > { %v1767_v7 = vmul.f32 0.088388346, %v1761_v5 }
 0x37f   : > { %v1769_v9 = vadd.f32 %v1767_v7, %v1742_v6 }
 0x381   : > { %v1772_v10 = vsel %vm1771_vm13, %v1769_v9, -inf }
 0x382   : > { %1773 = vmax.xlane.f32.xlu0 %v1772_v10 }
 0x384   : > { %v1764_v11 = vpop.f32.mrf.mxu0 }
 0x385   : > { %v1768_v55 = vmul.f32 0.088388346, %v1764_v11 }
 0x387   : > { %v1770_v20 = vadd.f32 %v1768_v55, %v1743_v56 }
 0x389   : > { %v1842_v13 = vpop.f32.mrf.mxu2  ;;  %v1775_v25 = vsel %vm1771_vm13, %v1770_v20, -inf }
 0x38a   : > { %v1848_v14 = vmul.f32 0.088388346, %v1842_v13 }
 0x38c   : > { %v1850_v15 = vadd.f32 %v1848_v14, %v1742_v6  ;;  %v1922_v17 = vpop.f32.mrf.mxu0 }
 0x38d   : > { %v1928_v21 = vmul.f32 0.088388346, %v1922_v17 }
 0x38e   : > { %v1852_v43 = vsel %vm1771_vm13, %v1850_v15, -inf }
 0x38f   : > { %1853 = vmax.xlane.f32.xlu2 %v1852_v43  ;;  %v1930_v28 = vadd.f32 %v1928_v21, %v1742_v6  ;;  %v2101_v21 = vld [vmem:[%s6035_s22 + $0xe0] sm:$0xff] }
 0x391   : > { %v1845_v39 = vpop.f32.mrf.mxu2  ;;  %v1932_v29 = vsel %vm1771_vm13, %v1930_v28, -inf }
 0x392   : > { %v1849_v44 = vmul.f32 0.088388346, %v1845_v39 }
 0x394   : > { %v1851_v40 = vadd.f32 %v1849_v44, %v1743_v56  ;;  %v1925_v57 = vpop.f32.mrf.mxu0 }
 0x395   : > { %v1929_v18 = vmul.f32 0.088388346, %v1925_v57 }
 0x396   : > { %v1855_v22 = vsel %vm1771_vm13, %v1851_v40, -inf }
 0x397   : > { %1856 = vmax.xlane.f32.xlu1 %v1855_v22  ;;  %1776 = vmax.xlane.f32.xlu2 %v1775_v25  ;;  %v1931_v35 = vadd.f32 %v1929_v18, %v1743_v56  ;;  %v2102_v22 = vld [vmem:[%s6035_s22 + $0xe8] sm:$0xff]  ;;  %v2099_v25 = vld [vmem:[%s6035_s22 + $0xd0] sm:$0xff] }
 0x398   : > { %v2098_v18 = vld [vmem:[%s6035_s22 + $0xc8] sm:$0xff] }
 0x399   : > { %v2002_v26 = vpop.f32.mrf.mxu2  ;;  %v1935_v36 = vsel %vm1771_vm13, %v1931_v35, -inf }
 0x39a   : > { %v2008_v27 = vmul.f32 0.088388346, %v2002_v26  ;;  %v2100_v26 = vld [vmem:[%s6035_s22 + $0xd8] sm:$0xff] }
 0x39c   : > { %v2010_v58 = vadd.f32 %v2008_v27, %v1742_v6 }
 0x39e   : > { %v2012_v19 = vsel %vm1771_vm13, %v2010_v58, -inf }
 0x39f   : > { %2013 = vmax.xlane.f32.xlu0 %v2012_v19  ;;  %1933 = vmax.xlane.f32.xlu1 %v1932_v29  ;;  %v2095_v29 = vld [vmem:[%s6035_s22 + $0xb0] sm:$0xff] }
 0x3a1   : > { %v2005_v31 = vpop.f32.mrf.mxu2 }
 0x3a2   : > { %v2009_v32 = vmul.f32 0.088388346, %v2005_v31  ;;  %v2135_v31 = vld [vmem:[%s6035_s22 + $0x1f0] sm:$0xff] }
 0x3a4   : > { %v2011_v48 = vadd.f32 %v2009_v32, %v1743_v56  ;;  %v2096_v32 = vld [vmem:[%s6035_s22 + $0xb8] sm:$0xff] }
 0x3a6   : > { %v2015_v33 = vsel %vm1771_vm13, %v2011_v48, -inf }
 0x3a7   : > { %2016 = vmax.xlane.f32.xlu2 %v2015_v33  ;;  %1936 = vmax.xlane.f32.xlu0 %v1935_v36  ;;  %v2093_v33 = vld [vmem:[%s6035_s22 + $0xa0] sm:$0xff]  ;;  %v2134_v36 = vld [vmem:[%s6035_s22 + $0x1e8] sm:$0xff] }
 0x3f5   : > { %v1774_v41 = vpop.xlane.xlu0 %1773 }
 0x3f6   : > { %v1778_v54 = vsub.f32 %v1769_v9, %v1774_v41  ;;  %v2094_v41 = vld [vmem:[%s6035_s22 + $0xa8] sm:$0xff] }
 0x3f8   : > { %v1780_v42 = vmul.f32 1.442695, %v1778_v54  ;;  %v2131_v54 = vld [vmem:[%s6035_s22 + $0x1d0] sm:$0xff] }
 0x3fa   : > { %4946 = vpow2.f32 %v1780_v42  ;;  %v2091_v42 = vld [vmem:[%s6035_s22 + $0x90] sm:$0xff] }
 0x400   : > { %v4947_v37 = vpop.eup %4946 }
 0x401   : > { %v1784_v50 = vsel %vm1771_vm13, %v4947_v37, 0.0 }
 0x402   : > { %v1854_v38 = vpop.xlane.xlu2 %1853  ;;  %1785 = vadd.xlane.f32.xlu2 %v1784_v50  ;;  %v2092_v50 = vld [vmem:[%s6035_s22 + $0x98] sm:$0xff] }
 0x403   : > { %v1858_v51 = vsub.f32 %v1850_v15, %v1854_v38  ;;  %v2129_v38 = vld [vmem:[%s6035_s22 + $0x1c0] sm:$0xff] }
 0x405   : > { %v1860_v52 = vmul.f32 1.442695, %v1858_v51 }
 0x407   : > { %4948 = vpow2.f32 %v1860_v52  ;;  %v2089_v52 = vld [vmem:[%s6035_s22 + $0x80] sm:$0xff] }
 0x40a   : > { %v1857_v59 = vpop.xlane.xlu1 %1856  ;;  %v1777_v60 = vpop.xlane.xlu2 %1776 }
 0x40b   : > { %v1859_v61 = vsub.f32 %v1851_v40, %v1857_v59  ;;  %v1779_v8 = vsub.f32 %v1770_v20, %v1777_v60  ;;  %v2103_v20 = vld [vmem:[%s6035_s22 + $0xf0] sm:$0xff]  ;;  %v2104_v40 = vld [vmem:[%s6035_s22 + $0xf8] sm:$0xff] }
 0x40c   : > { %2137 = vmatpush.msrb.mxu0 %v2103_v20  ;;  %2195 = vmatpush.msrb.mxu2 %v2104_v40  ;;  %v2073_v40 = vld [vmem:[%s6035_s22] sm:$0xff] }
 0x40d   : > { %v4949_v62 = vpop.eup %4948  ;;  %v1862_v23 = vmul.f32 1.442695, %v1859_v61  ;;  %v1782_v45 = vmul.f32 1.442695, %v1779_v8  ;;  %v2090_v8 = vld [vmem:[%s6035_s22 + $0x88] sm:$0xff] }
 0x40e   : > { %v1864_v53 = vsel %vm1771_vm13, %v4949_v62, 0.0  ;;  %2138 = vmatpush.msrb.mxu0 %v2101_v21  ;;  %2196 = vmatpush.msrb.mxu2 %v2102_v22  ;;  %v2123_v21 = vld [vmem:[%s6035_s22 + $0x190] sm:$0xff]  ;;  %v2074_v22 = vld [vmem:[%s6035_s22 + $0x8] sm:$0xff] }
 0x40f   : > { %4950 = vpow2.f32 %v1862_v23  ;;  %1865 = vadd.xlane.f32.xlu1 %v1864_v53  ;;  %v2130_v53 = vld [vmem:[%s6035_s22 + $0x1c8] sm:$0xff] }
 0x410   : > { %4952 = vpow2.f32 %v1782_v45  ;;  %2139 = vmatpush.msrb.mxu0 %v2099_v25  ;;  %2197 = vmatpush.msrb.mxu2 %v2100_v26  ;;  %v2087_v45 = vld [vmem:[%s6035_s22 + $0x70] sm:$0xff]  ;;  %v2121_v25 = vld [vmem:[%s6035_s22 + $0x180] sm:$0xff]  ;;  %v2122_v26 = vld [vmem:[%s6035_s22 + $0x188] sm:$0xff] }
 0x412   : > { %v2014_v24 = vpop.xlane.xlu0 %2013  ;;  %v1934_v63 = vpop.xlane.xlu1 %1933  ;;  %2198 = vmatpush.msrb.mxu2 %v2098_v18  ;;  %v2116_v18 = vld [vmem:[%s6035_s22 + $0x158] sm:$0xff] }
 0x413   : > { %v2018_v46 = vsub.f32 %v2010_v58, %v2014_v24  ;;  %v1938_v0 = vsub.f32 %v1930_v28, %v1934_v63  ;;  %v2097_v28 = vld [vmem:[%s6035_s22 + $0xc0] sm:$0xff]  ;;  %v2088_v24 = vld [vmem:[%s6035_s22 + $0x78] sm:$0xff]  ;;  %v2127_v63 = vld [vmem:[%s6035_s22 + $0x1b0] sm:$0xff] }
 0x414   : > { %2140 = vmatpush.msrb.mxu0 %v2097_v28  ;;  %2199 = vmatpush.msrb.mxu2 %v2096_v32  ;;  %v2117_v28 = vld [vmem:[%s6035_s22 + $0x160] sm:$0xff]  ;;  %v2112_v32 = vld [vmem:[%s6035_s22 + $0x138] sm:$0xff] }
 0x415   : > { %v6540_v12 = vpop.eup %4950  ;;  %v2020_v16 = vmul.f32 1.442695, %v2018_v46  ;;  %v1940_v30 = vmul.f32 1.442695, %v1938_v0  ;;  %v2085_v46 = vld [vmem:[%s6035_s22 + $0x60] sm:$0xff]  ;;  %v2128_v0 = vld [vmem:[%s6035_s22 + $0x1b8] sm:$0xff] }
 0x416   : > { %v6542_v1 = vpop.eup %4952  ;;  %v1867_v2 = vsel %vm1771_vm13, %v6540_v12, 0.0  ;;  %2141 = vmatpush.msrb.mxu0 %v2095_v29  ;;  %2200 = vmatpush.msrb.mxu2 %v2094_v41  ;;  %v2114_v29 = vld [vmem:[%s6035_s22 + $0x148] sm:$0xff]  ;;  %v2105_v41 = vld [vmem:[%s6035_s22 + $0x100] sm:$0xff] }
 0x417   : > { %4954 = vpow2.f32 %v2020_v16  ;;  %v1787_v49 = vsel %vm1771_vm13, %v6542_v1, 0.0  ;;  %1868 = vadd.xlane.f32.xlu0 %v1867_v2  ;;  %v2125_v16 = vld [vmem:[%s6035_s22 + $0x1a0] sm:$0xff]  ;;  %v2084_v2 = vld [vmem:[%s6035_s22 + $0x58] sm:$0xff] }
 0x418   : > { %4956 = vpow2.f32 %v1940_v30  ;;  %1788 = vadd.xlane.f32.xlu1 %v1787_v49  ;;  %2142 = vmatpush.msrb.mxu0 %v2093_v33  ;;  %v2083_v30 = vld [vmem:[%s6035_s22 + $0x50] sm:$0xff] }
 0x419   : > { %2201 = vmatpush.msrb.mxu2 %v2092_v50  ;;  %v2107_v33 = vld [vmem:[%s6035_s22 + $0x110] sm:$0xff] }
 0x41a   : > { %v2017_v3 = vpop.xlane.xlu2 %2016  ;;  %v1937_v47 = vpop.xlane.xlu0 %1936  ;;  %2143 = vmatpush.msrb.mxu0 %v2091_v42 }
 0x41b   : > { %v2019_v4 = vsub.f32 %v2011_v48, %v2017_v3  ;;  %v1939_v5 = vsub.f32 %v1931_v35, %v1937_v47  ;;  %v2136_v35 = vld [vmem:[%s6035_s22 + $0x1f8] sm:$0xff]  ;;  %v2133_v48 = vld [vmem:[%s6035_s22 + $0x1e0] sm:$0xff]  ;;  %2202 = vmatpush.msrb.mxu2 %v2090_v8 }
 0x41c   : > { %2144 = vmatpush.msrb.mxu0 %v2089_v52  ;;  %v2081_v3 = vld [vmem:[%s6035_s22 + $0x40] sm:$0xff] }
 0x41d   : > { %v6548_v6 = vpop.eup %4954  ;;  %v2022_v7 = vmul.f32 1.442695, %v2019_v4  ;;  %v1942_v9 = vmul.f32 1.442695, %v1939_v5  ;;  %2203 = vmatpush.msrb.mxu2 %v2088_v24 }
 0x41e   : > { %v6550_v10 = vpop.eup %4956  ;;  %v2024_v11 = vsel %vm1771_vm13, %v6548_v6, 0.0  ;;  %2145 = vmatpush.msrb.mxu0 %v2087_v45  ;;  %v2261_v45 = vld [vmem:[%s848_s26] sm:$0x3]  ;;  %s7991_s26 = scalar_lea.vmem [#allocation16], %s6006_s20 }
 0x41f   : > { %4958 = vpow2.f32 %v2022_v7  ;;  %2025 = vadd.xlane.f32.xlu2 %v2024_v11  ;;  %v1944_v13 = vsel %vm1771_vm13, %v6550_v10, 0.0  ;;  %v2082_v7 = vld [vmem:[%s6035_s22 + $0x48] sm:$0xff] }
 0x420   : > { %4960 = vpow2.f32 %v1942_v9  ;;  %1945 = vadd.xlane.f32.xlu0 %v1944_v13  ;;  %2146 = vmatpush.msrb.mxu0 %v2085_v46  ;;  %v2079_v13 = vld [vmem:[%s6035_s22 + $0x30] sm:$0xff] }
 0x422   : > { %2147 = vmatpush.msrb.mxu0 %v2083_v30 }
 0x424   : > { %2148 = vmatpush.msrb.mxu0 %v2081_v3 }
 0x425   : > { %v6556_v14 = vpop.eup %4958 }
 0x426   : > { %v6558_v15 = vpop.eup %4960  ;;  %v2027_v55 = vsel %vm1771_vm13, %v6556_v14, 0.0  ;;  %2149 = vmatpush.msrb.mxu0 %v2079_v13 }
 0x427   : > { %2028 = vadd.xlane.f32.xlu1 %v2027_v55  ;;  %v1947_v43 = vsel %vm1771_vm13, %v6558_v15, 0.0  ;;  %v2080_v55 = vld [vmem:[%s6035_s22 + $0x38] sm:$0xff] }
 0x428   : > { %1948 = vadd.xlane.f32.xlu2 %v1947_v43  ;;  %v2078_v43 = vld [vmem:[%s6035_s22 + $0x28] sm:$0xff] }
 0x475   : > { %v1786_v56 = vpop.xlane.xlu2 %1785 }
 0x476   : > { %4962 = vrcp.f32 %v1786_v56  ;;  %v2076_v56 = vld [vmem:[%s6035_s22 + $0x18] sm:$0xff] }
 0x47c   : > { %v4963_v17 = vpop.eup %4962 }
 0x47d   : > { %v1792_v39 = vmul.f32 %v4963_v17, %v4947_v37  ;;  %v2132_v37 = vld [vmem:[%s6035_s22 + $0x1d8] sm:$0xff] }
 0x47f   : > { %4777 = vmatmul.msk.f32.vlgmr.msrb.gmra.mxu1 %vm1771_vm13, %v1792_v39 }
 0x480   : > { %2166 = vmatpush.msrb.mxu1 %v2135_v31  ;;  %v2111_v31 = vld [vmem:[%s6035_s22 + $0x130] sm:$0xff] }
 0x482   : > { %v1866_v44 = vpop.xlane.xlu1 %1865  ;;  %2167 = vmatpush.msrb.mxu1 %v2133_v48  ;;  %v2110_v48 = vld [vmem:[%s6035_s22 + $0x128] sm:$0xff] }
 0x483   : > { %4964 = vrcp.f32 %v1866_v44 }
 0x484   : > { %2168 = vmatpush.msrb.mxu1 %v2131_v54  ;;  %v2106_v54 = vld [vmem:[%s6035_s22 + $0x108] sm:$0xff] }
 0x486   : > { %2169 = vmatpush.msrb.mxu1 %v2129_v38 }
 0x488   : > { %2170 = vmatpush.msrb.mxu1 %v2127_v63  ;;  %v5050_v63 = vld [vmem:[#allocation2 + $0x30] sm:$0xff] }
 0x489   : > { %v4965_v27 = vpop.eup %4964 }
 0x48a   : > { %v1872_v57 = vmul.f32 %v4965_v27, %v4949_v62  ;;  %v1869_v58 = vpop.xlane.xlu0 %1868  ;;  %2171 = vmatpush.msrb.mxu1 %v2125_v16  ;;  %v2120_v27 = vld [vmem:[%s6035_s22 + $0x178] sm:$0xff]  ;;  %v2264_v16 = vperm.slane %v2261_v45, 1 }
 0x48b   : > { %v1789_v19 = vpop.xlane.xlu1 %1788  ;;  %4966 = vrcp.f32 %v1869_v58  ;;  %v2115_v58 = vld [vmem:[%s6035_s22 + $0x150] sm:$0xff] }
 0x48c   : > { %4968 = vrcp.f32 %v1789_v19  ;;  %4779 = vmatmul.msk.f32.vlgmr.msrb.gmra.mxu3 %vm1771_vm13, %v1872_v57  ;;  %2172 = vmatpush.msrb.mxu1 %v2123_v21  ;;  %v2118_v57 = vld [vmem:[%s6035_s22 + $0x168] sm:$0xff]  ;;  %v2113_v19 = vld [vmem:[%s6035_s22 + $0x140] sm:$0xff]  ;;  %v5054_v21 = vld [vmem:[#allocation2 + $0x8] sm:$0xff] }
 0x48d   : > { %2224 = vmatpush.msrb.mxu3 %v2136_v35  ;;  %v2109_v35 = vld [vmem:[%s6035_s22 + $0x120] sm:$0xff] }
 0x48e   : > { %2173 = vmatpush.msrb.mxu1 %v2121_v25 }
 0x48f   : > { %2225 = vmatpush.msrb.mxu3 %v2134_v36  ;;  %v2108_v36 = vld [vmem:[%s6035_s22 + $0x118] sm:$0xff] }
 0x491   : > { %v4967_v51 = vpop.eup %4966  ;;  %2226 = vmatpush.msrb.mxu3 %v2132_v37 }
 0x492   : > { %v4969_v59 = vpop.eup %4968  ;;  %v2026_v60 = vpop.xlane.xlu2 %2025  ;;  %v1873_v61 = vmul.f32 %v4967_v51, %v6540_v12  ;;  %v2086_v12 = vld [vmem:[%s6035_s22 + $0x68] sm:$0xff] }
 0x493   : > { %4970 = vrcp.f32 %v2026_v60  ;;  %v1946_v62 = vpop.xlane.xlu0 %1945  ;;  %v1793_v23 = vmul.f32 %v4969_v59, %v6542_v1  ;;  %2227 = vmatpush.msrb.mxu3 %v2130_v53  ;;  %v2126_v1 = vld [vmem:[%s6035_s22 + $0x1a8] sm:$0xff]  ;;  %2204 = vmatpush.msrb.mxu2 %v2086_v12 }
 0x494   : > { %4972 = vrcp.f32 %v1946_v62  ;;  %4780 = vmatmul.msk.f32.gmra.mxu3 %vm1771_vm13, %v1873_v61 }
 0x495   : > { %4778 = vmatmul.msk.f32.gmra.mxu1 %vm1771_vm13, %v1793_v23  ;;  %2228 = vmatpush.msrb.mxu3 %v2128_v0  ;;  %v2263_v0 = vperm.slane %v2261_v45, 0 }
 0x496   : > { %2205 = vmatpush.msrb.mxu2 %v2084_v2 }
 0x497   : > { %2229 = vmatpush.msrb.mxu3 %v2126_v1  ;;  %v5051_v1 = vld [vmem:[#allocation2] sm:$0xff] }
 0x498   : > { %2206 = vmatpush.msrb.mxu2 %v2082_v7 }
 0x499   : > { %v4971_v49 = vpop.eup %4970 }
 0x49a   : > { %v4973_v47 = vpop.eup %4972  ;;  %v2032_v4 = vmul.f32 %v4971_v49, %v6548_v6  ;;  %v2029_v5 = vpop.xlane.xlu1 %2028  ;;  %v2077_v6 = vld [vmem:[%s6035_s22 + $0x20] sm:$0xff]  ;;  %2207 = vmatpush.msrb.mxu2 %v2080_v55 }
 0x49b   : > { %v1952_v9 = vmul.f32 %v4973_v47, %v6550_v10  ;;  %4974 = vrcp.f32 %v2029_v5  ;;  %v1949_v11 = vpop.xlane.xlu2 %1948  ;;  %v2075_v10 = vld [vmem:[%s6035_s22 + $0x10] sm:$0xff]  ;;  %2150 = vmatpush.msrb.mxu0 %v2077_v6 }
 0x49c   : > { %4976 = vrcp.f32 %v1949_v11  ;;  %4783 = vmatmul.msk.f32.vlgmr.msra.gmra.mxu3 %vm1771_vm13, %v2032_v4  ;;  %2208 = vmatpush.msrb.mxu2 %v2078_v43  ;;  %v5053_v43 = vld [vmem:[#allocation2 + $0x10] sm:$0xff] }
 0x49d   : > { %4781 = vmatmul.msk.f32.vlgmr.msra.gmra.mxu1 %vm1771_vm13, %v1952_v9  ;;  %2151 = vmatpush.msrb.mxu0 %v2075_v10  ;;  %v5052_v9 = vld [vmem:[#allocation2 + $0x18] sm:$0xff] }
 0x49e   : > { %2209 = vmatpush.msrb.mxu2 %v2076_v56 }
 0x49f   : > { %2152 = vmatpush.msrb.mxu0 %v2073_v40 }
 0x4a0   : > { %2210 = vmatpush.msrb.mxu2 %v2074_v22 }
 0x4a1   : > { %v4975_v17 = vpop.eup %4974 }
 0x4a2   : > { %v4977_v39 = vpop.eup %4976  ;;  %v2033_v44 = vmul.f32 %v4975_v17, %v6556_v14  ;;  %v2124_v14 = vld [vmem:[%s6035_s22 + $0x198] sm:$0xff] }
 0x4a3   : > { %v1953_v20 = vmul.f32 %v4977_v39, %v6558_v15  ;;  %2230 = vmatpush.msrb.mxu3 %v2124_v14  ;;  %v2119_v15 = vld [vmem:[%s6035_s22 + $0x170] sm:$0xff]  ;;  %s7990_s22 = scalar_lea.vmem [#allocation15], %s6006_s20  ;;  %s7993_s20 = sld [smem:[#allocation41_spill]] }
 0x4a4   : > { %4784 = vmatmul.msk.f32.gmra.mxu3 %vm1771_vm13, %v2033_v44  ;;  %2174 = vmatpush.msrb.mxu1 %v2119_v15 }
 0x4a5   : > { %4782 = vmatmul.msk.f32.gmra.mxu1 %vm1771_vm13, %v1953_v20  ;;  %2231 = vmatpush.msrb.mxu3 %v2122_v26  ;;  %v5055_v26 = vld [vmem:[#allocation2 + $0x20] sm:$0xff] }
 0x4a6   : > { %2175 = vmatpush.msrb.mxu1 %v2117_v28 }
 0x4a7   : > { %2232 = vmatpush.msrb.mxu3 %v2120_v27 }
 0x4a8   : > { %2176 = vmatpush.msrb.mxu1 %v2115_v58 }
 0x4a9   : > { %2233 = vmatpush.msrb.mxu3 %v2118_v57  ;;  %p4785_p4 = scmp.ne.s32.totalorder %s7993_s20, 1 }
 0x4aa   : > { %2177 = vmatpush.msrb.mxu1 %v2113_v19 }
 0x4ab   : > { %2234 = vmatpush.msrb.mxu3 %v2116_v18 }
 0x4ac   : > { %2178 = vmatpush.msrb.mxu1 %v2111_v31  ;;  %v5056_v31 = vld [vmem:[#allocation2 + $0x28] sm:$0xff] }
 0x4ad   : > { %2235 = vmatpush.msrb.mxu3 %v2114_v29 }
 0x4ae   : > { %2179 = vmatpush.msrb.mxu1 %v2109_v35 }
 0x4af   : > { %2236 = vmatpush.msrb.mxu3 %v2112_v32 }
 0x4b0   : > { %2180 = vmatpush.msrb.mxu1 %v2107_v33 }
 0x4b1   : > { %2237 = vmatpush.msrb.mxu3 %v2110_v48  ;;  %v5057_v48 = vld [vmem:[#allocation2 + $0x38] sm:$0xff] }
 0x4b2   : > { %2181 = vmatpush.msrb.mxu1 %v2105_v41 }
 0x4b3   : > { %2238 = vmatpush.msrb.mxu3 %v2108_v36 }
 0x4b5   : > { %2239 = vmatpush.msrb.mxu3 %v2106_v54 }
 0x4fc   : > { %v1817_v42 = vpop.f32.mrf.mxu1 }
 0x4fd   : > { %2153 = vmatmul.f32.vlgmr.msrb.gmra.mxu0 %v1817_v42  ;;  %2211 = vmatmul.f32.vlgmr.msrb.gmra.mxu2 %v1817_v42 }
 0x50f   : > { %v1897_v37 = vpop.f32.mrf.mxu3 }
 0x510   : > { %2182 = vmatmul.f32.vlgmr.msrb.gmra.mxu1 %v1897_v37  ;;  %2240 = vmatmul.f32.vlgmr.msrb.gmra.mxu3 %v1897_v37 }
 0x512   : > { %v1820_v50 = vpop.f32.mrf.mxu1 }
 0x513   : > { %2156 = vmatmul.f32.gmra.mxu0 %v1820_v50  ;;  %2214 = vmatmul.f32.gmra.mxu2 %v1820_v50  ;;  %v2523_v50 = vld [vmem:[%s6052_s30 + $0x3c0] sm:$0xff] }
 0x514   : > { %2677 = vmatpush.msra.mxu0 %v2523_v50  ;;  %v2595_v50 = vld [vmem:[%s6052_s30 + $0x600] sm:$0xff] }
 0x517   : > { %v1900_v38 = vpop.f32.mrf.mxu3 }
 0x518   : > { %2185 = vmatmul.f32.gmra.mxu1 %v1900_v38  ;;  %2243 = vmatmul.f32.gmra.mxu3 %v1900_v38  ;;  %v2651_v38 = vld [vmem:[%s6052_s30 + $0x7c0] sm:$0xff] }
 0x519   : > { %2706 = vmatpush.msra.mxu1 %v2651_v38  ;;  %v2468_v38 = vld [vmem:[%s6052_s30 + $0x208] sm:$0xff] }
 0x51a   : > { %v1977_v51 = vpop.f32.mrf.mxu1 }
 0x51b   : > { %2159 = vmatmul.f32.gmra.mxu0 %v1977_v51  ;;  %2217 = vmatmul.f32.gmra.mxu2 %v1977_v51  ;;  %v2524_v51 = vld [vmem:[%s6052_s30 + $0x3c8] sm:$0xff] }
 0x51c   : > { %2735 = vmatpush.msra.mxu2 %v2524_v51  ;;  %v2596_v51 = vld [vmem:[%s6052_s30 + $0x608] sm:$0xff] }
 0x51f   : > { %v2057_v52 = vpop.f32.mrf.mxu3 }
 0x520   : > { %2188 = vmatmul.f32.gmra.mxu1 %v2057_v52  ;;  %2246 = vmatmul.f32.gmra.mxu3 %v2057_v52  ;;  %v2652_v52 = vld [vmem:[%s6052_s30 + $0x7c8] sm:$0xff] }
 0x521   : > { %2764 = vmatpush.msra.mxu3 %v2652_v52  ;;  %v2459_v52 = vld [vmem:[%s6052_s30 + $0x1c0] sm:$0xff] }
 0x522   : > { %v1980_v59 = vpop.f32.mrf.mxu1 }
 0x523   : > { %2162 = vmatmul.f32.gmra.mxu0 %v1980_v59  ;;  %2220 = vmatmul.f32.gmra.mxu2 %v1980_v59  ;;  %v2515_v59 = vld [vmem:[%s6052_s30 + $0x380] sm:$0xff] }
 0x524   : > { %2678 = vmatpush.msra.mxu0 %v2515_v59  ;;  %v2587_v59 = vld [vmem:[%s6052_s30 + $0x5c0] sm:$0xff] }
 0x527   : > { %v2060_v60 = vpop.f32.mrf.mxu3 }
 0x528   : > { %2191 = vmatmul.f32.gmra.mxu1 %v2060_v60  ;;  %2249 = vmatmul.f32.gmra.mxu3 %v2060_v60  ;;  %v2643_v60 = vld [vmem:[%s6052_s30 + $0x780] sm:$0xff] }
 0x529   : > { %2707 = vmatpush.msra.mxu1 %v2643_v60  ;;  %v2460_v60 = vld [vmem:[%s6052_s30 + $0x1c8] sm:$0xff] }
 0x57a   : > { %v2154_v61 = vpop.f32.mrf.mxu0 }
 0x580   : > { %v2212_v62 = vpop.f32.mrf.mxu2 }
 0x58d   : > { %v2183_v8 = vpop.f32.mrf.mxu1 }
 0x58e   : > { %v2184_v23 = vadd.f32 %v2183_v8, %v2154_v61 }
 0x590   : > { %v2157_v53 = vpop.f32.mrf.mxu0  ;;  %v2253_v46 = vadd.f32 %v5050_v63, %v2184_v23  ;;  %v2644_v23 = vld [vmem:[%s6052_s30 + $0x788] sm:$0xff] }
 0x591   : > { %2765 = vmatpush.msra.mxu3 %v2644_v23  ;;  %v2451_v23 = vld [vmem:[%s6052_s30 + $0x180] sm:$0xff] }
 0x592   : > { %v6644_v3 = vadd.f32 %v2263_v0, %v2253_v46 }
 0x593   : > { %v2241_v24 = vpop.f32.mrf.mxu3 }
 0x594   : > { %v2242_v12 = vadd.f32 %v2241_v24, %v2212_v62  ;;  %v2516_v62 = vld [vmem:[%s6052_s30 + $0x388] sm:$0xff] }
 0x595   : > { %v2186_v30 = vpop.f32.mrf.mxu1  ;;  %2736 = vmatpush.msra.mxu2 %v2516_v62  ;;  %v2588_v62 = vld [vmem:[%s6052_s30 + $0x5c8] sm:$0xff] }
 0x596   : > { %v2254_v2 = vadd.f32 %v5051_v1, %v2242_v12  ;;  %v2215_v49 = vpop.f32.mrf.mxu2  ;;  %v2187_v4 = vadd.f32 %v2186_v30, %v2157_v53 }
 0x598   : > { %v6646_v47 = vadd.f32 %v2264_v16, %v2254_v2  ;;  %v2255_v11 = vadd.f32 %v5052_v9, %v2187_v4  ;;  %v2160_v55 = vpop.f32.mrf.mxu0 }
 0x59a   : > { %v2277_v5 = vadd.f32 %v6646_v47, %v6644_v3  ;;  %v6650_v56 = vadd.f32 %v2263_v0, %v2255_v11 }
 0x59b   : > { %v2244_v7 = vpop.f32.mrf.mxu3 }
 0x59c   : > { %v2245_v13 = vadd.f32 %v2244_v7, %v2215_v49  ;;  %2278 = vadd.xlane.f32.xlu0 %v2277_v5 }
 0x59d   : > { %v2189_v6 = vpop.f32.mrf.mxu1 }
 0x59e   : > { %v2256_v10 = vadd.f32 %v5053_v43, %v2245_v13  ;;  %v2190_v39 = vadd.f32 %v2189_v6, %v2160_v55  ;;  %v2218_v44 = vpop.f32.mrf.mxu2 }
 0x5a0   : > { %v6652_v17 = vadd.f32 %v2264_v16, %v2256_v10  ;;  %v2257_v22 = vadd.f32 %v5054_v21, %v2190_v39  ;;  %v2163_v27 = vpop.f32.mrf.mxu0  ;;  %v2508_v21 = vld [vmem:[%s6052_s30 + $0x348] sm:$0xff] }
 0x5a1   : > { %2737 = vmatpush.msra.mxu2 %v2508_v21  ;;  %v2539_v21 = vld [vmem:[%s6052_s30 + $0x440] sm:$0xff] }
 0x5a2   : > { %v2280_v20 = vadd.f32 %v6652_v17, %v6650_v56  ;;  %v6656_v28 = vadd.f32 %v2263_v0, %v2257_v22  ;;  %v2636_v22 = vld [vmem:[%s6052_s30 + $0x748] sm:$0xff] }
 0x5a3   : > { %v2247_v40 = vpop.f32.mrf.mxu3  ;;  %2766 = vmatpush.msra.mxu3 %v2636_v22  ;;  %v2412_v22 = vld [vmem:[%s6052_s30 + $0x48] sm:$0xff] }
 0x5a4   : > { %v2248_v14 = vadd.f32 %v2247_v40, %v2218_v44  ;;  %2281 = vadd.xlane.f32.xlu1 %v2280_v20  ;;  %v2507_v20 = vld [vmem:[%s6052_s30 + $0x340] sm:$0xff] }
 0x5a5   : > { %v2192_v25 = vpop.f32.mrf.mxu1  ;;  %v2635_v40 = vld [vmem:[%s6052_s30 + $0x740] sm:$0xff]  ;;  %2679 = vmatpush.msra.mxu0 %v2507_v20  ;;  %v2548_v20 = vld [vmem:[%s6052_s30 + $0x488] sm:$0xff] }
 0x5a6   : > { %v2258_v15 = vadd.f32 %v5055_v26, %v2248_v14  ;;  %v2193_v58 = vadd.f32 %v2192_v25, %v2163_v27  ;;  %v2221_v19 = vpop.f32.mrf.mxu2  ;;  %2708 = vmatpush.msra.mxu1 %v2635_v40  ;;  %v2499_v14 = vld [vmem:[%s6052_s30 + $0x300] sm:$0xff]  ;;  %v2500_v26 = vld [vmem:[%s6052_s30 + $0x308] sm:$0xff] }
 0x5a7   : > { %v2627_v25 = vld [vmem:[%s6052_s30 + $0x700] sm:$0xff]  ;;  %2680 = vmatpush.msra.mxu0 %v2499_v14  ;;  %2738 = vmatpush.msra.mxu2 %v2500_v26  ;;  %v2540_v14 = vld [vmem:[%s6052_s30 + $0x448] sm:$0xff] }
 0x5a8   : > { %v6658_v57 = vadd.f32 %v2264_v16, %v2258_v15  ;;  %v2259_v32 = vadd.f32 %v5056_v31, %v2193_v58  ;;  %2709 = vmatpush.msra.mxu1 %v2627_v25  ;;  %v2628_v15 = vld [vmem:[%s6052_s30 + $0x708] sm:$0xff]  ;;  %v2491_v27 = vld [vmem:[%s6052_s30 + $0x2c0] sm:$0xff] }
 0x5a9   : > { %2767 = vmatpush.msra.mxu3 %v2628_v15  ;;  %v2619_v58 = vld [vmem:[%s6052_s30 + $0x6c0] sm:$0xff]  ;;  %2681 = vmatpush.msra.mxu0 %v2491_v27  ;;  %v2404_v15 = vld [vmem:[%s6052_s30 + $0x8] sm:$0xff] }
 0x5aa   : > { %v2283_v18 = vadd.f32 %v6658_v57, %v6656_v28  ;;  %v6662_v36 = vadd.f32 %v2263_v0, %v2259_v32  ;;  %2710 = vmatpush.msra.mxu1 %v2619_v58  ;;  %v2611_v31 = vld [vmem:[%s6052_s30 + $0x680] sm:$0xff]  ;;  %v2484_v32 = vld [vmem:[%s6052_s30 + $0x288] sm:$0xff]  ;;  %v2525_v58 = vld [vmem:[%s6052_s30 + $0x3d0] sm:$0xff] }
 0x5ab   : > { %v2250_v29 = vpop.f32.mrf.mxu3  ;;  %v2411_v40 = vld [vmem:[%s6052_s30 + $0x40] sm:$0xff]  ;;  %v2532_v27 = vld [vmem:[%s6052_s30 + $0x408] sm:$0xff] }
 0x5ac   : > { %v2251_v35 = vadd.f32 %v2250_v29, %v2221_v19  ;;  %2284 = vadd.xlane.f32.xlu2 %v2283_v18  ;;  %v2492_v18 = vld [vmem:[%s6052_s30 + $0x2c8] sm:$0xff]  ;;  %v2483_v29 = vld [vmem:[%s6052_s30 + $0x280] sm:$0xff]  ;;  %2711 = vmatpush.msra.mxu1 %v2611_v31 }
 0x5ad   : > { %v2620_v19 = vld [vmem:[%s6052_s30 + $0x6c8] sm:$0xff]  ;;  %2739 = vmatpush.msra.mxu2 %v2492_v18  ;;  %2682 = vmatpush.msra.mxu0 %v2483_v29  ;;  %v2403_v25 = vld [vmem:[%s6052_s30] sm:$0xff]  ;;  %v2653_v18 = vld [vmem:[%s6052_s30 + $0x7d0] sm:$0xff] }
 0x5ae   : > { %v2260_v33 = vadd.f32 %v5057_v48, %v2251_v35  ;;  %2768 = vmatpush.msra.mxu3 %v2620_v19  ;;  %v2612_v35 = vld [vmem:[%s6052_s30 + $0x688] sm:$0xff]  ;;  %v2475_v48 = vld [vmem:[%s6052_s30 + $0x240] sm:$0xff]  ;;  %v2526_v19 = vld [vmem:[%s6052_s30 + $0x3d8] sm:$0xff] }
 0x5af   : > { %2740 = vmatpush.msra.mxu2 %v2484_v32  ;;  %2683 = vmatpush.msra.mxu0 %v2475_v48  ;;  %v2531_v26 = vld [vmem:[%s6052_s30 + $0x400] sm:$0xff]  ;;  %v2654_v29 = vld [vmem:[%s6052_s30 + $0x7d8] sm:$0xff]  ;;  %v2517_v32 = vld [vmem:[%s6052_s30 + $0x390] sm:$0xff] }
 0x5b0   : > { %v6664_v41 = vadd.f32 %v2264_v16, %v2260_v33  ;;  %2769 = vmatpush.msra.mxu3 %v2612_v35  ;;  %v2603_v33 = vld [vmem:[%s6052_s30 + $0x640] sm:$0xff]  ;;  %v2645_v35 = vld [vmem:[%s6052_s30 + $0x790] sm:$0xff]  ;;  %v2518_v48 = vld [vmem:[%s6052_s30 + $0x398] sm:$0xff] }
 0x5b1   : > { %2712 = vmatpush.msra.mxu1 %v2603_v33 }
 0x5b2   : > { %v2286_v54 = vadd.f32 %v6664_v41, %v6662_v36 }
 0x5b3   : > { %2713 = vmatpush.msra.mxu1 %v2595_v50  ;;  %v2510_v50 = vld [vmem:[%s6052_s30 + $0x358] sm:$0xff] }
 0x5b4   : > { %2287 = vadd.xlane.f32.xlu0 %v2286_v54  ;;  %v2476_v54 = vld [vmem:[%s6052_s30 + $0x248] sm:$0xff] }
 0x5b5   : > { %2741 = vmatpush.msra.mxu2 %v2476_v54  ;;  %2714 = vmatpush.msra.mxu1 %v2587_v59  ;;  %v2646_v54 = vld [vmem:[%s6052_s30 + $0x798] sm:$0xff]  ;;  %v2629_v59 = vld [vmem:[%s6052_s30 + $0x710] sm:$0xff] }
 0x5b7   : > { %2742 = vmatpush.msra.mxu2 %v2468_v38 }
 0x5b9   : > { %2743 = vmatpush.msra.mxu2 %v2460_v60  ;;  %v2502_v60 = vld [vmem:[%s6052_s30 + $0x318] sm:$0xff] }
 0x60f   : > { %v2279_v42 = vpop.xlane.xlu0 %2278 }
 0x610   : > { %v2289_v37 = vmul.f32 %v2279_v42, %v6111_v34  ;;  %v2604_v42 = vld [vmem:[%s6052_s30 + $0x648] sm:$0xff] }
 0x611   : > { %2770 = vmatpush.msra.mxu3 %v2604_v42  ;;  %v2509_v42 = vld [vmem:[%s6052_s30 + $0x350] sm:$0xff] }
 0x612   : > { %v6676_v61 = vsub.f32 %v6644_v3, %v2289_v37  ;;  %v6679_v8 = vsub.f32 %v6646_v47, %v2289_v37  ;;  %v2467_v37 = vld [vmem:[%s6052_s30 + $0x200] sm:$0xff] }
 0x613   : > { %2684 = vmatpush.msra.mxu0 %v2467_v37  ;;  %2771 = vmatpush.msra.mxu3 %v2596_v51  ;;  %v2637_v37 = vld [vmem:[%s6052_s30 + $0x750] sm:$0xff]  ;;  %v2638_v51 = vld [vmem:[%s6052_s30 + $0x758] sm:$0xff] }
 0x614   : > { %v2301_v45 = vmul.f32 %v6676_v61, %v6676_v61  ;;  %v2302_v53 = vmul.f32 %v6679_v8, %v6679_v8 }
 0x615   : > { %2685 = vmatpush.msra.mxu0 %v2459_v52  ;;  %2772 = vmatpush.msra.mxu3 %v2588_v62  ;;  %v2501_v52 = vld [vmem:[%s6052_s30 + $0x310] sm:$0xff]  ;;  %v2630_v62 = vld [vmem:[%s6052_s30 + $0x718] sm:$0xff] }
 0x616   : > { %v2309_v24 = vadd.f32 %v2302_v53, %v2301_v45  ;;  %v2579_v45 = vld [vmem:[%s6052_s30 + $0x580] sm:$0xff]  ;;  %v2452_v53 = vld [vmem:[%s6052_s30 + $0x188] sm:$0xff] }
 0x617   : > { %v2282_v63 = vpop.xlane.xlu1 %2281  ;;  %2686 = vmatpush.msra.mxu0 %v2451_v23  ;;  %2715 = vmatpush.msra.mxu1 %v2579_v45  ;;  %v2493_v23 = vld [vmem:[%s6052_s30 + $0x2d0] sm:$0xff] }
 0x618   : > { %v2290_v46 = vmul.f32 %v2282_v63, %v6111_v34  ;;  %2310 = vadd.xlane.f32.xlu1 %v2309_v24  ;;  %v2580_v24 = vld [vmem:[%s6052_s30 + $0x588] sm:$0xff]  ;;  %2744 = vmatpush.msra.mxu2 %v2452_v53  ;;  %v2443_v63 = vld [vmem:[%s6052_s30 + $0x140] sm:$0xff]  ;;  %v2621_v45 = vld [vmem:[%s6052_s30 + $0x6d0] sm:$0xff] }
 0x619   : > { %2773 = vmatpush.msra.mxu3 %v2580_v24  ;;  %2687 = vmatpush.msra.mxu0 %v2443_v63  ;;  %v2494_v53 = vld [vmem:[%s6052_s30 + $0x2d8] sm:$0xff] }
 0x61a   : > { %v6689_v0 = vsub.f32 %v6650_v56, %v2290_v46  ;;  %v6692_v12 = vsub.f32 %v6652_v17, %v2290_v46  ;;  %v2571_v46 = vld [vmem:[%s6052_s30 + $0x540] sm:$0xff]  ;;  %v2622_v24 = vld [vmem:[%s6052_s30 + $0x6d8] sm:$0xff] }
 0x61b   : > { %2716 = vmatpush.msra.mxu1 %v2571_v46  ;;  %v2485_v46 = vld [vmem:[%s6052_s30 + $0x290] sm:$0xff] }
 0x61c   : > { %v2303_v16 = vmul.f32 %v6689_v0, %v6689_v0  ;;  %v2304_v30 = vmul.f32 %v6692_v12, %v6692_v12 }
 0x61e   : > { %v2312_v1 = vadd.f32 %v2304_v30, %v2303_v16  ;;  %v2444_v16 = vld [vmem:[%s6052_s30 + $0x148] sm:$0xff] }
 0x61f   : > { %v2285_v2 = vpop.xlane.xlu2 %2284  ;;  %v2572_v30 = vld [vmem:[%s6052_s30 + $0x548] sm:$0xff]  ;;  %2745 = vmatpush.msra.mxu2 %v2444_v16  ;;  %v2613_v16 = vld [vmem:[%s6052_s30 + $0x690] sm:$0xff] }
 0x620   : > { %v2291_v49 = vmul.f32 %v2285_v2, %v6111_v34  ;;  %2313 = vadd.xlane.f32.xlu2 %v2312_v1  ;;  %2774 = vmatpush.msra.mxu3 %v2572_v30  ;;  %v2435_v1 = vld [vmem:[%s6052_s30 + $0x100] sm:$0xff]  ;;  %v2486_v30 = vld [vmem:[%s6052_s30 + $0x298] sm:$0xff] }
 0x621   : > { %v2563_v2 = vld [vmem:[%s6052_s30 + $0x500] sm:$0xff]  ;;  %2688 = vmatpush.msra.mxu0 %v2435_v1 }
 0x622   : > { %v6700_v4 = vsub.f32 %v6656_v28, %v2291_v49  ;;  %v6703_v5 = vsub.f32 %v6658_v57, %v2291_v49  ;;  %v2436_v49 = vld [vmem:[%s6052_s30 + $0x108] sm:$0xff]  ;;  %2717 = vmatpush.msra.mxu1 %v2563_v2  ;;  %v2614_v2 = vld [vmem:[%s6052_s30 + $0x698] sm:$0xff] }
 0x623   : > { %2746 = vmatpush.msra.mxu2 %v2436_v49  ;;  %v2477_v49 = vld [vmem:[%s6052_s30 + $0x250] sm:$0xff] }
 0x624   : > { %v2305_v7 = vmul.f32 %v6700_v4, %v6700_v4  ;;  %v2306_v9 = vmul.f32 %v6703_v5, %v6703_v5 }
 0x626   : > { %v2315_v11 = vadd.f32 %v2306_v9, %v2305_v7  ;;  %v2564_v7 = vld [vmem:[%s6052_s30 + $0x508] sm:$0xff]  ;;  %v2427_v9 = vld [vmem:[%s6052_s30 + $0xc0] sm:$0xff] }
 0x627   : > { %v2288_v13 = vpop.xlane.xlu0 %2287  ;;  %2775 = vmatpush.msra.mxu3 %v2564_v7  ;;  %2689 = vmatpush.msra.mxu0 %v2427_v9  ;;  %v2605_v7 = vld [vmem:[%s6052_s30 + $0x650] sm:$0xff]  ;;  %v2478_v9 = vld [vmem:[%s6052_s30 + $0x258] sm:$0xff] }
 0x628   : > { %v2292_v55 = vmul.f32 %v2288_v13, %v6111_v34  ;;  %2316 = vadd.xlane.f32.xlu0 %v2315_v11  ;;  %v2555_v11 = vld [vmem:[%s6052_s30 + $0x4c0] sm:$0xff]  ;;  %v2428_v13 = vld [vmem:[%s6052_s30 + $0xc8] sm:$0xff] }
 0x629   : > { %2718 = vmatpush.msra.mxu1 %v2555_v11  ;;  %2747 = vmatpush.msra.mxu2 %v2428_v13 }
 0x62a   : > { %v6711_v6 = vsub.f32 %v6662_v36, %v2292_v55  ;;  %v6714_v43 = vsub.f32 %v6664_v41, %v2292_v55  ;;  %v2556_v55 = vld [vmem:[%s6052_s30 + $0x4c8] sm:$0xff] }
 0x62b   : > { %2776 = vmatpush.msra.mxu3 %v2556_v55  ;;  %v2606_v55 = vld [vmem:[%s6052_s30 + $0x658] sm:$0xff] }
 0x62c   : > { %v2307_v10 = vmul.f32 %v6711_v6, %v6711_v6  ;;  %v2308_v39 = vmul.f32 %v6714_v43, %v6714_v43 }
 0x62d   : > { %2777 = vmatpush.msra.mxu3 %v2548_v20  ;;  %v2470_v20 = vld [vmem:[%s6052_s30 + $0x218] sm:$0xff] }
 0x62e   : > { %v2318_v44 = vadd.f32 %v2308_v39, %v2307_v10  ;;  %v2419_v10 = vld [vmem:[%s6052_s30 + $0x80] sm:$0xff] }
 0x62f   : > { %v2547_v39 = vld [vmem:[%s6052_s30 + $0x480] sm:$0xff]  ;;  %2690 = vmatpush.msra.mxu0 %v2419_v10  ;;  %2778 = vmatpush.msra.mxu3 %v2540_v14  ;;  %v2589_v14 = vld [vmem:[%s6052_s30 + $0x5d0] sm:$0xff] }
 0x630   : > { %2319 = vadd.xlane.f32.xlu1 %v2318_v44  ;;  %v2420_v44 = vld [vmem:[%s6052_s30 + $0x88] sm:$0xff]  ;;  %2719 = vmatpush.msra.mxu1 %v2547_v39  ;;  %v2469_v39 = vld [vmem:[%s6052_s30 + $0x210] sm:$0xff] }
 0x631   : > { %2748 = vmatpush.msra.mxu2 %v2420_v44  ;;  %2691 = vmatpush.msra.mxu0 %v2411_v40  ;;  %v2597_v44 = vld [vmem:[%s6052_s30 + $0x610] sm:$0xff]  ;;  %v2598_v40 = vld [vmem:[%s6052_s30 + $0x618] sm:$0xff] }
 0x632   : > { %2720 = vmatpush.msra.mxu1 %v2539_v21  ;;  %2779 = vmatpush.msra.mxu3 %v2532_v27 }
 0x633   : > { %2749 = vmatpush.msra.mxu2 %v2412_v22  ;;  %2692 = vmatpush.msra.mxu0 %v2403_v25  ;;  %v2461_v22 = vld [vmem:[%s6052_s30 + $0x1d0] sm:$0xff]  ;;  %v2462_v25 = vld [vmem:[%s6052_s30 + $0x1d8] sm:$0xff] }
 0x634   : > { %2721 = vmatpush.msra.mxu1 %v2531_v26  ;;  %2880 = vmatpush.msrb.mxu3 %v2654_v29  ;;  %v2590_v26 = vld [vmem:[%s6052_s30 + $0x5d8] sm:$0xff] }
 0x635   : > { %2750 = vmatpush.msra.mxu2 %v2404_v15  ;;  %2793 = vmatpush.msrb.mxu0 %v2525_v58  ;;  %v2453_v58 = vld [vmem:[%s6052_s30 + $0x190] sm:$0xff]  ;;  %v2275_v29 = vld [vmem:[%s7990_s22] sm:$0x3] }
 0x636   : > { %2822 = vmatpush.msrb.mxu1 %v2653_v18  ;;  %2881 = vmatpush.msrb.mxu3 %v2646_v54  ;;  %v2581_v18 = vld [vmem:[%s6052_s30 + $0x590] sm:$0xff]  ;;  %v2446_v54 = vld [vmem:[%s6052_s30 + $0x158] sm:$0xff] }
 0x637   : > { %2851 = vmatpush.msrb.mxu2 %v2526_v19  ;;  %2794 = vmatpush.msrb.mxu0 %v2517_v32  ;;  %v2454_v19 = vld [vmem:[%s6052_s30 + $0x198] sm:$0xff] }
 0x638   : > { %2823 = vmatpush.msrb.mxu1 %v2645_v35  ;;  %2882 = vmatpush.msrb.mxu3 %v2638_v51  ;;  %v2582_v32 = vld [vmem:[%s6052_s30 + $0x598] sm:$0xff]  ;;  %v2437_v51 = vld [vmem:[%s6052_s30 + $0x110] sm:$0xff] }
 0x639   : > { %2852 = vmatpush.msrb.mxu2 %v2518_v48  ;;  %2795 = vmatpush.msrb.mxu0 %v2509_v42  ;;  %v2445_v48 = vld [vmem:[%s6052_s30 + $0x150] sm:$0xff] }
 0x63a   : > { %2824 = vmatpush.msrb.mxu1 %v2637_v37  ;;  %2883 = vmatpush.msrb.mxu3 %v2630_v62 }
 0x63b   : > { %2853 = vmatpush.msrb.mxu2 %v2510_v50  ;;  %2796 = vmatpush.msrb.mxu0 %v2501_v52  ;;  %v2574_v50 = vld [vmem:[%s6052_s30 + $0x558] sm:$0xff]  ;;  %v2565_v52 = vld [vmem:[%s6052_s30 + $0x510] sm:$0xff] }
 0x63c   : > { %2825 = vmatpush.msrb.mxu1 %v2629_v59  ;;  %2884 = vmatpush.msrb.mxu3 %v2622_v24  ;;  %v2276_v59 = vld [vmem:[%s7991_s26] sm:$0x3]  ;;  %v6853_v24 = vperm.slane %v2275_v29, 1 }
 0x63d   : > { %2854 = vmatpush.msrb.mxu2 %v2502_v60  ;;  %2797 = vmatpush.msrb.mxu0 %v2493_v23  ;;  %v2438_v23 = vld [vmem:[%s6052_s30 + $0x118] sm:$0xff] }
 0x63e   : > { %2826 = vmatpush.msrb.mxu1 %v2621_v45  ;;  %2885 = vmatpush.msrb.mxu3 %v2614_v2  ;;  %v2566_v45 = vld [vmem:[%s6052_s30 + $0x518] sm:$0xff]  ;;  %v6865_v2 = vperm.slane %v2276_v59, 1 }
 0x63f   : > { %2855 = vmatpush.msrb.mxu2 %v2494_v53  ;;  %2798 = vmatpush.msrb.mxu0 %v2485_v46  ;;  %v6851_v53 = vperm.slane %v2275_v29, 0  ;;  %v2429_v46 = vld [vmem:[%s6052_s30 + $0xd0] sm:$0xff] }
 0x640   : > { %2827 = vmatpush.msrb.mxu1 %v2613_v16  ;;  %2886 = vmatpush.msrb.mxu3 %v2606_v55  ;;  %v2557_v16 = vld [vmem:[%s6052_s30 + $0x4d0] sm:$0xff] }
 0x641   : > { %2856 = vmatpush.msrb.mxu2 %v2486_v30  ;;  %2799 = vmatpush.msrb.mxu0 %v2477_v49  ;;  %v2430_v30 = vld [vmem:[%s6052_s30 + $0xd8] sm:$0xff]  ;;  %v2549_v55 = vld [vmem:[%s6052_s30 + $0x490] sm:$0xff] }
 0x642   : > { %2828 = vmatpush.msrb.mxu1 %v2605_v7  ;;  %2887 = vmatpush.msrb.mxu3 %v2598_v40  ;;  %v2413_v40 = vld [vmem:[%s6052_s30 + $0x50] sm:$0xff] }
 0x643   : > { %2857 = vmatpush.msrb.mxu2 %v2478_v9  ;;  %2800 = vmatpush.msrb.mxu0 %v2469_v39  ;;  %v2558_v9 = vld [vmem:[%s6052_s30 + $0x4d8] sm:$0xff] }
 0x644   : > { %2829 = vmatpush.msrb.mxu1 %v2597_v44  ;;  %2888 = vmatpush.msrb.mxu3 %v2590_v26  ;;  %v2422_v44 = vld [vmem:[%s6052_s30 + $0x98] sm:$0xff] }
 0x645   : > { %2858 = vmatpush.msrb.mxu2 %v2470_v20  ;;  %2801 = vmatpush.msrb.mxu0 %v2461_v22  ;;  %v2550_v20 = vld [vmem:[%s6052_s30 + $0x498] sm:$0xff]  ;;  %v2541_v22 = vld [vmem:[%s6052_s30 + $0x450] sm:$0xff] }
 0x646   : > { %2830 = vmatpush.msrb.mxu1 %v2589_v14  ;;  %2889 = vmatpush.msrb.mxu3 %v2582_v32  ;;  %v2414_v14 = vld [vmem:[%s6052_s30 + $0x58] sm:$0xff]  ;;  %v2533_v32 = vld [vmem:[%s6052_s30 + $0x410] sm:$0xff] }
 0x647   : > { %2859 = vmatpush.msrb.mxu2 %v2462_v25  ;;  %2802 = vmatpush.msrb.mxu0 %v2453_v58  ;;  %v2542_v25 = vld [vmem:[%s6052_s30 + $0x458] sm:$0xff] }
 0x648   : > { %2831 = vmatpush.msrb.mxu1 %v2581_v18  ;;  %2890 = vmatpush.msrb.mxu3 %v2574_v50  ;;  %v2655_v50 = vld [vmem:[%s6052_s30 + $0x7e0] sm:$0xff] }
 0x649   : > { %2860 = vmatpush.msrb.mxu2 %v2454_v19  ;;  %2803 = vmatpush.msrb.mxu0 %v2445_v48 }
 0x64a   : > { %2891 = vmatpush.msrb.mxu3 %v2566_v45 }
 0x64b   : > { %2861 = vmatpush.msrb.mxu2 %v2446_v54  ;;  %2804 = vmatpush.msrb.mxu0 %v2437_v51  ;;  %v2527_v54 = vld [vmem:[%s6052_s30 + $0x3e0] sm:$0xff] }
 0x64c   : > { %2892 = vmatpush.msrb.mxu3 %v2558_v9  ;;  %v2511_v9 = vld [vmem:[%s6052_s30 + $0x360] sm:$0xff] }
 0x64d   : > { %2862 = vmatpush.msrb.mxu2 %v2438_v23  ;;  %2805 = vmatpush.msrb.mxu0 %v2429_v46  ;;  %v2647_v23 = vld [vmem:[%s6052_s30 + $0x7a0] sm:$0xff] }
 0x64e   : > { %2893 = vmatpush.msrb.mxu3 %v2550_v20  ;;  %v2631_v20 = vld [vmem:[%s6052_s30 + $0x720] sm:$0xff] }
 0x64f   : > { %2863 = vmatpush.msrb.mxu2 %v2430_v30 }
 0x650   : > { %2894 = vmatpush.msrb.mxu3 %v2542_v25  ;;  %v2623_v25 = vld [vmem:[%s6052_s30 + $0x6e0] sm:$0xff] }
 0x651   : > { %2864 = vmatpush.msrb.mxu2 %v2422_v44  ;;  %v2503_v44 = vld [vmem:[%s6052_s30 + $0x320] sm:$0xff] }
 0x653   : > { %2865 = vmatpush.msrb.mxu2 %v2414_v14  ;;  %v2495_v14 = vld [vmem:[%s6052_s30 + $0x2e0] sm:$0xff] }
 0x68b   : > { %v2311_v31 = vpop.xlane.xlu1 %2310 }
 0x68c   : > { %v2321_v33 = vmul.f32 %v2311_v31, %v6111_v34 }
 0x68e   : > { %v6788_v38 = vadd.f32 1e-05, %v2321_v33  ;;  %v2573_v33 = vld [vmem:[%s6052_s30 + $0x550] sm:$0xff] }
 0x68f   : > { %2832 = vmatpush.msrb.mxu1 %v2573_v33 }
 0x690   : > { %4978 = vrsqrt.f32 %v6788_v38  ;;  %vm2335_vm15 = vweird.f32 %v6788_v38 }
 0x691   : > { %2833 = vmatpush.msrb.mxu1 %v2565_v52 }
 0x693   : > { %v2314_v63 = vpop.xlane.xlu2 %2313  ;;  %2834 = vmatpush.msrb.mxu1 %v2557_v16 }
 0x694   : > { %v2322_v1 = vmul.f32 %v2314_v63, %v6111_v34 }
 0x695   : > { %2835 = vmatpush.msrb.mxu1 %v2549_v55  ;;  %v2512_v55 = vld [vmem:[%s6052_s30 + $0x368] sm:$0xff] }
 0x696   : > { %v6808_v11 = vpop.eup %4978  ;;  %v6810_v13 = vadd.f32 1e-05, %v2322_v1  ;;  %v6863_v1 = vperm.slane %v2276_v59, 0  ;;  %v2528_v59 = vld [vmem:[%s6052_s30 + $0x3e8] sm:$0xff] }
 0x697   : > { %v2330_v10 = vmul.f32 %v6808_v11, %v6788_v38  ;;  %vm2336_vm14 = vweird.f32 %v6808_v11  ;;  %2836 = vmatpush.msrb.mxu1 %v2541_v22 }
 0x698   : > { %4980 = vrsqrt.f32 %v6810_v13  ;;  %vm2337_vm0 = vmor %vm2335_vm15, %vm2336_vm14  ;;  %vm2345_vm2 = vweird.f32 %v6810_v13 }
 0x699   : > { %v2331_v21 = vmul.f32 %v6808_v11, %v2330_v10  ;;  %2837 = vmatpush.msrb.mxu1 %v2533_v32 }
 0x69b   : > { %v2332_v15 = vmul.f32 0.5, %v2331_v21  ;;  %v2317_v27 = vpop.xlane.xlu0 %2316 }
 0x69c   : > { %v2323_v31 = vmul.f32 %v2317_v27, %v6111_v34 }
 0x69d   : > { %v2333_v35 = vsub.f32 1.5, %v2332_v15 }
 0x69e   : > { %v6836_v42 = vpop.eup %4980  ;;  %v6838_v37 = vadd.f32 1e-05, %v2323_v31  ;;  %v2405_v31 = vld [vmem:[%s6052_s30 + $0x10] sm:$0xff] }
 0x69f   : > { %v2334_v60 = vmul.f32 %v6808_v11, %v2333_v35  ;;  %v2340_v62 = vmul.f32 %v6836_v42, %v6810_v13  ;;  %vm2346_vm1 = vweird.f32 %v6836_v42  ;;  %v2406_v13 = vld [vmem:[%s6052_s30 + $0x18] sm:$0xff] }
 0x6a0   : > { %4982 = vrsqrt.f32 %v6838_v37  ;;  %vm2347_vm3 = vmor %vm2345_vm2, %vm2346_vm1  ;;  %v2534_v35 = vld [vmem:[%s6052_s30 + $0x418] sm:$0xff]  ;;  %2866 = vmatpush.msrb.mxu2 %v2406_v13  ;;  %vm2355_vm5 = vweird.f32 %v6838_v37  ;;  %v2487_v13 = vld [vmem:[%s6052_s30 + $0x2a0] sm:$0xff] }
 0x6a1   : > { %v2338_v38 = vsel %vm2337_vm0, %v6808_v11, %v2334_v60  ;;  %v2341_v63 = vmul.f32 %v6836_v42, %v2340_v62  ;;  %v2421_v11 = vld [vmem:[%s6052_s30 + $0x90] sm:$0xff]  ;;  %v2656_v60 = vld [vmem:[%s6052_s30 + $0x7e8] sm:$0xff]  ;;  %2895 = vmatpush.msrb.mxu3 %v2534_v35  ;;  %v2519_v62 = vld [vmem:[%s6052_s30 + $0x3a0] sm:$0xff] }
 0x6a2   : > { %v2369_v49 = vmul.f32 %v2338_v38, %v6676_v61  ;;  %v2370_v7 = vmul.f32 %v2338_v38, %v6679_v8  ;;  %2806 = vmatpush.msrb.mxu0 %v2421_v11  ;;  %v2639_v11 = vld [vmem:[%s6052_s30 + $0x760] sm:$0xff] }
 0x6a3   : > { %v2342_v10 = vmul.f32 0.5, %v2341_v63  ;;  %v2320_v39 = vpop.xlane.xlu1 %2319  ;;  %v2520_v63 = vld [vmem:[%s6052_s30 + $0x3a8] sm:$0xff]  ;;  %v2615_v35 = vld [vmem:[%s6052_s30 + $0x6a0] sm:$0xff] }
 0x6a4   : > { %v2382_v21 = vmul.f32 %v6851_v53, %v2369_v49  ;;  %v2383_v61 = vmul.f32 %v6853_v24, %v2370_v7  ;;  %v2324_v8 = vmul.f32 %v2320_v39, %v6111_v34  ;;  %2807 = vmatpush.msrb.mxu0 %v2413_v40 }
 0x6a5   : > { %v2343_v26 = vsub.f32 1.5, %v2342_v10  ;;  %v2640_v10 = vld [vmem:[%s6052_s30 + $0x768] sm:$0xff] }
 0x6a6   : > { %v6882_v15 = vpop.eup %4982  ;;  %v6885_v27 = vadd.f32 %v6863_v1, %v2382_v21  ;;  %v6888_v58 = vadd.f32 %v6865_v2, %v2383_v61  ;;  %v6890_v18 = vadd.f32 1e-05, %v2324_v8  ;;  %2808 = vmatpush.msrb.mxu0 %v2405_v31  ;;  %v2504_v61 = vld [vmem:[%s6052_s30 + $0x328] sm:$0xff] }
 0x6a7   : > { %v2344_v19 = vmul.f32 %v6836_v42, %v2343_v26  ;;  %v2350_v29 = vmul.f32 %v6882_v15, %v6838_v37  ;;  %vm2356_vm4 = vweird.f32 %v6882_v15  ;;  %v2632_v8 = vld [vmem:[%s6052_s30 + $0x728] sm:$0xff] }
 0x6a8   : > { %4984 = vrsqrt.f32 %v6890_v18  ;;  %2693 = vmatmul.f32.vlgmr.msra.gmra.mxu0 %v6885_v27  ;;  %2722 = vmatmul.f32.vlgmr.msra.gmra.mxu1 %v6888_v58  ;;  %vm2357_vm6 = vmor %vm2355_vm5, %vm2356_vm4  ;;  %vm2365_vm8 = vweird.f32 %v6890_v18 }
 0x6a9   : > { %v2348_v48 = vsel %vm2347_vm3, %v6836_v42, %v2344_v19  ;;  %v2351_v33 = vmul.f32 %v6882_v15, %v2350_v29  ;;  %2751 = vmatmul.f32.vlgmr.msra.gmra.mxu2 %v6885_v27  ;;  %2780 = vmatmul.f32.vlgmr.msra.gmra.mxu3 %v6888_v58  ;;  %v2624_v19 = vld [vmem:[%s6052_s30 + $0x6e8] sm:$0xff] }
 0x6aa   : > { %v2371_v51 = vmul.f32 %v2348_v48, %v6689_v0  ;;  %v2372_v52 = vmul.f32 %v2348_v48, %v6692_v12  ;;  %2909 = vmatpush.msra.mxu0 %v2527_v54  ;;  %2938 = vmatpush.msra.mxu1 %v2655_v50  ;;  %v2648_v0 = vld [vmem:[%s6052_s30 + $0x7a8] sm:$0xff]  ;;  %v2607_v50 = vld [vmem:[%s6052_s30 + $0x660] sm:$0xff] }
 0x6ab   : > { %v2352_v42 = vmul.f32 0.5, %v2351_v33  ;;  %2967 = vmatpush.msra.mxu2 %v2528_v59  ;;  %2996 = vmatpush.msra.mxu3 %v2656_v60  ;;  %v2488_v48 = vld [vmem:[%s6052_s30 + $0x2a8] sm:$0xff] }
 0x6ac   : > { %v2384_v45 = vmul.f32 %v6851_v53, %v2371_v51  ;;  %v2385_v38 = vmul.f32 %v6853_v24, %v2372_v52  ;;  %2910 = vmatpush.msra.mxu0 %v2519_v62  ;;  %2939 = vmatpush.msra.mxu1 %v2647_v23  ;;  %v2616_v33 = vld [vmem:[%s6052_s30 + $0x6a8] sm:$0xff]  ;;  %v2599_v62 = vld [vmem:[%s6052_s30 + $0x620] sm:$0xff] }
 0x6ad   : > { %v2353_v12 = vsub.f32 1.5, %v2352_v42  ;;  %2968 = vmatpush.msra.mxu2 %v2520_v63  ;;  %2997 = vmatpush.msra.mxu3 %v2648_v0  ;;  %v2480_v59 = vld [vmem:[%s6052_s30 + $0x268] sm:$0xff]  ;;  %v2471_v42 = vld [vmem:[%s6052_s30 + $0x220] sm:$0xff] }
 0x6ae   : > { %v4985_v46 = vpop.eup %4984  ;;  %v6923_v16 = vadd.f32 %v6863_v1, %v2384_v45  ;;  %v6926_v30 = vadd.f32 %v6865_v2, %v2385_v38  ;;  %2911 = vmatpush.msra.mxu0 %v2511_v9  ;;  %2940 = vmatpush.msra.mxu1 %v2639_v11  ;;  %v2608_v60 = vld [vmem:[%s6052_s30 + $0x668] sm:$0xff]  ;;  %v2575_v9 = vld [vmem:[%s6052_s30 + $0x560] sm:$0xff] }
 0x6af   : > { %v2354_v49 = vmul.f32 %v6882_v15, %v2353_v12  ;;  %v2360_v7 = vmul.f32 %v4985_v46, %v6890_v18  ;;  %2969 = vmatpush.msra.mxu2 %v2512_v55  ;;  %2998 = vmatpush.msra.mxu3 %v2640_v10  ;;  %vm2366_vm7 = vweird.f32 %v4985_v46  ;;  %v2479_v18 = vld [vmem:[%s6052_s30 + $0x260] sm:$0xff]  ;;  %v2464_v0 = vld [vmem:[%s6052_s30 + $0x1e8] sm:$0xff] }
 0x6b0   : > { %2696 = vmatmul.f32.gmra.mxu0 %v6923_v16  ;;  %2725 = vmatmul.f32.gmra.mxu1 %v6926_v30  ;;  %vm2367_vm9 = vmor %vm2365_vm8, %vm2366_vm7  ;;  %v2583_v12 = vld [vmem:[%s6052_s30 + $0x5a0] sm:$0xff]  ;;  %v2448_v11 = vld [vmem:[%s6052_s30 + $0x168] sm:$0xff] }
 0x6b1   : > { %v2358_v37 = vsel %vm2357_vm6, %v6882_v15, %v2354_v49  ;;  %v2361_v39 = vmul.f32 %v4985_v46, %v2360_v7  ;;  %2754 = vmatmul.f32.gmra.mxu2 %v6923_v16  ;;  %2783 = vmatmul.f32.gmra.mxu3 %v6926_v30  ;;  %v2584_v49 = vld [vmem:[%s6052_s30 + $0x5a8] sm:$0xff]  ;;  %v2447_v7 = vld [vmem:[%s6052_s30 + $0x160] sm:$0xff] }
 0x6b2   : > { %v2373_v40 = vmul.f32 %v2358_v37, %v6700_v4  ;;  %v2374_v21 = vmul.f32 %v2358_v37, %v6703_v5  ;;  %2912 = vmatpush.msra.mxu0 %v2503_v44  ;;  %2941 = vmatpush.msra.mxu1 %v2631_v20  ;;  %v2496_v4 = vld [vmem:[%s6052_s30 + $0x2e8] sm:$0xff]  ;;  %v2439_v10 = vld [vmem:[%s6052_s30 + $0x120] sm:$0xff] }
 0x6b3   : > { %v2362_v22 = vmul.f32 0.5, %v2361_v39  ;;  %2970 = vmatpush.msra.mxu2 %v2504_v61  ;;  %2999 = vmatpush.msra.mxu3 %v2632_v8  ;;  %v2576_v55 = vld [vmem:[%s6052_s30 + $0x568] sm:$0xff]  ;;  %v2567_v37 = vld [vmem:[%s6052_s30 + $0x520] sm:$0xff] }
 0x6b4   : > { %v2386_v26 = vmul.f32 %v6851_v53, %v2373_v40  ;;  %v2387_v15 = vmul.f32 %v6853_v24, %v2374_v21  ;;  %2913 = vmatpush.msra.mxu0 %v2495_v14  ;;  %2942 = vmatpush.msra.mxu1 %v2623_v25  ;;  %v2440_v39 = vld [vmem:[%s6052_s30 + $0x128] sm:$0xff]  ;;  %v2431_v20 = vld [vmem:[%s6052_s30 + $0xe0] sm:$0xff] }
 0x6b5   : > { %v2363_v5 = vsub.f32 1.5, %v2362_v22  ;;  %2971 = vmatpush.msra.mxu2 %v2496_v4  ;;  %3000 = vmatpush.msra.mxu3 %v2624_v19  ;;  %v2568_v44 = vld [vmem:[%s6052_s30 + $0x528] sm:$0xff]  ;;  %v2559_v40 = vld [vmem:[%s6052_s30 + $0x4e0] sm:$0xff] }
 0x6b6   : > { %v6955_v29 = vadd.f32 %v6863_v1, %v2386_v26  ;;  %v6958_v31 = vadd.f32 %v6865_v2, %v2387_v15  ;;  %2914 = vmatpush.msra.mxu0 %v2487_v13  ;;  %2943 = vmatpush.msra.mxu1 %v2615_v35  ;;  %v2432_v21 = vld [vmem:[%s6052_s30 + $0xe8] sm:$0xff]  ;;  %v2423_v8 = vld [vmem:[%s6052_s30 + $0xa0] sm:$0xff] }
 0x6b7   : > { %v2364_v32 = vmul.f32 %v4985_v46, %v2363_v5  ;;  %2972 = vmatpush.msra.mxu2 %v2488_v48  ;;  %3001 = vmatpush.msra.mxu3 %v2616_v33  ;;  %v2560_v61 = vld [vmem:[%s6052_s30 + $0x4e8] sm:$0xff]  ;;  %v2551_v22 = vld [vmem:[%s6052_s30 + $0x4a0] sm:$0xff]  ;;  %v2529_v48 = vld [vmem:[%s6052_s30 + $0x3f0] sm:$0xff] }
 0x6b8   : > { %2699 = vmatmul.f32.gmra.mxu0 %v6955_v29  ;;  %2728 = vmatmul.f32.gmra.mxu1 %v6958_v31  ;;  %v2424_v14 = vld [vmem:[%s6052_s30 + $0xa8] sm:$0xff]  ;;  %v2415_v26 = vld [vmem:[%s6052_s30 + $0x60] sm:$0xff]  ;;  %v2657_v33 = vld [vmem:[%s6052_s30 + $0x7f0] sm:$0xff] }
 0x6b9   : > { %v2368_v54 = vsel %vm2367_vm9, %v4985_v46, %v2364_v32  ;;  %2757 = vmatmul.f32.gmra.mxu2 %v6955_v29  ;;  %2786 = vmatmul.f32.gmra.mxu3 %v6958_v31  ;;  %v2456_v46 = vld [vmem:[%s6052_s30 + $0x1a8] sm:$0xff]  ;;  %v2543_v15 = vld [vmem:[%s6052_s30 + $0x460] sm:$0xff] }
 0x6ba   : > { %v2375_v51 = vmul.f32 %v2368_v54, %v6711_v6  ;;  %v2376_v52 = vmul.f32 %v2368_v54, %v6714_v43  ;;  %2915 = vmatpush.msra.mxu0 %v2479_v18  ;;  %2944 = vmatpush.msra.mxu1 %v2607_v50  ;;  %v2472_v6 = vld [vmem:[%s6052_s30 + $0x228] sm:$0xff]  ;;  %v2407_v5 = vld [vmem:[%s6052_s30 + $0x20] sm:$0xff]  ;;  %v2530_v54 = vld [vmem:[%s6052_s30 + $0x3f8] sm:$0xff] }
 0x6bb   : > { %v2600_v43 = vld [vmem:[%s6052_s30 + $0x628] sm:$0xff]  ;;  %2973 = vmatpush.msra.mxu2 %v2480_v59  ;;  %3002 = vmatpush.msra.mxu3 %v2608_v60  ;;  %v2535_v32 = vld [vmem:[%s6052_s30 + $0x420] sm:$0xff]  ;;  %v2658_v18 = vld [vmem:[%s6052_s30 + $0x7f8] sm:$0xff] }
 0x6bc   : > { %v2388_v23 = vmul.f32 %v6851_v53, %v2375_v51  ;;  %v2389_v45 = vmul.f32 %v6853_v24, %v2376_v52  ;;  %2916 = vmatpush.msra.mxu0 %v2471_v42  ;;  %2945 = vmatpush.msra.mxu1 %v2599_v62  ;;  %v2463_v53 = vld [vmem:[%s6052_s30 + $0x1e0] sm:$0xff]  ;;  %v2552_v25 = vld [vmem:[%s6052_s30 + $0x4a8] sm:$0xff]  ;;  %v2521_v50 = vld [vmem:[%s6052_s30 + $0x3b0] sm:$0xff] }
 0x6bd   : > { %2974 = vmatpush.msra.mxu2 %v2472_v6  ;;  %3003 = vmatpush.msra.mxu3 %v2600_v43  ;;  %v2591_v24 = vld [vmem:[%s6052_s30 + $0x5e0] sm:$0xff]  ;;  %v2416_v4 = vld [vmem:[%s6052_s30 + $0x68] sm:$0xff]  ;;  %v2649_v51 = vld [vmem:[%s6052_s30 + $0x7b0] sm:$0xff] }
 0x6be   : > { %v6982_v38 = vadd.f32 %v6863_v1, %v2388_v23  ;;  %v6985_v63 = vadd.f32 %v6865_v2, %v2389_v45  ;;  %v2592_v1 = vld [vmem:[%s6052_s30 + $0x5e8] sm:$0xff]  ;;  %v2455_v2 = vld [vmem:[%s6052_s30 + $0x1a0] sm:$0xff]  ;;  %2917 = vmatpush.msra.mxu0 %v2463_v53  ;;  %2946 = vmatpush.msra.mxu1 %v2591_v24  ;;  %v2522_v52 = vld [vmem:[%s6052_s30 + $0x3b8] sm:$0xff] }
 0x6bf   : > { %2975 = vmatpush.msra.mxu2 %v2464_v0  ;;  %3004 = vmatpush.msra.mxu3 %v2592_v1  ;;  %v2544_v19 = vld [vmem:[%s6052_s30 + $0x468] sm:$0xff]  ;;  %v2650_v59 = vld [vmem:[%s6052_s30 + $0x7b8] sm:$0xff]  ;;  %v2513_v60 = vld [vmem:[%s6052_s30 + $0x370] sm:$0xff] }
 0x6c0   : > { %2702 = vmatmul.f32.gmra.mxu0 %v6982_v38  ;;  %2731 = vmatmul.f32.gmra.mxu1 %v6985_v63  ;;  %v2408_v13 = vld [vmem:[%s6052_s30 + $0x28] sm:$0xff]  ;;  %v2641_v42 = vld [vmem:[%s6052_s30 + $0x770] sm:$0xff]  ;;  %v2514_v62 = vld [vmem:[%s6052_s30 + $0x378] sm:$0xff] }
 0x6c1   : > { %2760 = vmatmul.f32.gmra.mxu2 %v6982_v38  ;;  %2789 = vmatmul.f32.gmra.mxu3 %v6985_v63  ;;  %v2536_v35 = vld [vmem:[%s6052_s30 + $0x428] sm:$0xff]  ;;  %v2642_v23 = vld [vmem:[%s6052_s30 + $0x778] sm:$0xff]  ;;  %v2505_v45 = vld [vmem:[%s6052_s30 + $0x330] sm:$0xff] }
 0x6c2   : > { %2918 = vmatpush.msra.mxu0 %v2455_v2  ;;  %2947 = vmatpush.msra.mxu1 %v2583_v12  ;;  %v2633_v6 = vld [vmem:[%s6052_s30 + $0x730] sm:$0xff]  ;;  %v2506_v43 = vld [vmem:[%s6052_s30 + $0x338] sm:$0xff] }
 0x6c3   : > { %2976 = vmatpush.msra.mxu2 %v2456_v46  ;;  %3005 = vmatpush.msra.mxu3 %v2584_v49  ;;  %v2634_v53 = vld [vmem:[%s6052_s30 + $0x738] sm:$0xff]  ;;  %v2497_v24 = vld [vmem:[%s6052_s30 + $0x2f0] sm:$0xff] }
 0x6c4   : > { %2919 = vmatpush.msra.mxu0 %v2447_v7  ;;  %2948 = vmatpush.msra.mxu1 %v2575_v9  ;;  %v2625_v0 = vld [vmem:[%s6052_s30 + $0x6f0] sm:$0xff]  ;;  %v2498_v1 = vld [vmem:[%s6052_s30 + $0x2f8] sm:$0xff] }
 0x6c5   : > { %2977 = vmatpush.msra.mxu2 %v2448_v11  ;;  %3006 = vmatpush.msra.mxu3 %v2576_v55  ;;  %v2626_v2 = vld [vmem:[%s6052_s30 + $0x6f8] sm:$0xff]  ;;  %v2489_v12 = vld [vmem:[%s6052_s30 + $0x2b0] sm:$0xff] }
 0x6c6   : > { %2920 = vmatpush.msra.mxu0 %v2439_v10  ;;  %2949 = vmatpush.msra.mxu1 %v2567_v37  ;;  %v2617_v46 = vld [vmem:[%s6052_s30 + $0x6b0] sm:$0xff]  ;;  %v2490_v49 = vld [vmem:[%s6052_s30 + $0x2b8] sm:$0xff] }
 0x6c7   : > { %2978 = vmatpush.msra.mxu2 %v2440_v39  ;;  %3007 = vmatpush.msra.mxu3 %v2568_v44  ;;  %v2618_v7 = vld [vmem:[%s6052_s30 + $0x6b8] sm:$0xff]  ;;  %v2481_v9 = vld [vmem:[%s6052_s30 + $0x270] sm:$0xff] }
 0x6c8   : > { %2809 = vmatmul.f32.vlgmr.msrb.gmra.mxu0 %v6885_v27  ;;  %2838 = vmatmul.f32.vlgmr.msrb.gmra.mxu1 %v6888_v58  ;;  %v2609_v11 = vld [vmem:[%s6052_s30 + $0x670] sm:$0xff]  ;;  %v2482_v55 = vld [vmem:[%s6052_s30 + $0x278] sm:$0xff] }
 0x6c9   : > { %2867 = vmatmul.f32.vlgmr.msrb.gmra.mxu2 %v6885_v27  ;;  %2896 = vmatmul.f32.vlgmr.msrb.gmra.mxu3 %v6888_v58  ;;  %v2610_v10 = vld [vmem:[%s6052_s30 + $0x678] sm:$0xff]  ;;  %v2473_v37 = vld [vmem:[%s6052_s30 + $0x230] sm:$0xff] }
 0x6ca   : > { %2921 = vmatpush.msra.mxu0 %v2431_v20  ;;  %2950 = vmatpush.msra.mxu1 %v2559_v40  ;;  %v2601_v39 = vld [vmem:[%s6052_s30 + $0x630] sm:$0xff]  ;;  %v2474_v44 = vld [vmem:[%s6052_s30 + $0x238] sm:$0xff] }
 0x6cb   : > { %2979 = vmatpush.msra.mxu2 %v2432_v21  ;;  %3008 = vmatpush.msra.mxu3 %v2560_v61  ;;  %v2602_v20 = vld [vmem:[%s6052_s30 + $0x638] sm:$0xff]  ;;  %v2465_v40 = vld [vmem:[%s6052_s30 + $0x1f0] sm:$0xff] }
 0x6cc   : > { %2922 = vmatpush.msra.mxu0 %v2423_v8  ;;  %2951 = vmatpush.msra.mxu1 %v2551_v22  ;;  %v2593_v21 = vld [vmem:[%s6052_s30 + $0x5f0] sm:$0xff]  ;;  %v2466_v61 = vld [vmem:[%s6052_s30 + $0x1f8] sm:$0xff] }
 0x6cd   : > { %2980 = vmatpush.msra.mxu2 %v2424_v14  ;;  %3009 = vmatpush.msra.mxu3 %v2552_v25  ;;  %v2594_v8 = vld [vmem:[%s6052_s30 + $0x5f8] sm:$0xff]  ;;  %v2457_v22 = vld [vmem:[%s6052_s30 + $0x1b0] sm:$0xff] }
 0x6ce   : > { %2923 = vmatpush.msra.mxu0 %v2415_v26  ;;  %2952 = vmatpush.msra.mxu1 %v2543_v15  ;;  %v2585_v14 = vld [vmem:[%s6052_s30 + $0x5b0] sm:$0xff]  ;;  %v2458_v25 = vld [vmem:[%s6052_s30 + $0x1b8] sm:$0xff] }
 0x6cf   : > { %2981 = vmatpush.msra.mxu2 %v2416_v4  ;;  %3010 = vmatpush.msra.mxu3 %v2544_v19  ;;  %v2586_v26 = vld [vmem:[%s6052_s30 + $0x5b8] sm:$0xff]  ;;  %v2449_v15 = vld [vmem:[%s6052_s30 + $0x170] sm:$0xff] }
 0x6d0   : > { %2812 = vmatmul.f32.gmra.mxu0 %v6923_v16  ;;  %2841 = vmatmul.f32.gmra.mxu1 %v6926_v30  ;;  %v2577_v4 = vld [vmem:[%s6052_s30 + $0x570] sm:$0xff]  ;;  %v2450_v19 = vld [vmem:[%s6052_s30 + $0x178] sm:$0xff] }
 0x6d1   : > { %2870 = vmatmul.f32.gmra.mxu2 %v6923_v16  ;;  %2899 = vmatmul.f32.gmra.mxu3 %v6926_v30 }
 0x6d2   : > { %2924 = vmatpush.msra.mxu0 %v2407_v5  ;;  %2953 = vmatpush.msra.mxu1 %v2535_v32  ;;  %v2578_v5 = vld [vmem:[%s6052_s30 + $0x578] sm:$0xff]  ;;  %v2441_v32 = vld [vmem:[%s6052_s30 + $0x130] sm:$0xff] }
 0x6d3   : > { %2982 = vmatpush.msra.mxu2 %v2408_v13  ;;  %3011 = vmatpush.msra.mxu3 %v2536_v35  ;;  %v2569_v13 = vld [vmem:[%s6052_s30 + $0x530] sm:$0xff]  ;;  %v2442_v35 = vld [vmem:[%s6052_s30 + $0x138] sm:$0xff] }
 0x6d4   : > { %3025 = vmatpush.msrb.mxu0 %v2529_v48  ;;  %3054 = vmatpush.msrb.mxu1 %v2657_v33  ;;  %v2570_v48 = vld [vmem:[%s6052_s30 + $0x538] sm:$0xff]  ;;  %v2433_v33 = vld [vmem:[%s6052_s30 + $0xf0] sm:$0xff] }
 0x6d5   : > { %3083 = vmatpush.msrb.mxu2 %v2530_v54  ;;  %3112 = vmatpush.msrb.mxu3 %v2658_v18  ;;  %v2561_v54 = vld [vmem:[%s6052_s30 + $0x4f0] sm:$0xff]  ;;  %v2434_v18 = vld [vmem:[%s6052_s30 + $0xf8] sm:$0xff] }
 0x6d6   : > { %3026 = vmatpush.msrb.mxu0 %v2521_v50  ;;  %3055 = vmatpush.msrb.mxu1 %v2649_v51  ;;  %v2562_v50 = vld [vmem:[%s6052_s30 + $0x4f8] sm:$0xff]  ;;  %v2425_v51 = vld [vmem:[%s6052_s30 + $0xb0] sm:$0xff] }
 0x6d7   : > { %3084 = vmatpush.msrb.mxu2 %v2522_v52  ;;  %3113 = vmatpush.msrb.mxu3 %v2650_v59  ;;  %v2553_v52 = vld [vmem:[%s6052_s30 + $0x4b0] sm:$0xff]  ;;  %v2426_v59 = vld [vmem:[%s6052_s30 + $0xb8] sm:$0xff] }
 0x6d8   : > { %2815 = vmatmul.f32.gmra.mxu0 %v6955_v29  ;;  %2844 = vmatmul.f32.gmra.mxu1 %v6958_v31 }
 0x6d9   : > { %2873 = vmatmul.f32.gmra.mxu2 %v6955_v29  ;;  %2902 = vmatmul.f32.gmra.mxu3 %v6958_v31 }
 0x6da   : > { %3027 = vmatpush.msrb.mxu0 %v2513_v60  ;;  %3056 = vmatpush.msrb.mxu1 %v2641_v42  ;;  %v2554_v60 = vld [vmem:[%s6052_s30 + $0x4b8] sm:$0xff]  ;;  %v2417_v42 = vld [vmem:[%s6052_s30 + $0x70] sm:$0xff] }
 0x6db   : > { %3085 = vmatpush.msrb.mxu2 %v2514_v62  ;;  %3114 = vmatpush.msrb.mxu3 %v2642_v23  ;;  %v2545_v62 = vld [vmem:[%s6052_s30 + $0x470] sm:$0xff]  ;;  %v2418_v23 = vld [vmem:[%s6052_s30 + $0x78] sm:$0xff] }
 0x6dc   : > { %3028 = vmatpush.msrb.mxu0 %v2505_v45  ;;  %3057 = vmatpush.msrb.mxu1 %v2633_v6  ;;  %v2546_v45 = vld [vmem:[%s6052_s30 + $0x478] sm:$0xff]  ;;  %v2409_v6 = vld [vmem:[%s6052_s30 + $0x30] sm:$0xff] }
 0x6dd   : > { %3086 = vmatpush.msrb.mxu2 %v2506_v43  ;;  %3115 = vmatpush.msrb.mxu3 %v2634_v53  ;;  %v2537_v43 = vld [vmem:[%s6052_s30 + $0x430] sm:$0xff]  ;;  %v2410_v53 = vld [vmem:[%s6052_s30 + $0x38] sm:$0xff] }
 0x6de   : > { %3029 = vmatpush.msrb.mxu0 %v2497_v24  ;;  %3058 = vmatpush.msrb.mxu1 %v2625_v0  ;;  %v2538_v24 = vld [vmem:[%s6052_s30 + $0x438] sm:$0xff]  ;;  %v3459_v0 = vld [vmem:[%s6061_s17 + $0xf0] sm:$0xff] }
 0x6df   : > { %3087 = vmatpush.msrb.mxu2 %v2498_v1  ;;  %3116 = vmatpush.msrb.mxu3 %v2626_v2  ;;  %v3457_v1 = vld [vmem:[%s6061_s17 + $0xe0] sm:$0xff]  ;;  %v3455_v2 = vld [vmem:[%s6061_s17 + $0xd0] sm:$0xff] }
 0x6e0   : > { %2818 = vmatmul.f32.gmra.mxu0 %v6982_v38  ;;  %2847 = vmatmul.f32.gmra.mxu1 %v6985_v63 }
 0x6e1   : > { %2876 = vmatmul.f32.gmra.mxu2 %v6982_v38  ;;  %2905 = vmatmul.f32.gmra.mxu3 %v6985_v63 }
 0x6e2   : > { %3030 = vmatpush.msrb.mxu0 %v2489_v12  ;;  %3059 = vmatpush.msrb.mxu1 %v2617_v46  ;;  %v3491_v12 = vld [vmem:[%s6061_s17 + $0x1f0] sm:$0xff]  ;;  %v3453_v46 = vld [vmem:[%s6061_s17 + $0xc0] sm:$0xff] }
 0x6e3   : > { %3088 = vmatpush.msrb.mxu2 %v2490_v49  ;;  %3117 = vmatpush.msrb.mxu3 %v2618_v7  ;;  %v3489_v49 = vld [vmem:[%s6061_s17 + $0x1e0] sm:$0xff]  ;;  %v3451_v7 = vld [vmem:[%s6061_s17 + $0xb0] sm:$0xff] }
 0x6e4   : > { %3031 = vmatpush.msrb.mxu0 %v2481_v9  ;;  %3060 = vmatpush.msrb.mxu1 %v2609_v11  ;;  %v3487_v9 = vld [vmem:[%s6061_s17 + $0x1d0] sm:$0xff]  ;;  %v3449_v11 = vld [vmem:[%s6061_s17 + $0xa0] sm:$0xff] }
 0x6e5   : > { %3089 = vmatpush.msrb.mxu2 %v2482_v55  ;;  %3118 = vmatpush.msrb.mxu3 %v2610_v10  ;;  %v3485_v55 = vld [vmem:[%s6061_s17 + $0x1c0] sm:$0xff]  ;;  %v3447_v10 = vld [vmem:[%s6061_s17 + $0x90] sm:$0xff] }
 0x6e6   : > { %3032 = vmatpush.msrb.mxu0 %v2473_v37  ;;  %3061 = vmatpush.msrb.mxu1 %v2601_v39  ;;  %v3483_v37 = vld [vmem:[%s6061_s17 + $0x1b0] sm:$0xff] }
 0x6e7   : > { %3090 = vmatpush.msrb.mxu2 %v2474_v44  ;;  %3119 = vmatpush.msrb.mxu3 %v2602_v20  ;;  %v3443_v39 = vld [vmem:[%s6061_s17 + $0x70] sm:$0xff]  ;;  %v3441_v20 = vld [vmem:[%s6061_s17 + $0x60] sm:$0xff] }
 0x6e8   : > { %2925 = vmatmul.f32.vlgmr.msra.gmra.mxu0 %v6885_v27  ;;  %2954 = vmatmul.f32.vlgmr.msra.gmra.mxu1 %v6888_v58  ;;  %v3479_v44 = vld [vmem:[%s6061_s17 + $0x190] sm:$0xff] }
 0x6e9   : > { %2983 = vmatmul.f32.vlgmr.msra.gmra.mxu2 %v6885_v27  ;;  %3012 = vmatmul.f32.vlgmr.msra.gmra.mxu3 %v6888_v58 }
 0x6ea   : > { %3033 = vmatpush.msrb.mxu0 %v2465_v40  ;;  %3062 = vmatpush.msrb.mxu1 %v2593_v21  ;;  %v3477_v40 = vld [vmem:[%s6061_s17 + $0x180] sm:$0xff] }
 0x6eb   : > { %3091 = vmatpush.msrb.mxu2 %v2466_v61  ;;  %3120 = vmatpush.msrb.mxu3 %v2594_v8  ;;  %v3437_v21 = vld [vmem:[%s6061_s17 + $0x40] sm:$0xff]  ;;  %v7154_v8 = vld [vmem:[%s6055_s27] sm:$0xff] }
 0x6ec   : > { %3034 = vmatpush.msrb.mxu0 %v2457_v22  ;;  %3063 = vmatpush.msrb.mxu1 %v2585_v14  ;;  %v3473_v61 = vld [vmem:[%s6061_s17 + $0x160] sm:$0xff]  ;;  %v3523_v22 = vld [vmem:[%s6061_s17 + $0x2f0] sm:$0xff] }
 0x6ed   : > { %3092 = vmatpush.msrb.mxu2 %v2458_v25  ;;  %3121 = vmatpush.msrb.mxu3 %v2586_v26  ;;  %v3433_v14 = vld [vmem:[%s6061_s17 + $0x20] sm:$0xff]  ;;  %v7166_v26 = vperm.slane %v7154_v8, 0 }
 0x6ee   : > { %3035 = vmatpush.msrb.mxu0 %v2449_v15  ;;  %3064 = vmatpush.msrb.mxu1 %v2577_v4  ;;  %v3469_v25 = vld [vmem:[%s6061_s17 + $0x140] sm:$0xff]  ;;  %v3431_v4 = vld [vmem:[%s6061_s17 + $0x10] sm:$0xff] }
 0x6ef   : > { %3093 = vmatpush.msrb.mxu2 %v2450_v19  ;;  %3122 = vmatpush.msrb.mxu3 %v2578_v5  ;;  %v3521_v15 = vld [vmem:[%s6061_s17 + $0x2e0] sm:$0xff]  ;;  %v3467_v19 = vld [vmem:[%s6061_s17 + $0x130] sm:$0xff] }
 0x6f0   : > { %2928 = vmatmul.f32.gmra.mxu0 %v6923_v16  ;;  %2957 = vmatmul.f32.gmra.mxu1 %v6926_v30 }
 0x6f1   : > { %2986 = vmatmul.f32.gmra.mxu2 %v6923_v16  ;;  %3015 = vmatmul.f32.gmra.mxu3 %v6926_v30 }
 0x6f2   : > { %3036 = vmatpush.msrb.mxu0 %v2441_v32  ;;  %3065 = vmatpush.msrb.mxu1 %v2569_v13  ;;  %v3429_v32 = vld [vmem:[%s6061_s17] sm:$0xff] }
 0x6f3   : > { %3094 = vmatpush.msrb.mxu2 %v2442_v35  ;;  %3123 = vmatpush.msrb.mxu3 %v2570_v48  ;;  %v3465_v13 = vld [vmem:[%s6061_s17 + $0x120] sm:$0xff] }
 0x6f4   : > { %3037 = vmatpush.msrb.mxu0 %v2433_v33  ;;  %3066 = vmatpush.msrb.mxu1 %v2561_v54  ;;  %v3517_v48 = vld [vmem:[%s6061_s17 + $0x2c0] sm:$0xff]  ;;  %v3555_v33 = vld [vmem:[%s6061_s17 + $0x3f0] sm:$0xff] }
 0x6f5   : > { %3095 = vmatpush.msrb.mxu2 %v2434_v18  ;;  %3124 = vmatpush.msrb.mxu3 %v2562_v50  ;;  %v3463_v54 = vld [vmem:[%s6061_s17 + $0x110] sm:$0xff] }
 0x6f6   : > { %3038 = vmatpush.msrb.mxu0 %v2425_v51  ;;  %3067 = vmatpush.msrb.mxu1 %v2553_v52  ;;  %v3515_v50 = vld [vmem:[%s6061_s17 + $0x2b0] sm:$0xff]  ;;  %v3553_v51 = vld [vmem:[%s6061_s17 + $0x3e0] sm:$0xff]  ;;  %v7183_v52 = vperm.slane %v7154_v8, 1 }
 0x6f7   : > { %3096 = vmatpush.msrb.mxu2 %v2426_v59  ;;  %3125 = vmatpush.msrb.mxu3 %v2554_v60  ;;  %v3461_v59 = vld [vmem:[%s6061_s17 + $0x100] sm:$0xff] }
 0x6f8   : > { %2931 = vmatmul.f32.gmra.mxu0 %v6955_v29  ;;  %2960 = vmatmul.f32.gmra.mxu1 %v6958_v31 }
 0x6f9   : > { %2989 = vmatmul.f32.gmra.mxu2 %v6955_v29  ;;  %3018 = vmatmul.f32.gmra.mxu3 %v6958_v31 }
 0x6fa   : > { %3039 = vmatpush.msrb.mxu0 %v2417_v42  ;;  %3068 = vmatpush.msrb.mxu1 %v2545_v62  ;;  %v3513_v42 = vld [vmem:[%s6061_s17 + $0x2a0] sm:$0xff]  ;;  %v3551_v62 = vld [vmem:[%s6061_s17 + $0x3d0] sm:$0xff] }
 0x6fb   : > { %3097 = vmatpush.msrb.mxu2 %v2418_v23  ;;  %3126 = vmatpush.msrb.mxu3 %v2546_v45 }
 0x6fc   : > { %3040 = vmatpush.msrb.mxu0 %v2409_v6  ;;  %3069 = vmatpush.msrb.mxu1 %v2537_v43  ;;  %v3511_v43 = vld [vmem:[%s6061_s17 + $0x290] sm:$0xff] }
 0x6fd   : > { %3098 = vmatpush.msrb.mxu2 %v2410_v53  ;;  %3127 = vmatpush.msrb.mxu3 %v2538_v24  ;;  %v3549_v53 = vld [vmem:[%s6061_s17 + $0x3c0] sm:$0xff] }
 0x6fe   : > { %3685 = vmatpush.msra.mxu0 %v3459_v0  ;;  %3714 = vmatpush.msra.mxu1 %v3491_v12 }
 0x6ff   : > { %3743 = vmatpush.msra.mxu2 %v3523_v22  ;;  %3772 = vmatpush.msra.mxu3 %v3555_v33 }
 0x700   : > { %2934 = vmatmul.f32.gmra.mxu0 %v6982_v38  ;;  %2963 = vmatmul.f32.gmra.mxu1 %v6985_v63 }
 0x701   : > { %2992 = vmatmul.f32.gmra.mxu2 %v6982_v38  ;;  %3021 = vmatmul.f32.gmra.mxu3 %v6985_v63 }
 0x702   : > { %3686 = vmatpush.msra.mxu0 %v3457_v1  ;;  %3715 = vmatpush.msra.mxu1 %v3489_v49  ;;  %v3547_v49 = vld [vmem:[%s6061_s17 + $0x3b0] sm:$0xff] }
 0x703   : > { %3744 = vmatpush.msra.mxu2 %v3521_v15  ;;  %3773 = vmatpush.msra.mxu3 %v3553_v51 }
 0x704   : > { %3687 = vmatpush.msra.mxu0 %v3455_v2  ;;  %3716 = vmatpush.msra.mxu1 %v3487_v9 }
 0x705   : > { %3774 = vmatpush.msra.mxu3 %v3551_v62 }
 0x706   : > { %3688 = vmatpush.msra.mxu0 %v3453_v46  ;;  %3717 = vmatpush.msra.mxu1 %v3485_v55  ;;  %v3509_v46 = vld [vmem:[%s6061_s17 + $0x280] sm:$0xff]  ;;  %v3507_v55 = vld [vmem:[%s6061_s17 + $0x270] sm:$0xff] }
 0x707   : > { %3775 = vmatpush.msra.mxu3 %v3549_v53  ;;  %v3495_v53 = vld [vmem:[%s6061_s17 + $0x210] sm:$0xff] }
 0x708   : > { %3041 = vmatmul.f32.vlgmr.msrb.gmra.mxu0 %v6885_v27  ;;  %3070 = vmatmul.f32.vlgmr.msrb.gmra.mxu1 %v6888_v58 }
 0x709   : > { %3099 = vmatmul.f32.vlgmr.msrb.gmra.mxu2 %v6885_v27  ;;  %3128 = vmatmul.f32.vlgmr.msrb.gmra.mxu3 %v6888_v58  ;;  %v3445_v27 = vld [vmem:[%s6061_s17 + $0x80] sm:$0xff] }
 0x70a   : > { %3689 = vmatpush.msra.mxu0 %v3451_v7  ;;  %v3481_v58 = vld [vmem:[%s6061_s17 + $0x1a0] sm:$0xff]  ;;  %3718 = vmatpush.msra.mxu1 %v3483_v37 }
 0x70b   : > { %3776 = vmatpush.msra.mxu3 %v3547_v49 }
 0x70c   : > { %3690 = vmatpush.msra.mxu0 %v3449_v11  ;;  %3719 = vmatpush.msra.mxu1 %v3481_v58 }
 0x70e   : > { %3691 = vmatpush.msra.mxu0 %v3447_v10  ;;  %3720 = vmatpush.msra.mxu1 %v3479_v44  ;;  %v3545_v10 = vld [vmem:[%s6061_s17 + $0x3a0] sm:$0xff] }
 0x70f   : > { %3777 = vmatpush.msra.mxu3 %v3545_v10 }
 0x710   : > { %3044 = vmatmul.f32.gmra.mxu0 %v6923_v16  ;;  %3073 = vmatmul.f32.gmra.mxu1 %v6926_v30 }
 0x711   : > { %3102 = vmatmul.f32.gmra.mxu2 %v6923_v16  ;;  %3131 = vmatmul.f32.gmra.mxu3 %v6926_v30  ;;  %v3439_v16 = vld [vmem:[%s6061_s17 + $0x50] sm:$0xff] }
 0x712   : > { %3692 = vmatpush.msra.mxu0 %v3445_v27  ;;  %v3475_v30 = vld [vmem:[%s6061_s17 + $0x170] sm:$0xff]  ;;  %3721 = vmatpush.msra.mxu1 %v3477_v40 }
 0x714   : > { %3693 = vmatpush.msra.mxu0 %v3443_v39  ;;  %3722 = vmatpush.msra.mxu1 %v3475_v30  ;;  %v3505_v39 = vld [vmem:[%s6061_s17 + $0x260] sm:$0xff] }
 0x716   : > { %3694 = vmatpush.msra.mxu0 %v3441_v20  ;;  %3723 = vmatpush.msra.mxu1 %v3473_v61  ;;  %v3543_v20 = vld [vmem:[%s6061_s17 + $0x390] sm:$0xff]  ;;  %v3541_v61 = vld [vmem:[%s6061_s17 + $0x380] sm:$0xff] }
 0x717   : > { %3778 = vmatpush.msra.mxu3 %v3543_v20 }
 0x718   : > { %3047 = vmatmul.f32.gmra.mxu0 %v6955_v29  ;;  %3076 = vmatmul.f32.gmra.mxu1 %v6958_v31 }
 0x719   : > { %3105 = vmatmul.f32.gmra.mxu2 %v6955_v29  ;;  %3134 = vmatmul.f32.gmra.mxu3 %v6958_v31  ;;  %v3435_v29 = vld [vmem:[%s6061_s17 + $0x30] sm:$0xff] }
 0x71a   : > { %3695 = vmatpush.msra.mxu0 %v3439_v16  ;;  %v3471_v31 = vld [vmem:[%s6061_s17 + $0x150] sm:$0xff]  ;;  %3779 = vmatpush.msra.mxu3 %v3541_v61 }
 0x71b   : > { %3724 = vmatpush.msra.mxu1 %v3471_v31 }
 0x71c   : > { %3696 = vmatpush.msra.mxu0 %v3437_v21  ;;  %v3503_v21 = vld [vmem:[%s6061_s17 + $0x250] sm:$0xff] }
 0x71d   : > { %3725 = vmatpush.msra.mxu1 %v3469_v25 }
 0x71e   : > { %3697 = vmatpush.msra.mxu0 %v3435_v29 }
 0x71f   : > { %3726 = vmatpush.msra.mxu1 %v3467_v19  ;;  %v3539_v19 = vld [vmem:[%s6061_s17 + $0x370] sm:$0xff] }
 0x720   : > { %3050 = vmatmul.f32.gmra.mxu0 %v6982_v38  ;;  %3079 = vmatmul.f32.gmra.mxu1 %v6985_v63 }
 0x721   : > { %3108 = vmatmul.f32.gmra.mxu2 %v6982_v38  ;;  %3137 = vmatmul.f32.gmra.mxu3 %v6985_v63  ;;  %v3519_v38 = vld [vmem:[%s6061_s17 + $0x2d0] sm:$0xff] }
 0x722   : > { %3698 = vmatpush.msra.mxu0 %v3433_v14  ;;  %3745 = vmatpush.msra.mxu2 %v3519_v38 }
 0x723   : > { %3727 = vmatpush.msra.mxu1 %v3465_v13  ;;  %3780 = vmatpush.msra.mxu3 %v3539_v19  ;;  %v3499_v13 = vld [vmem:[%s6061_s17 + $0x230] sm:$0xff] }
 0x724   : > { %3699 = vmatpush.msra.mxu0 %v3431_v4  ;;  %3746 = vmatpush.msra.mxu2 %v3517_v48  ;;  %v3501_v4 = vld [vmem:[%s6061_s17 + $0x240] sm:$0xff] }
 0x725   : > { %v2694_v5 = vpop.f32.mrf.mxu0  ;;  %v2723_v63 = vpop.f32.mrf.mxu1  ;;  %3728 = vmatpush.msra.mxu1 %v3463_v54 }
 0x726   : > { %v2695_v35 = vadd.f32 %v2694_v5, %v7166_v26  ;;  %3700 = vmatpush.msra.mxu0 %v3429_v32  ;;  %3747 = vmatpush.msra.mxu2 %v3515_v50 }
 0x727   : > { %3729 = vmatpush.msra.mxu1 %v3461_v59  ;;  %v3497_v59 = vld [vmem:[%s6061_s17 + $0x220] sm:$0xff] }
 0x728   : > { %v7178_v18 = vadd.f32 %v2723_v63, %v2695_v35  ;;  %3748 = vmatpush.msra.mxu2 %v3513_v42  ;;  %v3537_v35 = vld [vmem:[%s6061_s17 + $0x360] sm:$0xff] }
 0x729   : > { %3781 = vmatpush.msra.mxu3 %v3537_v35 }
 0x72a   : > { %v3173_v60 = vmul.f32 0.044715, %v7178_v18  ;;  %3749 = vmatpush.msra.mxu2 %v3511_v43 }
 0x72c   : > { %v3205_v23 = vmul.f32 %v3173_v60, %v7178_v18  ;;  %v2752_v45 = vpop.f32.mrf.mxu2  ;;  %v2781_v6 = vpop.f32.mrf.mxu3  ;;  %3750 = vmatpush.msra.mxu2 %v3509_v46  ;;  %v3141_v60 = vmul.f32 0.5, %v7178_v18 }
 0x72d   : > { %v2753_v24 = vadd.f32 %v2752_v45, %v7183_v52  ;;  %v2697_v0 = vpop.f32.mrf.mxu0  ;;  %v2726_v1 = vpop.f32.mrf.mxu1 }
 0x72e   : > { %v3237_v2 = vmul.f32 %v3205_v23, %v7178_v18  ;;  %v2698_v12 = vadd.f32 %v2697_v0, %v7166_v26  ;;  %3751 = vmatpush.msra.mxu2 %v3507_v55  ;;  %v3535_v23 = vld [vmem:[%s6061_s17 + $0x350] sm:$0xff] }
 0x72f   : > { %v7197_v7 = vadd.f32 %v2781_v6, %v2753_v24  ;;  %3782 = vmatpush.msra.mxu3 %v3535_v23  ;;  %v3533_v24 = vld [vmem:[%s6061_s17 + $0x340] sm:$0xff]  ;;  %v3531_v55 = vld [vmem:[%s6061_s17 + $0x330] sm:$0xff] }
 0x730   : > { %v3269_v9 = vadd.f32 %v3237_v2, %v7178_v18  ;;  %v7200_v11 = vadd.f32 %v2726_v1, %v2698_v12  ;;  %3752 = vmatpush.msra.mxu2 %v3505_v39  ;;  %v3529_v39 = vld [vmem:[%s6061_s17 + $0x320] sm:$0xff] }
 0x731   : > { %v3174_v37 = vmul.f32 0.044715, %v7197_v7  ;;  %3783 = vmatpush.msra.mxu3 %v3533_v24  ;;  %v3142_v61 = vmul.f32 0.5, %v7197_v7  ;;  %v7286_v24 = vperm.slane %v7154_v8, 3 }
 0x732   : > { %v3301_v27 = vmul.f32 0.7978846, %v3269_v9  ;;  %v3181_v58 = vmul.f32 0.044715, %v7200_v11  ;;  %3753 = vmatpush.msra.mxu2 %v3503_v21  ;;  %v3493_v9 = vld [vmem:[%s6061_s17 + $0x200] sm:$0xff] }
 0x733   : > { %v3206_v44 = vmul.f32 %v3174_v37, %v7197_v7  ;;  %3784 = vmatpush.msra.mxu3 %v3531_v55 }
 0x734   : > { %4986 = vtanh.f32 %v3301_v27  ;;  %v2755_v40 = vpop.f32.mrf.mxu2  ;;  %v2784_v16 = vpop.f32.mrf.mxu3  ;;  %v3213_v30 = vmul.f32 %v3181_v58, %v7200_v11  ;;  %3754 = vmatpush.msra.mxu2 %v3501_v4  ;;  %v3585_v4 = vld [vmem:[%s6061_s17 + $0x4e0] sm:$0xff] }
 0x735   : > { %v3238_v29 = vmul.f32 %v3206_v44, %v7197_v7  ;;  %v2756_v31 = vadd.f32 %v2755_v40, %v7183_v52  ;;  %v2700_v22 = vpop.f32.mrf.mxu0  ;;  %v2729_v14 = vpop.f32.mrf.mxu1  ;;  %v3587_v44 = vld [vmem:[%s6061_s17 + $0x4f0] sm:$0xff]  ;;  %v7254_v40 = vperm.slane %v7154_v8, 2  ;;  %3785 = vmatpush.msra.mxu3 %v3529_v39  ;;  %v3577_v39 = vld [vmem:[%s6061_s17 + $0x4a0] sm:$0xff] }
 0x736   : > { %v2701_v25 = vadd.f32 %v2700_v22, %v7166_v26  ;;  %v3245_v15 = vmul.f32 %v3213_v30, %v7200_v11  ;;  %3755 = vmatpush.msra.mxu2 %v3499_v13  ;;  %3801 = vmatpush.msrb.mxu0 %v3587_v44  ;;  %v3149_v22 = vmul.f32 0.5, %v7200_v11  ;;  %v3525_v13 = vld [vmem:[%s6061_s17 + $0x300] sm:$0xff]  ;;  %v3615_v44 = vld [vmem:[%s6061_s17 + $0x5d0] sm:$0xff] }
 0x737   : > { %v3270_v38 = vadd.f32 %v3238_v29, %v7197_v7  ;;  %v7219_v5 = vadd.f32 %v2784_v16, %v2756_v31 }
 0x738   : > { %v7221_v63 = vadd.f32 %v2729_v14, %v2701_v25  ;;  %v3277_v32 = vadd.f32 %v3245_v15, %v7200_v11  ;;  %3756 = vmatpush.msra.mxu2 %v3497_v59  ;;  %v3527_v15 = vld [vmem:[%s6061_s17 + $0x310] sm:$0xff]  ;;  %3802 = vmatpush.msrb.mxu0 %v3585_v4 }
 0x739   : > { %v3302_v48 = vmul.f32 0.7978846, %v3270_v38  ;;  %v3182_v33 = vmul.f32 0.044715, %v7219_v5  ;;  %3786 = vmatpush.msra.mxu3 %v3527_v15  ;;  %v3611_v15 = vld [vmem:[%s6061_s17 + $0x5b0] sm:$0xff] }
 0x73a   : > { %v4987_v54 = vpop.eup %4986  ;;  %v3189_v50 = vmul.f32 0.044715, %v7221_v63  ;;  %v3309_v51 = vmul.f32 0.7978846, %v3277_v32  ;;  %3757 = vmatpush.msra.mxu2 %v3495_v53  ;;  %v3157_v55 = vmul.f32 0.5, %v7221_v63 }
 0x73b   : > { %4988 = vtanh.f32 %v3302_v48  ;;  %v3365_v42 = vadd.f32 1.0, %v4987_v54  ;;  %v3214_v62 = vmul.f32 %v3182_v33, %v7219_v5  ;;  %3787 = vmatpush.msra.mxu3 %v3525_v13 }
 0x73c   : > { %v2758_v45 = vpop.f32.mrf.mxu2  ;;  %v2787_v6 = vpop.f32.mrf.mxu3  ;;  %4990 = vtanh.f32 %v3309_v51  ;;  %v3221_v43 = vmul.f32 %v3189_v50, %v7221_v63  ;;  %3758 = vmatpush.msra.mxu2 %v3493_v9  ;;  %v3583_v50 = vld [vmem:[%s6061_s17 + $0x4d0] sm:$0xff] }
 0x73d   : > { %v2759_v0 = vadd.f32 %v2758_v45, %v7183_v52  ;;  %v2703_v1 = vpop.f32.mrf.mxu0  ;;  %v2732_v2 = vpop.f32.mrf.mxu1  ;;  %v7236_v18 = vmul.f32 %v3365_v42, %v3141_v60  ;;  %v3246_v12 = vmul.f32 %v3214_v62, %v7219_v5  ;;  %v3619_v60 = vld [vmem:[%s6061_s17 + $0x5f0] sm:$0xff]  ;;  %v3581_v62 = vld [vmem:[%s6061_s17 + $0x4c0] sm:$0xff]  ;;  %3803 = vmatpush.msrb.mxu0 %v3583_v50 }
 0x73e   : > { %v2704_v46 = vadd.f32 %v2703_v1, %v7166_v26  ;;  %v3253_v49 = vmul.f32 %v3221_v43, %v7221_v63  ;;  %3830 = vmatpush.msrb.mxu1 %v3619_v60  ;;  %v3579_v1 = vld [vmem:[%s6061_s17 + $0x4b0] sm:$0xff] }
 0x73f   : > { %v7243_v10 = vadd.f32 %v2787_v6, %v2759_v0  ;;  %3701 = vmatmul.f32.vlgmr.msra.gmra.mxu0 %v7236_v18  ;;  %v3278_v37 = vadd.f32 %v3246_v12, %v7219_v5  ;;  %v3617_v6 = vld [vmem:[%s6061_s17 + $0x5e0] sm:$0xff]  ;;  %v3571_v50 = vld [vmem:[%s6061_s17 + $0x470] sm:$0xff] }
 0x740   : > { %v7247_v27 = vadd.f32 %v2732_v2, %v2704_v46  ;;  %v3285_v58 = vadd.f32 %v3253_v49, %v7221_v63  ;;  %3831 = vmatpush.msrb.mxu1 %v3617_v6  ;;  %v3150_v46 = vmul.f32 0.5, %v7219_v5  ;;  %3804 = vmatpush.msrb.mxu0 %v3581_v62  ;;  %v3613_v5 = vld [vmem:[%s6061_s17 + $0x5c0] sm:$0xff] }
 0x741   : > { %v4989_v26 = vpop.eup %4988  ;;  %v3190_v20 = vmul.f32 0.044715, %v7243_v10  ;;  %v3310_v16 = vmul.f32 0.7978846, %v3278_v37 }
 0x742   : > { %v4991_v30 = vpop.eup %4990  ;;  %v3197_v21 = vmul.f32 0.044715, %v7247_v27  ;;  %v3366_v29 = vadd.f32 1.0, %v4989_v26  ;;  %v3317_v31 = vmul.f32 0.7978846, %v3285_v58  ;;  %3805 = vmatpush.msrb.mxu0 %v3579_v1  ;;  %3832 = vmatpush.msrb.mxu1 %v3615_v44  ;;  %v3165_v6 = vmul.f32 0.5, %v7247_v27 }
 0x743   : > { %v3373_v14 = vadd.f32 1.0, %v4991_v30  ;;  %4992 = vtanh.f32 %v3310_v16  ;;  %v3222_v25 = vmul.f32 %v3190_v20, %v7243_v10 }
 0x744   : > { %v2761_v19 = vpop.f32.mrf.mxu2  ;;  %v2790_v38 = vpop.f32.mrf.mxu3  ;;  %v7262_v32 = vmul.f32 %v3366_v29, %v3142_v61  ;;  %4994 = vtanh.f32 %v3317_v31  ;;  %v3229_v7 = vmul.f32 %v3197_v21, %v7247_v27  ;;  %3806 = vmatpush.msrb.mxu0 %v3577_v39  ;;  %3833 = vmatpush.msrb.mxu1 %v3613_v5  ;;  %v3565_v5 = vld [vmem:[%s6061_s17 + $0x440] sm:$0xff] }
 0x745   : > { %v2762_v11 = vadd.f32 %v2761_v19, %v7183_v52  ;;  %v2810_v35 = vpop.f32.mrf.mxu0  ;;  %v2839_v48 = vpop.f32.mrf.mxu1  ;;  %v7267_v33 = vmul.f32 %v3373_v14, %v3149_v22  ;;  %v3254_v54 = vmul.f32 %v3222_v25, %v7243_v10  ;;  %v3575_v22 = vld [vmem:[%s6061_s17 + $0x490] sm:$0xff] }
 0x746   : > { %v2811_v51 = vadd.f32 %v2810_v35, %v7254_v40  ;;  %3730 = vmatmul.f32.vlgmr.msra.gmra.mxu1 %v7262_v32  ;;  %v3261_v59 = vmul.f32 %v3229_v7, %v7247_v27  ;;  %3807 = vmatpush.msrb.mxu0 %v3575_v22 }
 0x747   : > { %v7275_v42 = vadd.f32 %v2790_v38, %v2762_v11  ;;  %3704 = vmatmul.f32.gmra.mxu0 %v7267_v33  ;;  %v3286_v52 = vadd.f32 %v3254_v54, %v7243_v10  ;;  %v3573_v38 = vld [vmem:[%s6061_s17 + $0x480] sm:$0xff]  ;;  %3834 = vmatpush.msrb.mxu1 %v3611_v15 }
 0x748   : > { %v7280_v23 = vadd.f32 %v2839_v48, %v2811_v51  ;;  %v3293_v45 = vadd.f32 %v3261_v59, %v7247_v27  ;;  %v3609_v11 = vld [vmem:[%s6061_s17 + $0x5a0] sm:$0xff]  ;;  %3808 = vmatpush.msrb.mxu0 %v3573_v38 }
 0x749   : > { %v4993_v43 = vpop.eup %4992  ;;  %v3198_v53 = vmul.f32 0.044715, %v7275_v42  ;;  %v3318_v0 = vmul.f32 0.7978846, %v3286_v52  ;;  %v3158_v52 = vmul.f32 0.5, %v7243_v10  ;;  %3835 = vmatpush.msrb.mxu1 %v3609_v11  ;;  %v3166_v38 = vmul.f32 0.5, %v7275_v42 }
 0x74a   : > { %v4995_v2 = vpop.eup %4994  ;;  %v3175_v12 = vmul.f32 0.044715, %v7280_v23  ;;  %v3374_v49 = vadd.f32 1.0, %v4993_v43  ;;  %v3325_v9 = vmul.f32 0.7978846, %v3293_v45  ;;  %3809 = vmatpush.msrb.mxu0 %v3571_v50  ;;  %v3561_v50 = vld [vmem:[%s6061_s17 + $0x420] sm:$0xff] }
 0x74b   : > { %v3381_v37 = vadd.f32 1.0, %v4995_v2  ;;  %4996 = vtanh.f32 %v3318_v0  ;;  %v3230_v58 = vmul.f32 %v3198_v53, %v7275_v42  ;;  %v3569_v53 = vld [vmem:[%s6061_s17 + $0x460] sm:$0xff]  ;;  %v3607_v0 = vld [vmem:[%s6061_s17 + $0x590] sm:$0xff] }
 0x74c   : > { %v3207_v26 = vmul.f32 %v3175_v12, %v7280_v23  ;;  %v2868_v20 = vpop.f32.mrf.mxu2  ;;  %v2897_v16 = vpop.f32.mrf.mxu3  ;;  %v7296_v30 = vmul.f32 %v3374_v49, %v3150_v46  ;;  %4998 = vtanh.f32 %v3325_v9  ;;  %v3605_v46 = vld [vmem:[%s6061_s17 + $0x580] sm:$0xff]  ;;  %3836 = vmatpush.msrb.mxu1 %v3607_v0  ;;  %3810 = vmatpush.msrb.mxu0 %v3569_v53  ;;  %v3559_v0 = vld [vmem:[%s6061_s17 + $0x410] sm:$0xff] }
 0x74d   : > { %v2869_v63 = vadd.f32 %v2868_v20, %v7286_v24  ;;  %v2813_v21 = vpop.f32.mrf.mxu0  ;;  %v2842_v61 = vpop.f32.mrf.mxu1  ;;  %v7300_v29 = vmul.f32 %v3381_v37, %v3157_v55  ;;  %v3262_v31 = vmul.f32 %v3230_v58, %v7275_v42  ;;  %v3567_v58 = vld [vmem:[%s6061_s17 + $0x450] sm:$0xff] }
 0x74e   : > { %v3239_v14 = vmul.f32 %v3207_v26, %v7280_v23  ;;  %v2814_v25 = vadd.f32 %v2813_v21, %v7254_v40  ;;  %3733 = vmatmul.f32.gmra.mxu1 %v7296_v30  ;;  %v3603_v26 = vld [vmem:[%s6061_s17 + $0x570] sm:$0xff]  ;;  %3811 = vmatpush.msrb.mxu0 %v3567_v58 }
 0x74f   : > { %v7308_v4 = vadd.f32 %v2897_v16, %v2869_v63  ;;  %3707 = vmatmul.f32.gmra.mxu0 %v7300_v29  ;;  %v3294_v19 = vadd.f32 %v3262_v31, %v7275_v42  ;;  %3837 = vmatpush.msrb.mxu1 %v3605_v46  ;;  %v3651_v58 = vld [vmem:[%s6061_s17 + $0x6f0] sm:$0xff] }
 0x750   : > { %v3271_v7 = vadd.f32 %v3239_v14, %v7280_v23  ;;  %v7314_v13 = vadd.f32 %v2842_v61, %v2814_v25  ;;  %v3601_v61 = vld [vmem:[%s6061_s17 + $0x560] sm:$0xff]  ;;  %v3563_v25 = vld [vmem:[%s6061_s17 + $0x430] sm:$0xff]  ;;  %3812 = vmatpush.msrb.mxu0 %v3565_v5  ;;  %3859 = vmatpush.msrb.mxu2 %v3651_v58 }
 0x751   : > { %v4997_v35 = vpop.eup %4996  ;;  %v3176_v48 = vmul.f32 0.044715, %v7308_v4  ;;  %v3326_v54 = vmul.f32 0.7978846, %v3294_v19  ;;  %3838 = vmatpush.msrb.mxu1 %v3603_v26  ;;  %v3681_v58 = vld [vmem:[%s6061_s17 + $0x7e0] sm:$0xff] }
 0x752   : > { %v4999_v51 = vpop.eup %4998  ;;  %v3303_v59 = vmul.f32 0.7978846, %v3271_v7  ;;  %v3183_v60 = vmul.f32 0.044715, %v7314_v13  ;;  %v3382_v62 = vadd.f32 1.0, %v4997_v35  ;;  %v3143_v35 = vmul.f32 0.5, %v7280_v23  ;;  %3813 = vmatpush.msrb.mxu0 %v3563_v25 }
 0x753   : > { %v3208_v45 = vmul.f32 %v3176_v48, %v7308_v4  ;;  %v3389_v43 = vadd.f32 1.0, %v4999_v51  ;;  %5000 = vtanh.f32 %v3326_v54  ;;  %3839 = vmatpush.msrb.mxu1 %v3601_v61  ;;  %v3599_v51 = vld [vmem:[%s6061_s17 + $0x550] sm:$0xff]  ;;  %v3151_v25 = vmul.f32 0.5, %v7314_v13 }
 0x754   : > { %5002 = vtanh.f32 %v3303_v59  ;;  %v2871_v1 = vpop.f32.mrf.mxu2  ;;  %v2900_v2 = vpop.f32.mrf.mxu3  ;;  %v7325_v12 = vmul.f32 %v3382_v62, %v3158_v52  ;;  %v3215_v10 = vmul.f32 %v3183_v60, %v7314_v13  ;;  %v3597_v62 = vld [vmem:[%s6061_s17 + $0x540] sm:$0xff]  ;;  %3814 = vmatpush.msrb.mxu0 %v3561_v50  ;;  %v3647_v50 = vld [vmem:[%s6061_s17 + $0x6d0] sm:$0xff] }
 0x755   : > { %v3240_v49 = vmul.f32 %v3208_v45, %v7308_v4  ;;  %v2872_v27 = vadd.f32 %v2871_v1, %v7286_v24  ;;  %v2816_v9 = vpop.f32.mrf.mxu0  ;;  %v2845_v55 = vpop.f32.mrf.mxu1  ;;  %v7331_v37 = vmul.f32 %v3389_v43, %v3165_v6  ;;  %3840 = vmatpush.msrb.mxu1 %v3599_v51 }
 0x756   : > { %v2817_v39 = vadd.f32 %v2816_v9, %v7254_v40  ;;  %3736 = vmatmul.f32.gmra.mxu1 %v7325_v12  ;;  %v3247_v44 = vmul.f32 %v3215_v10, %v7314_v13  ;;  %v3595_v10 = vld [vmem:[%s6061_s17 + $0x530] sm:$0xff]  ;;  %3815 = vmatpush.msrb.mxu0 %v3559_v0 }
 0x757   : > { %v3272_v20 = vadd.f32 %v3240_v49, %v7308_v4  ;;  %v7339_v16 = vadd.f32 %v2900_v2, %v2872_v27  ;;  %3710 = vmatmul.f32.gmra.mxu0 %v7331_v37  ;;  %3841 = vmatpush.msrb.mxu1 %v3597_v62  ;;  %v3557_v27 = vld [vmem:[%s6061_s17 + $0x400] sm:$0xff] }
 0x758   : > { %v7343_v63 = vadd.f32 %v2845_v55, %v2817_v39  ;;  %v3279_v21 = vadd.f32 %v3247_v44, %v7314_v13  ;;  %v3460_v39 = vld [vmem:[%s6061_s17 + $0xf8] sm:$0xff]  ;;  %3816 = vmatpush.msrb.mxu0 %v3557_v27  ;;  %v3589_v13 = vld [vmem:[%s6061_s17 + $0x500] sm:$0xff]  ;;  %v7414_v27 = vperm.slane %v7154_v8, 5 }
 0x759   : > { %v5001_v31 = vpop.eup %5000  ;;  %v3304_v22 = vmul.f32 0.7978846, %v3272_v20  ;;  %v3184_v14 = vmul.f32 0.044715, %v7339_v16  ;;  %v7381_v20 = vperm.slane %v7154_v8, 4  ;;  %3842 = vmatpush.msrb.mxu1 %v3595_v10  ;;  %v3492_v10 = vld [vmem:[%s6061_s17 + $0x1f8] sm:$0xff] }
 0x75a   : > { %v5003_v15 = vpop.eup %5002  ;;  %v3191_v19 = vmul.f32 0.044715, %v7343_v63  ;;  %v3390_v7 = vadd.f32 1.0, %v5001_v31  ;;  %v3311_v11 = vmul.f32 0.7978846, %v3279_v21  ;;  %v3144_v31 = vmul.f32 0.5, %v7308_v4  ;;  %3917 = vmatpush.msra.mxu0 %v3460_v39 }
 0x75b   : > { %5004 = vtanh.f32 %v3304_v22  ;;  %v3367_v48 = vadd.f32 1.0, %v5003_v15  ;;  %v3216_v54 = vmul.f32 %v3184_v14, %v7339_v16 }
 0x75c   : > { %v2874_v59 = vpop.f32.mrf.mxu2  ;;  %v2903_v60 = vpop.f32.mrf.mxu3  ;;  %v7355_v52 = vmul.f32 %v3390_v7, %v3166_v38  ;;  %5006 = vtanh.f32 %v3311_v11  ;;  %v3223_v42 = vmul.f32 %v3191_v19, %v7343_v63  ;;  %v3591_v38 = vld [vmem:[%s6061_s17 + $0x510] sm:$0xff]  ;;  %v3649_v7 = vld [vmem:[%s6061_s17 + $0x6e0] sm:$0xff]  ;;  %v3458_v11 = vld [vmem:[%s6061_s17 + $0xe8] sm:$0xff] }
 0x75d   : > { %v2875_v45 = vadd.f32 %v2874_v59, %v7286_v24  ;;  %v2819_v23 = vpop.f32.mrf.mxu0  ;;  %v2848_v6 = vpop.f32.mrf.mxu1  ;;  %v7360_v43 = vmul.f32 %v3367_v48, %v3143_v35  ;;  %v3248_v53 = vmul.f32 %v3216_v54, %v7339_v16  ;;  %3860 = vmatpush.msrb.mxu2 %v3649_v7  ;;  %3918 = vmatpush.msra.mxu0 %v3458_v11  ;;  %v3679_v7 = vld [vmem:[%s6061_s17 + $0x7d0] sm:$0xff]  ;;  %v3450_v11 = vld [vmem:[%s6061_s17 + $0xa8] sm:$0xff] }
 0x75e   : > { %v2820_v1 = vadd.f32 %v2819_v23, %v7254_v40  ;;  %3739 = vmatmul.f32.gmra.mxu1 %v7355_v52  ;;  %v3255_v2 = vmul.f32 %v3223_v42, %v7343_v63  ;;  %v3593_v40 = vld [vmem:[%s6061_s17 + $0x520] sm:$0xff] }
 0x75f   : > { %v7368_v46 = vadd.f32 %v2903_v60, %v2875_v45  ;;  %3759 = vmatmul.f32.vlgmr.msra.gmra.mxu2 %v7360_v43  ;;  %v3280_v49 = vadd.f32 %v3248_v53, %v7339_v16  ;;  %3843 = vmatpush.msrb.mxu1 %v3593_v40  ;;  %v3456_v45 = vld [vmem:[%s6061_s17 + $0xd8] sm:$0xff]  ;;  %v3683_v53 = vld [vmem:[%s6061_s17 + $0x7f0] sm:$0xff] }
 0x760   : > { %v7373_v9 = vadd.f32 %v2848_v6, %v2820_v1  ;;  %v3287_v55 = vadd.f32 %v3255_v2, %v7343_v63  ;;  %3861 = vmatpush.msrb.mxu2 %v3647_v50  ;;  %v3454_v2 = vld [vmem:[%s6061_s17 + $0xc8] sm:$0xff]  ;;  %3919 = vmatpush.msra.mxu0 %v3456_v45  ;;  %v3643_v40 = vld [vmem:[%s6061_s17 + $0x6b0] sm:$0xff] }
 0x761   : > { %v5005_v44 = vpop.eup %5004  ;;  %v3192_v26 = vmul.f32 0.044715, %v7368_v46  ;;  %v3312_v5 = vmul.f32 0.7978846, %v3280_v49  ;;  %3844 = vmatpush.msrb.mxu1 %v3591_v38  ;;  %3888 = vmatpush.msrb.mxu3 %v3683_v53  ;;  %v3641_v38 = vld [vmem:[%s6061_s17 + $0x6a0] sm:$0xff]  ;;  %v3639_v45 = vld [vmem:[%s6061_s17 + $0x690] sm:$0xff] }
 0x762   : > { %v5007_v21 = vpop.eup %5006  ;;  %v3199_v61 = vmul.f32 0.044715, %v7373_v9  ;;  %v3368_v22 = vadd.f32 1.0, %v5005_v44  ;;  %v3319_v14 = vmul.f32 0.7978846, %v3287_v55  ;;  %3920 = vmatpush.msra.mxu0 %v3454_v2  ;;  %v3486_v53 = vld [vmem:[%s6061_s17 + $0x1c8] sm:$0xff] }
 0x763   : > { %v3375_v15 = vadd.f32 1.0, %v5007_v21  ;;  %5008 = vtanh.f32 %v3312_v5  ;;  %v3224_v19 = vmul.f32 %v3192_v26, %v7368_v46  ;;  %3845 = vmatpush.msrb.mxu1 %v3589_v13  ;;  %v3452_v5 = vld [vmem:[%s6061_s17 + $0xb8] sm:$0xff]  ;;  %v3490_v21 = vld [vmem:[%s6061_s17 + $0x1e8] sm:$0xff]  ;;  %3889 = vmatpush.msrb.mxu3 %v3681_v58  ;;  %v3677_v13 = vld [vmem:[%s6061_s17 + $0x7c0] sm:$0xff] }
 0x764   : > { %v2877_v35 = vpop.f32.mrf.mxu2  ;;  %v2906_v48 = vpop.f32.mrf.mxu3  ;;  %v7390_v4 = vmul.f32 %v3368_v22, %v3144_v31  ;;  %5010 = vtanh.f32 %v3319_v14  ;;  %v3231_v54 = vmul.f32 %v3199_v61, %v7373_v9  ;;  %v3152_v31 = vmul.f32 0.5, %v7339_v16  ;;  %3921 = vmatpush.msra.mxu0 %v3452_v5  ;;  %v3673_v5 = vld [vmem:[%s6061_s17 + $0x7a0] sm:$0xff] }
 0x765   : > { %v2878_v51 = vadd.f32 %v2877_v35, %v7286_v24  ;;  %v2926_v59 = vpop.f32.mrf.mxu0  ;;  %v2955_v60 = vpop.f32.mrf.mxu1  ;;  %v7396_v42 = vmul.f32 %v3375_v15, %v3151_v25  ;;  %v3256_v62 = vmul.f32 %v3224_v19, %v7368_v46  ;;  %v3645_v24 = vld [vmem:[%s6061_s17 + $0x6c0] sm:$0xff]  ;;  %3946 = vmatpush.msra.mxu1 %v3492_v10  ;;  %v3159_v25 = vmul.f32 0.5, %v7343_v63  ;;  %v3488_v63 = vld [vmem:[%s6061_s17 + $0x1d8] sm:$0xff]  ;;  %3890 = vmatpush.msrb.mxu3 %v3679_v7 }
 0x766   : > { %v2927_v23 = vadd.f32 %v2926_v59, %v7381_v20  ;;  %3788 = vmatmul.f32.vlgmr.msra.gmra.mxu3 %v7390_v4  ;;  %v3263_v6 = vmul.f32 %v3231_v54, %v7373_v9  ;;  %3862 = vmatpush.msrb.mxu2 %v3645_v24  ;;  %v3167_v7 = vmul.f32 0.5, %v7373_v9 }
 0x767   : > { %v7405_v0 = vadd.f32 %v2906_v48, %v2878_v51  ;;  %3762 = vmatmul.f32.gmra.mxu2 %v7396_v42  ;;  %v3288_v1 = vadd.f32 %v3256_v62, %v7368_v46  ;;  %3947 = vmatpush.msra.mxu1 %v3490_v21 }
 0x768   : > { %v7411_v49 = vadd.f32 %v2955_v60, %v2927_v23  ;;  %v3295_v55 = vadd.f32 %v3263_v6, %v7373_v9  ;;  %3863 = vmatpush.msrb.mxu2 %v3643_v40  ;;  %v3448_v23 = vld [vmem:[%s6061_s17 + $0x98] sm:$0xff]  ;;  %3922 = vmatpush.msra.mxu0 %v3450_v11  ;;  %v3446_v40 = vld [vmem:[%s6061_s17 + $0x88] sm:$0xff] }
 0x769   : > { %v5009_v39 = vpop.eup %5008  ;;  %v3200_v44 = vmul.f32 0.044715, %v7405_v0  ;;  %v3320_v26 = vmul.f32 0.7978846, %v3288_v1  ;;  %3948 = vmatpush.msra.mxu1 %v3488_v63  ;;  %v3675_v1 = vld [vmem:[%s6061_s17 + $0x7b0] sm:$0xff]  ;;  %3891 = vmatpush.msrb.mxu3 %v3677_v13  ;;  %v3442_v9 = vld [vmem:[%s6061_s17 + $0x68] sm:$0xff] }
 0x76a   : > { %v5011_v61 = vpop.eup %5010  ;;  %v3177_v8 = vmul.f32 0.044715, %v7411_v49  ;;  %v3376_v22 = vadd.f32 1.0, %v5009_v39  ;;  %v3327_v14 = vmul.f32 0.7978846, %v3295_v55  ;;  %3864 = vmatpush.msrb.mxu2 %v3641_v38  ;;  %v3637_v55 = vld [vmem:[%s6061_s17 + $0x680] sm:$0xff]  ;;  %3923 = vmatpush.msra.mxu0 %v3448_v23 }
 0x76b   : > { %v3383_v15 = vadd.f32 1.0, %v5011_v61  ;;  %5012 = vtanh.f32 %v3320_v26  ;;  %v3232_v19 = vmul.f32 %v3200_v44, %v7405_v0  ;;  %v3160_v44 = vmul.f32 0.5, %v7368_v46  ;;  %v3484_v26 = vld [vmem:[%s6061_s17 + $0x1b8] sm:$0xff]  ;;  %3949 = vmatpush.msra.mxu1 %v3486_v53  ;;  %3892 = vmatpush.msrb.mxu3 %v3675_v1 }
 0x76c   : > { %v3209_v35 = vmul.f32 %v3177_v8, %v7411_v49  ;;  %v2984_v16 = vpop.f32.mrf.mxu2  ;;  %v3013_v48 = vpop.f32.mrf.mxu3  ;;  %v7430_v54 = vmul.f32 %v3376_v22, %v3152_v31  ;;  %5014 = vtanh.f32 %v3327_v14  ;;  %3865 = vmatpush.msrb.mxu2 %v3639_v45  ;;  %v3635_v31 = vld [vmem:[%s6061_s17 + $0x670] sm:$0xff]  ;;  %v3444_v22 = vld [vmem:[%s6061_s17 + $0x78] sm:$0xff]  ;;  %3924 = vmatpush.msra.mxu0 %v3446_v40 }
 0x76d   : > { %v2985_v50 = vadd.f32 %v2984_v16, %v7414_v27  ;;  %v2929_v51 = vpop.f32.mrf.mxu0  ;;  %v2958_v59 = vpop.f32.mrf.mxu1  ;;  %v7435_v60 = vmul.f32 %v3383_v15, %v3159_v25  ;;  %v3264_v62 = vmul.f32 %v3232_v19, %v7405_v0  ;;  %v3482_v19 = vld [vmem:[%s6061_s17 + $0x1a8] sm:$0xff]  ;;  %3950 = vmatpush.msra.mxu1 %v3484_v26  ;;  %3893 = vmatpush.msrb.mxu3 %v3673_v5  ;;  %v3671_v16 = vld [vmem:[%s6061_s17 + $0x790] sm:$0xff]  ;;  %v3629_v26 = vld [vmem:[%s6061_s17 + $0x640] sm:$0xff] }
 0x76e   : > { %v3241_v6 = vmul.f32 %v3209_v35, %v7411_v49  ;;  %v2930_v24 = vadd.f32 %v2929_v51, %v7381_v20  ;;  %3791 = vmatmul.f32.gmra.mxu3 %v7430_v54  ;;  %3866 = vmatpush.msrb.mxu2 %v3637_v55  ;;  %v3633_v35 = vld [vmem:[%s6061_s17 + $0x660] sm:$0xff]  ;;  %v3440_v55 = vld [vmem:[%s6061_s17 + $0x58] sm:$0xff] }
 0x76f   : > { %v7445_v2 = vadd.f32 %v3013_v48, %v2985_v50  ;;  %3765 = vmatmul.f32.gmra.mxu2 %v7435_v60  ;;  %v3296_v10 = vadd.f32 %v3264_v62, %v7405_v0  ;;  %3925 = vmatpush.msra.mxu0 %v3444_v22  ;;  %v3476_v22 = vld [vmem:[%s6061_s17 + $0x178] sm:$0xff] }
 0x770   : > { %v3273_v58 = vadd.f32 %v3241_v6, %v7411_v49  ;;  %v7452_v39 = vadd.f32 %v2958_v59, %v2930_v24  ;;  %3867 = vmatpush.msrb.mxu2 %v3635_v31  ;;  %3951 = vmatpush.msra.mxu1 %v3482_v19  ;;  %v3480_v6 = vld [vmem:[%s6061_s17 + $0x198] sm:$0xff]  ;;  %v3631_v24 = vld [vmem:[%s6061_s17 + $0x650] sm:$0xff]  ;;  %v3438_v31 = vld [vmem:[%s6061_s17 + $0x48] sm:$0xff] }
 0x771   : > { %v5013_v21 = vpop.eup %5012  ;;  %v3178_v61 = vmul.f32 0.044715, %v7445_v2  ;;  %v3328_v8 = vmul.f32 0.7978846, %v3296_v10  ;;  %3894 = vmatpush.msrb.mxu3 %v3671_v16  ;;  %v3669_v10 = vld [vmem:[%s6061_s17 + $0x780] sm:$0xff]  ;;  %3926 = vmatpush.msra.mxu0 %v3442_v9  ;;  %v3145_v16 = vmul.f32 0.5, %v7411_v49 }
 0x772   : > { %v5015_v14 = vpop.eup %5014  ;;  %v3305_v25 = vmul.f32 0.7978846, %v3273_v58  ;;  %v3185_v15 = vmul.f32 0.044715, %v7452_v39  ;;  %v3384_v46 = vadd.f32 1.0, %v5013_v21  ;;  %3868 = vmatpush.msrb.mxu2 %v3633_v35  ;;  %v3168_v21 = vmul.f32 0.5, %v7405_v0  ;;  %3952 = vmatpush.msra.mxu1 %v3480_v6 }
 0x773   : > { %v3210_v38 = vmul.f32 %v3178_v61, %v7445_v2  ;;  %v3391_v11 = vadd.f32 1.0, %v5015_v14  ;;  %5016 = vtanh.f32 %v3328_v8  ;;  %v3667_v8 = vld [vmem:[%s6061_s17 + $0x770] sm:$0xff]  ;;  %3895 = vmatpush.msrb.mxu3 %v3669_v10  ;;  %3927 = vmatpush.msra.mxu0 %v3440_v55  ;;  %v3665_v19 = vld [vmem:[%s6061_s17 + $0x760] sm:$0xff]  ;;  %v3436_v35 = vld [vmem:[%s6061_s17 + $0x38] sm:$0xff] }
 0x774   : > { %5018 = vtanh.f32 %v3305_v25  ;;  %v2987_v48 = vpop.f32.mrf.mxu2  ;;  %v3016_v63 = vpop.f32.mrf.mxu3  ;;  %v7466_v13 = vmul.f32 %v3384_v46, %v3160_v44  ;;  %v3217_v50 = vmul.f32 %v3185_v15, %v7452_v39  ;;  %v3478_v44 = vld [vmem:[%s6061_s17 + $0x188] sm:$0xff]  ;;  %3869 = vmatpush.msrb.mxu2 %v3631_v24  ;;  %v3627_v46 = vld [vmem:[%s6061_s17 + $0x630] sm:$0xff]  ;;  %v3625_v49 = vld [vmem:[%s6061_s17 + $0x620] sm:$0xff] }
 0x775   : > { %v3242_v51 = vmul.f32 %v3210_v38, %v7445_v2  ;;  %v2988_v59 = vadd.f32 %v2987_v48, %v7414_v27  ;;  %v2932_v62 = vpop.f32.mrf.mxu0  ;;  %v2961_v45 = vpop.f32.mrf.mxu1  ;;  %v7472_v23 = vmul.f32 %v3391_v11, %v3167_v7  ;;  %3953 = vmatpush.msra.mxu1 %v3478_v44  ;;  %3896 = vmatpush.msrb.mxu3 %v3667_v8  ;;  %v3663_v10 = vld [vmem:[%s6061_s17 + $0x750] sm:$0xff]  ;;  %v3434_v55 = vld [vmem:[%s6061_s17 + $0x28] sm:$0xff] }
 0x776   : > { %v2933_v53 = vadd.f32 %v2932_v62, %v7381_v20  ;;  %3794 = vmatmul.f32.gmra.mxu3 %v7466_v13  ;;  %v3249_v1 = vmul.f32 %v3217_v50, %v7452_v39  ;;  %3870 = vmatpush.msrb.mxu2 %v3629_v26  ;;  %v3474_v50 = vld [vmem:[%s6061_s17 + $0x168] sm:$0xff]  ;;  %v3472_v26 = vld [vmem:[%s6061_s17 + $0x158] sm:$0xff] }
 0x777   : > { %v3274_v40 = vadd.f32 %v3242_v51, %v7445_v2  ;;  %v7482_v58 = vadd.f32 %v3016_v63, %v2988_v59  ;;  %3768 = vmatmul.f32.gmra.mxu2 %v7472_v23  ;;  %3928 = vmatpush.msra.mxu0 %v3438_v31  ;;  %v3661_v31 = vld [vmem:[%s6061_s17 + $0x740] sm:$0xff] }
 0x778   : > { %v7487_v5 = vadd.f32 %v2961_v45, %v2933_v53  ;;  %v3281_v61 = vadd.f32 %v3249_v1, %v7452_v39  ;;  %3954 = vmatpush.msra.mxu1 %v3476_v22  ;;  %3871 = vmatpush.msrb.mxu2 %v3627_v46  ;;  %v3432_v22 = vld [vmem:[%s6061_s17 + $0x18] sm:$0xff] }
 0x779   : > { %v5017_v14 = vpop.eup %5016  ;;  %v3306_v25 = vmul.f32 0.7978846, %v3274_v40  ;;  %v3186_v15 = vmul.f32 0.044715, %v7482_v58  ;;  %3897 = vmatpush.msrb.mxu3 %v3665_v19  ;;  %3929 = vmatpush.msra.mxu0 %v3436_v35  ;;  %v3470_v19 = vld [vmem:[%s6061_s17 + $0x148] sm:$0xff] }
 0x77a   : > { %v5019_v38 = vpop.eup %5018  ;;  %v3193_v0 = vmul.f32 0.044715, %v7487_v5  ;;  %v3392_v7 = vadd.f32 1.0, %v5017_v14  ;;  %v3313_v11 = vmul.f32 0.7978846, %v3281_v61  ;;  %3955 = vmatpush.msra.mxu1 %v3474_v50  ;;  %3872 = vmatpush.msrb.mxu2 %v3625_v49 }
 0x77b   : > { %5020 = vtanh.f32 %v3306_v25  ;;  %v3369_v48 = vadd.f32 1.0, %v5019_v38  ;;  %v3218_v63 = vmul.f32 %v3186_v15, %v7482_v58  ;;  %v5058_v25 = vld [vmem:[%s6055_s27] sm:$0xff]  ;;  %3898 = vmatpush.msrb.mxu3 %v3663_v10  ;;  %3930 = vmatpush.msra.mxu0 %v3434_v55  ;;  %v3621_v38 = vld [vmem:[%s6061_s17 + $0x600] sm:$0xff] }
 0x77c   : > { %v2990_v9 = vpop.f32.mrf.mxu2  ;;  %v3019_v51 = vpop.f32.mrf.mxu3  ;;  %v7502_v59 = vmul.f32 %v3392_v7, %v3168_v21  ;;  %5022 = vtanh.f32 %v3313_v11  ;;  %v3225_v62 = vmul.f32 %v3193_v0, %v7487_v5  ;;  %v3623_v21 = vld [vmem:[%s6061_s17 + $0x610] sm:$0xff]  ;;  %v7527_v15 = vperm.slane %v5058_v25, 6  ;;  %3956 = vmatpush.msra.mxu1 %v3472_v26 }
 0x77d   : > { %v2991_v45 = vadd.f32 %v2990_v9, %v7414_v27  ;;  %v2935_v6 = vpop.f32.mrf.mxu0  ;;  %v2964_v24 = vpop.f32.mrf.mxu1  ;;  %v7507_v53 = vmul.f32 %v3369_v48, %v3145_v16  ;;  %v3250_v1 = vmul.f32 %v3218_v63, %v7482_v58  ;;  %v3659_v0 = vld [vmem:[%s6061_s17 + $0x730] sm:$0xff]  ;;  %3873 = vmatpush.msrb.mxu2 %v3623_v21  ;;  %v3468_v16 = vld [vmem:[%s6061_s17 + $0x138] sm:$0xff]  ;;  %3899 = vmatpush.msrb.mxu3 %v3661_v31 }
 0x77e   : > { %v2936_v40 = vadd.f32 %v2935_v6, %v7381_v20  ;;  %3797 = vmatmul.f32.gmra.mxu3 %v7502_v59  ;;  %v3257_v44 = vmul.f32 %v3225_v62, %v7487_v5  ;;  %v3146_v20 = vmul.f32 0.5, %v7445_v2  ;;  %v3430_v2 = vld [vmem:[%s6061_s17 + $0x8] sm:$0xff]  ;;  %3931 = vmatpush.msra.mxu0 %v3432_v22  ;;  %v3153_v62 = vmul.f32 0.5, %v7452_v39  ;;  %v3657_v6 = vld [vmem:[%s6061_s17 + $0x720] sm:$0xff]  ;;  %v3588_v31 = vld [vmem:[%s6061_s17 + $0x4f8] sm:$0xff] }
 0x77f   : > { %v7517_v61 = vadd.f32 %v3019_v51, %v2991_v45  ;;  %3817 = vmatmul.f32.vlgmr.msrb.gmra.mxu0 %v7507_v53  ;;  %v3282_v8 = vadd.f32 %v3250_v1, %v7482_v58  ;;  %v3524_v51 = vld [vmem:[%s6061_s17 + $0x2f8] sm:$0xff]  ;;  %3957 = vmatpush.msra.mxu1 %v3470_v19  ;;  %v3466_v39 = vld [vmem:[%s6061_s17 + $0x128] sm:$0xff]  ;;  %v3655_v22 = vld [vmem:[%s6061_s17 + $0x710] sm:$0xff] }
 0x780   : > { %v7524_v14 = vadd.f32 %v2964_v24, %v2936_v40  ;;  %v3289_v46 = vadd.f32 %v3257_v44, %v7487_v5  ;;  %3874 = vmatpush.msrb.mxu2 %v3621_v38  ;;  %3900 = vmatpush.msrb.mxu3 %v3659_v0  ;;  %v3522_v19 = vld [vmem:[%s6061_s17 + $0x2e8] sm:$0xff] }
 0x781   : > { %v5021_v7 = vpop.eup %5020  ;;  %v3194_v11 = vmul.f32 0.044715, %v7517_v61  ;;  %v3314_v35 = vmul.f32 0.7978846, %v3282_v8  ;;  %3932 = vmatpush.msra.mxu0 %v3430_v2  ;;  %3958 = vmatpush.msra.mxu1 %v3468_v16  ;;  %v7564_v2 = vperm.slane %v5058_v25, 7  ;;  %v3154_v16 = vmul.f32 0.5, %v7482_v58 }
 0x782   : > { %v5023_v48 = vpop.eup %5022  ;;  %v3201_v63 = vmul.f32 0.044715, %v7524_v14  ;;  %v3370_v50 = vadd.f32 1.0, %v5021_v7  ;;  %v3321_v9 = vmul.f32 0.7978846, %v3289_v46  ;;  %3975 = vmatpush.msra.mxu2 %v3524_v51  ;;  %3901 = vmatpush.msrb.mxu3 %v3657_v6  ;;  %v3586_v7 = vld [vmem:[%s6061_s17 + $0x4e8] sm:$0xff] }
 0x783   : > { %v3377_v49 = vadd.f32 1.0, %v5023_v48  ;;  %5024 = vtanh.f32 %v3314_v35  ;;  %v3226_v45 = vmul.f32 %v3194_v11, %v7517_v61  ;;  %3959 = vmatpush.msra.mxu1 %v3466_v39  ;;  %v3653_v11 = vld [vmem:[%s6061_s17 + $0x700] sm:$0xff]  ;;  %4033 = vmatpush.msrb.mxu0 %v3588_v31  ;;  %v3556_v25 = vld [vmem:[%s6061_s17 + $0x3f8] sm:$0xff]  ;;  %v3161_v39 = vmul.f32 0.5, %v7487_v5 }
 0x784   : > { %v2993_v24 = vpop.f32.mrf.mxu2  ;;  %v3022_v1 = vpop.f32.mrf.mxu3  ;;  %v7541_v10 = vmul.f32 %v3370_v50, %v3146_v20  ;;  %5026 = vtanh.f32 %v3321_v9  ;;  %v3233_v55 = vmul.f32 %v3201_v63, %v7524_v14  ;;  %3902 = vmatpush.msrb.mxu3 %v3655_v22  ;;  %v3462_v63 = vld [vmem:[%s6061_s17 + $0x108] sm:$0xff]  ;;  %v3520_v50 = vld [vmem:[%s6061_s17 + $0x2d8] sm:$0xff]  ;;  %3976 = vmatpush.msra.mxu2 %v3522_v19 }
 0x785   : > { %v2994_v40 = vadd.f32 %v2993_v24, %v7414_v27  ;;  %v3042_v44 = vpop.f32.mrf.mxu0  ;;  %v3071_v26 = vpop.f32.mrf.mxu1  ;;  %v7546_v21 = vmul.f32 %v3377_v49, %v3153_v62  ;;  %v3258_v8 = vmul.f32 %v3226_v45, %v7517_v61  ;;  %v3464_v27 = vld [vmem:[%s6061_s17 + $0x118] sm:$0xff]  ;;  %v3518_v45 = vld [vmem:[%s6061_s17 + $0x2c8] sm:$0xff]  ;;  %4034 = vmatpush.msrb.mxu0 %v3586_v7 }
 0x786   : > { %v3043_v20 = vadd.f32 %v3042_v44, %v7527_v15  ;;  %3846 = vmatmul.f32.vlgmr.msrb.gmra.mxu1 %v7541_v10  ;;  %v3265_v46 = vmul.f32 %v3233_v55, %v7524_v14  ;;  %v3584_v9 = vld [vmem:[%s6061_s17 + $0x4d8] sm:$0xff]  ;;  %3903 = vmatpush.msrb.mxu3 %v3653_v11  ;;  %v3554_v11 = vld [vmem:[%s6061_s17 + $0x3e8] sm:$0xff] }
 0x787   : > { %v7556_v38 = vadd.f32 %v3022_v1, %v2994_v40  ;;  %3820 = vmatmul.f32.gmra.mxu0 %v7546_v21  ;;  %v3290_v0 = vadd.f32 %v3258_v8, %v7517_v61  ;;  %3960 = vmatpush.msra.mxu1 %v3464_v27  ;;  %v3620_v55 = vld [vmem:[%s6061_s17 + $0x5f8] sm:$0xff] }
 0x788   : > { %v7562_v35 = vadd.f32 %v3071_v26, %v3043_v20  ;;  %v3297_v48 = vadd.f32 %v3265_v46, %v7524_v14  ;;  %3977 = vmatpush.msra.mxu2 %v3520_v50  ;;  %v3582_v26 = vld [vmem:[%s6061_s17 + $0x4c8] sm:$0xff]  ;;  %4035 = vmatpush.msrb.mxu0 %v3584_v9  ;;  %v3516_v5 = vld [vmem:[%s6061_s17 + $0x2b8] sm:$0xff] }
 0x789   : > { %v5025_v51 = vpop.eup %5024  ;;  %v3202_v62 = vmul.f32 0.044715, %v7556_v38  ;;  %v3322_v49 = vmul.f32 0.7978846, %v3290_v0  ;;  %3961 = vmatpush.msra.mxu1 %v3462_v63  ;;  %4004 = vmatpush.msra.mxu3 %v3556_v25  ;;  %v3618_v50 = vld [vmem:[%s6061_s17 + $0x5e8] sm:$0xff] }
 0x78a   : > { %v5027_v6 = vpop.eup %5026  ;;  %v3179_v58 = vmul.f32 0.044715, %v7562_v35  ;;  %v3378_v24 = vadd.f32 1.0, %v5025_v51  ;;  %v3329_v1 = vmul.f32 0.7978846, %v3297_v48  ;;  %3978 = vmatpush.msra.mxu2 %v3518_v45  ;;  %4036 = vmatpush.msrb.mxu0 %v3582_v26  ;;  %v3514_v9 = vld [vmem:[%s6061_s17 + $0x2a8] sm:$0xff] }
 0x78b   : > { %v3385_v40 = vadd.f32 1.0, %v5027_v6  ;;  %5028 = vtanh.f32 %v3322_v49  ;;  %v3234_v44 = vmul.f32 %v3202_v62, %v7556_v38  ;;  %4062 = vmatpush.msrb.mxu1 %v3620_v55  ;;  %v3552_v49 = vld [vmem:[%s6061_s17 + $0x3d8] sm:$0xff]  ;;  %v3578_v45 = vld [vmem:[%s6061_s17 + $0x4a8] sm:$0xff]  ;;  %4005 = vmatpush.msra.mxu3 %v3554_v11 }
 0x78c   : > { %v3211_v8 = vmul.f32 %v3179_v58, %v7562_v35  ;;  %v3100_v31 = vpop.f32.mrf.mxu2  ;;  %v3129_v22 = vpop.f32.mrf.mxu3  ;;  %v7580_v20 = vmul.f32 %v3378_v24, %v3154_v16  ;;  %5030 = vtanh.f32 %v3329_v1  ;;  %v3580_v16 = vld [vmem:[%s6061_s17 + $0x4b8] sm:$0xff]  ;;  %3979 = vmatpush.msra.mxu2 %v3516_v5  ;;  %v3162_v58 = vmul.f32 0.5, %v7517_v61  ;;  %v3550_v55 = vld [vmem:[%s6061_s17 + $0x3c8] sm:$0xff] }
 0x78d   : > { %v3101_v46 = vadd.f32 %v3100_v31, %v7564_v2  ;;  %v3045_v27 = vpop.f32.mrf.mxu0  ;;  %v3074_v19 = vpop.f32.mrf.mxu1  ;;  %v7584_v0 = vmul.f32 %v3385_v40, %v3161_v39  ;;  %v3266_v7 = vmul.f32 %v3234_v44, %v7556_v38  ;;  %4037 = vmatpush.msrb.mxu0 %v3580_v16  ;;  %v3616_v24 = vld [vmem:[%s6061_s17 + $0x5d8] sm:$0xff]  ;;  %4063 = vmatpush.msrb.mxu1 %v3618_v50 }
 0x78e   : > { %v3243_v48 = vmul.f32 %v3211_v8, %v7562_v35  ;;  %v3046_v63 = vadd.f32 %v3045_v27, %v7527_v15  ;;  %3849 = vmatmul.f32.gmra.mxu1 %v7580_v20  ;;  %v3512_v1 = vld [vmem:[%s6061_s17 + $0x298] sm:$0xff]  ;;  %3980 = vmatpush.msra.mxu2 %v3514_v9  ;;  %v3614_v8 = vld [vmem:[%s6061_s17 + $0x5c8] sm:$0xff] }
 0x78f   : > { %v7594_v51 = vadd.f32 %v3129_v22, %v3101_v46  ;;  %3823 = vmatmul.f32.gmra.mxu0 %v7584_v0  ;;  %v3298_v62 = vadd.f32 %v3266_v7, %v7556_v38  ;;  %v3576_v26 = vld [vmem:[%s6061_s17 + $0x498] sm:$0xff]  ;;  %4006 = vmatpush.msra.mxu3 %v3552_v49  ;;  %v3510_v46 = vld [vmem:[%s6061_s17 + $0x288] sm:$0xff] }
 0x790   : > { %v3275_v25 = vadd.f32 %v3243_v48, %v7562_v35  ;;  %v7601_v6 = vadd.f32 %v3074_v19, %v3046_v63  ;;  %4038 = vmatpush.msrb.mxu0 %v3578_v45  ;;  %v3169_v19 = vmul.f32 0.5, %v7524_v14  ;;  %4064 = vmatpush.msrb.mxu1 %v3616_v24  ;;  %v3548_v11 = vld [vmem:[%s6061_s17 + $0x3b8] sm:$0xff] }
 0x791   : > { %v5029_v39 = vpop.eup %5028  ;;  %v3180_v40 = vmul.f32 0.044715, %v7594_v51  ;;  %v3330_v44 = vmul.f32 0.7978846, %v3298_v62  ;;  %3981 = vmatpush.msra.mxu2 %v3512_v1  ;;  %4007 = vmatpush.msra.mxu3 %v3550_v55  ;;  %v3612_v9 = vld [vmem:[%s6061_s17 + $0x5b8] sm:$0xff] }
 0x792   : > { %v5031_v31 = vpop.eup %5030  ;;  %v3307_v22 = vmul.f32 0.7978846, %v3275_v25  ;;  %v3187_v5 = vmul.f32 0.044715, %v7601_v6  ;;  %v3386_v61 = vadd.f32 1.0, %v5029_v39  ;;  %4039 = vmatpush.msrb.mxu0 %v3576_v26  ;;  %4065 = vmatpush.msrb.mxu1 %v3614_v8  ;;  %v3508_v24 = vld [vmem:[%s6061_s17 + $0x278] sm:$0xff] }
 0x793   : > { %v3212_v27 = vmul.f32 %v3180_v40, %v7594_v51  ;;  %v3393_v7 = vadd.f32 1.0, %v5031_v31  ;;  %5032 = vtanh.f32 %v3330_v44  ;;  %3982 = vmatpush.msra.mxu2 %v3510_v46  ;;  %4008 = vmatpush.msra.mxu3 %v3548_v11  ;;  %v3546_v39 = vld [vmem:[%s6061_s17 + $0x3a8] sm:$0xff]  ;;  %v3572_v8 = vld [vmem:[%s6061_s17 + $0x478] sm:$0xff] }
 0x794   : > { %5034 = vtanh.f32 %v3307_v22  ;;  %v3103_v16 = vpop.f32.mrf.mxu2  ;;  %v3132_v48 = vpop.f32.mrf.mxu3  ;;  %v7615_v63 = vmul.f32 %v3386_v61, %v3162_v58  ;;  %v3219_v50 = vmul.f32 %v3187_v5, %v7601_v6  ;;  %v3574_v58 = vld [vmem:[%s6061_s17 + $0x488] sm:$0xff]  ;;  %4066 = vmatpush.msrb.mxu1 %v3612_v9  ;;  %v3170_v5 = vmul.f32 0.5, %v7556_v38  ;;  %v3544_v46 = vld [vmem:[%s6061_s17 + $0x398] sm:$0xff] }
 0x795   : > { %v3244_v14 = vmul.f32 %v3212_v27, %v7594_v51  ;;  %v3104_v62 = vadd.f32 %v3103_v16, %v7564_v2  ;;  %v3048_v49 = vpop.f32.mrf.mxu0  ;;  %v3077_v45 = vpop.f32.mrf.mxu1  ;;  %v7621_v25 = vmul.f32 %v3393_v7, %v3169_v19  ;;  %v3610_v40 = vld [vmem:[%s6061_s17 + $0x5a8] sm:$0xff]  ;;  %4040 = vmatpush.msrb.mxu0 %v3574_v58  ;;  %3983 = vmatpush.msra.mxu2 %v3508_v24  ;;  %v3608_v19 = vld [vmem:[%s6061_s17 + $0x598] sm:$0xff] }
 0x796   : > { %v3049_v1 = vadd.f32 %v3048_v49, %v7527_v15  ;;  %3852 = vmatmul.f32.gmra.mxu1 %v7615_v63  ;;  %v3251_v55 = vmul.f32 %v3219_v50, %v7601_v6  ;;  %v3506_v31 = vld [vmem:[%s6061_s17 + $0x268] sm:$0xff]  ;;  %4009 = vmatpush.msra.mxu3 %v3546_v39 }
 0x797   : > { %v3276_v44 = vadd.f32 %v3244_v14, %v7594_v51  ;;  %v7631_v26 = vadd.f32 %v3132_v48, %v3104_v62  ;;  %3826 = vmatmul.f32.gmra.mxu0 %v7621_v25  ;;  %v3570_v27 = vld [vmem:[%s6061_s17 + $0x468] sm:$0xff]  ;;  %4067 = vmatpush.msrb.mxu1 %v3610_v40  ;;  %v3504_v48 = vld [vmem:[%s6061_s17 + $0x258] sm:$0xff] }
 0x798   : > { %v7636_v22 = vadd.f32 %v3077_v45, %v3049_v1  ;;  %v3283_v61 = vadd.f32 %v3251_v55, %v7601_v6  ;;  %v3542_v50 = vld [vmem:[%s6061_s17 + $0x388] sm:$0xff]  ;;  %4041 = vmatpush.msrb.mxu0 %v3572_v8  ;;  %3984 = vmatpush.msra.mxu2 %v3506_v31  ;;  %v3147_v45 = vmul.f32 0.5, %v7562_v35  ;;  %v3568_v1 = vld [vmem:[%s6061_s17 + $0x458] sm:$0xff] }
 0x799   : > { %v5033_v7 = vpop.eup %5032  ;;  %v3308_v11 = vmul.f32 0.7978846, %v3276_v44  ;;  %v3188_v16 = vmul.f32 0.044715, %v7631_v26  ;;  %v3606_v49 = vld [vmem:[%s6061_s17 + $0x588] sm:$0xff]  ;;  %4010 = vmatpush.msra.mxu3 %v3544_v46  ;;  %4068 = vmatpush.msrb.mxu1 %v3608_v19  ;;  %v3540_v46 = vld [vmem:[%s6061_s17 + $0x378] sm:$0xff] }
 0x79a   : > { %v5035_v9 = vpop.eup %5034  ;;  %v3195_v38 = vmul.f32 0.044715, %v7636_v22  ;;  %v3394_v14 = vadd.f32 1.0, %v5033_v7  ;;  %v3315_v62 = vmul.f32 0.7978846, %v3283_v61  ;;  %4042 = vmatpush.msrb.mxu0 %v3570_v27  ;;  %3985 = vmatpush.msra.mxu2 %v3504_v48  ;;  %v3566_v7 = vld [vmem:[%s6061_s17 + $0x448] sm:$0xff] }
 0x79b   : > { %5036 = vtanh.f32 %v3308_v11  ;;  %v3371_v58 = vadd.f32 1.0, %v5035_v9  ;;  %v3220_v24 = vmul.f32 %v3188_v16, %v7631_v26  ;;  %4011 = vmatpush.msra.mxu3 %v3542_v50  ;;  %4069 = vmatpush.msrb.mxu1 %v3606_v49  ;;  %v3604_v11 = vld [vmem:[%s6061_s17 + $0x578] sm:$0xff]  ;;  %v3538_v9 = vld [vmem:[%s6061_s17 + $0x368] sm:$0xff] }
 0x79c   : > { %v3106_v55 = vpop.f32.mrf.mxu2  ;;  %v3135_v39 = vpop.f32.mrf.mxu3  ;;  %v7651_v40 = vmul.f32 %v3394_v14, %v3170_v5  ;;  %5038 = vtanh.f32 %v3315_v62  ;;  %v3227_v44 = vmul.f32 %v3195_v38, %v7636_v22  ;;  %v3502_v5 = vld [vmem:[%s6061_s17 + $0x248] sm:$0xff]  ;;  %4043 = vmatpush.msrb.mxu0 %v3568_v1  ;;  %v3148_v38 = vmul.f32 0.5, %v7594_v51  ;;  %v3564_v49 = vld [vmem:[%s6061_s17 + $0x438] sm:$0xff] }
 0x79d   : > { %v3107_v35 = vadd.f32 %v3106_v55, %v7564_v2  ;;  %v3051_v8 = vpop.f32.mrf.mxu0  ;;  %v7655_v31 = vmul.f32 %v3371_v58, %v3147_v45  ;;  %v3252_v61 = vmul.f32 %v3220_v24, %v7631_v26  ;;  %v3080_v48 = vpop.f32.mrf.mxu1  ;;  %3986 = vmatpush.msra.mxu2 %v3502_v5  ;;  %4012 = vmatpush.msra.mxu3 %v3540_v46  ;;  %v3602_v45 = vld [vmem:[%s6061_s17 + $0x568] sm:$0xff]  ;;  %v3536_v55 = vld [vmem:[%s6061_s17 + $0x358] sm:$0xff]  ;;  %v3155_v5 = vmul.f32 0.5, %v7601_v6 }
 0x79e   : > { %v3052_v19 = vadd.f32 %v3051_v8, %v7527_v15  ;;  %3855 = vmatmul.f32.gmra.mxu1 %v7651_v40  ;;  %v3259_v27 = vmul.f32 %v3227_v44, %v7636_v22  ;;  %v3500_v15 = vld [vmem:[%s6061_s17 + $0x238] sm:$0xff]  ;;  %v3498_v58 = vld [vmem:[%s6061_s17 + $0x228] sm:$0xff]  ;;  %4044 = vmatpush.msrb.mxu0 %v3566_v7 }
 0x79f   : > { %v7665_v16 = vadd.f32 %v3135_v39, %v3107_v35  ;;  %3875 = vmatmul.f32.vlgmr.msrb.gmra.mxu2 %v7655_v31  ;;  %3933 = vmatmul.f32.vlgmr.msra.gmra.mxu0 %v7236_v18  ;;  %v3284_v50 = vadd.f32 %v3252_v61, %v7631_v26  ;;  %v3562_v39 = vld [vmem:[%s6061_s17 + $0x428] sm:$0xff]  ;;  %v3600_v61 = vld [vmem:[%s6061_s17 + $0x558] sm:$0xff] }
 0x7a0   : > { %v7673_v14 = vadd.f32 %v3080_v48, %v3052_v19  ;;  %v3291_v62 = vadd.f32 %v3259_v27, %v7636_v22  ;;  %4070 = vmatpush.msrb.mxu1 %v3604_v11  ;;  %3987 = vmatpush.msra.mxu2 %v3500_v15  ;;  %v3496_v15 = vld [vmem:[%s6061_s17 + $0x218] sm:$0xff] }
 0x7a1   : > { %v5037_v24 = vpop.eup %5036  ;;  %v3196_v18 = vmul.f32 0.044715, %v7665_v16  ;;  %v3316_v1 = vmul.f32 0.7978846, %v3284_v50  ;;  %4013 = vmatpush.msra.mxu3 %v3538_v9  ;;  %4045 = vmatpush.msrb.mxu0 %v3564_v49  ;;  %v3534_v9 = vld [vmem:[%s6061_s17 + $0x348] sm:$0xff] }
 0x7a2   : > { %v5039_v44 = vpop.eup %5038  ;;  %v3203_v51 = vmul.f32 0.044715, %v7673_v14  ;;  %v3372_v35 = vadd.f32 1.0, %v5037_v24  ;;  %v3323_v8 = vmul.f32 0.7978846, %v3291_v62  ;;  %4071 = vmatpush.msrb.mxu1 %v3602_v45  ;;  %3988 = vmatpush.msra.mxu2 %v3498_v58  ;;  %v3598_v49 = vld [vmem:[%s6061_s17 + $0x548] sm:$0xff] }
 0x7a3   : > { %v3379_v46 = vadd.f32 1.0, %v5039_v44  ;;  %5040 = vtanh.f32 %v3316_v1  ;;  %v3228_v19 = vmul.f32 %v3196_v18, %v7665_v16  ;;  %4014 = vmatpush.msra.mxu3 %v3536_v55  ;;  %4046 = vmatpush.msrb.mxu0 %v3562_v39  ;;  %v3494_v24 = vld [vmem:[%s6061_s17 + $0x208] sm:$0xff]  ;;  %v3532_v18 = vld [vmem:[%s6061_s17 + $0x338] sm:$0xff] }
 0x7a4   : > { %v3109_v27 = vpop.f32.mrf.mxu2  ;;  %v7686_v7 = vmul.f32 %v3372_v35, %v3148_v38  ;;  %5042 = vtanh.f32 %v3323_v8  ;;  %v3235_v11 = vmul.f32 %v3203_v51, %v7673_v14  ;;  %4072 = vmatpush.msrb.mxu1 %v3600_v61  ;;  %v3138_v38 = vpop.f32.mrf.mxu3  ;;  %3989 = vmatpush.msra.mxu2 %v3496_v15  ;;  %v3596_v55 = vld [vmem:[%s6061_s17 + $0x538] sm:$0xff]  ;;  %v3530_v35 = vld [vmem:[%s6061_s17 + $0x328] sm:$0xff]  ;;  %v3156_v61 = vmul.f32 0.5, %v7631_v26 }
 0x7a5   : > { %v3110_v6 = vadd.f32 %v3109_v27, %v7564_v2  ;;  %v7690_v48 = vmul.f32 %v3379_v46, %v3155_v5  ;;  %v3260_v50 = vmul.f32 %v3228_v19, %v7665_v16  ;;  %v3560_v2 = vld [vmem:[%s6061_s17 + $0x418] sm:$0xff]  ;;  %4015 = vmatpush.msra.mxu3 %v3534_v9  ;;  %v3594_v19 = vld [vmem:[%s6061_s17 + $0x528] sm:$0xff]  ;;  %v3163_v27 = vmul.f32 0.5, %v7636_v22 }
 0x7a6   : > { %3904 = vmatmul.f32.vlgmr.msrb.gmra.mxu3 %v7686_v7  ;;  %3962 = vmatmul.f32.vlgmr.msra.gmra.mxu1 %v7262_v32  ;;  %v3267_v62 = vmul.f32 %v3235_v11, %v7673_v14  ;;  %v3558_v32 = vld [vmem:[%s6061_s17 + $0x408] sm:$0xff]  ;;  %v3652_v8 = vld [vmem:[%s6061_s17 + $0x6f8] sm:$0xff] }
 0x7a7   : > { %v7700_v45 = vadd.f32 %v3138_v38, %v3110_v6  ;;  %3878 = vmatmul.f32.gmra.mxu2 %v7690_v48  ;;  %3936 = vmatmul.f32.gmra.mxu0 %v7267_v33  ;;  %v3292_v58 = vadd.f32 %v3260_v50, %v7665_v16  ;;  %v3528_v15 = vld [vmem:[%s6061_s17 + $0x318] sm:$0xff]  ;;  %v3650_v38 = vld [vmem:[%s6061_s17 + $0x6e8] sm:$0xff] }
 0x7a8   : > { %v3299_v1 = vadd.f32 %v3267_v62, %v7673_v14  ;;  %4047 = vmatpush.msrb.mxu0 %v3560_v2  ;;  %4073 = vmatpush.msrb.mxu1 %v3598_v49  ;;  %v3592_v9 = vld [vmem:[%s6061_s17 + $0x518] sm:$0xff]  ;;  %v3526_v2 = vld [vmem:[%s6061_s17 + $0x308] sm:$0xff] }
 0x7a9   : > { %v5041_v39 = vpop.eup %5040  ;;  %v3204_v44 = vmul.f32 0.044715, %v7700_v45  ;;  %v3324_v51 = vmul.f32 0.7978846, %v3292_v58  ;;  %3990 = vmatpush.msra.mxu2 %v3494_v24  ;;  %4016 = vmatpush.msra.mxu3 %v3532_v18  ;;  %v3590_v49 = vld [vmem:[%s6061_s17 + $0x508] sm:$0xff]  ;;  %v3648_v58 = vld [vmem:[%s6061_s17 + $0x6d8] sm:$0xff] }
 0x7aa   : > { %v5043_v33 = vpop.eup %5042  ;;  %v3380_v5 = vadd.f32 1.0, %v5041_v39  ;;  %v3331_v46 = vmul.f32 0.7978846, %v3299_v1  ;;  %4048 = vmatpush.msrb.mxu0 %v3558_v32  ;;  %4074 = vmatpush.msrb.mxu1 %v3596_v55  ;;  %v3684_v24 = vld [vmem:[%s6061_s17 + $0x7f8] sm:$0xff]  ;;  %v3164_v32 = vmul.f32 0.5, %v7665_v16  ;;  %v3682_v39 = vld [vmem:[%s6061_s17 + $0x7e8] sm:$0xff] }
 0x7ab   : > { %v3387_v11 = vadd.f32 1.0, %v5043_v33  ;;  %5044 = vtanh.f32 %v3324_v51  ;;  %v3236_v6 = vmul.f32 %v3204_v44, %v7700_v45  ;;  %4017 = vmatpush.msra.mxu3 %v3530_v35  ;;  %4091 = vmatpush.msrb.mxu2 %v3652_v8  ;;  %v3171_v44 = vmul.f32 0.5, %v7673_v14  ;;  %v3644_v16 = vld [vmem:[%s6061_s17 + $0x6b8] sm:$0xff]  ;;  %v3642_v14 = vld [vmem:[%s6061_s17 + $0x6a8] sm:$0xff] }
 0x7ac   : > { %v7717_v50 = vmul.f32 %v3380_v5, %v3156_v61  ;;  %5046 = vtanh.f32 %v3331_v46  ;;  %4075 = vmatpush.msrb.mxu1 %v3594_v19  ;;  %v3680_v33 = vld [vmem:[%s6061_s17 + $0x7d8] sm:$0xff]  ;;  %v3678_v61 = vld [vmem:[%s6061_s17 + $0x7c8] sm:$0xff] }
 0x7ad   : > { %v7719_v26 = vmul.f32 %v3387_v11, %v3163_v27  ;;  %v3268_v22 = vmul.f32 %v3236_v6, %v7700_v45  ;;  %4018 = vmatpush.msra.mxu3 %v3528_v15  ;;  %4092 = vmatpush.msrb.mxu2 %v3650_v38  ;;  %v3640_v46 = vld [vmem:[%s6061_s17 + $0x698] sm:$0xff]  ;;  %v3172_v27 = vmul.f32 0.5, %v7700_v45  ;;  %v3674_v6 = vld [vmem:[%s6061_s17 + $0x7a8] sm:$0xff] }
 0x7ae   : > { %3907 = vmatmul.f32.gmra.mxu3 %v7717_v50  ;;  %3965 = vmatmul.f32.gmra.mxu1 %v7296_v30  ;;  %v3676_v19 = vld [vmem:[%s6061_s17 + $0x7b8] sm:$0xff]  ;;  %v3634_v15 = vld [vmem:[%s6061_s17 + $0x668] sm:$0xff] }
 0x7af   : > { %3881 = vmatmul.f32.gmra.mxu2 %v7719_v26  ;;  %3939 = vmatmul.f32.gmra.mxu0 %v7300_v29  ;;  %v3300_v62 = vadd.f32 %v3268_v22, %v7700_v45  ;;  %v3646_v29 = vld [vmem:[%s6061_s17 + $0x6c8] sm:$0xff]  ;;  %v3636_v45 = vld [vmem:[%s6061_s17 + $0x678] sm:$0xff] }
 0x7b0   : > { %4076 = vmatpush.msrb.mxu1 %v3592_v9  ;;  %4019 = vmatpush.msra.mxu3 %v3526_v2  ;;  %v3672_v22 = vld [vmem:[%s6061_s17 + $0x798] sm:$0xff]  ;;  %v3670_v9 = vld [vmem:[%s6061_s17 + $0x788] sm:$0xff] }
 0x7b1   : > { %v5045_v18 = vpop.eup %5044  ;;  %v3332_v1 = vmul.f32 0.7978846, %v3300_v62  ;;  %4093 = vmatpush.msrb.mxu2 %v3648_v58  ;;  %v3632_v38 = vld [vmem:[%s6061_s17 + $0x658] sm:$0xff]  ;;  %v3658_v58 = vld [vmem:[%s6061_s17 + $0x728] sm:$0xff] }
 0x7b2   : > { %v5047_v30 = vpop.eup %5046  ;;  %v3388_v55 = vadd.f32 1.0, %v5045_v18  ;;  %4077 = vmatpush.msrb.mxu1 %v3590_v49  ;;  %4120 = vmatpush.msrb.mxu3 %v3684_v24  ;;  %v3628_v62 = vld [vmem:[%s6061_s17 + $0x638] sm:$0xff]  ;;  %v3622_v49 = vld [vmem:[%s6061_s17 + $0x608] sm:$0xff] }
 0x7b3   : > { %v3395_v51 = vadd.f32 1.0, %v5047_v30  ;;  %5048 = vtanh.f32 %v3332_v1  ;;  %4094 = vmatpush.msrb.mxu2 %v3646_v29  ;;  %v3664_v2 = vld [vmem:[%s6061_s17 + $0x758] sm:$0xff] }
 0x7b4   : > { %v7738_v35 = vmul.f32 %v3388_v55, %v3164_v32  ;;  %4121 = vmatpush.msrb.mxu3 %v3682_v39  ;;  %v3656_v24 = vld [vmem:[%s6061_s17 + $0x718] sm:$0xff] }
 0x7b5   : > { %v7740_v8 = vmul.f32 %v3395_v51, %v3171_v44  ;;  %4095 = vmatpush.msrb.mxu2 %v3644_v16 }
 0x7b6   : > { %3910 = vmatmul.f32.gmra.mxu3 %v7738_v35  ;;  %3968 = vmatmul.f32.gmra.mxu1 %v7325_v12 }
 0x7b7   : > { %3884 = vmatmul.f32.gmra.mxu2 %v7740_v8  ;;  %3942 = vmatmul.f32.gmra.mxu0 %v7331_v37  ;;  %v3638_v37 = vld [vmem:[%s6061_s17 + $0x688] sm:$0xff] }
 0x7b8   : > { %4122 = vmatpush.msrb.mxu3 %v3680_v33  ;;  %4096 = vmatpush.msrb.mxu2 %v3642_v14 }
 0x7b9   : > { %v5049_v5 = vpop.eup %5048 }
 0x7ba   : > { %v3396_v11 = vadd.f32 1.0, %v5049_v5  ;;  %4123 = vmatpush.msrb.mxu3 %v3678_v61  ;;  %4097 = vmatpush.msrb.mxu2 %v3640_v46  ;;  %v7803_v5 = vld [vmem:[%s7992_s29] sm:$0x3] }
 0x7bc   : > { %v7753_v12 = vmul.f32 %v3396_v11, %v3172_v27  ;;  %4124 = vmatpush.msrb.mxu3 %v3676_v19  ;;  %4098 = vmatpush.msrb.mxu2 %v3638_v37 }
 0x7be   : > { %3913 = vmatmul.f32.gmra.mxu3 %v7753_v12  ;;  %3971 = vmatmul.f32.gmra.mxu1 %v7355_v52  ;;  %v3668_v52 = vld [vmem:[%s6061_s17 + $0x778] sm:$0xff] }
 0x7bf   : > { %3991 = vmatmul.f32.vlgmr.msra.gmra.mxu2 %v7360_v43  ;;  %4049 = vmatmul.f32.vlgmr.msrb.gmra.mxu0 %v7507_v53  ;;  %v3630_v43 = vld [vmem:[%s6061_s17 + $0x648] sm:$0xff] }
 0x7c0   : > { %4125 = vmatpush.msrb.mxu3 %v3674_v6  ;;  %4099 = vmatpush.msrb.mxu2 %v3636_v45  ;;  %v3666_v53 = vld [vmem:[%s6061_s17 + $0x768] sm:$0xff]  ;;  %v4159_v6 = vperm.slane %v7803_v5, 0 }
 0x7c2   : > { %4126 = vmatpush.msrb.mxu3 %v3672_v22  ;;  %4100 = vmatpush.msrb.mxu2 %v3634_v15 }
 0x7c4   : > { %4127 = vmatpush.msrb.mxu3 %v3670_v9  ;;  %4101 = vmatpush.msrb.mxu2 %v3632_v38 }
 0x7c6   : > { %4020 = vmatmul.f32.vlgmr.msra.gmra.mxu3 %v7390_v4  ;;  %4078 = vmatmul.f32.vlgmr.msrb.gmra.mxu1 %v7541_v10  ;;  %v3626_v4 = vld [vmem:[%s6061_s17 + $0x628] sm:$0xff] }
 0x7c7   : > { %3994 = vmatmul.f32.gmra.mxu2 %v7396_v42  ;;  %4052 = vmatmul.f32.gmra.mxu0 %v7546_v21  ;;  %v3662_v10 = vld [vmem:[%s6061_s17 + $0x748] sm:$0xff]  ;;  %v3624_v42 = vld [vmem:[%s6061_s17 + $0x618] sm:$0xff] }
 0x7c8   : > { %4128 = vmatpush.msrb.mxu3 %v3668_v52  ;;  %4102 = vmatpush.msrb.mxu2 %v3630_v43  ;;  %v3660_v21 = vld [vmem:[%s6061_s17 + $0x738] sm:$0xff] }
 0x7ca   : > { %4129 = vmatpush.msrb.mxu3 %v3666_v53  ;;  %4103 = vmatpush.msrb.mxu2 %v3628_v62 }
 0x7cc   : > { %4130 = vmatpush.msrb.mxu3 %v3664_v2  ;;  %4104 = vmatpush.msrb.mxu2 %v3626_v4 }
 0x7ce   : > { %4023 = vmatmul.f32.gmra.mxu3 %v7430_v54  ;;  %4081 = vmatmul.f32.gmra.mxu1 %v7580_v20  ;;  %v3654_v54 = vld [vmem:[%s6061_s17 + $0x708] sm:$0xff] }
 0x7cf   : > { %3997 = vmatmul.f32.gmra.mxu2 %v7435_v60  ;;  %4055 = vmatmul.f32.gmra.mxu0 %v7584_v0  ;;  %v3702_v60 = vpop.f32.mrf.mxu0 }
 0x7d0   : > { %4131 = vmatpush.msrb.mxu3 %v3662_v10  ;;  %4105 = vmatpush.msrb.mxu2 %v3624_v42 }
 0x7d2   : > { %4132 = vmatpush.msrb.mxu3 %v3660_v21  ;;  %4106 = vmatpush.msrb.mxu2 %v3622_v49 }
 0x7d4   : > { %4133 = vmatpush.msrb.mxu3 %v3658_v58 }
 0x7d6   : > { %4026 = vmatmul.f32.gmra.mxu3 %v7466_v13  ;;  %4084 = vmatmul.f32.gmra.mxu1 %v7615_v63  ;;  %v3731_v13 = vpop.f32.mrf.mxu1 }
 0x7d7   : > { %4000 = vmatmul.f32.gmra.mxu2 %v7472_v23  ;;  %4058 = vmatmul.f32.gmra.mxu0 %v7621_v25  ;;  %v3705_v23 = vpop.f32.mrf.mxu0  ;;  %v3732_v29 = vadd.f32 %v3731_v13, %v3702_v60 }
 0x7d8   : > { %4134 = vmatpush.msrb.mxu3 %v3656_v24 }
 0x7da   : > { %4135 = vmatpush.msrb.mxu3 %v3654_v54 }
 0x7de   : > { %4029 = vmatmul.f32.gmra.mxu3 %v7502_v59  ;;  %4087 = vmatmul.f32.gmra.mxu1 %v7651_v40  ;;  %v3734_v20 = vpop.f32.mrf.mxu1 }
 0x7df   : > { %4107 = vmatmul.f32.vlgmr.msrb.gmra.mxu2 %v7655_v31  ;;  %v3708_v59 = vpop.f32.mrf.mxu0  ;;  %v3735_v14 = vadd.f32 %v3734_v20, %v3705_v23 }
 0x7e2   : > { %v3760_v0 = vpop.f32.mrf.mxu2 }
 0x7e3   : > { %v3761_v44 = vadd.f32 %v3760_v0, %v3732_v29 }
 0x7e6   : > { %4136 = vmatmul.f32.vlgmr.msrb.gmra.mxu3 %v7686_v7  ;;  %v3737_v63 = vpop.f32.mrf.mxu1 }
 0x7e7   : > { %4110 = vmatmul.f32.gmra.mxu2 %v7690_v48  ;;  %v3711_v25 = vpop.f32.mrf.mxu0  ;;  %v3738_v38 = vadd.f32 %v3737_v63, %v3708_v59 }
 0x7e9   : > { %v3789_v40 = vpop.f32.mrf.mxu3 }
 0x7ea   : > { %v3763_v31 = vpop.f32.mrf.mxu2 }
 0x7eb   : > { %v3764_v46 = vadd.f32 %v3763_v31, %v3735_v14 }
 0x7ee   : > { %4139 = vmatmul.f32.gmra.mxu3 %v7717_v50  ;;  %v3740_v7 = vpop.f32.mrf.mxu1 }
 0x7ef   : > { %4113 = vmatmul.f32.gmra.mxu2 %v7719_v26  ;;  %v3741_v24 = vadd.f32 %v3740_v7, %v3711_v25 }
 0x7f1   : > { %v3792_v18 = vpop.f32.mrf.mxu3 }
 0x7f2   : > { %v3766_v1 = vpop.f32.mrf.mxu2 }
 0x7f3   : > { %v3767_v53 = vadd.f32 %v3766_v1, %v3738_v38 }
 0x7f6   : > { %4142 = vmatmul.f32.gmra.mxu3 %v7738_v35  ;;  %v3790_v35 = vadd.f32 %v3789_v40, %v3761_v44 }
 0x7f7   : > { %4116 = vmatmul.f32.gmra.mxu2 %v7740_v8 }
 0x7f9   : > { %v3795_v30 = vpop.f32.mrf.mxu3 }
 0x7fa   : > { %v3769_v55 = vpop.f32.mrf.mxu2  ;;  %v3796_v4 = vadd.f32 %v3795_v30, %v3767_v53 }
 0x7fb   : > { %v3770_v13 = vadd.f32 %v3769_v55, %v3741_v24 }
 0x7fc   : > { %v3818_v48 = vpop.f32.mrf.mxu0 }
 0x7fd   : > { %v3819_v33 = vadd.f32 %v3818_v48, %v3790_v35 }
 0x7fe   : > { %4145 = vmatmul.f32.gmra.mxu3 %v7753_v12  ;;  %v3793_v12 = vadd.f32 %v3792_v18, %v3764_v46 }
 0x801   : > { %v3798_v51 = vpop.f32.mrf.mxu3 }
 0x802   : > { %v3799_v59 = vadd.f32 %v3798_v51, %v3770_v13 }
 0x803   : > { %v3847_v50 = vpop.f32.mrf.mxu1 }
 0x804   : > { %v3821_v26 = vpop.f32.mrf.mxu0  ;;  %v3848_v61 = vadd.f32 %v3847_v50, %v3819_v33 }
 0x805   : > { %v3822_v22 = vadd.f32 %v3821_v26, %v3793_v12 }
 0x80b   : > { %v3850_v32 = vpop.f32.mrf.mxu1 }
 0x80c   : > { %v3824_v39 = vpop.f32.mrf.mxu0  ;;  %v3851_v52 = vadd.f32 %v3850_v32, %v3822_v22 }
 0x80d   : > { %v3825_v49 = vadd.f32 %v3824_v39, %v3796_v4  ;;  %v4160_v4 = vperm.slane %v7803_v5, 1 }
 0x813   : > { %v3853_v16 = vpop.f32.mrf.mxu1 }
 0x814   : > { %v3827_v27 = vpop.f32.mrf.mxu0  ;;  %v3854_v54 = vadd.f32 %v3853_v16, %v3825_v49 }
 0x815   : > { %v3828_v40 = vadd.f32 %v3827_v27, %v3799_v59 }
 0x81b   : > { %v3856_v9 = vpop.f32.mrf.mxu1 }
 0x81c   : > { %v3934_v21 = vpop.f32.mrf.mxu0  ;;  %v3857_v18 = vadd.f32 %v3856_v9, %v3828_v40 }
 0x822   : > { %v3876_v8 = vpop.f32.mrf.mxu2 }
 0x823   : > { %v3877_v19 = vadd.f32 %v3876_v8, %v3848_v61  ;;  %v3963_v60 = vpop.f32.mrf.mxu1 }
 0x824   : > { %v3937_v48 = vpop.f32.mrf.mxu0  ;;  %v3964_v33 = vadd.f32 %v3963_v60, %v3934_v21 }
 0x829   : > { %v3905_v11 = vpop.f32.mrf.mxu3 }
 0x82a   : > { %v3906_v37 = vadd.f32 %v3905_v11, %v3877_v19  ;;  %v3879_v45 = vpop.f32.mrf.mxu2 }
 0x82b   : > { %v3880_v62 = vadd.f32 %v3879_v45, %v3851_v52  ;;  %v3966_v25 = vpop.f32.mrf.mxu1 }
 0x82c   : > { %v4149_v15 = vadd.f32 %v3906_v37, %v6644_v3  ;;  %v3940_v55 = vpop.f32.mrf.mxu0  ;;  %v3967_v11 = vadd.f32 %v3966_v25, %v3937_v48 }
 0x82e   : > { %v7807_v43 = vadd.f32 %v4159_v6, %v4149_v15 }
 0x830   : > { %4171 = vst [vmem:[#allocation2 + $0x30] sm:$0xff] %v7807_v43 }
 0x831   : > { %v3908_v2 = vpop.f32.mrf.mxu3 }
 0x832   : > { %v3909_v10 = vadd.f32 %v3908_v2, %v3880_v62  ;;  %v3882_v42 = vpop.f32.mrf.mxu2 }
 0x833   : > { %v3883_v23 = vadd.f32 %v3882_v42, %v3854_v54  ;;  %v3969_v39 = vpop.f32.mrf.mxu1 }
 0x834   : > { %v4151_v58 = vadd.f32 %v3909_v10, %v6650_v56  ;;  %v3943_v44 = vpop.f32.mrf.mxu0  ;;  %v3970_v53 = vadd.f32 %v3969_v39, %v3940_v55 }
 0x836   : > { %v7811_v3 = vadd.f32 %v4159_v6, %v4151_v58 }
 0x838   : > { %4173 = vst [vmem:[#allocation2 + $0x18] sm:$0xff] %v7811_v3 }
 0x839   : > { %v3911_v20 = vpop.f32.mrf.mxu3 }
 0x83a   : > { %v3912_v0 = vadd.f32 %v3911_v20, %v3883_v23  ;;  %v3885_v63 = vpop.f32.mrf.mxu2 }
 0x83b   : > { %v3886_v56 = vadd.f32 %v3885_v63, %v3857_v18  ;;  %v3972_v8 = vpop.f32.mrf.mxu1 }
 0x83c   : > { %v4153_v31 = vadd.f32 %v3912_v0, %v6656_v28  ;;  %v4050_v61 = vpop.f32.mrf.mxu0  ;;  %v3973_v23 = vadd.f32 %v3972_v8, %v3943_v44 }
 0x83e   : > { %v7815_v50 = vadd.f32 %v4159_v6, %v4153_v31 }
 0x840   : > { %4175 = vst [vmem:[#allocation2 + $0x8] sm:$0xff] %v7815_v50 }
 0x841   : > { %v3914_v7 = vpop.f32.mrf.mxu3 }
 0x842   : > { %v3915_v1 = vadd.f32 %v3914_v7, %v3886_v56  ;;  %v3992_v26 = vpop.f32.mrf.mxu2 }
 0x843   : > { %v3993_v46 = vadd.f32 %v3992_v26, %v3964_v33  ;;  %v4079_v27 = vpop.f32.mrf.mxu1 }
 0x844   : > { %v4155_v30 = vadd.f32 %v3915_v1, %v6662_v36  ;;  %v4053_v45 = vpop.f32.mrf.mxu0 }
 0x846   : > { %v7819_v32 = vadd.f32 %v4159_v6, %v4155_v30 }
 0x848   : > { %4177 = vst [vmem:[#allocation2 + $0x28] sm:$0xff] %v7819_v32 }
 0x849   : > { %v4021_v29 = vpop.f32.mrf.mxu3 }
 0x84a   : > { %v3995_v28 = vpop.f32.mrf.mxu2  ;;  %v4022_v19 = vadd.f32 %v4021_v29, %v3993_v46 }
 0x84b   : > { %v3996_v6 = vadd.f32 %v3995_v28, %v3967_v11  ;;  %v4082_v38 = vpop.f32.mrf.mxu1 }
 0x84c   : > { %v4051_v12 = vadd.f32 %v4050_v61, %v4022_v19  ;;  %v4056_v54 = vpop.f32.mrf.mxu0 }
 0x84e   : > { %v4080_v15 = vadd.f32 %v4079_v27, %v4051_v12 }
 0x851   : > { %v4024_v51 = vpop.f32.mrf.mxu3 }
 0x852   : > { %v3998_v35 = vpop.f32.mrf.mxu2  ;;  %v4025_v22 = vadd.f32 %v4024_v51, %v3996_v6 }
 0x853   : > { %v3999_v42 = vadd.f32 %v3998_v35, %v3970_v53  ;;  %v4085_v0 = vpop.f32.mrf.mxu1 }
 0x854   : > { %v4054_v62 = vadd.f32 %v4053_v45, %v4025_v22  ;;  %v4059_v56 = vpop.f32.mrf.mxu0 }
 0x856   : > { %v4083_v24 = vadd.f32 %v4082_v38, %v4054_v62 }
 0x859   : > { %v4027_v16 = vpop.f32.mrf.mxu3 }
 0x85a   : > { %v4001_v14 = vpop.f32.mrf.mxu2  ;;  %v4028_v49 = vadd.f32 %v4027_v16, %v3999_v42 }
 0x85b   : > { %v4002_v40 = vadd.f32 %v4001_v14, %v3973_v23  ;;  %v4088_v30 = vpop.f32.mrf.mxu1 }
 0x85c   : > { %v4057_v20 = vadd.f32 %v4056_v54, %v4028_v49 }
 0x861   : > { %v4030_v36 = vpop.f32.mrf.mxu3 }
 0x862   : > { %v4108_v37 = vpop.f32.mrf.mxu2  ;;  %v4031_v31 = vadd.f32 %v4030_v36, %v4002_v40 }
 0x863   : > { %v4109_v9 = vadd.f32 %v4108_v37, %v4080_v15 }
 0x864   : > { %v4060_v7 = vadd.f32 %v4059_v56, %v4031_v31 }
 0x866   : > { %v4089_v28 = vadd.f32 %v4088_v30, %v4060_v7 }
 0x869   : > { %v4137_v52 = vpop.f32.mrf.mxu3 }
 0x86a   : > { %v4138_v2 = vadd.f32 %v4137_v52, %v4109_v9  ;;  %v4111_v10 = vpop.f32.mrf.mxu2 }
 0x86b   : > { %v4112_v60 = vadd.f32 %v4111_v10, %v4083_v24 }
 0x86c   : > { %v4150_v21 = vadd.f32 %v4138_v2, %v6646_v47  ;;  %v4086_v47 = vadd.f32 %v4085_v0, %v4057_v20 }
 0x86e   : > { %v7824_v58 = vadd.f32 %v4160_v4, %v4150_v21 }
 0x870   : > { %4172 = vst [vmem:[#allocation2] sm:$0xff] %v7824_v58 }
 0x871   : > { %v4140_v13 = vpop.f32.mrf.mxu3 }
 0x872   : > { %v4141_v59 = vadd.f32 %v4140_v13, %v4112_v60  ;;  %v4114_v63 = vpop.f32.mrf.mxu2 }
 0x873   : > { %v4115_v18 = vadd.f32 %v4114_v63, %v4086_v47 }
 0x874   : > { %v4152_v5 = vadd.f32 %v4141_v59, %v6652_v17 }
 0x876   : > { %v7828_v48 = vadd.f32 %v4160_v4, %v4152_v5 }
 0x878   : > { %4174 = vst [vmem:[#allocation2 + $0x10] sm:$0xff] %v7828_v48 }
 0x879   : > { %v4143_v25 = vpop.f32.mrf.mxu3 }
 0x87a   : > { %v4144_v1 = vadd.f32 %v4143_v25, %v4115_v18  ;;  %v4117_v55 = vpop.f32.mrf.mxu2 }
 0x87b   : > { %v4118_v39 = vadd.f32 %v4117_v55, %v4089_v28 }
 0x87c   : > { %v4154_v26 = vadd.f32 %v4144_v1, %v6658_v57 }
 0x87e   : > { %v4168_v29 = vadd.f32 %v4160_v4, %v4154_v26 }
 0x880   : > { %4176 = vst [vmem:[#allocation2 + $0x20] sm:$0xff] %v4168_v29 }
 0x881   : > { %v4146_v17 = vpop.f32.mrf.mxu3 }
 0x882   : > { %v4147_v44 = vadd.f32 %v4146_v17, %v4118_v39 }
 0x884   : > { %v4156_v51 = vadd.f32 %v4147_v44, %v6664_v41  ;;  %4182 = sbr.rel (%p4785_p4) target bundleno = 2601 (0xa29), region = 156 }
 0x886   : > { %v4170_v35 = vadd.f32 %v4160_v4, %v4156_v51 }
 0x888   : > { %4178 = vst [vmem:[#allocation2 + $0x38] sm:$0xff] %v4170_v35 }
 0x889   : > { %v4194_v8 = vadd.f32 %v4170_v35, %v7819_v32  ;;  %v4191_v16 = vadd.f32 %v4168_v29, %v7815_v50  ;;  %v4188_v57 = vadd.f32 %v7828_v48, %v7811_v3  ;;  %v4185_v33 = vadd.f32 %v7824_v58, %v7807_v43  ;;  %v4326_v41 = vld [vmem:[#allocation27 + $0x78] sm:$0xff]  ;;  %v4325_v61 = vld [vmem:[#allocation27 + $0x70] sm:$0xff]  ;;  %v4340_v23 = vld [vmem:[#allocation27 + $0xe8] sm:$0xff] }
 0x88a   : > { %v4342_v14 = vld [vmem:[#allocation27 + $0xf8] sm:$0xff]  ;;  %4793 = vmatpush.msra.mxu2 %v4326_v41  ;;  %v4341_v46 = vld [vmem:[#allocation27 + $0xf0] sm:$0xff]  ;;  %4343 = vmatpush.msra.mxu0 %v4326_v41  ;;  %v4339_v20 = vld [vmem:[#allocation27 + $0xe0] sm:$0xff] }
 0x88b   : > { %4195 = vadd.xlane.f32.xlu1 %v4194_v8  ;;  %4192 = vadd.xlane.f32.xlu0 %v4191_v16  ;;  %v4322_v59 = vld [vmem:[#allocation27 + $0x58] sm:$0xff]  ;;  %v4321_v63 = vld [vmem:[#allocation27 + $0x50] sm:$0xff]  ;;  %v4320_v5 = vld [vmem:[#allocation27 + $0x48] sm:$0xff] }
 0x88c   : > { %4809 = vmatpush.msra.mxu3 %v4342_v14  ;;  %4372 = vmatpush.msra.mxu1 %v4342_v14  ;;  %v4338_v0 = vld [vmem:[#allocation27 + $0xd8] sm:$0xff]  ;;  %v4337_v40 = vld [vmem:[#allocation27 + $0xd0] sm:$0xff]  ;;  %v4336_v31 = vld [vmem:[#allocation27 + $0xc8] sm:$0xff] }
 0x88d   : > { %4794 = vmatpush.msra.mxu2 %v4325_v61  ;;  %4344 = vmatpush.msra.mxu0 %v4325_v61  ;;  %v4335_v47 = vld [vmem:[#allocation27 + $0xc0] sm:$0xff]  ;;  %v4318_v18 = vld [vmem:[#allocation27 + $0x38] sm:$0xff]  ;;  %v4317_v25 = vld [vmem:[#allocation27 + $0x30] sm:$0xff] }
 0x88e   : > { %4810 = vmatpush.msra.mxu3 %v4341_v46  ;;  %4373 = vmatpush.msra.mxu1 %v4341_v46  ;;  %v4334_v56 = vld [vmem:[#allocation27 + $0xb8] sm:$0xff]  ;;  %v4333_v7 = vld [vmem:[#allocation27 + $0xb0] sm:$0xff]  ;;  %v4316_v1 = vld [vmem:[#allocation27 + $0x28] sm:$0xff] }
 0x88f   : > { %v4332_v26 = vld [vmem:[#allocation27 + $0xa8] sm:$0xff]  ;;  %v4315_v30 = vld [vmem:[#allocation27 + $0x20] sm:$0xff]  ;;  %v4330_v28 = vld [vmem:[#allocation27 + $0x98] sm:$0xff] }
 0x890   : > { %4811 = vmatpush.msra.mxu3 %v4340_v23  ;;  %4374 = vmatpush.msra.mxu1 %v4340_v23  ;;  %v4331_v55 = vld [vmem:[#allocation27 + $0xa0] sm:$0xff]  ;;  %v4313_v39 = vld [vmem:[#allocation27 + $0x10] sm:$0xff]  ;;  %v4312_v44 = vld [vmem:[#allocation27 + $0x8] sm:$0xff] }
 0x891   : > { %v4329_v17 = vld [vmem:[#allocation27 + $0x90] sm:$0xff]  ;;  %v4328_v51 = vld [vmem:[#allocation27 + $0x88] sm:$0xff]  ;;  %v4327_v8 = vld [vmem:[#allocation27 + $0x80] sm:$0xff] }
 0x892   : > { %4812 = vmatpush.msra.mxu3 %v4339_v20  ;;  %4375 = vmatpush.msra.mxu1 %v4339_v20 }
 0x893   : > { %4189 = vadd.xlane.f32.xlu1 %v4188_v57  ;;  %4186 = vadd.xlane.f32.xlu0 %v4185_v33 }
 0x894   : > { %4813 = vmatpush.msra.mxu3 %v4338_v0  ;;  %4376 = vmatpush.msra.mxu1 %v4338_v0 }
 0x896   : > { %4814 = vmatpush.msra.mxu3 %v4337_v40  ;;  %4377 = vmatpush.msra.mxu1 %v4337_v40 }
 0x898   : > { %4815 = vmatpush.msra.mxu3 %v4336_v31  ;;  %4378 = vmatpush.msra.mxu1 %v4336_v31 }
 0x89a   : > { %4816 = vmatpush.msra.mxu3 %v4335_v47  ;;  %4379 = vmatpush.msra.mxu1 %v4335_v47 }
 0x89c   : > { %4817 = vmatpush.msra.mxu3 %v4334_v56  ;;  %4380 = vmatpush.msra.mxu1 %v4334_v56 }
 0x89e   : > { %4818 = vmatpush.msra.mxu3 %v4333_v7  ;;  %4381 = vmatpush.msra.mxu1 %v4333_v7 }
 0x8a0   : > { %4819 = vmatpush.msra.mxu3 %v4332_v26  ;;  %4382 = vmatpush.msra.mxu1 %v4332_v26 }
 0x8a2   : > { %4820 = vmatpush.msra.mxu3 %v4331_v55  ;;  %4383 = vmatpush.msra.mxu1 %v4331_v55 }
 0x8a4   : > { %4821 = vmatpush.msra.mxu3 %v4330_v28  ;;  %4384 = vmatpush.msra.mxu1 %v4330_v28 }
 0x8a6   : > { %4822 = vmatpush.msra.mxu3 %v4329_v17  ;;  %4385 = vmatpush.msra.mxu1 %v4329_v17 }
 0x8a8   : > { %4823 = vmatpush.msra.mxu3 %v4328_v51  ;;  %4386 = vmatpush.msra.mxu1 %v4328_v51 }
 0x8aa   : > { %4824 = vmatpush.msra.mxu3 %v4327_v8  ;;  %4387 = vmatpush.msra.mxu1 %v4327_v8 }
 0x8fe   : > { %v4196_v19 = vpop.xlane.xlu1 %4195  ;;  %v4193_v27 = vpop.xlane.xlu0 %4192 }
 0x8ff   : > { %v4200_v36 = vmul.f32 %v4196_v19, %v6111_v34  ;;  %v4199_v11 = vmul.f32 %v4193_v27, %v6111_v34 }
 0x901   : > { %v7843_v12 = vsub.f32 %v7819_v32, %v4200_v36  ;;  %v7845_v37 = vsub.f32 %v4170_v35, %v4200_v36  ;;  %v7848_v6 = vsub.f32 %v7815_v50, %v4199_v11  ;;  %v7850_v45 = vsub.f32 %v4168_v29, %v4199_v11  ;;  %v4314_v29 = vld [vmem:[#allocation27 + $0x18] sm:$0xff]  ;;  %v4311_v35 = vld [vmem:[#allocation27] sm:$0xff] }
 0x903   : > { %v4213_v22 = vmul.f32 %v7848_v6, %v7848_v6  ;;  %v4214_v15 = vmul.f32 %v7850_v45, %v7850_v45  ;;  %v4215_v9 = vmul.f32 %v7843_v12, %v7843_v12  ;;  %v4216_v32 = vmul.f32 %v7845_v37, %v7845_v37 }
 0x905   : > { %v4223_v38 = vadd.f32 %v4214_v15, %v4213_v22  ;;  %v4226_v52 = vadd.f32 %v4216_v32, %v4215_v9 }
 0x906   : > { %v4190_v53 = vpop.xlane.xlu1 %4189  ;;  %v4187_v62 = vpop.xlane.xlu0 %4186 }
 0x907   : > { %v4198_v50 = vmul.f32 %v4190_v53, %v6111_v34  ;;  %v4197_v2 = vmul.f32 %v4187_v62, %v6111_v34  ;;  %4224 = vadd.xlane.f32.xlu2 %v4223_v38  ;;  %4227 = vadd.xlane.f32.xlu0 %v4226_v52 }
 0x909   : > { %v7863_v4 = vsub.f32 %v7811_v3, %v4198_v50  ;;  %v7866_v10 = vsub.f32 %v7828_v48, %v4198_v50  ;;  %v7869_v42 = vsub.f32 %v7807_v43, %v4197_v2  ;;  %v7872_v21 = vsub.f32 %v7824_v58, %v4197_v2  ;;  %v4324_v43 = vld [vmem:[#allocation27 + $0x68] sm:$0xff]  ;;  %v4323_v58 = vld [vmem:[#allocation27 + $0x60] sm:$0xff] }
 0x90a   : > { %4795 = vmatpush.msra.mxu2 %v4324_v43  ;;  %4345 = vmatpush.msra.mxu0 %v4324_v43  ;;  %v4319_v48 = vld [vmem:[#allocation27 + $0x40] sm:$0xff] }
 0x90b   : > { %v4211_v49 = vmul.f32 %v7863_v4, %v7863_v4  ;;  %v4212_v24 = vmul.f32 %v7866_v10, %v7866_v10  ;;  %v4209_v54 = vmul.f32 %v7869_v42, %v7869_v42  ;;  %v4210_v3 = vmul.f32 %v7872_v21, %v7872_v21 }
 0x90c   : > { %4796 = vmatpush.msra.mxu2 %v4323_v58  ;;  %4346 = vmatpush.msra.mxu0 %v4323_v58 }
 0x90d   : > { %v4220_v60 = vadd.f32 %v4212_v24, %v4211_v49  ;;  %v4217_v13 = vadd.f32 %v4210_v3, %v4209_v54  ;;  %v4183_v49 = vld [vmem:[#allocation24] sm:$0x3] }
 0x90e   : > { %4797 = vmatpush.msra.mxu2 %v4322_v59  ;;  %4347 = vmatpush.msra.mxu0 %v4322_v59  ;;  %v4286_v58 = vperm.slane %v4183_v49, 0  ;;  %v4287_v20 = vperm.slane %v4183_v49, 1 }
 0x90f   : > { %4221 = vadd.xlane.f32.xlu1 %v4220_v60  ;;  %4218 = vadd.xlane.f32.xlu2 %v4217_v13 }
 0x910   : > { %4798 = vmatpush.msra.mxu2 %v4321_v63  ;;  %4348 = vmatpush.msra.mxu0 %v4321_v63 }
 0x912   : > { %4799 = vmatpush.msra.mxu2 %v4320_v5  ;;  %4349 = vmatpush.msra.mxu0 %v4320_v5 }
 0x914   : > { %4800 = vmatpush.msra.mxu2 %v4319_v48  ;;  %4350 = vmatpush.msra.mxu0 %v4319_v48 }
 0x916   : > { %4801 = vmatpush.msra.mxu2 %v4318_v18  ;;  %4351 = vmatpush.msra.mxu0 %v4318_v18 }
 0x918   : > { %4802 = vmatpush.msra.mxu2 %v4317_v25  ;;  %4352 = vmatpush.msra.mxu0 %v4317_v25 }
 0x91a   : > { %4803 = vmatpush.msra.mxu2 %v4316_v1  ;;  %4353 = vmatpush.msra.mxu0 %v4316_v1 }
 0x91c   : > { %4804 = vmatpush.msra.mxu2 %v4315_v30  ;;  %4354 = vmatpush.msra.mxu0 %v4315_v30 }
 0x91e   : > { %4805 = vmatpush.msra.mxu2 %v4314_v29  ;;  %4355 = vmatpush.msra.mxu0 %v4314_v29 }
 0x920   : > { %4806 = vmatpush.msra.mxu2 %v4313_v39  ;;  %4356 = vmatpush.msra.mxu0 %v4313_v39 }
 0x922   : > { %4807 = vmatpush.msra.mxu2 %v4312_v44  ;;  %4357 = vmatpush.msra.mxu0 %v4312_v44 }
 0x924   : > { %4808 = vmatpush.msra.mxu2 %v4311_v35  ;;  %4358 = vmatpush.msra.mxu0 %v4311_v35 }
 0x97a   : > { %v4225_v16 = vpop.xlane.xlu2 %4224  ;;  %v4228_v57 = vpop.xlane.xlu0 %4227 }
 0x97b   : > { %v4231_v33 = vmul.f32 %v4225_v16, %v6111_v34  ;;  %v4232_v41 = vmul.f32 %v4228_v57, %v6111_v34 }
 0x97d   : > { %v4235_v14 = vadd.f32 1e-05, %v4231_v33  ;;  %v4236_v61 = vadd.f32 1e-05, %v4232_v41 }
 0x97f   : > { %5059 = vrsqrt.f32 %v4235_v14  ;;  %vm4273_vm11 = vweird.f32 %v4236_v61  ;;  %vm4263_vm13 = vweird.f32 %v4235_v14 }
 0x980   : > { %5061 = vrsqrt.f32 %v4236_v61 }
 0x982   : > { %v4222_v46 = vpop.xlane.xlu1 %4221  ;;  %v4219_v19 = vpop.xlane.xlu2 %4218 }
 0x983   : > { %v4230_v27 = vmul.f32 %v4222_v46, %v6111_v34  ;;  %v4229_v36 = vmul.f32 %v4219_v19, %v6111_v34  ;;  %v4184_v34 = vld [vmem:[#allocation25] sm:$0x3] }
 0x984   : > { %v4299_v63 = vperm.slane %v4184_v34, 0  ;;  %v4300_v40 = vperm.slane %v4184_v34, 1 }
 0x985   : > { %v5060_v11 = vpop.eup %5059  ;;  %v4234_v22 = vadd.f32 1e-05, %v4230_v27  ;;  %v4233_v15 = vadd.f32 1e-05, %v4229_v36 }
 0x986   : > { %v5062_v9 = vpop.eup %5061  ;;  %v4258_v32 = vmul.f32 %v5060_v11, %v4235_v14  ;;  %vm4264_vm10 = vweird.f32 %v5060_v11 }
 0x987   : > { %v4268_v38 = vmul.f32 %v5062_v9, %v4236_v61  ;;  %5063 = vrsqrt.f32 %v4234_v22  ;;  %vm4274_vm12 = vweird.f32 %v5062_v9  ;;  %vm4265_vm14 = vmor %vm4263_vm13, %vm4264_vm10  ;;  %vm4253_vm1 = vweird.f32 %v4234_v22 }
 0x988   : > { %v4259_v52 = vmul.f32 %v5060_v11, %v4258_v32  ;;  %5065 = vrsqrt.f32 %v4233_v15  ;;  %vm4275_vm15 = vmor %vm4273_vm11, %vm4274_vm12  ;;  %vm4243_vm3 = vweird.f32 %v4233_v15 }
 0x989   : > { %v4269_v53 = vmul.f32 %v5062_v9, %v4268_v38 }
 0x98a   : > { %v4260_v62 = vmul.f32 0.5, %v4259_v52 }
 0x98b   : > { %v4270_v50 = vmul.f32 0.5, %v4269_v53 }
 0x98c   : > { %v4261_v2 = vsub.f32 1.5, %v4260_v62 }
 0x98d   : > { %v5064_v24 = vpop.eup %5063  ;;  %v4271_v54 = vsub.f32 1.5, %v4270_v50 }
 0x98e   : > { %v5066_v3 = vpop.eup %5065  ;;  %v4262_v60 = vmul.f32 %v5060_v11, %v4261_v2  ;;  %v4248_v13 = vmul.f32 %v5064_v24, %v4234_v22  ;;  %vm4254_vm2 = vweird.f32 %v5064_v24 }
 0x98f   : > { %v4272_v43 = vmul.f32 %v5062_v9, %v4271_v54  ;;  %v4238_v23 = vmul.f32 %v5066_v3, %v4233_v15  ;;  %vm4244_vm0 = vweird.f32 %v5066_v3  ;;  %vm4255_vm5 = vmor %vm4253_vm1, %vm4254_vm2 }
 0x990   : > { %v4249_v59 = vmul.f32 %v5064_v24, %v4248_v13  ;;  %v4266_v0 = vsel %vm4265_vm14, %v5060_v11, %v4262_v60  ;;  %vm4245_vm4 = vmor %vm4243_vm3, %vm4244_vm0 }
 0x991   : > { %v4239_v5 = vmul.f32 %v5066_v3, %v4238_v23  ;;  %v4281_v31 = vmul.f32 %v4266_v0, %v7848_v6  ;;  %v4282_v48 = vmul.f32 %v4266_v0, %v7850_v45  ;;  %v4276_v47 = vsel %vm4275_vm15, %v5062_v9, %v4272_v43 }
 0x992   : > { %v4250_v18 = vmul.f32 0.5, %v4249_v59  ;;  %v4283_v26 = vmul.f32 %v4276_v47, %v7843_v12  ;;  %v4284_v28 = vmul.f32 %v4276_v47, %v7845_v37 }
 0x993   : > { %v4240_v56 = vmul.f32 0.5, %v4239_v5  ;;  %v4294_v25 = vmul.f32 %v4286_v58, %v4281_v31  ;;  %v4295_v7 = vmul.f32 %v4287_v20, %v4282_v48 }
 0x994   : > { %v4251_v1 = vsub.f32 1.5, %v4250_v18  ;;  %v4296_v17 = vmul.f32 %v4286_v58, %v4283_v26  ;;  %v4297_v44 = vmul.f32 %v4287_v20, %v4284_v28 }
 0x995   : > { %v4241_v30 = vsub.f32 1.5, %v4240_v56  ;;  %v4307_v55 = vadd.f32 %v4299_v63, %v4294_v25  ;;  %v4308_v29 = vadd.f32 %v4300_v40, %v4295_v7 }
 0x996   : > { %v4252_v39 = vmul.f32 %v5064_v24, %v4251_v1  ;;  %v4309_v37 = vadd.f32 %v4299_v63, %v4296_v17  ;;  %v4310_v57 = vadd.f32 %v4300_v40, %v4297_v44 }
 0x997   : > { %v4242_v6 = vmul.f32 %v5066_v3, %v4241_v30  ;;  %4365 = vmatmul.f32.vlgmr.msra.gmra.mxu2 %v4307_v55  ;;  %4394 = vmatmul.f32.vlgmr.msra.gmra.mxu3 %v4308_v29 }
 0x998   : > { %v4256_v35 = vsel %vm4255_vm5, %v5064_v24, %v4252_v39 }
 0x999   : > { %v4246_v45 = vsel %vm4245_vm4, %v5066_v3, %v4242_v6  ;;  %v4279_v14 = vmul.f32 %v4256_v35, %v7863_v4  ;;  %v4280_v61 = vmul.f32 %v4256_v35, %v7866_v10 }
 0x99a   : > { %v4277_v51 = vmul.f32 %v4246_v45, %v7869_v42  ;;  %v4278_v12 = vmul.f32 %v4246_v45, %v7872_v21 }
 0x99b   : > { %v4292_v46 = vmul.f32 %v4286_v58, %v4279_v14  ;;  %v4293_v19 = vmul.f32 %v4287_v20, %v4280_v61 }
 0x99c   : > { %v4290_v8 = vmul.f32 %v4286_v58, %v4277_v51  ;;  %v4291_v16 = vmul.f32 %v4287_v20, %v4278_v12 }
 0x99d   : > { %v4305_v42 = vadd.f32 %v4299_v63, %v4292_v46  ;;  %v4306_v27 = vadd.f32 %v4300_v40, %v4293_v19 }
 0x99e   : > { %v4303_v33 = vadd.f32 %v4299_v63, %v4290_v8  ;;  %v4304_v41 = vadd.f32 %v4300_v40, %v4291_v16 }
 0x99f   : > { %4368 = vmatmul.f32.gmra.mxu2 %v4309_v37  ;;  %4397 = vmatmul.f32.gmra.mxu3 %v4310_v57 }
 0x9a0   : > { %4359 = vmatmul.f32.vlgmr.msra.gmra.mxu0 %v4303_v33  ;;  %4388 = vmatmul.f32.vlgmr.msra.gmra.mxu1 %v4304_v41 }
 0x9a8   : > { %4362 = vmatmul.f32.gmra.mxu0 %v4305_v42  ;;  %4391 = vmatmul.f32.gmra.mxu1 %v4306_v27 }
 0xa1a   : > { %v4366_v21 = vpop.f32.mrf.mxu2  ;;  %v4395_v36 = vpop.f32.mrf.mxu3 }
 0xa1b   : > { %v4396_v11 = vadd.f32 %v4395_v36, %v4366_v21 }
 0xa1d   : > { %4403 = vst [vmem:[#allocation28 + $0x10] sm:$0xff] %v4396_v11  ;;  %v4360_v22 = vpop.f32.mrf.mxu0  ;;  %v4389_v15 = vpop.f32.mrf.mxu1 }
 0xa1e   : > { %v4390_v9 = vadd.f32 %v4389_v15, %v4360_v22 }
 0xa20   : > { %4401 = vst [vmem:[#allocation28] sm:$0xff] %v4390_v9 }
 0xa22   : > { %v4369_v4 = vpop.f32.mrf.mxu2  ;;  %v4398_v10 = vpop.f32.mrf.mxu3 }
 0xa23   : > { %v4399_v32 = vadd.f32 %v4398_v10, %v4369_v4 }
 0xa25   : > { %4404 = vst [vmem:[#allocation28 + $0x18] sm:$0xff] %v4399_v32  ;;  %v4363_v38 = vpop.f32.mrf.mxu0  ;;  %v4392_v52 = vpop.f32.mrf.mxu1 }
 0xa26   : > { %v4393_v53 = vadd.f32 %v4392_v52, %v4363_v38 }
 0xa28   : > { %4402 = vst [vmem:[#allocation28 + $0x8] sm:$0xff] %v4393_v53 }
 0xa29 PF: > { %s7994_s30 = sld [smem:[#allocation41_spill]]  ;;  %s5605_s27 = smov [#allocation28]  }
 0xa2a   : > { %s4410_s17 = sshll.u32 %s5605_s27, 4  ;;  %s7995_s25 = sld [smem:[#allocation55_spill]]  ;;  %s4411_s17 = int_to_ptr.vmem [resolvable:$true] %s4410_s17 }
 0xa2b   : > { %s5606_s0 = smov 128   ;;  %s5607_s14 = smov 8  }
 0xa2f   : > { %p4887_p5 = scmp.eq.s32.totalorder %s7994_s30, 1 }
 0xa30   : > { %s4412_s3 = sshll.u32 %s7995_s25, 4  ;;  %s4413_s3 = int_to_ptr.hbm [resolvable:$true] %s4412_s3 }
 0xa31   : > { %4868 = dma.vmem_to_hbm [thread:$0]  (%p4887_p5), %s4411_s17, 512, %s4413_s3, [#allocation6], %s5606_s0, %s5606_s0, %s5607_s14  }
 0xa32   : > { %5574 = dma.done.wait (%p4887_p5), [#allocation6], 512  }
 0xa33   : > { %5576 = vsyncadd (%p4887_p5), [#allocation6], 4294966784 }
 0xa34 PF: > { %s7996_s27 = sld [smem:[#allocation42_spill]] }
 0xa35   : > { %s7997_s24 = sld [smem:[#allocation39_spill]] }
 0xa36   : > { %s7998_s25 = sld [smem:[#allocation40_spill]] }
 0xa37   : > { %s7999_s26 = sld [smem:[#allocation43_spill]] }
 0xa3a   : > { %p47_p8 = scmp.ge.s32.totalorder %s7996_s27, 4  }
 0xa3c   :  { %49 = sbr.rel (!%p47_p8) target bundleno = 28 (0x1c), region = 278 }
 0xa41   :  { %4429 = vsyncpa [#allocation5], 1 }
 0xa42   :  { %4431 = vsyncpa [#allocation5 + $0x1], 1 }
 0xa43   :  { %4432 = vsyncpa [#allocation8], 1 }
 0xa44   :  { %4434 = vsyncpa [#allocation8 + $0x1], 1 }
 0xa45   :  { %4435 = vsyncpa [#allocation11], 1 }
 0xa46   :  { %4437 = vsyncpa [#allocation11 + $0x1], 1 }
 0xa47   :  { %4438 = vsyncpa [#allocation14], 1 }
 0xa48   :  { %4440 = vsyncpa [#allocation14 + $0x1], 1 }
 0xa49   :  { %4441 = vsyncpa [#allocation17], 1 }
 0xa4a   :  { %4443 = vsyncpa [#allocation17 + $0x1], 1 }
 0xa4b   :  { %4444 = vsyncpa [#allocation20], 1 }
 0xa4c   :  { %4446 = vsyncpa [#allocation20 + $0x1], 1 }
 0xa4d   :  { %4447 = vsyncpa [#allocation23], 1 }
 0xa4e   :  { %4449 = vsyncpa [#allocation23 + $0x1], 1 }
 0xa4f   :  { %4450 = vsyncpa [#allocation26], 1 }
 0xa50   :  { %4451 = vsyncpa [#allocation6], 1 }
 0xa51   :  { %4453 = vsyncpa [#allocation6 + $0x1], 1 }

</bundles_post_ra>
